<compile_context>
chip_gen: v7x
topology: tpu7x:2x2x1
jax: 0.10.0
libtpu: 0.0.40
codegen_flags: <defaults>
</compile_context>

<pallas_src>
import math

import jax
import jax.numpy as jnp
from jax.experimental import pallas as pl
from jax.experimental.pallas import tpu as pltpu


# -----------------------------------------------------------------------------
# Tiling helpers
# -----------------------------------------------------------------------------
def _pick_tile(dim, preferred, align):
    """Largest divisor of `dim` that is <= preferred and a multiple of `align`;
    falls back to `dim` itself (a full-extent block is always layout-legal)."""
    if dim <= preferred:
        return dim
    t = (preferred // align) * align
    while t >= align:
        if dim % t == 0:
            return t
        t -= align
    return dim


def _pick_rows(rows, row_bytes, budget=2 * 1024 * 1024):
    """Largest divisor of `rows` whose block stays under a VMEM byte budget."""
    cap = max(1, min(rows, budget // max(row_bytes, 1)))
    for t in range(cap, 0, -1):
        if rows % t == 0:
            return t
    return rows


# -----------------------------------------------------------------------------
# Kernels
# -----------------------------------------------------------------------------
def _conv_mm_kernel(a_ref, w_ref, b_ref, o_ref):
    """im2col matmul. Grid = (M tiles, Cout tiles, K tiles); K is innermost.

    The f32 output block is resident across the K axis and doubles as the
    accumulator; bias + ReLU are applied in place at the last K step."""
    k = pl.program_id(2)

    @pl.when(k == 0)
    def _():
        o_ref[...] = jnp.zeros_like(o_ref)

    o_ref[...] += jnp.dot(a_ref[...], w_ref[...],
                          preferred_element_type=jnp.float32)

    @pl.when(k == pl.num_programs(2) - 1)
    def _():
        o_ref[...] = jnp.maximum(o_ref[...] + b_ref[...], 0.0)


def _make_maxpool_kernel(c):
    """2x2/stride-2 max pool on an x view of shape (rows, 2, Wo, 2*C).

    dim 1 is the vertical (dy) pair; the lane axis packs (dx, c) so the
    horizontal pair is the two static half-slices [:, :, :c] / [:, :, c:]."""
    def kernel(x_ref, o_ref):
        x = x_ref[...]                               # (tr, 2, Wo, 2C)
        m = jnp.maximum(x[:, 0], x[:, 1])            # vertical max  -> (tr, Wo, 2C)
        o_ref[...] = jnp.maximum(m[:, :, :c], m[:, :, c:])   # horizontal max
    return kernel


# -----------------------------------------------------------------------------
# Wrappers
# -----------------------------------------------------------------------------
def normalize_input(x_nhwc, mean, std):
    """((x+1)/2 - mean)/std. Plain jnp: tiny per-channel affine; XLA fuses it
    into the first conv's im2col glue (Pallas would waste 125/128 lanes)."""
    return ((x_nhwc + 1.0) * 0.5 - mean) / std


def conv3x3_relu(x, w_hwio, b):
    """3x3 conv, stride 1, padding 1, fused bias + ReLU.

    x:      (N, H, W, Cin)    NHWC, f32
    w_hwio: (3, 3, Cin, Cout) (PyTorch OIHW weight transposed to HWIO)
    b:      (Cout,)
    """
    N, H, W, Cin = x.shape
    Cout = w_hwio.shape[-1]
    M = N * H * W
    K = 9 * Cin

    # im2col in bf16 (glue). Tap order (dy, dx, ci) matches w_hwio.reshape(K, Cout).
    # TODO(synk): fully fused im2col (a tap axis on the grid with shifted-window
    # index_maps into the padded NHWC tensor) would avoid materializing the 9x
    # slab in HBM entirely; not implemented here.
    xp = jnp.pad(x.astype(jnp.bfloat16), ((0, 0), (1, 1), (1, 1), (0, 0)))
    A = jnp.concatenate(
        [xp[:, dy:dy + H, dx:dx + W, :] for dy in range(3) for dx in range(3)],
        axis=-1).reshape(M, K)
    Wm = w_hwio.astype(jnp.bfloat16).reshape(K, Cout)
    bm = b.astype(jnp.float32).reshape(1, Cout)

    # Tile sizes: bk = 256 when it divides K (MXU-friendly), otherwise the full
    # K extent (always legal, avoids any K padding / extra HBM copy).
    bk = 256 if K % 256 == 0 else K
    tm = _pick_tile(M, 256, 8)
    tn = _pick_tile(Cout, 256, 128)
    grid = (M // tm, Cout // tn, K // bk)

    out = pl.pallas_call(
        _conv_mm_kernel,
        out_shape=jax.ShapeDtypeStruct((M, Cout), jnp.float32),
        grid_spec=pltpu.PrefetchScalarGridSpec(
            num_scalar_prefetch=0,
            grid=grid,
            in_specs=[pl.BlockSpec((tm, bk), lambda i, j, k: (i, k)),
                      pl.BlockSpec((bk, tn), lambda i, j, k: (k, j)),
                      pl.BlockSpec((1, tn), lambda i, j, k: (0, j))],
            out_specs=pl.BlockSpec((tm, tn), lambda i, j, k: (i, j))),
        compiler_params=pltpu.CompilerParams(
            dimension_semantics=("parallel", "parallel", "arbitrary"),
            vmem_limit_bytes=32 * 1024 * 1024),
        cost_estimate=pl.CostEstimate(
            flops=2 * M * K * Cout,
            transcendentals=0,
            bytes_accessed=M * K * 2 + K * Cout * 2 + M * Cout * 4 + Cout * 4),
    )(A, Wm, bm)
    return out.reshape(N, H, W, Cout)


def maxpool2x2(x):
    """2x2 max pool, stride 2 (NHWC). Row-tiled; only free contiguous reshapes,
    no strided HBM views are materialized."""
    N, H, W, C = x.shape
    assert H % 2 == 0 and W % 2 == 0, "maxpool2x2 expects even spatial dims"
    Ho, Wo = H // 2, W // 2
    R = N * Ho

    # (N, H, W, C) -> (N*Ho, 2, Wo, 2*C): pure contiguous reshape (no data movement).
    xv = x.reshape(R, 2, Wo, 2 * C)
    tr = _pick_rows(R, 2 * W * C * 4)

    out = pl.pallas_call(
        _make_maxpool_kernel(C),
        out_shape=jax.ShapeDtypeStruct((R, Wo, C), jnp.float32),
        grid=(R // tr,),
        in_specs=[pl.BlockSpec((tr, 2, Wo, 2 * C), lambda i: (i, 0, 0, 0))],
        out_specs=pl.BlockSpec((tr, Wo, C), lambda i: (i, 0, 0)),
        compiler_params=pltpu.CompilerParams(
            dimension_semantics=("parallel",)),
    )(xv)
    return out.reshape(N, Ho, Wo, C)


# -----------------------------------------------------------------------------
# VGG19 feature extractor
# -----------------------------------------------------------------------------
# (name, Cin, Cout, maxpool_before_conv)
VGG19_CFG = [
    ("relu1_1", 3, 64, False),
    ("relu1_2", 64, 64, False),
    ("relu2_1", 64, 128, True),
    ("relu2_2", 128, 128, False),
    ("relu3_1", 128, 256, True),
    ("relu3_2", 256, 256, False),
    ("relu3_3", 256, 256, False),
    ("relu3_4", 256, 256, False),
    ("relu4_1", 256, 512, True),
    ("relu4_2", 512, 512, False),
    ("relu4_3", 512, 512, False),
    ("relu4_4", 512, 512, False),
    ("relu5_1", 512, 512, True),
    ("relu5_2", 512, 512, False),
    ("relu5_3", 512, 512, False),
    ("relu5_4", 512, 512, False),
]


def init_vgg19_params(key):
    """Deterministic synthetic weights (He-style scale), HWIO layout, f32."""
    params = []
    for i, (_, cin, cout, _) in enumerate(VGG19_CFG):
        kw, kb = jax.random.split(jax.random.fold_in(key, i))
        scale = math.sqrt(2.0 / (9.0 * cin))
        w = scale * jax.random.normal(kw, (3, 3, cin, cout), dtype=jnp.float32)
        b = 0.01 * jax.random.normal(kb, (cout,), dtype=jnp.float32)
        params.append((w, b))
    return params


def vgg19_forward(x_nchw, params, resize_input=False):
    """Matches VGG19.forward: returns dict {relu{i}_{j}: NCHW feature map}."""
    # TODO(synk): resize_input=True path (F.interpolate bilinear, align_corners=True)
    # is not implemented; the module default (False) is the path reproduced here.
    del resize_input

    mean = jnp.array([0.485, 0.456, 0.406], dtype=jnp.float32)
    std = jnp.array([0.229, 0.224, 0.225], dtype=jnp.float32)

    x = jnp.transpose(x_nchw.astype(jnp.float32), (0, 2, 3, 1))  # NCHW -> NHWC
    h = normalize_input(x, mean, std)

    feats = {}
    for (name, _, _, pool_before), (w, b) in zip(VGG19_CFG, params):
        if pool_before:
            h = maxpool2x2(h)
        h = conv3x3_relu(h, w, b)
        feats[name] = jnp.transpose(h, (0, 3, 1, 2))  # back to NCHW
    return feats


# -----------------------------------------------------------------------------
if __name__ == "__main__":
    key = jax.random.PRNGKey(0)
    k_x, k_w = jax.random.split(key)

    # Small NCHW input in [-1, 1]; channels must be 3 to match mean/std buffers.
    x = jax.random.uniform(k_x, (2, 3, 16, 16), dtype=jnp.float32,
                           minval=-1.0, maxval=1.0)
    params = init_vgg19_params(k_w)

    feats = jax.jit(vgg19_forward)(x, params)
    feats = jax.block_until_ready(feats)

    # Light sanity checks (spatial halves at each pool; all values finite).
    assert feats["relu1_2"].shape == (2, 64, 16, 16)
    assert feats["relu2_2"].shape == (2, 128, 8, 8)
    assert feats["relu3_4"].shape == (2, 256, 4, 4)
    assert feats["relu4_4"].shape == (2, 512, 2, 2)
    assert feats["relu5_4"].shape == (2, 512, 1, 1)
    assert all(bool(jnp.all(jnp.isfinite(v))) for v in feats.values())

    print("KERNEL_OK")
</pallas_src>

<mosaic_0001>
module attributes {stable_mosaic.version = 11 : i64} {
  func.func @_conv_mm_kernel(%arg0: i32, %arg1: i32, %arg2: i32, %arg3: memref<256x27xbf16, #tpu.memory_space<vmem>>, %arg4: memref<27x64xbf16, #tpu.memory_space<vmem>>, %arg5: memref<1x64xf32, #tpu.memory_space<vmem>>, %arg6: memref<256x64xf32, #tpu.memory_space<vmem>>) attributes {dimension_semantics = [#tpu.dimension_semantics<parallel>, #tpu.dimension_semantics<parallel>, #tpu.dimension_semantics<arbitrary>], iteration_bounds = array<i64: 2, 1, 1>, scalar_prefetch = 0 : i64, scratch_operands = 0 : i64, tpu.core_type = #tpu.core_type<tc>, window_params = [{transform_indices = @transform_0, window_bounds = array<i64: 256, 27>}, {transform_indices = @transform_1, window_bounds = array<i64: 27, 64>}, {transform_indices = @transform_2, window_bounds = array<i64: 1, 64>}, {transform_indices = @transform_3, window_bounds = array<i64: 256, 64>}]} {
    %c0_i32 = arith.constant 0 : i32
    %0 = arith.cmpi eq, %arg2, %c0_i32 : i32
    %1 = arith.extui %0 : i1 to i32
    %c0_i32_0 = arith.constant 0 : i32
    %2 = arith.cmpi ne, %1, %c0_i32_0 : i32
    scf.if %2 {
      %cst_10 = arith.constant 0.000000e+00 : f32
      %12 = vector.broadcast %cst_10 : f32 to vector<256x64xf32>
      %c0_11 = arith.constant 0 : index
      %c0_12 = arith.constant 0 : index
      %13 = vector.load %arg6[%c0_11, %c0_12] : memref<256x64xf32, #tpu.memory_space<vmem>>, vector<256x64xf32>
      tpu.vector_store %arg6[%c0_11, %c0_12], %12 {strides = array<i32>} : memref<256x64xf32, #tpu.memory_space<vmem>>, vector<256x64xf32>,
    } else {
    }
    %c0 = arith.constant 0 : index
    %c0_1 = arith.constant 0 : index
    %3 = vector.load %arg6[%c0, %c0_1] : memref<256x64xf32, #tpu.memory_space<vmem>>, vector<256x64xf32>
    %c0_2 = arith.constant 0 : index
    %c0_3 = arith.constant 0 : index
    %4 = vector.load %arg3[%c0_2, %c0_3] : memref<256x27xbf16, #tpu.memory_space<vmem>>, vector<256x27xbf16>
    %c0_4 = arith.constant 0 : index
    %c0_5 = arith.constant 0 : index
    %5 = vector.load %arg4[%c0_4, %c0_5] : memref<27x64xbf16, #tpu.memory_space<vmem>>, vector<27x64xbf16>
    %cst = arith.constant dense<0.000000e+00> : vector<256x64xf32>
    %6 = tpu.matmul %4, %5, %cst {dimension_numbers = #tpu.dot_dimension_numbers<[1], [0], [0], [1], [0, 0, 1, 1], [], []>} : vector<256x27xbf16>, vector<27x64xbf16>, vector<256x64xf32> -> vector<256x64xf32>
    %7 = arith.addf %3, %6 : vector<256x64xf32>
    %c0_6 = arith.constant 0 : index
    %c0_7 = arith.constant 0 : index
    %8 = vector.load %arg6[%c0_6, %c0_7] : memref<256x64xf32, #tpu.memory_space<vmem>>, vector<256x64xf32>
    tpu.vector_store %arg6[%c0_6, %c0_7], %7 {strides = array<i32>} : memref<256x64xf32, #tpu.memory_space<vmem>>, vector<256x64xf32>,
    %c0_i32_8 = arith.constant 0 : i32
    %9 = arith.cmpi eq, %arg2, %c0_i32_8 : i32
    %10 = arith.extui %9 : i1 to i32
    %c0_i32_9 = arith.constant 0 : i32
    %11 = arith.cmpi ne, %10, %c0_i32_9 : i32
    scf.if %11 {
      %c0_10 = arith.constant 0 : index
      %c0_11 = arith.constant 0 : index
      %12 = vector.load %arg6[%c0_10, %c0_11] : memref<256x64xf32, #tpu.memory_space<vmem>>, vector<256x64xf32>
      %c0_12 = arith.constant 0 : index
      %c0_13 = arith.constant 0 : index
      %13 = vector.load %arg5[%c0_12, %c0_13] : memref<1x64xf32, #tpu.memory_space<vmem>>, vector<1x64xf32>
      %14 = vector.broadcast %13 : vector<1x64xf32> to vector<256x64xf32>
      %15 = arith.addf %12, %14 : vector<256x64xf32>
      %cst_14 = arith.constant 0.000000e+00 : f32
      %16 = vector.broadcast %cst_14 : f32 to vector<256x64xf32>
      %17 = arith.maximumf %15, %16 : vector<256x64xf32>
      %c0_15 = arith.constant 0 : index
      %c0_16 = arith.constant 0 : index
      %18 = vector.load %arg6[%c0_15, %c0_16] : memref<256x64xf32, #tpu.memory_space<vmem>>, vector<256x64xf32>
      tpu.vector_store %arg6[%c0_15, %c0_16], %17 {strides = array<i32>} : memref<256x64xf32, #tpu.memory_space<vmem>>, vector<256x64xf32>,
    } else {
    }
    return
  }
  func.func @transform_0(%arg0: i32, %arg1: i32, %arg2: i32) -> (i32, i32) {
    %c0_i32 = arith.constant 0 : i32
    return %arg0, %arg2 : i32, i32
  }
  func.func @transform_1(%arg0: i32, %arg1: i32, %arg2: i32) -> (i32, i32) {
    %c0_i32 = arith.constant 0 : i32
    return %arg2, %arg1 : i32, i32
  }
  func.func @transform_2(%arg0: i32, %arg1: i32, %arg2: i32) -> (i32, i32) {
    %c0_i32 = arith.constant 0 : i32
    %c0_i32_0 = arith.constant 0 : i32
    return %c0_i32, %arg1 : i32, i32
  }
  func.func @transform_3(%arg0: i32, %arg1: i32, %arg2: i32) -> (i32, i32) {
    %c0_i32 = arith.constant 0 : i32
    return %arg0, %arg1 : i32, i32
  }
}

module attributes {stable_mosaic.version = 11 : i64} {
  func.func @_conv_mm_kernel(%arg0: i32, %arg1: i32, %arg2: i32, %arg3: memref<256x576xbf16, #tpu.memory_space<vmem>>, %arg4: memref<576x64xbf16, #tpu.memory_space<vmem>>, %arg5: memref<1x64xf32, #tpu.memory_space<vmem>>, %arg6: memref<256x64xf32, #tpu.memory_space<vmem>>) attributes {dimension_semantics = [#tpu.dimension_semantics<parallel>, #tpu.dimension_semantics<parallel>, #tpu.dimension_semantics<arbitrary>], iteration_bounds = array<i64: 2, 1, 1>, scalar_prefetch = 0 : i64, scratch_operands = 0 : i64, tpu.core_type = #tpu.core_type<tc>, window_params = [{transform_indices = @transform_0, window_bounds = array<i64: 256, 576>}, {transform_indices = @transform_1, window_bounds = array<i64: 576, 64>}, {transform_indices = @transform_2, window_bounds = array<i64: 1, 64>}, {transform_indices = @transform_3, window_bounds = array<i64: 256, 64>}]} {
    %c0_i32 = arith.constant 0 : i32
    %0 = arith.cmpi eq, %arg2, %c0_i32 : i32
    %1 = arith.extui %0 : i1 to i32
    %c0_i32_0 = arith.constant 0 : i32
    %2 = arith.cmpi ne, %1, %c0_i32_0 : i32
    scf.if %2 {
      %cst_10 = arith.constant 0.000000e+00 : f32
      %12 = vector.broadcast %cst_10 : f32 to vector<256x64xf32>
      %c0_11 = arith.constant 0 : index
      %c0_12 = arith.constant 0 : index
      %13 = vector.load %arg6[%c0_11, %c0_12] : memref<256x64xf32, #tpu.memory_space<vmem>>, vector<256x64xf32>
      tpu.vector_store %arg6[%c0_11, %c0_12], %12 {strides = array<i32>} : memref<256x64xf32, #tpu.memory_space<vmem>>, vector<256x64xf32>,
    } else {
    }
    %c0 = arith.constant 0 : index
    %c0_1 = arith.constant 0 : index
    %3 = vector.load %arg6[%c0, %c0_1] : memref<256x64xf32, #tpu.memory_space<vmem>>, vector<256x64xf32>
    %c0_2 = arith.constant 0 : index
    %c0_3 = arith.constant 0 : index
    %4 = vector.load %arg3[%c0_2, %c0_3] : memref<256x576xbf16, #tpu.memory_space<vmem>>, vector<256x576xbf16>
    %c0_4 = arith.constant 0 : index
    %c0_5 = arith.constant 0 : index
    %5 = vector.load %arg4[%c0_4, %c0_5] : memref<576x64xbf16, #tpu.memory_space<vmem>>, vector<576x64xbf16>
    %cst = arith.constant dense<0.000000e+00> : vector<256x64xf32>
    %6 = tpu.matmul %4, %5, %cst {dimension_numbers = #tpu.dot_dimension_numbers<[1], [0], [0], [1], [0, 0, 1, 1], [], []>} : vector<256x576xbf16>, vector<576x64xbf16>, vector<256x64xf32> -> vector<256x64xf32>
    %7 = arith.addf %3, %6 : vector<256x64xf32>
    %c0_6 = arith.constant 0 : index
    %c0_7 = arith.constant 0 : index
    %8 = vector.load %arg6[%c0_6, %c0_7] : memref<256x64xf32, #tpu.memory_space<vmem>>, vector<256x64xf32>
    tpu.vector_store %arg6[%c0_6, %c0_7], %7 {strides = array<i32>} : memref<256x64xf32, #tpu.memory_space<vmem>>, vector<256x64xf32>,
    %c0_i32_8 = arith.constant 0 : i32
    %9 = arith.cmpi eq, %arg2, %c0_i32_8 : i32
    %10 = arith.extui %9 : i1 to i32
    %c0_i32_9 = arith.constant 0 : i32
    %11 = arith.cmpi ne, %10, %c0_i32_9 : i32
    scf.if %11 {
      %c0_10 = arith.constant 0 : index
      %c0_11 = arith.constant 0 : index
      %12 = vector.load %arg6[%c0_10, %c0_11] : memref<256x64xf32, #tpu.memory_space<vmem>>, vector<256x64xf32>
      %c0_12 = arith.constant 0 : index
      %c0_13 = arith.constant 0 : index
      %13 = vector.load %arg5[%c0_12, %c0_13] : memref<1x64xf32, #tpu.memory_space<vmem>>, vector<1x64xf32>
      %14 = vector.broadcast %13 : vector<1x64xf32> to vector<256x64xf32>
      %15 = arith.addf %12, %14 : vector<256x64xf32>
      %cst_14 = arith.constant 0.000000e+00 : f32
      %16 = vector.broadcast %cst_14 : f32 to vector<256x64xf32>
      %17 = arith.maximumf %15, %16 : vector<256x64xf32>
      %c0_15 = arith.constant 0 : index
      %c0_16 = arith.constant 0 : index
      %18 = vector.load %arg6[%c0_15, %c0_16] : memref<256x64xf32, #tpu.memory_space<vmem>>, vector<256x64xf32>
      tpu.vector_store %arg6[%c0_15, %c0_16], %17 {strides = array<i32>} : memref<256x64xf32, #tpu.memory_space<vmem>>, vector<256x64xf32>,
    } else {
    }
    return
  }
  func.func @transform_0(%arg0: i32, %arg1: i32, %arg2: i32) -> (i32, i32) {
    %c0_i32 = arith.constant 0 : i32
    return %arg0, %arg2 : i32, i32
  }
  func.func @transform_1(%arg0: i32, %arg1: i32, %arg2: i32) -> (i32, i32) {
    %c0_i32 = arith.constant 0 : i32
    return %arg2, %arg1 : i32, i32
  }
  func.func @transform_2(%arg0: i32, %arg1: i32, %arg2: i32) -> (i32, i32) {
    %c0_i32 = arith.constant 0 : i32
    %c0_i32_0 = arith.constant 0 : i32
    return %c0_i32, %arg1 : i32, i32
  }
  func.func @transform_3(%arg0: i32, %arg1: i32, %arg2: i32) -> (i32, i32) {
    %c0_i32 = arith.constant 0 : i32
    return %arg0, %arg1 : i32, i32
  }
}

module attributes {stable_mosaic.version = 11 : i64} {
  func.func @kernel(%arg0: i32, %arg1: memref<16x2x8x128xf32, #tpu.memory_space<vmem>>, %arg2: memref<16x8x64xf32, #tpu.memory_space<vmem>>) attributes {dimension_semantics = [#tpu.dimension_semantics<parallel>], iteration_bounds = array<i64: 1>, scalar_prefetch = 0 : i64, scratch_operands = 0 : i64, tpu.core_type = #tpu.core_type<tc>, window_params = [{transform_indices = @transform_0, window_bounds = array<i64: 16, 2, 8, 128>}, {transform_indices = @transform_1, window_bounds = array<i64: 16, 8, 64>}]} {
    %c0 = arith.constant 0 : index
    %c0_0 = arith.constant 0 : index
    %c0_1 = arith.constant 0 : index
    %c0_2 = arith.constant 0 : index
    %0 = vector.load %arg1[%c0, %c0_0, %c0_1, %c0_2] : memref<16x2x8x128xf32, #tpu.memory_space<vmem>>, vector<16x2x8x128xf32>
    %1 = vector.extract_strided_slice %0 {offsets = [0, 0, 0, 0], sizes = [16, 1, 8, 128], strides = [1, 1, 1, 1]} : vector<16x2x8x128xf32> to vector<16x1x8x128xf32>
    %2 = vector.shape_cast %1 : vector<16x1x8x128xf32> to vector<16x8x128xf32>
    %3 = vector.extract_strided_slice %0 {offsets = [0, 1, 0, 0], sizes = [16, 1, 8, 128], strides = [1, 1, 1, 1]} : vector<16x2x8x128xf32> to vector<16x1x8x128xf32>
    %4 = vector.shape_cast %3 : vector<16x1x8x128xf32> to vector<16x8x128xf32>
    %5 = arith.maximumf %2, %4 : vector<16x8x128xf32>
    %6 = vector.extract_strided_slice %5 {offsets = [0, 0, 0], sizes = [16, 8, 64], strides = [1, 1, 1]} : vector<16x8x128xf32> to vector<16x8x64xf32>
    %7 = vector.extract_strided_slice %5 {offsets = [0, 0, 64], sizes = [16, 8, 64], strides = [1, 1, 1]} : vector<16x8x128xf32> to vector<16x8x64xf32>
    %8 = arith.maximumf %6, %7 : vector<16x8x64xf32>
    %c0_3 = arith.constant 0 : index
    %c0_4 = arith.constant 0 : index
    %c0_5 = arith.constant 0 : index
    %9 = vector.load %arg2[%c0_3, %c0_4, %c0_5] : memref<16x8x64xf32, #tpu.memory_space<vmem>>, vector<16x8x64xf32>
    tpu.vector_store %arg2[%c0_3, %c0_4, %c0_5], %8 {strides = array<i32>} : memref<16x8x64xf32, #tpu.memory_space<vmem>>, vector<16x8x64xf32>,
    return
  }
  func.func @transform_0(%arg0: i32) -> (i32, i32, i32, i32) {
    %c0_i32 = arith.constant 0 : i32
    %c0_i32_0 = arith.constant 0 : i32
    %c0_i32_1 = arith.constant 0 : i32
    %c0_i32_2 = arith.constant 0 : i32
    return %arg0, %c0_i32, %c0_i32_0, %c0_i32_1 : i32, i32, i32, i32
  }
  func.func @transform_1(%arg0: i32) -> (i32, i32, i32) {
    %c0_i32 = arith.constant 0 : i32
    %c0_i32_0 = arith.constant 0 : i32
    %c0_i32_1 = arith.constant 0 : i32
    return %arg0, %c0_i32, %c0_i32_0 : i32, i32, i32
  }
}

module attributes {stable_mosaic.version = 11 : i64} {
  func.func @_conv_mm_kernel(%arg0: i32, %arg1: i32, %arg2: i32, %arg3: memref<128x576xbf16, #tpu.memory_space<vmem>>, %arg4: memref<576x128xbf16, #tpu.memory_space<vmem>>, %arg5: memref<1x128xf32, #tpu.memory_space<vmem>>, %arg6: memref<128x128xf32, #tpu.memory_space<vmem>>) attributes {dimension_semantics = [#tpu.dimension_semantics<parallel>, #tpu.dimension_semantics<parallel>, #tpu.dimension_semantics<arbitrary>], iteration_bounds = array<i64: 1, 1, 1>, scalar_prefetch = 0 : i64, scratch_operands = 0 : i64, tpu.core_type = #tpu.core_type<tc>, window_params = [{transform_indices = @transform_0, window_bounds = array<i64: 128, 576>}, {transform_indices = @transform_1, window_bounds = array<i64: 576, 128>}, {transform_indices = @transform_2, window_bounds = array<i64: 1, 128>}, {transform_indices = @transform_3, window_bounds = array<i64: 128, 128>}]} {
    %c0_i32 = arith.constant 0 : i32
    %0 = arith.cmpi eq, %arg2, %c0_i32 : i32
    %1 = arith.extui %0 : i1 to i32
    %c0_i32_0 = arith.constant 0 : i32
    %2 = arith.cmpi ne, %1, %c0_i32_0 : i32
    scf.if %2 {
      %cst_10 = arith.constant 0.000000e+00 : f32
      %12 = vector.broadcast %cst_10 : f32 to vector<128x128xf32>
      %c0_11 = arith.constant 0 : index
      %c0_12 = arith.constant 0 : index
      %13 = vector.load %arg6[%c0_11, %c0_12] : memref<128x128xf32, #tpu.memory_space<vmem>>, vector<128x128xf32>
      tpu.vector_store %arg6[%c0_11, %c0_12], %12 {strides = array<i32>} : memref<128x128xf32, #tpu.memory_space<vmem>>, vector<128x128xf32>,
    } else {
    }
    %c0 = arith.constant 0 : index
    %c0_1 = arith.constant 0 : index
    %3 = vector.load %arg6[%c0, %c0_1] : memref<128x128xf32, #tpu.memory_space<vmem>>, vector<128x128xf32>
    %c0_2 = arith.constant 0 : index
    %c0_3 = arith.constant 0 : index
    %4 = vector.load %arg3[%c0_2, %c0_3] : memref<128x576xbf16, #tpu.memory_space<vmem>>, vector<128x576xbf16>
    %c0_4 = arith.constant 0 : index
    %c0_5 = arith.constant 0 : index
    %5 = vector.load %arg4[%c0_4, %c0_5] : memref<576x128xbf16, #tpu.memory_space<vmem>>, vector<576x128xbf16>
    %cst = arith.constant dense<0.000000e+00> : vector<128x128xf32>
    %6 = tpu.matmul %4, %5, %cst {dimension_numbers = #tpu.dot_dimension_numbers<[1], [0], [0], [1], [0, 0, 1, 1], [], []>} : vector<128x576xbf16>, vector<576x128xbf16>, vector<128x128xf32> -> vector<128x128xf32>
    %7 = arith.addf %3, %6 : vector<128x128xf32>
    %c0_6 = arith.constant 0 : index
    %c0_7 = arith.constant 0 : index
    %8 = vector.load %arg6[%c0_6, %c0_7] : memref<128x128xf32, #tpu.memory_space<vmem>>, vector<128x128xf32>
    tpu.vector_store %arg6[%c0_6, %c0_7], %7 {strides = array<i32>} : memref<128x128xf32, #tpu.memory_space<vmem>>, vector<128x128xf32>,
    %c0_i32_8 = arith.constant 0 : i32
    %9 = arith.cmpi eq, %arg2, %c0_i32_8 : i32
    %10 = arith.extui %9 : i1 to i32
    %c0_i32_9 = arith.constant 0 : i32
    %11 = arith.cmpi ne, %10, %c0_i32_9 : i32
    scf.if %11 {
      %c0_10 = arith.constant 0 : index
      %c0_11 = arith.constant 0 : index
      %12 = vector.load %arg6[%c0_10, %c0_11] : memref<128x128xf32, #tpu.memory_space<vmem>>, vector<128x128xf32>
      %c0_12 = arith.constant 0 : index
      %c0_13 = arith.constant 0 : index
      %13 = vector.load %arg5[%c0_12, %c0_13] : memref<1x128xf32, #tpu.memory_space<vmem>>, vector<1x128xf32>
      %14 = vector.broadcast %13 : vector<1x128xf32> to vector<128x128xf32>
      %15 = arith.addf %12, %14 : vector<128x128xf32>
      %cst_14 = arith.constant 0.000000e+00 : f32
      %16 = vector.broadcast %cst_14 : f32 to vector<128x128xf32>
      %17 = arith.maximumf %15, %16 : vector<128x128xf32>
      %c0_15 = arith.constant 0 : index
      %c0_16 = arith.constant 0 : index
      %18 = vector.load %arg6[%c0_15, %c0_16] : memref<128x128xf32, #tpu.memory_space<vmem>>, vector<128x128xf32>
      tpu.vector_store %arg6[%c0_15, %c0_16], %17 {strides = array<i32>} : memref<128x128xf32, #tpu.memory_space<vmem>>, vector<128x128xf32>,
    } else {
    }
    return
  }
  func.func @transform_0(%arg0: i32, %arg1: i32, %arg2: i32) -> (i32, i32) {
    %c0_i32 = arith.constant 0 : i32
    return %arg0, %arg2 : i32, i32
  }
  func.func @transform_1(%arg0: i32, %arg1: i32, %arg2: i32) -> (i32, i32) {
    %c0_i32 = arith.constant 0 : i32
    return %arg2, %arg1 : i32, i32
  }
  func.func @transform_2(%arg0: i32, %arg1: i32, %arg2: i32) -> (i32, i32) {
    %c0_i32 = arith.constant 0 : i32
    %c0_i32_0 = arith.constant 0 : i32
    return %c0_i32, %arg1 : i32, i32
  }
  func.func @transform_3(%arg0: i32, %arg1: i32, %arg2: i32) -> (i32, i32) {
    %c0_i32 = arith.constant 0 : i32
    return %arg0, %arg1 : i32, i32
  }
}

module attributes {stable_mosaic.version = 11 : i64} {
  func.func @_conv_mm_kernel(%arg0: i32, %arg1: i32, %arg2: i32, %arg3: memref<128x1152xbf16, #tpu.memory_space<vmem>>, %arg4: memref<1152x128xbf16, #tpu.memory_space<vmem>>, %arg5: memref<1x128xf32, #tpu.memory_space<vmem>>, %arg6: memref<128x128xf32, #tpu.memory_space<vmem>>) attributes {dimension_semantics = [#tpu.dimension_semantics<parallel>, #tpu.dimension_semantics<parallel>, #tpu.dimension_semantics<arbitrary>], iteration_bounds = array<i64: 1, 1, 1>, scalar_prefetch = 0 : i64, scratch_operands = 0 : i64, tpu.core_type = #tpu.core_type<tc>, window_params = [{transform_indices = @transform_0, window_bounds = array<i64: 128, 1152>}, {transform_indices = @transform_1, window_bounds = array<i64: 1152, 128>}, {transform_indices = @transform_2, window_bounds = array<i64: 1, 128>}, {transform_indices = @transform_3, window_bounds = array<i64: 128, 128>}]} {
    %c0_i32 = arith.constant 0 : i32
    %0 = arith.cmpi eq, %arg2, %c0_i32 : i32
    %1 = arith.extui %0 : i1 to i32
    %c0_i32_0 = arith.constant 0 : i32
    %2 = arith.cmpi ne, %1, %c0_i32_0 : i32
    scf.if %2 {
      %cst_10 = arith.constant 0.000000e+00 : f32
      %12 = vector.broadcast %cst_10 : f32 to vector<128x128xf32>
      %c0_11 = arith.constant 0 : index
      %c0_12 = arith.constant 0 : index
      %13 = vector.load %arg6[%c0_11, %c0_12] : memref<128x128xf32, #tpu.memory_space<vmem>>, vector<128x128xf32>
      tpu.vector_store %arg6[%c0_11, %c0_12], %12 {strides = array<i32>} : memref<128x128xf32, #tpu.memory_space<vmem>>, vector<128x128xf32>,
    } else {
    }
    %c0 = arith.constant 0 : index
    %c0_1 = arith.constant 0 : index
    %3 = vector.load %arg6[%c0, %c0_1] : memref<128x128xf32, #tpu.memory_space<vmem>>, vector<128x128xf32>
    %c0_2 = arith.constant 0 : index
    %c0_3 = arith.constant 0 : index
    %4 = vector.load %arg3[%c0_2, %c0_3] : memref<128x1152xbf16, #tpu.memory_space<vmem>>, vector<128x1152xbf16>
    %c0_4 = arith.constant 0 : index
    %c0_5 = arith.constant 0 : index
    %5 = vector.load %arg4[%c0_4, %c0_5] : memref<1152x128xbf16, #tpu.memory_space<vmem>>, vector<1152x128xbf16>
    %cst = arith.constant dense<0.000000e+00> : vector<128x128xf32>
    %6 = tpu.matmul %4, %5, %cst {dimension_numbers = #tpu.dot_dimension_numbers<[1], [0], [0], [1], [0, 0, 1, 1], [], []>} : vector<128x1152xbf16>, vector<1152x128xbf16>, vector<128x128xf32> -> vector<128x128xf32>
    %7 = arith.addf %3, %6 : vector<128x128xf32>
    %c0_6 = arith.constant 0 : index
    %c0_7 = arith.constant 0 : index
    %8 = vector.load %arg6[%c0_6, %c0_7] : memref<128x128xf32, #tpu.memory_space<vmem>>, vector<128x128xf32>
    tpu.vector_store %arg6[%c0_6, %c0_7], %7 {strides = array<i32>} : memref<128x128xf32, #tpu.memory_space<vmem>>, vector<128x128xf32>,
    %c0_i32_8 = arith.constant 0 : i32
    %9 = arith.cmpi eq, %arg2, %c0_i32_8 : i32
    %10 = arith.extui %9 : i1 to i32
    %c0_i32_9 = arith.constant 0 : i32
    %11 = arith.cmpi ne, %10, %c0_i32_9 : i32
    scf.if %11 {
      %c0_10 = arith.constant 0 : index
      %c0_11 = arith.constant 0 : index
      %12 = vector.load %arg6[%c0_10, %c0_11] : memref<128x128xf32, #tpu.memory_space<vmem>>, vector<128x128xf32>
      %c0_12 = arith.constant 0 : index
      %c0_13 = arith.constant 0 : index
      %13 = vector.load %arg5[%c0_12, %c0_13] : memref<1x128xf32, #tpu.memory_space<vmem>>, vector<1x128xf32>
      %14 = vector.broadcast %13 : vector<1x128xf32> to vector<128x128xf32>
      %15 = arith.addf %12, %14 : vector<128x128xf32>
      %cst_14 = arith.constant 0.000000e+00 : f32
      %16 = vector.broadcast %cst_14 : f32 to vector<128x128xf32>
      %17 = arith.maximumf %15, %16 : vector<128x128xf32>
      %c0_15 = arith.constant 0 : index
      %c0_16 = arith.constant 0 : index
      %18 = vector.load %arg6[%c0_15, %c0_16] : memref<128x128xf32, #tpu.memory_space<vmem>>, vector<128x128xf32>
      tpu.vector_store %arg6[%c0_15, %c0_16], %17 {strides = array<i32>} : memref<128x128xf32, #tpu.memory_space<vmem>>, vector<128x128xf32>,
    } else {
    }
    return
  }
  func.func @transform_0(%arg0: i32, %arg1: i32, %arg2: i32) -> (i32, i32) {
    %c0_i32 = arith.constant 0 : i32
    return %arg0, %arg2 : i32, i32
  }
  func.func @transform_1(%arg0: i32, %arg1: i32, %arg2: i32) -> (i32, i32) {
    %c0_i32 = arith.constant 0 : i32
    return %arg2, %arg1 : i32, i32
  }
  func.func @transform_2(%arg0: i32, %arg1: i32, %arg2: i32) -> (i32, i32) {
    %c0_i32 = arith.constant 0 : i32
    %c0_i32_0 = arith.constant 0 : i32
    return %c0_i32, %arg1 : i32, i32
  }
  func.func @transform_3(%arg0: i32, %arg1: i32, %arg2: i32) -> (i32, i32) {
    %c0_i32 = arith.constant 0 : i32
    return %arg0, %arg1 : i32, i32
  }
}

module attributes {stable_mosaic.version = 11 : i64} {
  func.func @kernel(%arg0: i32, %arg1: memref<8x2x4x256xf32, #tpu.memory_space<vmem>>, %arg2: memref<8x4x128xf32, #tpu.memory_space<vmem>>) attributes {dimension_semantics = [#tpu.dimension_semantics<parallel>], iteration_bounds = array<i64: 1>, scalar_prefetch = 0 : i64, scratch_operands = 0 : i64, tpu.core_type = #tpu.core_type<tc>, window_params = [{transform_indices = @transform_0, window_bounds = array<i64: 8, 2, 4, 256>}, {transform_indices = @transform_1, window_bounds = array<i64: 8, 4, 128>}]} {
    %c0 = arith.constant 0 : index
    %c0_0 = arith.constant 0 : index
    %c0_1 = arith.constant 0 : index
    %c0_2 = arith.constant 0 : index
    %0 = vector.load %arg1[%c0, %c0_0, %c0_1, %c0_2] : memref<8x2x4x256xf32, #tpu.memory_space<vmem>>, vector<8x2x4x256xf32>
    %1 = vector.extract_strided_slice %0 {offsets = [0, 0, 0, 0], sizes = [8, 1, 4, 256], strides = [1, 1, 1, 1]} : vector<8x2x4x256xf32> to vector<8x1x4x256xf32>
    %2 = vector.shape_cast %1 : vector<8x1x4x256xf32> to vector<8x4x256xf32>
    %3 = vector.extract_strided_slice %0 {offsets = [0, 1, 0, 0], sizes = [8, 1, 4, 256], strides = [1, 1, 1, 1]} : vector<8x2x4x256xf32> to vector<8x1x4x256xf32>
    %4 = vector.shape_cast %3 : vector<8x1x4x256xf32> to vector<8x4x256xf32>
    %5 = arith.maximumf %2, %4 : vector<8x4x256xf32>
    %6 = vector.extract_strided_slice %5 {offsets = [0, 0, 0], sizes = [8, 4, 128], strides = [1, 1, 1]} : vector<8x4x256xf32> to vector<8x4x128xf32>
    %7 = vector.extract_strided_slice %5 {offsets = [0, 0, 128], sizes = [8, 4, 128], strides = [1, 1, 1]} : vector<8x4x256xf32> to vector<8x4x128xf32>
    %8 = arith.maximumf %6, %7 : vector<8x4x128xf32>
    %c0_3 = arith.constant 0 : index
    %c0_4 = arith.constant 0 : index
    %c0_5 = arith.constant 0 : index
    %9 = vector.load %arg2[%c0_3, %c0_4, %c0_5] : memref<8x4x128xf32, #tpu.memory_space<vmem>>, vector<8x4x128xf32>
    tpu.vector_store %arg2[%c0_3, %c0_4, %c0_5], %8 {strides = array<i32>} : memref<8x4x128xf32, #tpu.memory_space<vmem>>, vector<8x4x128xf32>,
    return
  }
  func.func @transform_0(%arg0: i32) -> (i32, i32, i32, i32) {
    %c0_i32 = arith.constant 0 : i32
    %c0_i32_0 = arith.constant 0 : i32
    %c0_i32_1 = arith.constant 0 : i32
    %c0_i32_2 = arith.constant 0 : i32
    return %arg0, %c0_i32, %c0_i32_0, %c0_i32_1 : i32, i32, i32, i32
  }
  func.func @transform_1(%arg0: i32) -> (i32, i32, i32) {
    %c0_i32 = arith.constant 0 : i32
    %c0_i32_0 = arith.constant 0 : i32
    %c0_i32_1 = arith.constant 0 : i32
    return %arg0, %c0_i32, %c0_i32_0 : i32, i32, i32
  }
}

module attributes {stable_mosaic.version = 11 : i64} {
  func.func @_conv_mm_kernel(%arg0: i32, %arg1: i32, %arg2: i32, %arg3: memref<32x1152xbf16, #tpu.memory_space<vmem>>, %arg4: memref<1152x256xbf16, #tpu.memory_space<vmem>>, %arg5: memref<1x256xf32, #tpu.memory_space<vmem>>, %arg6: memref<32x256xf32, #tpu.memory_space<vmem>>) attributes {dimension_semantics = [#tpu.dimension_semantics<parallel>, #tpu.dimension_semantics<parallel>, #tpu.dimension_semantics<arbitrary>], iteration_bounds = array<i64: 1, 1, 1>, scalar_prefetch = 0 : i64, scratch_operands = 0 : i64, tpu.core_type = #tpu.core_type<tc>, window_params = [{transform_indices = @transform_0, window_bounds = array<i64: 32, 1152>}, {transform_indices = @transform_1, window_bounds = array<i64: 1152, 256>}, {transform_indices = @transform_2, window_bounds = array<i64: 1, 256>}, {transform_indices = @transform_3, window_bounds = array<i64: 32, 256>}]} {
    %c0_i32 = arith.constant 0 : i32
    %0 = arith.cmpi eq, %arg2, %c0_i32 : i32
    %1 = arith.extui %0 : i1 to i32
    %c0_i32_0 = arith.constant 0 : i32
    %2 = arith.cmpi ne, %1, %c0_i32_0 : i32
    scf.if %2 {
      %cst_10 = arith.constant 0.000000e+00 : f32
      %12 = vector.broadcast %cst_10 : f32 to vector<32x256xf32>
      %c0_11 = arith.constant 0 : index
      %c0_12 = arith.constant 0 : index
      %13 = vector.load %arg6[%c0_11, %c0_12] : memref<32x256xf32, #tpu.memory_space<vmem>>, vector<32x256xf32>
      tpu.vector_store %arg6[%c0_11, %c0_12], %12 {strides = array<i32>} : memref<32x256xf32, #tpu.memory_space<vmem>>, vector<32x256xf32>,
    } else {
    }
    %c0 = arith.constant 0 : index
    %c0_1 = arith.constant 0 : index
    %3 = vector.load %arg6[%c0, %c0_1] : memref<32x256xf32, #tpu.memory_space<vmem>>, vector<32x256xf32>
    %c0_2 = arith.constant 0 : index
    %c0_3 = arith.constant 0 : index
    %4 = vector.load %arg3[%c0_2, %c0_3] : memref<32x1152xbf16, #tpu.memory_space<vmem>>, vector<32x1152xbf16>
    %c0_4 = arith.constant 0 : index
    %c0_5 = arith.constant 0 : index
    %5 = vector.load %arg4[%c0_4, %c0_5] : memref<1152x256xbf16, #tpu.memory_space<vmem>>, vector<1152x256xbf16>
    %cst = arith.constant dense<0.000000e+00> : vector<32x256xf32>
    %6 = tpu.matmul %4, %5, %cst {dimension_numbers = #tpu.dot_dimension_numbers<[1], [0], [0], [1], [0, 0, 1, 1], [], []>} : vector<32x1152xbf16>, vector<1152x256xbf16>, vector<32x256xf32> -> vector<32x256xf32>
    %7 = arith.addf %3, %6 : vector<32x256xf32>
    %c0_6 = arith.constant 0 : index
    %c0_7 = arith.constant 0 : index
    %8 = vector.load %arg6[%c0_6, %c0_7] : memref<32x256xf32, #tpu.memory_space<vmem>>, vector<32x256xf32>
    tpu.vector_store %arg6[%c0_6, %c0_7], %7 {strides = array<i32>} : memref<32x256xf32, #tpu.memory_space<vmem>>, vector<32x256xf32>,
    %c0_i32_8 = arith.constant 0 : i32
    %9 = arith.cmpi eq, %arg2, %c0_i32_8 : i32
    %10 = arith.extui %9 : i1 to i32
    %c0_i32_9 = arith.constant 0 : i32
    %11 = arith.cmpi ne, %10, %c0_i32_9 : i32
    scf.if %11 {
      %c0_10 = arith.constant 0 : index
      %c0_11 = arith.constant 0 : index
      %12 = vector.load %arg6[%c0_10, %c0_11] : memref<32x256xf32, #tpu.memory_space<vmem>>, vector<32x256xf32>
      %c0_12 = arith.constant 0 : index
      %c0_13 = arith.constant 0 : index
      %13 = vector.load %arg5[%c0_12, %c0_13] : memref<1x256xf32, #tpu.memory_space<vmem>>, vector<1x256xf32>
      %14 = vector.broadcast %13 : vector<1x256xf32> to vector<32x256xf32>
      %15 = arith.addf %12, %14 : vector<32x256xf32>
      %cst_14 = arith.constant 0.000000e+00 : f32
      %16 = vector.broadcast %cst_14 : f32 to vector<32x256xf32>
      %17 = arith.maximumf %15, %16 : vector<32x256xf32>
      %c0_15 = arith.constant 0 : index
      %c0_16 = arith.constant 0 : index
      %18 = vector.load %arg6[%c0_15, %c0_16] : memref<32x256xf32, #tpu.memory_space<vmem>>, vector<32x256xf32>
      tpu.vector_store %arg6[%c0_15, %c0_16], %17 {strides = array<i32>} : memref<32x256xf32, #tpu.memory_space<vmem>>, vector<32x256xf32>,
    } else {
    }
    return
  }
  func.func @transform_0(%arg0: i32, %arg1: i32, %arg2: i32) -> (i32, i32) {
    %c0_i32 = arith.constant 0 : i32
    return %arg0, %arg2 : i32, i32
  }
  func.func @transform_1(%arg0: i32, %arg1: i32, %arg2: i32) -> (i32, i32) {
    %c0_i32 = arith.constant 0 : i32
    return %arg2, %arg1 : i32, i32
  }
  func.func @transform_2(%arg0: i32, %arg1: i32, %arg2: i32) -> (i32, i32) {
    %c0_i32 = arith.constant 0 : i32
    %c0_i32_0 = arith.constant 0 : i32
    return %c0_i32, %arg1 : i32, i32
  }
  func.func @transform_3(%arg0: i32, %arg1: i32, %arg2: i32) -> (i32, i32) {
    %c0_i32 = arith.constant 0 : i32
    return %arg0, %arg1 : i32, i32
  }
}

module attributes {stable_mosaic.version = 11 : i64} {
  func.func @_conv_mm_kernel(%arg0: i32, %arg1: i32, %arg2: i32, %arg3: memref<32x256xbf16, #tpu.memory_space<vmem>>, %arg4: memref<256x256xbf16, #tpu.memory_space<vmem>>, %arg5: memref<1x256xf32, #tpu.memory_space<vmem>>, %arg6: memref<32x256xf32, #tpu.memory_space<vmem>>) attributes {dimension_semantics = [#tpu.dimension_semantics<parallel>, #tpu.dimension_semantics<parallel>, #tpu.dimension_semantics<arbitrary>], iteration_bounds = array<i64: 1, 1, 9>, scalar_prefetch = 0 : i64, scratch_operands = 0 : i64, tpu.core_type = #tpu.core_type<tc>, window_params = [{transform_indices = @transform_0, window_bounds = array<i64: 32, 256>}, {transform_indices = @transform_1, window_bounds = array<i64: 256, 256>}, {transform_indices = @transform_2, window_bounds = array<i64: 1, 256>}, {transform_indices = @transform_3, window_bounds = array<i64: 32, 256>}]} {
    %c0_i32 = arith.constant 0 : i32
    %0 = arith.cmpi eq, %arg2, %c0_i32 : i32
    %1 = arith.extui %0 : i1 to i32
    %c0_i32_0 = arith.constant 0 : i32
    %2 = arith.cmpi ne, %1, %c0_i32_0 : i32
    scf.if %2 {
      %cst_9 = arith.constant 0.000000e+00 : f32
      %12 = vector.broadcast %cst_9 : f32 to vector<32x256xf32>
      %c0_10 = arith.constant 0 : index
      %c0_11 = arith.constant 0 : index
      %13 = vector.load %arg6[%c0_10, %c0_11] : memref<32x256xf32, #tpu.memory_space<vmem>>, vector<32x256xf32>
      tpu.vector_store %arg6[%c0_10, %c0_11], %12 {strides = array<i32>} : memref<32x256xf32, #tpu.memory_space<vmem>>, vector<32x256xf32>,
    } else {
    }
    %c0 = arith.constant 0 : index
    %c0_1 = arith.constant 0 : index
    %3 = vector.load %arg6[%c0, %c0_1] : memref<32x256xf32, #tpu.memory_space<vmem>>, vector<32x256xf32>
    %c0_2 = arith.constant 0 : index
    %c0_3 = arith.constant 0 : index
    %4 = vector.load %arg3[%c0_2, %c0_3] : memref<32x256xbf16, #tpu.memory_space<vmem>>, vector<32x256xbf16>
    %c0_4 = arith.constant 0 : index
    %c0_5 = arith.constant 0 : index
    %5 = vector.load %arg4[%c0_4, %c0_5] : memref<256x256xbf16, #tpu.memory_space<vmem>>, vector<256x256xbf16>
    %cst = arith.constant dense<0.000000e+00> : vector<32x256xf32>
    %6 = tpu.matmul %4, %5, %cst {dimension_numbers = #tpu.dot_dimension_numbers<[1], [0], [0], [1], [0, 0, 1, 1], [], []>} : vector<32x256xbf16>, vector<256x256xbf16>, vector<32x256xf32> -> vector<32x256xf32>
    %7 = arith.addf %3, %6 : vector<32x256xf32>
    %c0_6 = arith.constant 0 : index
    %c0_7 = arith.constant 0 : index
    %8 = vector.load %arg6[%c0_6, %c0_7] : memref<32x256xf32, #tpu.memory_space<vmem>>, vector<32x256xf32>
    tpu.vector_store %arg6[%c0_6, %c0_7], %7 {strides = array<i32>} : memref<32x256xf32, #tpu.memory_space<vmem>>, vector<32x256xf32>,
    %c8_i32 = arith.constant 8 : i32
    %9 = arith.cmpi eq, %arg2, %c8_i32 : i32
    %10 = arith.extui %9 : i1 to i32
    %c0_i32_8 = arith.constant 0 : i32
    %11 = arith.cmpi ne, %10, %c0_i32_8 : i32
    scf.if %11 {
      %c0_9 = arith.constant 0 : index
      %c0_10 = arith.constant 0 : index
      %12 = vector.load %arg6[%c0_9, %c0_10] : memref<32x256xf32, #tpu.memory_space<vmem>>, vector<32x256xf32>
      %c0_11 = arith.constant 0 : index
      %c0_12 = arith.constant 0 : index
      %13 = vector.load %arg5[%c0_11, %c0_12] : memref<1x256xf32, #tpu.memory_space<vmem>>, vector<1x256xf32>
      %14 = vector.broadcast %13 : vector<1x256xf32> to vector<32x256xf32>
      %15 = arith.addf %12, %14 : vector<32x256xf32>
      %cst_13 = arith.constant 0.000000e+00 : f32
      %16 = vector.broadcast %cst_13 : f32 to vector<32x256xf32>
      %17 = arith.maximumf %15, %16 : vector<32x256xf32>
      %c0_14 = arith.constant 0 : index
      %c0_15 = arith.constant 0 : index
      %18 = vector.load %arg6[%c0_14, %c0_15] : memref<32x256xf32, #tpu.memory_space<vmem>>, vector<32x256xf32>
      tpu.vector_store %arg6[%c0_14, %c0_15], %17 {strides = array<i32>} : memref<32x256xf32, #tpu.memory_space<vmem>>, vector<32x256xf32>,
    } else {
    }
    return
  }
  func.func @transform_0(%arg0: i32, %arg1: i32, %arg2: i32) -> (i32, i32) {
    %c0_i32 = arith.constant 0 : i32
    return %arg0, %arg2 : i32, i32
  }
  func.func @transform_1(%arg0: i32, %arg1: i32, %arg2: i32) -> (i32, i32) {
    %c0_i32 = arith.constant 0 : i32
    return %arg2, %arg1 : i32, i32
  }
  func.func @transform_2(%arg0: i32, %arg1: i32, %arg2: i32) -> (i32, i32) {
    %c0_i32 = arith.constant 0 : i32
    %c0_i32_0 = arith.constant 0 : i32
    return %c0_i32, %arg1 : i32, i32
  }
  func.func @transform_3(%arg0: i32, %arg1: i32, %arg2: i32) -> (i32, i32) {
    %c0_i32 = arith.constant 0 : i32
    return %arg0, %arg1 : i32, i32
  }
}

module attributes {stable_mosaic.version = 11 : i64} {
  func.func @kernel(%arg0: i32, %arg1: memref<4x2x2x512xf32, #tpu.memory_space<vmem>>, %arg2: memref<4x2x256xf32, #tpu.memory_space<vmem>>) attributes {dimension_semantics = [#tpu.dimension_semantics<parallel>], iteration_bounds = array<i64: 1>, scalar_prefetch = 0 : i64, scratch_operands = 0 : i64, tpu.core_type = #tpu.core_type<tc>, window_params = [{transform_indices = @transform_0, window_bounds = array<i64: 4, 2, 2, 512>}, {transform_indices = @transform_1, window_bounds = array<i64: 4, 2, 256>}]} {
    %c0 = arith.constant 0 : index
    %c0_0 = arith.constant 0 : index
    %c0_1 = arith.constant 0 : index
    %c0_2 = arith.constant 0 : index
    %0 = vector.load %arg1[%c0, %c0_0, %c0_1, %c0_2] : memref<4x2x2x512xf32, #tpu.memory_space<vmem>>, vector<4x2x2x512xf32>
    %1 = vector.extract_strided_slice %0 {offsets = [0, 0, 0, 0], sizes = [4, 1, 2, 512], strides = [1, 1, 1, 1]} : vector<4x2x2x512xf32> to vector<4x1x2x512xf32>
    %2 = vector.shape_cast %1 : vector<4x1x2x512xf32> to vector<4x2x512xf32>
    %3 = vector.extract_strided_slice %0 {offsets = [0, 1, 0, 0], sizes = [4, 1, 2, 512], strides = [1, 1, 1, 1]} : vector<4x2x2x512xf32> to vector<4x1x2x512xf32>
    %4 = vector.shape_cast %3 : vector<4x1x2x512xf32> to vector<4x2x512xf32>
    %5 = arith.maximumf %2, %4 : vector<4x2x512xf32>
    %6 = vector.extract_strided_slice %5 {offsets = [0, 0, 0], sizes = [4, 2, 256], strides = [1, 1, 1]} : vector<4x2x512xf32> to vector<4x2x256xf32>
    %7 = vector.extract_strided_slice %5 {offsets = [0, 0, 256], sizes = [4, 2, 256], strides = [1, 1, 1]} : vector<4x2x512xf32> to vector<4x2x256xf32>
    %8 = arith.maximumf %6, %7 : vector<4x2x256xf32>
    %c0_3 = arith.constant 0 : index
    %c0_4 = arith.constant 0 : index
    %c0_5 = arith.constant 0 : index
    %9 = vector.load %arg2[%c0_3, %c0_4, %c0_5] : memref<4x2x256xf32, #tpu.memory_space<vmem>>, vector<4x2x256xf32>
    tpu.vector_store %arg2[%c0_3, %c0_4, %c0_5], %8 {strides = array<i32>} : memref<4x2x256xf32, #tpu.memory_space<vmem>>, vector<4x2x256xf32>,
    return
  }
  func.func @transform_0(%arg0: i32) -> (i32, i32, i32, i32) {
    %c0_i32 = arith.constant 0 : i32
    %c0_i32_0 = arith.constant 0 : i32
    %c0_i32_1 = arith.constant 0 : i32
    %c0_i32_2 = arith.constant 0 : i32
    return %arg0, %c0_i32, %c0_i32_0, %c0_i32_1 : i32, i32, i32, i32
  }
  func.func @transform_1(%arg0: i32) -> (i32, i32, i32) {
    %c0_i32 = arith.constant 0 : i32
    %c0_i32_0 = arith.constant 0 : i32
    %c0_i32_1 = arith.constant 0 : i32
    return %arg0, %c0_i32, %c0_i32_0 : i32, i32, i32
  }
}

module attributes {stable_mosaic.version = 11 : i64} {
  func.func @_conv_mm_kernel(%arg0: i32, %arg1: i32, %arg2: i32, %arg3: memref<8x256xbf16, #tpu.memory_space<vmem>>, %arg4: memref<256x256xbf16, #tpu.memory_space<vmem>>, %arg5: memref<1x256xf32, #tpu.memory_space<vmem>>, %arg6: memref<8x256xf32, #tpu.memory_space<vmem>>) attributes {dimension_semantics = [#tpu.dimension_semantics<parallel>, #tpu.dimension_semantics<parallel>, #tpu.dimension_semantics<arbitrary>], iteration_bounds = array<i64: 1, 2, 9>, scalar_prefetch = 0 : i64, scratch_operands = 0 : i64, tpu.core_type = #tpu.core_type<tc>, window_params = [{transform_indices = @transform_0, window_bounds = array<i64: 8, 256>}, {transform_indices = @transform_1, window_bounds = array<i64: 256, 256>}, {transform_indices = @transform_2, window_bounds = array<i64: 1, 256>}, {transform_indices = @transform_3, window_bounds = array<i64: 8, 256>}]} {
    %c0_i32 = arith.constant 0 : i32
    %0 = arith.cmpi eq, %arg2, %c0_i32 : i32
    %1 = arith.extui %0 : i1 to i32
    %c0_i32_0 = arith.constant 0 : i32
    %2 = arith.cmpi ne, %1, %c0_i32_0 : i32
    scf.if %2 {
      %cst_9 = arith.constant 0.000000e+00 : f32
      %12 = vector.broadcast %cst_9 : f32 to vector<8x256xf32>
      %c0_10 = arith.constant 0 : index
      %c0_11 = arith.constant 0 : index
      %13 = vector.load %arg6[%c0_10, %c0_11] : memref<8x256xf32, #tpu.memory_space<vmem>>, vector<8x256xf32>
      tpu.vector_store %arg6[%c0_10, %c0_11], %12 {strides = array<i32>} : memref<8x256xf32, #tpu.memory_space<vmem>>, vector<8x256xf32>,
    } else {
    }
    %c0 = arith.constant 0 : index
    %c0_1 = arith.constant 0 : index
    %3 = vector.load %arg6[%c0, %c0_1] : memref<8x256xf32, #tpu.memory_space<vmem>>, vector<8x256xf32>
    %c0_2 = arith.constant 0 : index
    %c0_3 = arith.constant 0 : index
    %4 = vector.load %arg3[%c0_2, %c0_3] : memref<8x256xbf16, #tpu.memory_space<vmem>>, vector<8x256xbf16>
    %c0_4 = arith.constant 0 : index
    %c0_5 = arith.constant 0 : index
    %5 = vector.load %arg4[%c0_4, %c0_5] : memref<256x256xbf16, #tpu.memory_space<vmem>>, vector<256x256xbf16>
    %cst = arith.constant dense<0.000000e+00> : vector<8x256xf32>
    %6 = tpu.matmul %4, %5, %cst {dimension_numbers = #tpu.dot_dimension_numbers<[1], [0], [0], [1], [0, 0, 1, 1], [], []>} : vector<8x256xbf16>, vector<256x256xbf16>, vector<8x256xf32> -> vector<8x256xf32>
    %7 = arith.addf %3, %6 : vector<8x256xf32>
    %c0_6 = arith.constant 0 : index
    %c0_7 = arith.constant 0 : index
    %8 = vector.load %arg6[%c0_6, %c0_7] : memref<8x256xf32, #tpu.memory_space<vmem>>, vector<8x256xf32>
    tpu.vector_store %arg6[%c0_6, %c0_7], %7 {strides = array<i32>} : memref<8x256xf32, #tpu.memory_space<vmem>>, vector<8x256xf32>,
    %c8_i32 = arith.constant 8 : i32
    %9 = arith.cmpi eq, %arg2, %c8_i32 : i32
    %10 = arith.extui %9 : i1 to i32
    %c0_i32_8 = arith.constant 0 : i32
    %11 = arith.cmpi ne, %10, %c0_i32_8 : i32
    scf.if %11 {
      %c0_9 = arith.constant 0 : index
      %c0_10 = arith.constant 0 : index
      %12 = vector.load %arg6[%c0_9, %c0_10] : memref<8x256xf32, #tpu.memory_space<vmem>>, vector<8x256xf32>
      %c0_11 = arith.constant 0 : index
      %c0_12 = arith.constant 0 : index
      %13 = vector.load %arg5[%c0_11, %c0_12] : memref<1x256xf32, #tpu.memory_space<vmem>>, vector<1x256xf32>
      %14 = vector.broadcast %13 : vector<1x256xf32> to vector<8x256xf32>
      %15 = arith.addf %12, %14 : vector<8x256xf32>
      %cst_13 = arith.constant 0.000000e+00 : f32
      %16 = vector.broadcast %cst_13 : f32 to vector<8x256xf32>
      %17 = arith.maximumf %15, %16 : vector<8x256xf32>
      %c0_14 = arith.constant 0 : index
      %c0_15 = arith.constant 0 : index
      %18 = vector.load %arg6[%c0_14, %c0_15] : memref<8x256xf32, #tpu.memory_space<vmem>>, vector<8x256xf32>
      tpu.vector_store %arg6[%c0_14, %c0_15], %17 {strides = array<i32>} : memref<8x256xf32, #tpu.memory_space<vmem>>, vector<8x256xf32>,
    } else {
    }
    return
  }
  func.func @transform_0(%arg0: i32, %arg1: i32, %arg2: i32) -> (i32, i32) {
    %c0_i32 = arith.constant 0 : i32
    return %arg0, %arg2 : i32, i32
  }
  func.func @transform_1(%arg0: i32, %arg1: i32, %arg2: i32) -> (i32, i32) {
    %c0_i32 = arith.constant 0 : i32
    return %arg2, %arg1 : i32, i32
  }
  func.func @transform_2(%arg0: i32, %arg1: i32, %arg2: i32) -> (i32, i32) {
    %c0_i32 = arith.constant 0 : i32
    %c0_i32_0 = arith.constant 0 : i32
    return %c0_i32, %arg1 : i32, i32
  }
  func.func @transform_3(%arg0: i32, %arg1: i32, %arg2: i32) -> (i32, i32) {
    %c0_i32 = arith.constant 0 : i32
    return %arg0, %arg1 : i32, i32
  }
}

module attributes {stable_mosaic.version = 11 : i64} {
  func.func @_conv_mm_kernel(%arg0: i32, %arg1: i32, %arg2: i32, %arg3: memref<8x256xbf16, #tpu.memory_space<vmem>>, %arg4: memref<256x256xbf16, #tpu.memory_space<vmem>>, %arg5: memref<1x256xf32, #tpu.memory_space<vmem>>, %arg6: memref<8x256xf32, #tpu.memory_space<vmem>>) attributes {dimension_semantics = [#tpu.dimension_semantics<parallel>, #tpu.dimension_semantics<parallel>, #tpu.dimension_semantics<arbitrary>], iteration_bounds = array<i64: 1, 2, 18>, scalar_prefetch = 0 : i64, scratch_operands = 0 : i64, tpu.core_type = #tpu.core_type<tc>, window_params = [{transform_indices = @transform_0, window_bounds = array<i64: 8, 256>}, {transform_indices = @transform_1, window_bounds = array<i64: 256, 256>}, {transform_indices = @transform_2, window_bounds = array<i64: 1, 256>}, {transform_indices = @transform_3, window_bounds = array<i64: 8, 256>}]} {
    %c0_i32 = arith.constant 0 : i32
    %0 = arith.cmpi eq, %arg2, %c0_i32 : i32
    %1 = arith.extui %0 : i1 to i32
    %c0_i32_0 = arith.constant 0 : i32
    %2 = arith.cmpi ne, %1, %c0_i32_0 : i32
    scf.if %2 {
      %cst_9 = arith.constant 0.000000e+00 : f32
      %12 = vector.broadcast %cst_9 : f32 to vector<8x256xf32>
      %c0_10 = arith.constant 0 : index
      %c0_11 = arith.constant 0 : index
      %13 = vector.load %arg6[%c0_10, %c0_11] : memref<8x256xf32, #tpu.memory_space<vmem>>, vector<8x256xf32>
      tpu.vector_store %arg6[%c0_10, %c0_11], %12 {strides = array<i32>} : memref<8x256xf32, #tpu.memory_space<vmem>>, vector<8x256xf32>,
    } else {
    }
    %c0 = arith.constant 0 : index
    %c0_1 = arith.constant 0 : index
    %3 = vector.load %arg6[%c0, %c0_1] : memref<8x256xf32, #tpu.memory_space<vmem>>, vector<8x256xf32>
    %c0_2 = arith.constant 0 : index
    %c0_3 = arith.constant 0 : index
    %4 = vector.load %arg3[%c0_2, %c0_3] : memref<8x256xbf16, #tpu.memory_space<vmem>>, vector<8x256xbf16>
    %c0_4 = arith.constant 0 : index
    %c0_5 = arith.constant 0 : index
    %5 = vector.load %arg4[%c0_4, %c0_5] : memref<256x256xbf16, #tpu.memory_space<vmem>>, vector<256x256xbf16>
    %cst = arith.constant dense<0.000000e+00> : vector<8x256xf32>
    %6 = tpu.matmul %4, %5, %cst {dimension_numbers = #tpu.dot_dimension_numbers<[1], [0], [0], [1], [0, 0, 1, 1], [], []>} : vector<8x256xbf16>, vector<256x256xbf16>, vector<8x256xf32> -> vector<8x256xf32>
    %7 = arith.addf %3, %6 : vector<8x256xf32>
    %c0_6 = arith.constant 0 : index
    %c0_7 = arith.constant 0 : index
    %8 = vector.load %arg6[%c0_6, %c0_7] : memref<8x256xf32, #tpu.memory_space<vmem>>, vector<8x256xf32>
    tpu.vector_store %arg6[%c0_6, %c0_7], %7 {strides = array<i32>} : memref<8x256xf32, #tpu.memory_space<vmem>>, vector<8x256xf32>,
    %c17_i32 = arith.constant 17 : i32
    %9 = arith.cmpi eq, %arg2, %c17_i32 : i32
    %10 = arith.extui %9 : i1 to i32
    %c0_i32_8 = arith.constant 0 : i32
    %11 = arith.cmpi ne, %10, %c0_i32_8 : i32
    scf.if %11 {
      %c0_9 = arith.constant 0 : index
      %c0_10 = arith.constant 0 : index
      %12 = vector.load %arg6[%c0_9, %c0_10] : memref<8x256xf32, #tpu.memory_space<vmem>>, vector<8x256xf32>
      %c0_11 = arith.constant 0 : index
      %c0_12 = arith.constant 0 : index
      %13 = vector.load %arg5[%c0_11, %c0_12] : memref<1x256xf32, #tpu.memory_space<vmem>>, vector<1x256xf32>
      %14 = vector.broadcast %13 : vector<1x256xf32> to vector<8x256xf32>
      %15 = arith.addf %12, %14 : vector<8x256xf32>
      %cst_13 = arith.constant 0.000000e+00 : f32
      %16 = vector.broadcast %cst_13 : f32 to vector<8x256xf32>
      %17 = arith.maximumf %15, %16 : vector<8x256xf32>
      %c0_14 = arith.constant 0 : index
      %c0_15 = arith.constant 0 : index
      %18 = vector.load %arg6[%c0_14, %c0_15] : memref<8x256xf32, #tpu.memory_space<vmem>>, vector<8x256xf32>
      tpu.vector_store %arg6[%c0_14, %c0_15], %17 {strides = array<i32>} : memref<8x256xf32, #tpu.memory_space<vmem>>, vector<8x256xf32>,
    } else {
    }
    return
  }
  func.func @transform_0(%arg0: i32, %arg1: i32, %arg2: i32) -> (i32, i32) {
    %c0_i32 = arith.constant 0 : i32
    return %arg0, %arg2 : i32, i32
  }
  func.func @transform_1(%arg0: i32, %arg1: i32, %arg2: i32) -> (i32, i32) {
    %c0_i32 = arith.constant 0 : i32
    return %arg2, %arg1 : i32, i32
  }
  func.func @transform_2(%arg0: i32, %arg1: i32, %arg2: i32) -> (i32, i32) {
    %c0_i32 = arith.constant 0 : i32
    %c0_i32_0 = arith.constant 0 : i32
    return %c0_i32, %arg1 : i32, i32
  }
  func.func @transform_3(%arg0: i32, %arg1: i32, %arg2: i32) -> (i32, i32) {
    %c0_i32 = arith.constant 0 : i32
    return %arg0, %arg1 : i32, i32
  }
}

module attributes {stable_mosaic.version = 11 : i64} {
  func.func @kernel(%arg0: i32, %arg1: memref<2x2x1x1024xf32, #tpu.memory_space<vmem>>, %arg2: memref<2x1x512xf32, #tpu.memory_space<vmem>>) attributes {dimension_semantics = [#tpu.dimension_semantics<parallel>], iteration_bounds = array<i64: 1>, scalar_prefetch = 0 : i64, scratch_operands = 0 : i64, tpu.core_type = #tpu.core_type<tc>, window_params = [{transform_indices = @transform_0, window_bounds = array<i64: 2, 2, 1, 1024>}, {transform_indices = @transform_1, window_bounds = array<i64: 2, 1, 512>}]} {
    %c0 = arith.constant 0 : index
    %c0_0 = arith.constant 0 : index
    %c0_1 = arith.constant 0 : index
    %c0_2 = arith.constant 0 : index
    %0 = vector.load %arg1[%c0, %c0_0, %c0_1, %c0_2] : memref<2x2x1x1024xf32, #tpu.memory_space<vmem>>, vector<2x2x1x1024xf32>
    %1 = vector.extract_strided_slice %0 {offsets = [0, 0, 0, 0], sizes = [2, 1, 1, 1024], strides = [1, 1, 1, 1]} : vector<2x2x1x1024xf32> to vector<2x1x1x1024xf32>
    %2 = vector.shape_cast %1 : vector<2x1x1x1024xf32> to vector<2x1x1024xf32>
    %3 = vector.extract_strided_slice %0 {offsets = [0, 1, 0, 0], sizes = [2, 1, 1, 1024], strides = [1, 1, 1, 1]} : vector<2x2x1x1024xf32> to vector<2x1x1x1024xf32>
    %4 = vector.shape_cast %3 : vector<2x1x1x1024xf32> to vector<2x1x1024xf32>
    %5 = arith.maximumf %2, %4 : vector<2x1x1024xf32>
    %6 = vector.extract_strided_slice %5 {offsets = [0, 0, 0], sizes = [2, 1, 512], strides = [1, 1, 1]} : vector<2x1x1024xf32> to vector<2x1x512xf32>
    %7 = vector.extract_strided_slice %5 {offsets = [0, 0, 512], sizes = [2, 1, 512], strides = [1, 1, 1]} : vector<2x1x1024xf32> to vector<2x1x512xf32>
    %8 = arith.maximumf %6, %7 : vector<2x1x512xf32>
    %c0_3 = arith.constant 0 : index
    %c0_4 = arith.constant 0 : index
    %c0_5 = arith.constant 0 : index
    %9 = vector.load %arg2[%c0_3, %c0_4, %c0_5] : memref<2x1x512xf32, #tpu.memory_space<vmem>>, vector<2x1x512xf32>
    tpu.vector_store %arg2[%c0_3, %c0_4, %c0_5], %8 {strides = array<i32>} : memref<2x1x512xf32, #tpu.memory_space<vmem>>, vector<2x1x512xf32>,
    return
  }
  func.func @transform_0(%arg0: i32) -> (i32, i32, i32, i32) {
    %c0_i32 = arith.constant 0 : i32
    %c0_i32_0 = arith.constant 0 : i32
    %c0_i32_1 = arith.constant 0 : i32
    %c0_i32_2 = arith.constant 0 : i32
    return %arg0, %c0_i32, %c0_i32_0, %c0_i32_1 : i32, i32, i32, i32
  }
  func.func @transform_1(%arg0: i32) -> (i32, i32, i32) {
    %c0_i32 = arith.constant 0 : i32
    %c0_i32_0 = arith.constant 0 : i32
    %c0_i32_1 = arith.constant 0 : i32
    return %arg0, %c0_i32, %c0_i32_0 : i32, i32, i32
  }
}

module attributes {stable_mosaic.version = 11 : i64} {
  func.func @_conv_mm_kernel(%arg0: i32, %arg1: i32, %arg2: i32, %arg3: memref<2x256xbf16, #tpu.memory_space<vmem>>, %arg4: memref<256x256xbf16, #tpu.memory_space<vmem>>, %arg5: memref<1x256xf32, #tpu.memory_space<vmem>>, %arg6: memref<2x256xf32, #tpu.memory_space<vmem>>) attributes {dimension_semantics = [#tpu.dimension_semantics<parallel>, #tpu.dimension_semantics<parallel>, #tpu.dimension_semantics<arbitrary>], iteration_bounds = array<i64: 1, 2, 18>, scalar_prefetch = 0 : i64, scratch_operands = 0 : i64, tpu.core_type = #tpu.core_type<tc>, window_params = [{transform_indices = @transform_0, window_bounds = array<i64: 2, 256>}, {transform_indices = @transform_1, window_bounds = array<i64: 256, 256>}, {transform_indices = @transform_2, window_bounds = array<i64: 1, 256>}, {transform_indices = @transform_3, window_bounds = array<i64: 2, 256>}]} {
    %c0_i32 = arith.constant 0 : i32
    %0 = arith.cmpi eq, %arg2, %c0_i32 : i32
    %1 = arith.extui %0 : i1 to i32
    %c0_i32_0 = arith.constant 0 : i32
    %2 = arith.cmpi ne, %1, %c0_i32_0 : i32
    scf.if %2 {
      %cst_9 = arith.constant 0.000000e+00 : f32
      %12 = vector.broadcast %cst_9 : f32 to vector<2x256xf32>
      %c0_10 = arith.constant 0 : index
      %c0_11 = arith.constant 0 : index
      %13 = vector.load %arg6[%c0_10, %c0_11] : memref<2x256xf32, #tpu.memory_space<vmem>>, vector<2x256xf32>
      tpu.vector_store %arg6[%c0_10, %c0_11], %12 {strides = array<i32>} : memref<2x256xf32, #tpu.memory_space<vmem>>, vector<2x256xf32>,
    } else {
    }
    %c0 = arith.constant 0 : index
    %c0_1 = arith.constant 0 : index
    %3 = vector.load %arg6[%c0, %c0_1] : memref<2x256xf32, #tpu.memory_space<vmem>>, vector<2x256xf32>
    %c0_2 = arith.constant 0 : index
    %c0_3 = arith.constant 0 : index
    %4 = vector.load %arg3[%c0_2, %c0_3] : memref<2x256xbf16, #tpu.memory_space<vmem>>, vector<2x256xbf16>
    %c0_4 = arith.constant 0 : index
    %c0_5 = arith.constant 0 : index
    %5 = vector.load %arg4[%c0_4, %c0_5] : memref<256x256xbf16, #tpu.memory_space<vmem>>, vector<256x256xbf16>
    %cst = arith.constant dense<0.000000e+00> : vector<2x256xf32>
    %6 = tpu.matmul %4, %5, %cst {dimension_numbers = #tpu.dot_dimension_numbers<[1], [0], [0], [1], [0, 0, 1, 1], [], []>} : vector<2x256xbf16>, vector<256x256xbf16>, vector<2x256xf32> -> vector<2x256xf32>
    %7 = arith.addf %3, %6 : vector<2x256xf32>
    %c0_6 = arith.constant 0 : index
    %c0_7 = arith.constant 0 : index
    %8 = vector.load %arg6[%c0_6, %c0_7] : memref<2x256xf32, #tpu.memory_space<vmem>>, vector<2x256xf32>
    tpu.vector_store %arg6[%c0_6, %c0_7], %7 {strides = array<i32>} : memref<2x256xf32, #tpu.memory_space<vmem>>, vector<2x256xf32>,
    %c17_i32 = arith.constant 17 : i32
    %9 = arith.cmpi eq, %arg2, %c17_i32 : i32
    %10 = arith.extui %9 : i1 to i32
    %c0_i32_8 = arith.constant 0 : i32
    %11 = arith.cmpi ne, %10, %c0_i32_8 : i32
    scf.if %11 {
      %c0_9 = arith.constant 0 : index
      %c0_10 = arith.constant 0 : index
      %12 = vector.load %arg6[%c0_9, %c0_10] : memref<2x256xf32, #tpu.memory_space<vmem>>, vector<2x256xf32>
      %c0_11 = arith.constant 0 : index
      %c0_12 = arith.constant 0 : index
      %13 = vector.load %arg5[%c0_11, %c0_12] : memref<1x256xf32, #tpu.memory_space<vmem>>, vector<1x256xf32>
      %14 = vector.broadcast %13 : vector<1x256xf32> to vector<2x256xf32>
      %15 = arith.addf %12, %14 : vector<2x256xf32>
      %cst_13 = arith.constant 0.000000e+00 : f32
      %16 = vector.broadcast %cst_13 : f32 to vector<2x256xf32>
      %17 = arith.maximumf %15, %16 : vector<2x256xf32>
      %c0_14 = arith.constant 0 : index
      %c0_15 = arith.constant 0 : index
      %18 = vector.load %arg6[%c0_14, %c0_15] : memref<2x256xf32, #tpu.memory_space<vmem>>, vector<2x256xf32>
      tpu.vector_store %arg6[%c0_14, %c0_15], %17 {strides = array<i32>} : memref<2x256xf32, #tpu.memory_space<vmem>>, vector<2x256xf32>,
    } else {
    }
    return
  }
  func.func @transform_0(%arg0: i32, %arg1: i32, %arg2: i32) -> (i32, i32) {
    %c0_i32 = arith.constant 0 : i32
    return %arg0, %arg2 : i32, i32
  }
  func.func @transform_1(%arg0: i32, %arg1: i32, %arg2: i32) -> (i32, i32) {
    %c0_i32 = arith.constant 0 : i32
    return %arg2, %arg1 : i32, i32
  }
  func.func @transform_2(%arg0: i32, %arg1: i32, %arg2: i32) -> (i32, i32) {
    %c0_i32 = arith.constant 0 : i32
    %c0_i32_0 = arith.constant 0 : i32
    return %c0_i32, %arg1 : i32, i32
  }
  func.func @transform_3(%arg0: i32, %arg1: i32, %arg2: i32) -> (i32, i32) {
    %c0_i32 = arith.constant 0 : i32
    return %arg0, %arg1 : i32, i32
  }
}

</mosaic_0001>

<bundles_post_ra>
// kernel: vgg19_forward.20
= control target key start
LH: loop header
LB: loop body
LE: loop exit
PB: predicated region body
PF: predicated region fallthrough
CT: control target
= control target key end

     0   :  { %8 = vsyncpa [#allocation3], 0  ;;  %s1236_s12 = smov 0   ;;  %s1238_s13 = smov 0   ;;  %s1643_s0 = inlined_call_operand.vmem [shape: bf16[512,27], index: 0, kind: input, shape index: {}]   ;;  %s1644_s1 = inlined_call_operand.vmem [shape: bf16[27,64], index: 1, kind: input, shape index: {}]   ;;  %s1645_s2 = inlined_call_operand.hbm [shape: f32[1,64], index: 2, kind: input, shape index: {}]   ;;  %s1646_s3 = inlined_call_operand.vmem [shape: f32[512,64], index: 3, kind: output, shape index: {}]  }
   0x1   :  { %s1240_s14 = smov 0  }
   0x2 LB: > { %s995_s15 = sadd.s32 4294967295, %s1211_s14   ;;  %s33_s16 = sadd.s32 1, %s1207_s13  ;;  %s1211_s14 = sphi %s1240_s14, %s14_s14   ;;  %s1207_s13 = sphi %s1238_s13, %s1656_s13   ;;  %s1203_s12 = sphi %s1236_s12, %s1655_s12  }
   0x3   : > { %p35_p0 = scmp.ge.s32.totalorder %s33_s16, 2  ;;  %p997_p1 = scmp.ge.s32.totalorder %s1211_s14, 1 }
   0x4   : > { %p148_p2 = scmp.lt.s32.totalorder %s1211_s14, 3  ;;  %p1261_p4 = scmp.eq.s32.totalorder %s995_s15, 0 }
   0x5   : > { %s1658_s16 = smov (%p35_p0, %s33_s16), 0  ;;  %s1213_s19 = smov [#allocation2]  }
   0x6   : > { %p1257_p3 = pnand %p997_p1, %p148_p2  ;;  %s175_s20 = sshll.u32 %s1213_s19, 4  ;;  %s176_s20 = int_to_ptr.vmem [resolvable:$true] %s175_s20 }
   0x7   : > { %s1651_s18 = scalar_select %p1261_p4, 1, 0 }
   0x8   : > { %s1650_s17 = scalar_select %p1257_p3, 1, 0 }
   0x9   : > { %p1106_p5 = pneg %p1257_p3  ;;  %s1157_s24 = scalar_lea.hbm %s1645_s2, 16 }
   0xa   : > { %p1158_p7 = scmp.ne.s32.totalorder %s1645_s2, %s1157_s24  ;;  %p1164_p11 = scmp.lt.u32.totalorder %s1157_s24, %s1645_s2 }
   0xb   : > { %p1269_p6 = pnand %p1261_p4, %p1106_p5 }
   0xd   : > { %p1159_p8 = pneg %p1269_p6 }
   0xf   : > { %p1160_p9 = pnand %p1159_p8, %p1158_p7 }
  0x11   : > { %p1161_p10 = pneg %p1160_p9 }
  0x13   : > { %p1166_p12 = pnand %p1164_p11, %p1161_p10 }
  0x15   : > { %1169 = shalt.err (!%p1166_p12)
}
  0x16   : > { %s1170_s29 = scalar_lea.vmem %s176_s20, 16  ;;  %s1177_s30 = scalar_lea.vmem %s176_s20, 32 }
  0x17   : > { %p1171_p13 = scmp.ne.s32.totalorder %s176_s20, %s1170_s29  ;;  %p1178_p2 = scmp.lt.s32.totalorder %s176_s20, %s176_s20 }
  0x18   : > { %p1179_p5 = scmp.lt.s32.totalorder %s1177_s30, %s1170_s29 }
  0x19   : > { %p1173_p0 = pnand %p1171_p13, %p1159_p8 }
  0x1a   : > { %p1180_p4 = por %p1179_p5, %p1178_p2 }
  0x1b   : > { %p1174_p1 = pneg %p1173_p0 }
  0x1d   : > { %p1181_p3 = pnand %p1180_p4, %p1174_p1 }
  0x1f   : > { %1184 = shalt.err (!%p1181_p3)
}
  0x20   : > { %1109 = dma.hbm_to_vmem [thread:$0]  (!%p1269_p6), %s1645_s2, 16, %s176_s20, [#allocation3]  }
  0x21   : > { %p1653_p7 = scmp.ne.s32.totalorder %s1650_s17, 0 }
  0x22   : > { %p1654_p9 = scmp.ne.s32.totalorder (!%p1653_p7), %s1651_s18, 0 }
  0x23   : > { %200 = sbr.rel (%p1653_p7) target bundleno = 309 (0x135), region = 32 }
  0x2a   : > { %1198 = dma.done.wait (%p1654_p9), [#allocation3], 16  }
  0x2b   : > { %1200 = vsyncadd (%p1654_p9), [#allocation3], 4294967280  ;;  %s1003_s6 = sshll.u32 %s1203_s12, 5  ;;  %vm511_vm0 = vcmask 1044480   ;;  %vm512_vm1 = vcmask 1045504   ;;  %v1214_v0 = vmov 65535  }
  0x2c   : > { %p239_p4 = scmp.lt.s32.totalorder %s1003_s6, 63  ;;  %v513_v1 = vsel %vm511_vm0, 4294967295, %v1214_v0  ;;  %vm270_vm2 = vcmask 523264   ;;  %vm462_vm3 = vcmask 220160   ;;  %v1139_v2 = vld [vmem:[%s1644_s1] sm:$0xff]   ;;  %v1215_v4 = vmov 0.0  }
  0x2d   : > { %v514_v3 = vsel %vm512_vm1, %v513_v1, 0  ;;  %v1140_v5 = vld [vmem:[%s1644_s1 + $0x8] sm:$0x3f]   ;;  %1062 = vmatprep.subr.bf16.mxu0 %v1139_v2  ;;  %1098 = vmatprep.subr.bf16.mxu1 %v1139_v2  ;;  %v1436_v51 = vld [vmem:[#allocation2] ss:$0 sm:$0xff] }
  0x2e   : > { %s1660_s6 = smov (!%p239_p4, %s1003_s6), 63  ;;  %1063 = vmatpush3.bf16.msra.mxu0 %v1139_v2  ;;  %1100 = vmatpush3.bf16.msra.mxu1 %v1139_v2  ;;  %v516_v7 = vand.u32 %v1140_v5, %v514_v3 }
  0x2f   : > { %s1004_s7 = sshll.u32 %s1660_s6, 2  ;;  %s1006_s8 = sshll.u32 %s1660_s6, 3 }
  0x30   : > { %s1299_s11 = scalar_lea.vmem %s1643_s0, %s1004_s7  ;;  %s1304_s18 = scalar_lea.vmem %s1646_s3, %s1006_s8  ;;  %1064 = vmatprep.subr.bf16.mxu0 %v516_v7  ;;  %1099 = vmatprep.subr.bf16.mxu1 %v516_v7 }
  0x31   : > { %273 = vst.msk [vmem:[%s1304_s18 + $0x10] sm:$0xff] %vm270_vm2, %v1215_v4  ;;  %271 = vst.msk [vmem:[%s1304_s18] sm:$0xff] %vm270_vm2, %v1215_v4  ;;  %v1141_v6 = vld [vmem:[%s1299_s11] sm:$0xff]   ;;  %v1143_v9 = vld [vmem:[%s1299_s11 + $0x8] sm:$0xff]  }
  0x32   : > { %272 = vst.msk [vmem:[%s1304_s18 + $0x8] sm:$0xff] %vm270_vm2, %v1215_v4  ;;  %274 = vst.msk [vmem:[%s1304_s18 + $0x18] sm:$0xff] %vm270_vm2, %v1215_v4  ;;  %v1142_v8 = vld [vmem:[%s1299_s11 + $0x40] sm:$0xff]   ;;  %1066 = vmatprep.mubr.msk.bf16.mxu0 %vm462_vm3, %v1141_v6  ;;  %v1144_v10 = vld [vmem:[%s1299_s11 + $0x48] sm:$0xff]   ;;  %1065 = vmatpush3.bf16.msra.mxu0 %v516_v7 }
  0x33   : > { %275 = vst.msk [vmem:[%s1304_s18 + $0x20] sm:$0xff] %vm270_vm2, %v1215_v4  ;;  %276 = vst.msk [vmem:[%s1304_s18 + $0x28] sm:$0xff] %vm270_vm2, %v1215_v4  ;;  %1082 = vmatprep.mubr.msk.bf16.mxu1 %vm462_vm3, %v1142_v8  ;;  %v1145_v11 = vld [vmem:[%s1299_s11 + $0x10] sm:$0xff]   ;;  %1101 = vmatpush3.bf16.msra.mxu1 %v516_v7  ;;  %v1147_v13 = vld [vmem:[%s1299_s11 + $0x18] sm:$0xff]  }
  0x34   : > { %277 = vst.msk [vmem:[%s1304_s18 + $0x30] sm:$0xff] %vm270_vm2, %v1215_v4  ;;  %278 = vst.msk [vmem:[%s1304_s18 + $0x38] sm:$0xff] %vm270_vm2, %v1215_v4  ;;  %v1146_v12 = vld [vmem:[%s1299_s11 + $0x50] sm:$0xff]   ;;  %v1148_v14 = vld [vmem:[%s1299_s11 + $0x58] sm:$0xff]  }
  0x35   : > { %279 = vst.msk [vmem:[%s1304_s18 + $0x40] sm:$0xff] %vm270_vm2, %v1215_v4  ;;  %280 = vst.msk [vmem:[%s1304_s18 + $0x48] sm:$0xff] %vm270_vm2, %v1215_v4  ;;  %1067 = vmatmul.mubr.msk.bf16.vlgmr.msra.gmra.mrb[0].mxu0 %vm462_vm3, %v1143_v9  ;;  %v1149_v15 = vld [vmem:[%s1299_s11 + $0x20] sm:$0xff]   ;;  %v1151_v17 = vld [vmem:[%s1299_s11 + $0x28] sm:$0xff]  }
  0x36   : > { %281 = vst.msk [vmem:[%s1304_s18 + $0x50] sm:$0xff] %vm270_vm2, %v1215_v4  ;;  %282 = vst.msk [vmem:[%s1304_s18 + $0x58] sm:$0xff] %vm270_vm2, %v1215_v4  ;;  %1083 = vmatmul.mubr.msk.bf16.vlgmr.msra.gmra.mrb[0].mxu1 %vm462_vm3, %v1144_v10  ;;  %1070 = vmatprep.mubr.msk.bf16.mxu0 %vm462_vm3, %v1145_v11  ;;  %v1150_v16 = vld [vmem:[%s1299_s11 + $0x60] sm:$0xff]   ;;  %v1152_v18 = vld [vmem:[%s1299_s11 + $0x68] sm:$0xff]  }
  0x37   : > { %283 = vst.msk [vmem:[%s1304_s18 + $0x60] sm:$0xff] %vm270_vm2, %v1215_v4  ;;  %284 = vst.msk [vmem:[%s1304_s18 + $0x68] sm:$0xff] %vm270_vm2, %v1215_v4  ;;  %1086 = vmatprep.mubr.msk.bf16.mxu1 %vm462_vm3, %v1146_v12  ;;  %v1153_v19 = vld [vmem:[%s1299_s11 + $0x30] sm:$0xff]   ;;  %v1155_v21 = vld [vmem:[%s1299_s11 + $0x38] sm:$0xff]  }
  0x38   : > { %285 = vst.msk [vmem:[%s1304_s18 + $0x70] sm:$0xff] %vm270_vm2, %v1215_v4  ;;  %286 = vst.msk [vmem:[%s1304_s18 + $0x78] sm:$0xff] %vm270_vm2, %v1215_v4  ;;  %v1154_v20 = vld [vmem:[%s1299_s11 + $0x70] sm:$0xff]   ;;  %v1156_v22 = vld [vmem:[%s1299_s11 + $0x78] sm:$0xff]  }
  0x39   : > { %287 = vst.msk [vmem:[%s1304_s18 + $0x80] sm:$0xff] %vm270_vm2, %v1215_v4  ;;  %288 = vst.msk [vmem:[%s1304_s18 + $0x88] sm:$0xff] %vm270_vm2, %v1215_v4  ;;  %v305_v23 = vld [vmem:[%s1304_s18 + $0x10] sm:$0xff]  ;;  %v303_v25 = vld [vmem:[%s1304_s18] sm:$0xff] }
  0x3a   : > { %289 = vst.msk [vmem:[%s1304_s18 + $0x90] sm:$0xff] %vm270_vm2, %v1215_v4  ;;  %290 = vst.msk [vmem:[%s1304_s18 + $0x98] sm:$0xff] %vm270_vm2, %v1215_v4  ;;  %v306_v29 = vld [vmem:[%s1304_s18 + $0x18] sm:$0xff]  ;;  %v304_v35 = vld [vmem:[%s1304_s18 + $0x8] sm:$0xff] }
  0x3b   : > { %291 = vst.msk [vmem:[%s1304_s18 + $0xa0] sm:$0xff] %vm270_vm2, %v1215_v4  ;;  %292 = vst.msk [vmem:[%s1304_s18 + $0xa8] sm:$0xff] %vm270_vm2, %v1215_v4  ;;  %v309_v47 = vld [vmem:[%s1304_s18 + $0x30] sm:$0xff]  ;;  %v307_v49 = vld [vmem:[%s1304_s18 + $0x20] sm:$0xff] }
  0x3c   : > { %293 = vst.msk [vmem:[%s1304_s18 + $0xb0] sm:$0xff] %vm270_vm2, %v1215_v4  ;;  %294 = vst.msk [vmem:[%s1304_s18 + $0xb8] sm:$0xff] %vm270_vm2, %v1215_v4  ;;  %v310_v54 = vld [vmem:[%s1304_s18 + $0x38] sm:$0xff]  ;;  %v308_v60 = vld [vmem:[%s1304_s18 + $0x28] sm:$0xff] }
  0x3d   : > { %295 = vst.msk [vmem:[%s1304_s18 + $0xc0] sm:$0xff] %vm270_vm2, %v1215_v4  ;;  %296 = vst.msk [vmem:[%s1304_s18 + $0xc8] sm:$0xff] %vm270_vm2, %v1215_v4  ;;  %1071 = vmatmul.mubr.msk.bf16.gmra.mrb[4].mxu0 %vm462_vm3, %v1147_v13 }
  0x3e   : > { %297 = vst.msk [vmem:[%s1304_s18 + $0xd0] sm:$0xff] %vm270_vm2, %v1215_v4  ;;  %298 = vst.msk [vmem:[%s1304_s18 + $0xd8] sm:$0xff] %vm270_vm2, %v1215_v4  ;;  %1087 = vmatmul.mubr.msk.bf16.gmra.mrb[4].mxu1 %vm462_vm3, %v1148_v14  ;;  %1074 = vmatprep.mubr.msk.bf16.mxu0 %vm462_vm3, %v1149_v15 }
  0x3f   : > { %299 = vst.msk [vmem:[%s1304_s18 + $0xe0] sm:$0xff] %vm270_vm2, %v1215_v4  ;;  %300 = vst.msk [vmem:[%s1304_s18 + $0xe8] sm:$0xff] %vm270_vm2, %v1215_v4  ;;  %1090 = vmatprep.mubr.msk.bf16.mxu1 %vm462_vm3, %v1150_v16 }
  0x40   : > { %301 = vst.msk [vmem:[%s1304_s18 + $0xf0] sm:$0xff] %vm270_vm2, %v1215_v4  ;;  %302 = vst.msk [vmem:[%s1304_s18 + $0xf8] sm:$0xff] %vm270_vm2, %v1215_v4  ;;  %v319_v26 = vld [vmem:[%s1304_s18 + $0x80] sm:$0xff]  ;;  %v320_v36 = vld [vmem:[%s1304_s18 + $0x88] sm:$0xff] }
  0x41   : > { %v321_v24 = vld [vmem:[%s1304_s18 + $0x90] sm:$0xff]  ;;  %v322_v30 = vld [vmem:[%s1304_s18 + $0x98] sm:$0xff] }
  0x42   : > { %v323_v50 = vld [vmem:[%s1304_s18 + $0xa0] sm:$0xff]  ;;  %v324_v61 = vld [vmem:[%s1304_s18 + $0xa8] sm:$0xff] }
  0x43   : > { %v325_v48 = vld [vmem:[%s1304_s18 + $0xb0] sm:$0xff]  ;;  %v326_v55 = vld [vmem:[%s1304_s18 + $0xb8] sm:$0xff] }
  0x45   : > { %1075 = vmatmul.mubr.msk.bf16.gmra.mrb[8].mxu0 %vm462_vm3, %v1151_v17 }
  0x46   : > { %1091 = vmatmul.mubr.msk.bf16.gmra.mrb[8].mxu1 %vm462_vm3, %v1152_v18  ;;  %1078 = vmatprep.mubr.msk.bf16.mxu0 %vm462_vm3, %v1153_v19 }
  0x47   : > { %1094 = vmatprep.mubr.msk.bf16.mxu1 %vm462_vm3, %v1154_v20 }
  0x4d   : > { %1079 = vmatmul.mubr.msk.bf16.gmra.mrb[12].mxu0 %vm462_vm3, %v1155_v21 }
  0x4e   : > { %1095 = vmatmul.mubr.msk.bf16.gmra.mrb[12].mxu1 %vm462_vm3, %v1156_v22 }
 0x108   : > { %v1068_v27 = vpop.f32.mrb[0].mxu0 }
 0x109   : > { %v1084_v28 = vpop.f32.mrb[0].mxu1  ;;  %v681_v31 = vadd.f32 %v1068_v27, %v305_v23  ;;  %v552_v33 = vpop.f32.mrb[1].mxu0 }
 0x10a   : > { %v697_v32 = vadd.f32 %v1084_v28, %v321_v24  ;;  %v616_v34 = vpop.f32.mrb[1].mxu1  ;;  %v679_v37 = vadd.f32 %v552_v33, %v303_v25  ;;  %v1069_v39 = vpop.f32.mrb[2].mxu0  ;;  %v313_v28 = vld [vmem:[%s1304_s18 + $0x50] sm:$0xff]  ;;  %v327_v33 = vld [vmem:[%s1304_s18 + $0xc0] sm:$0xff] }
 0x10b   : > { %v695_v38 = vadd.f32 %v616_v34, %v319_v26  ;;  %v1085_v40 = vpop.f32.mrb[2].mxu1  ;;  %714 = vst.msk [vmem:[%s1304_s18 + $0x10] sm:$0xff] %vm270_vm2, %v681_v31  ;;  %v682_v41 = vadd.f32 %v1069_v39, %v306_v29  ;;  %v555_v43 = vpop.f32.mrb[3].mxu0  ;;  %v329_v29 = vld [vmem:[%s1304_s18 + $0xd0] sm:$0xff]  ;;  %v330_v39 = vld [vmem:[%s1304_s18 + $0xd8] sm:$0xff] }
 0x10c   : > { %730 = vst.msk [vmem:[%s1304_s18 + $0x90] sm:$0xff] %vm270_vm2, %v697_v32  ;;  %v698_v42 = vadd.f32 %v1085_v40, %v322_v30  ;;  %v619_v44 = vpop.f32.mrb[3].mxu1  ;;  %712 = vst.msk [vmem:[%s1304_s18] sm:$0xff] %vm270_vm2, %v679_v37  ;;  %v680_v45 = vadd.f32 %v555_v43, %v304_v35  ;;  %v311_v32 = vld [vmem:[%s1304_s18 + $0x40] sm:$0xff] }
 0x10d   : > { %728 = vst.msk [vmem:[%s1304_s18 + $0x80] sm:$0xff] %vm270_vm2, %v695_v38  ;;  %v696_v46 = vadd.f32 %v619_v44, %v320_v36  ;;  %715 = vst.msk [vmem:[%s1304_s18 + $0x18] sm:$0xff] %vm270_vm2, %v682_v41  ;;  %v314_v38 = vld [vmem:[%s1304_s18 + $0x58] sm:$0xff]  ;;  %v312_v44 = vld [vmem:[%s1304_s18 + $0x48] sm:$0xff] }
 0x10e   : > { %731 = vst.msk [vmem:[%s1304_s18 + $0x98] sm:$0xff] %vm270_vm2, %v698_v42  ;;  %713 = vst.msk [vmem:[%s1304_s18 + $0x8] sm:$0xff] %vm270_vm2, %v680_v45  ;;  %v328_v45 = vld [vmem:[%s1304_s18 + $0xc8] sm:$0xff] }
 0x10f   : > { %729 = vst.msk [vmem:[%s1304_s18 + $0x88] sm:$0xff] %vm270_vm2, %v696_v46 }
 0x110   : > { %v1072_v52 = vpop.f32.mrb[4].mxu0 }
 0x111   : > { %v1088_v53 = vpop.f32.mrb[4].mxu1  ;;  %v685_v56 = vadd.f32 %v1072_v52, %v309_v47  ;;  %v568_v58 = vpop.f32.mrb[5].mxu0 }
 0x112   : > { %v701_v57 = vadd.f32 %v1088_v53, %v325_v48  ;;  %v632_v59 = vpop.f32.mrb[5].mxu1  ;;  %v749_v62 = vld [vmem:[%s1304_s18 + $0x10] sm:$0xff]  ;;  %v683_v0 = vadd.f32 %v568_v58, %v307_v49  ;;  %v1073_v2 = vpop.f32.mrb[6].mxu0 }
 0x113   : > { %v765_v63 = vld [vmem:[%s1304_s18 + $0x90] sm:$0xff]  ;;  %v699_v1 = vadd.f32 %v632_v59, %v323_v50  ;;  %v1089_v3 = vpop.f32.mrb[6].mxu1  ;;  %v788_v4 = vadd.f32 %v1436_v51, %v749_v62  ;;  %v747_v6 = vld [vmem:[%s1304_s18] sm:$0xff]  ;;  %718 = vst.msk [vmem:[%s1304_s18 + $0x30] sm:$0xff] %vm270_vm2, %v685_v56  ;;  %v686_v8 = vadd.f32 %v1073_v2, %v310_v54  ;;  %v571_v10 = vpop.f32.mrb[7].mxu0 }
 0x114   : > { %v804_v5 = vadd.f32 %v1436_v51, %v765_v63  ;;  %v763_v7 = vld [vmem:[%s1304_s18 + $0x80] sm:$0xff]  ;;  %734 = vst.msk [vmem:[%s1304_s18 + $0xb0] sm:$0xff] %vm270_vm2, %v701_v57  ;;  %v702_v9 = vadd.f32 %v1089_v3, %v326_v55  ;;  %v635_v11 = vpop.f32.mrb[7].mxu1  ;;  %v786_v12 = vadd.f32 %v1436_v51, %v747_v6  ;;  %v750_v14 = vld [vmem:[%s1304_s18 + $0x18] sm:$0xff]  ;;  %716 = vst.msk [vmem:[%s1304_s18 + $0x20] sm:$0xff] %vm270_vm2, %v683_v0 }
 0x115   : > { %v802_v13 = vadd.f32 %v1436_v51, %v763_v7  ;;  %v766_v15 = vld [vmem:[%s1304_s18 + $0x98] sm:$0xff]  ;;  %732 = vst.msk [vmem:[%s1304_s18 + $0xa0] sm:$0xff] %vm270_vm2, %v699_v1  ;;  %v684_v16 = vadd.f32 %v571_v10, %v308_v60  ;;  %v700_v17 = vadd.f32 %v635_v11, %v324_v61  ;;  %v820_v18 = vmax.f32 %v788_v4, 0.0  ;;  %v748_v22 = vld [vmem:[%s1304_s18 + $0x8] sm:$0xff]  ;;  %719 = vst.msk [vmem:[%s1304_s18 + $0x38] sm:$0xff] %vm270_vm2, %v686_v8 }
 0x116   : > { %v836_v19 = vmax.f32 %v804_v5, 0.0  ;;  %v789_v20 = vadd.f32 %v1436_v51, %v750_v14  ;;  %v805_v21 = vadd.f32 %v1436_v51, %v766_v15  ;;  %v764_v23 = vld [vmem:[%s1304_s18 + $0x88] sm:$0xff]  ;;  %735 = vst.msk [vmem:[%s1304_s18 + $0xb8] sm:$0xff] %vm270_vm2, %v702_v9  ;;  %v818_v24 = vmax.f32 %v786_v12, 0.0  ;;  %v333_v14 = vld [vmem:[%s1304_s18 + $0xf0] sm:$0xff] }
 0x117   : > { %v834_v25 = vmax.f32 %v802_v13, 0.0  ;;  %v787_v26 = vadd.f32 %v1436_v51, %v748_v22  ;;  %v803_v27 = vadd.f32 %v1436_v51, %v764_v23  ;;  %717 = vst.msk [vmem:[%s1304_s18 + $0x28] sm:$0xff] %vm270_vm2, %v684_v16  ;;  %733 = vst.msk [vmem:[%s1304_s18 + $0xa8] sm:$0xff] %vm270_vm2, %v700_v17  ;;  %v317_v13 = vld [vmem:[%s1304_s18 + $0x70] sm:$0xff]  ;;  %v315_v17 = vld [vmem:[%s1304_s18 + $0x60] sm:$0xff] }
 0x118   : > { %852 = vst.msk [vmem:[%s1304_s18 + $0x10] sm:$0xff] %vm270_vm2, %v820_v18  ;;  %868 = vst.msk [vmem:[%s1304_s18 + $0x90] sm:$0xff] %vm270_vm2, %v836_v19  ;;  %v821_v30 = vmax.f32 %v789_v20, 0.0  ;;  %v837_v31 = vmax.f32 %v805_v21, 0.0  ;;  %v1076_v36 = vpop.f32.mrb[8].mxu0  ;;  %v331_v18 = vld [vmem:[%s1304_s18 + $0xe0] sm:$0xff] }
 0x119   : > { %850 = vst.msk [vmem:[%s1304_s18] sm:$0xff] %vm270_vm2, %v818_v24  ;;  %866 = vst.msk [vmem:[%s1304_s18 + $0x80] sm:$0xff] %vm270_vm2, %v834_v25  ;;  %v819_v34 = vmax.f32 %v787_v26, 0.0  ;;  %v835_v35 = vmax.f32 %v803_v27, 0.0  ;;  %v1092_v37 = vpop.f32.mrb[8].mxu1  ;;  %v689_v40 = vadd.f32 %v1076_v36, %v313_v28  ;;  %v584_v42 = vpop.f32.mrb[9].mxu0 }
 0x11a   : > { %853 = vst.msk [vmem:[%s1304_s18 + $0x18] sm:$0xff] %vm270_vm2, %v821_v30  ;;  %869 = vst.msk [vmem:[%s1304_s18 + $0x98] sm:$0xff] %vm270_vm2, %v837_v31  ;;  %v705_v41 = vadd.f32 %v1092_v37, %v329_v29  ;;  %v648_v43 = vpop.f32.mrb[9].mxu1  ;;  %v753_v46 = vld [vmem:[%s1304_s18 + $0x30] sm:$0xff]  ;;  %v687_v48 = vadd.f32 %v584_v42, %v311_v32  ;;  %v1077_v50 = vpop.f32.mrb[10].mxu0  ;;  %v318_v23 = vld [vmem:[%s1304_s18 + $0x78] sm:$0xff] }
 0x11b   : > { %851 = vst.msk [vmem:[%s1304_s18 + $0x8] sm:$0xff] %vm270_vm2, %v819_v34  ;;  %867 = vst.msk [vmem:[%s1304_s18 + $0x88] sm:$0xff] %vm270_vm2, %v835_v35  ;;  %v769_v47 = vld [vmem:[%s1304_s18 + $0xb0] sm:$0xff]  ;;  %v703_v49 = vadd.f32 %v648_v43, %v327_v33  ;;  %v1093_v52 = vpop.f32.mrb[10].mxu1  ;;  %v792_v53 = vadd.f32 %v1436_v51, %v753_v46  ;;  %v751_v55 = vld [vmem:[%s1304_s18 + $0x20] sm:$0xff]  ;;  %v690_v57 = vadd.f32 %v1077_v50, %v314_v38  ;;  %v587_v59 = vpop.f32.mrb[11].mxu0 }
 0x11c   : > { %v808_v54 = vadd.f32 %v1436_v51, %v769_v47  ;;  %v767_v56 = vld [vmem:[%s1304_s18 + $0xa0] sm:$0xff]  ;;  %722 = vst.msk [vmem:[%s1304_s18 + $0x50] sm:$0xff] %vm270_vm2, %v689_v40  ;;  %738 = vst.msk [vmem:[%s1304_s18 + $0xd0] sm:$0xff] %vm270_vm2, %v705_v41  ;;  %v706_v58 = vadd.f32 %v1093_v52, %v330_v39  ;;  %v651_v60 = vpop.f32.mrb[11].mxu1  ;;  %v790_v61 = vadd.f32 %v1436_v51, %v751_v55  ;;  %v754_v63 = vld [vmem:[%s1304_s18 + $0x38] sm:$0xff] }
 0x11d   : > { %v806_v62 = vadd.f32 %v1436_v51, %v767_v56  ;;  %v770_v0 = vld [vmem:[%s1304_s18 + $0xb8] sm:$0xff]  ;;  %720 = vst.msk [vmem:[%s1304_s18 + $0x40] sm:$0xff] %vm270_vm2, %v687_v48  ;;  %736 = vst.msk [vmem:[%s1304_s18 + $0xc0] sm:$0xff] %vm270_vm2, %v703_v49  ;;  %v688_v1 = vadd.f32 %v587_v59, %v312_v44  ;;  %v704_v2 = vadd.f32 %v651_v60, %v328_v45  ;;  %v824_v3 = vmax.f32 %v792_v53, 0.0  ;;  %v316_v29 = vld [vmem:[%s1304_s18 + $0x68] sm:$0xff] }
 0x11e   : > { %v840_v4 = vmax.f32 %v808_v54, 0.0  ;;  %v793_v5 = vadd.f32 %v1436_v51, %v754_v63  ;;  %v809_v6 = vadd.f32 %v1436_v51, %v770_v0  ;;  %v752_v7 = vld [vmem:[%s1304_s18 + $0x28] sm:$0xff]  ;;  %723 = vst.msk [vmem:[%s1304_s18 + $0x58] sm:$0xff] %vm270_vm2, %v690_v57  ;;  %739 = vst.msk [vmem:[%s1304_s18 + $0xd8] sm:$0xff] %vm270_vm2, %v706_v58  ;;  %v822_v9 = vmax.f32 %v790_v61, 0.0  ;;  %v334_v24 = vld [vmem:[%s1304_s18 + $0xf8] sm:$0xff] }
 0x11f   : > { %v768_v8 = vld [vmem:[%s1304_s18 + $0xa8] sm:$0xff]  ;;  %v838_v10 = vmax.f32 %v806_v62, 0.0  ;;  %v791_v11 = vadd.f32 %v1436_v51, %v752_v7  ;;  %721 = vst.msk [vmem:[%s1304_s18 + $0x48] sm:$0xff] %vm270_vm2, %v688_v1  ;;  %737 = vst.msk [vmem:[%s1304_s18 + $0xc8] sm:$0xff] %vm270_vm2, %v704_v2 }
 0x120   : > { %v807_v12 = vadd.f32 %v1436_v51, %v768_v8  ;;  %856 = vst.msk [vmem:[%s1304_s18 + $0x30] sm:$0xff] %vm270_vm2, %v824_v3  ;;  %872 = vst.msk [vmem:[%s1304_s18 + $0xb0] sm:$0xff] %vm270_vm2, %v840_v4  ;;  %v825_v15 = vmax.f32 %v793_v5, 0.0  ;;  %v841_v16 = vmax.f32 %v809_v6, 0.0  ;;  %v1080_v21 = vpop.f32.mrb[12].mxu0  ;;  %v332_v30 = vld [vmem:[%s1304_s18 + $0xe8] sm:$0xff] }
 0x121   : > { %854 = vst.msk [vmem:[%s1304_s18 + $0x20] sm:$0xff] %vm270_vm2, %v822_v9  ;;  %870 = vst.msk [vmem:[%s1304_s18 + $0xa0] sm:$0xff] %vm270_vm2, %v838_v10  ;;  %v823_v19 = vmax.f32 %v791_v11, 0.0  ;;  %v1096_v22 = vpop.f32.mrb[12].mxu1  ;;  %v693_v25 = vadd.f32 %v1080_v21, %v317_v13  ;;  %v600_v27 = vpop.f32.mrb[13].mxu0 }
 0x122   : > { %v839_v20 = vmax.f32 %v807_v12, 0.0  ;;  %857 = vst.msk [vmem:[%s1304_s18 + $0x38] sm:$0xff] %vm270_vm2, %v825_v15  ;;  %873 = vst.msk [vmem:[%s1304_s18 + $0xb8] sm:$0xff] %vm270_vm2, %v841_v16  ;;  %v709_v26 = vadd.f32 %v1096_v22, %v333_v14  ;;  %v664_v28 = vpop.f32.mrb[13].mxu1  ;;  %v691_v33 = vadd.f32 %v600_v27, %v315_v17  ;;  %v1081_v35 = vpop.f32.mrb[14].mxu0 }
 0x123   : > { %855 = vst.msk [vmem:[%s1304_s18 + $0x28] sm:$0xff] %vm270_vm2, %v823_v19  ;;  %v757_v31 = vld [vmem:[%s1304_s18 + $0x50] sm:$0xff]  ;;  %v707_v34 = vadd.f32 %v664_v28, %v331_v18  ;;  %v1097_v36 = vpop.f32.mrb[14].mxu1  ;;  %726 = vst.msk [vmem:[%s1304_s18 + $0x70] sm:$0xff] %vm270_vm2, %v693_v25  ;;  %v694_v41 = vadd.f32 %v1081_v35, %v318_v23  ;;  %v603_v43 = vpop.f32.mrb[15].mxu0 }
 0x124   : > { %871 = vst.msk [vmem:[%s1304_s18 + $0xa8] sm:$0xff] %vm270_vm2, %v839_v20  ;;  %v773_v32 = vld [vmem:[%s1304_s18 + $0xd0] sm:$0xff]  ;;  %v796_v37 = vadd.f32 %v1436_v51, %v757_v31  ;;  %v755_v39 = vld [vmem:[%s1304_s18 + $0x40] sm:$0xff]  ;;  %742 = vst.msk [vmem:[%s1304_s18 + $0xf0] sm:$0xff] %vm270_vm2, %v709_v26  ;;  %v710_v42 = vadd.f32 %v1097_v36, %v334_v24  ;;  %v667_v44 = vpop.f32.mrb[15].mxu1  ;;  %v692_v49 = vadd.f32 %v603_v43, %v316_v29 }
 0x125   : > { %v812_v38 = vadd.f32 %v1436_v51, %v773_v32  ;;  %v771_v40 = vld [vmem:[%s1304_s18 + $0xc0] sm:$0xff]  ;;  %v794_v45 = vadd.f32 %v1436_v51, %v755_v39  ;;  %v758_v47 = vld [vmem:[%s1304_s18 + $0x58] sm:$0xff]  ;;  %724 = vst.msk [vmem:[%s1304_s18 + $0x60] sm:$0xff] %vm270_vm2, %v691_v33  ;;  %740 = vst.msk [vmem:[%s1304_s18 + $0xe0] sm:$0xff] %vm270_vm2, %v707_v34  ;;  %v708_v50 = vadd.f32 %v667_v44, %v332_v30 }
 0x126   : > { %v810_v46 = vadd.f32 %v1436_v51, %v771_v40  ;;  %v774_v48 = vld [vmem:[%s1304_s18 + $0xd8] sm:$0xff]  ;;  %v828_v52 = vmax.f32 %v796_v37, 0.0  ;;  %v797_v54 = vadd.f32 %v1436_v51, %v758_v47  ;;  %v756_v56 = vld [vmem:[%s1304_s18 + $0x48] sm:$0xff]  ;;  %727 = vst.msk [vmem:[%s1304_s18 + $0x78] sm:$0xff] %vm270_vm2, %v694_v41  ;;  %743 = vst.msk [vmem:[%s1304_s18 + $0xf8] sm:$0xff] %vm270_vm2, %v710_v42 }
 0x127   : > { %v844_v53 = vmax.f32 %v812_v38, 0.0  ;;  %v813_v55 = vadd.f32 %v1436_v51, %v774_v48  ;;  %v772_v57 = vld [vmem:[%s1304_s18 + $0xc8] sm:$0xff]  ;;  %v826_v58 = vmax.f32 %v794_v45, 0.0  ;;  %v795_v60 = vadd.f32 %v1436_v51, %v756_v56  ;;  %725 = vst.msk [vmem:[%s1304_s18 + $0x68] sm:$0xff] %vm270_vm2, %v692_v49  ;;  %741 = vst.msk [vmem:[%s1304_s18 + $0xe8] sm:$0xff] %vm270_vm2, %v708_v50 }
 0x128   : > { %v842_v59 = vmax.f32 %v810_v46, 0.0  ;;  %v811_v61 = vadd.f32 %v1436_v51, %v772_v57  ;;  %860 = vst.msk [vmem:[%s1304_s18 + $0x50] sm:$0xff] %vm270_vm2, %v828_v52  ;;  %v829_v62 = vmax.f32 %v797_v54, 0.0 }
 0x129   : > { %876 = vst.msk [vmem:[%s1304_s18 + $0xd0] sm:$0xff] %vm270_vm2, %v844_v53  ;;  %v845_v63 = vmax.f32 %v813_v55, 0.0  ;;  %858 = vst.msk [vmem:[%s1304_s18 + $0x40] sm:$0xff] %vm270_vm2, %v826_v58  ;;  %v827_v0 = vmax.f32 %v795_v60, 0.0 }
 0x12a   : > { %874 = vst.msk [vmem:[%s1304_s18 + $0xc0] sm:$0xff] %vm270_vm2, %v842_v59  ;;  %v843_v1 = vmax.f32 %v811_v61, 0.0  ;;  %861 = vst.msk [vmem:[%s1304_s18 + $0x58] sm:$0xff] %vm270_vm2, %v829_v62  ;;  %v761_v2 = vld [vmem:[%s1304_s18 + $0x70] sm:$0xff] }
 0x12b   : > { %877 = vst.msk [vmem:[%s1304_s18 + $0xd8] sm:$0xff] %vm270_vm2, %v845_v63  ;;  %859 = vst.msk [vmem:[%s1304_s18 + $0x48] sm:$0xff] %vm270_vm2, %v827_v0  ;;  %v777_v3 = vld [vmem:[%s1304_s18 + $0xf0] sm:$0xff]  ;;  %v800_v4 = vadd.f32 %v1436_v51, %v761_v2 }
 0x12c   : > { %875 = vst.msk [vmem:[%s1304_s18 + $0xc8] sm:$0xff] %vm270_vm2, %v843_v1  ;;  %v816_v5 = vadd.f32 %v1436_v51, %v777_v3  ;;  %v759_v6 = vld [vmem:[%s1304_s18 + $0x60] sm:$0xff] }
 0x12d   : > { %v775_v7 = vld [vmem:[%s1304_s18 + $0xe0] sm:$0xff]  ;;  %v798_v8 = vadd.f32 %v1436_v51, %v759_v6  ;;  %v762_v10 = vld [vmem:[%s1304_s18 + $0x78] sm:$0xff]  ;;  %v832_v12 = vmax.f32 %v800_v4, 0.0 }
 0x12e   : > { %v814_v9 = vadd.f32 %v1436_v51, %v775_v7  ;;  %v778_v11 = vld [vmem:[%s1304_s18 + $0xf8] sm:$0xff]  ;;  %v848_v13 = vmax.f32 %v816_v5, 0.0  ;;  %v801_v14 = vadd.f32 %v1436_v51, %v762_v10  ;;  %v760_v16 = vld [vmem:[%s1304_s18 + $0x68] sm:$0xff] }
 0x12f   : > { %v817_v15 = vadd.f32 %v1436_v51, %v778_v11  ;;  %v776_v17 = vld [vmem:[%s1304_s18 + $0xe8] sm:$0xff]  ;;  %v830_v18 = vmax.f32 %v798_v8, 0.0  ;;  %v799_v20 = vadd.f32 %v1436_v51, %v760_v16  ;;  %864 = vst.msk [vmem:[%s1304_s18 + $0x70] sm:$0xff] %vm270_vm2, %v832_v12 }
 0x130   : > { %v846_v19 = vmax.f32 %v814_v9, 0.0  ;;  %v815_v21 = vadd.f32 %v1436_v51, %v776_v17  ;;  %880 = vst.msk [vmem:[%s1304_s18 + $0xf0] sm:$0xff] %vm270_vm2, %v848_v13  ;;  %v833_v22 = vmax.f32 %v801_v14, 0.0 }
 0x131   : > { %v849_v23 = vmax.f32 %v817_v15, 0.0  ;;  %862 = vst.msk [vmem:[%s1304_s18 + $0x60] sm:$0xff] %vm270_vm2, %v830_v18  ;;  %v831_v24 = vmax.f32 %v799_v20, 0.0 }
 0x132   : > { %878 = vst.msk [vmem:[%s1304_s18 + $0xe0] sm:$0xff] %vm270_vm2, %v846_v19  ;;  %v847_v25 = vmax.f32 %v815_v21, 0.0  ;;  %865 = vst.msk [vmem:[%s1304_s18 + $0x78] sm:$0xff] %vm270_vm2, %v833_v22 }
 0x133   : > { %881 = vst.msk [vmem:[%s1304_s18 + $0xf8] sm:$0xff] %vm270_vm2, %v849_v23  ;;  %863 = vst.msk [vmem:[%s1304_s18 + $0x68] sm:$0xff] %vm270_vm2, %v831_v24 }
 0x134   : > { %879 = vst.msk [vmem:[%s1304_s18 + $0xe8] sm:$0xff] %vm270_vm2, %v847_v25 }
 0x135 PF: > { %s14_s14 = sadd.s32 1, %s1211_s14   ;;  %s1655_s12 = smov %s1207_s13 }
 0x136   : > { %p11_p3 = scmp.ge.s32.totalorder %s14_s14, 4   ;;  %s1656_s13 = smov %s1658_s16 }
 0x138   :  { %13 = sbr.rel (!%p11_p3) target bundleno = 2 (0x2), region = 79 }
 0x13f   :  { %910 = vsyncpa [#allocation3], 1 }
 0x140   :  { %912 = vsyncpa [#allocation3 + $0x1], 1 }

// kernel: vgg19_forward.22
= control target key start
LH: loop header
LB: loop body
LE: loop exit
PB: predicated region body
PF: predicated region fallthrough
CT: control target
= control target key end

     0   :  { %s158_s22 = smov 64   ;;  %vm136_vm0 = vcmask 523264   ;;  %s369_s0 = inlined_call_operand.vmem [shape: f32[16,2,8,128], index: 0, kind: input, shape index: {}]   ;;  %s370_s1 = inlined_call_operand.vmem [shape: f32[16,8,64], index: 1, kind: output, shape index: {}]  }
   0x1   :  { %v12_v0 = vld [vmem:[%s369_s0 + $0x20] sm:$0xff]  ;;  %v13_v1 = vld [vmem:[%s369_s0 + $0x28] sm:$0xff]  ;;  %v14_v5 = vld [vmem:[%s369_s0 + $0x30] sm:$0xff] }
   0x2   :  { %v8_v2 = vld [vmem:[%s369_s0] sm:$0xff]  ;;  %v178_v3 = vmax.f32 %v12_v0, %v13_v1  ;;  %v9_v4 = vld [vmem:[%s369_s0 + $0x8] sm:$0xff]  ;;  %v15_v6 = vld [vmem:[%s369_s0 + $0x38] sm:$0xff] }
   0x3   :  { %v189_v7 = vmax.f32 %v8_v2, %v9_v4  ;;  %v10_v8 = vld [vmem:[%s369_s0 + $0x10] sm:$0xff]  ;;  %v11_v9 = vld [vmem:[%s369_s0 + $0x18] sm:$0xff]  ;;  %v199_v10 = vmax.f32 %v14_v5, %v15_v6  ;;  %v16_v14 = vld [vmem:[%s369_s0 + $0x40] sm:$0xff] }
   0x4   :  { %76 = vrot.lane.b32.xlu1 %v178_v3, %s158_s22  ;;  %v203_v11 = vmax.f32 %v10_v8, %v11_v9  ;;  %v18_v12 = vld [vmem:[%s369_s0 + $0x50] sm:$0xff]  ;;  %v19_v13 = vld [vmem:[%s369_s0 + $0x58] sm:$0xff]  ;;  %v17_v15 = vld [vmem:[%s369_s0 + $0x48] sm:$0xff] }
   0x5   :  { %72 = vrot.lane.b32.xlu0 %v189_v7, %s158_s22  ;;  %v219_v16 = vmax.f32 %v18_v12, %v19_v13  ;;  %v223_v17 = vmax.f32 %v16_v14, %v17_v15  ;;  %v22_v18 = vld [vmem:[%s369_s0 + $0x70] sm:$0xff]  ;;  %v23_v19 = vld [vmem:[%s369_s0 + $0x78] sm:$0xff]  ;;  %v20_v20 = vld [vmem:[%s369_s0 + $0x60] sm:$0xff] }
   0x6   :  { %v21_v21 = vld [vmem:[%s369_s0 + $0x68] sm:$0xff]  ;;  %v47_v22 = vmax.f32 %v22_v18, %v23_v19  ;;  %v26_v24 = vld [vmem:[%s369_s0 + $0x90] sm:$0xff]  ;;  %v27_v25 = vld [vmem:[%s369_s0 + $0x98] sm:$0xff] }
   0x7   :  { %v46_v23 = vmax.f32 %v20_v20, %v21_v21  ;;  %v24_v26 = vld [vmem:[%s369_s0 + $0x80] sm:$0xff]  ;;  %v25_v27 = vld [vmem:[%s369_s0 + $0x88] sm:$0xff]  ;;  %v49_v28 = vmax.f32 %v26_v24, %v27_v25  ;;  %v30_v30 = vld [vmem:[%s369_s0 + $0xb0] sm:$0xff] }
   0x8   :  { %78 = vrot.lane.b32.xlu1 %v199_v10, %s158_s22  ;;  %v48_v29 = vmax.f32 %v24_v26, %v25_v27  ;;  %v31_v31 = vld [vmem:[%s369_s0 + $0xb8] sm:$0xff]  ;;  %v28_v32 = vld [vmem:[%s369_s0 + $0xa0] sm:$0xff]  ;;  %v29_v33 = vld [vmem:[%s369_s0 + $0xa8] sm:$0xff] }
   0x9   :  { %74 = vrot.lane.b32.xlu0 %v203_v11, %s158_s22  ;;  %v51_v34 = vmax.f32 %v30_v30, %v31_v31  ;;  %v50_v35 = vmax.f32 %v28_v32, %v29_v33  ;;  %v34_v36 = vld [vmem:[%s369_s0 + $0xd0] sm:$0xff]  ;;  %v35_v37 = vld [vmem:[%s369_s0 + $0xd8] sm:$0xff]  ;;  %v32_v38 = vld [vmem:[%s369_s0 + $0xc0] sm:$0xff] }
   0xa   :  { %v33_v39 = vld [vmem:[%s369_s0 + $0xc8] sm:$0xff]  ;;  %v53_v40 = vmax.f32 %v34_v36, %v35_v37  ;;  %v38_v42 = vld [vmem:[%s369_s0 + $0xf0] sm:$0xff]  ;;  %v39_v43 = vld [vmem:[%s369_s0 + $0xf8] sm:$0xff] }
   0xb   :  { %v52_v41 = vmax.f32 %v32_v38, %v33_v39  ;;  %v36_v44 = vld [vmem:[%s369_s0 + $0xe0] sm:$0xff]  ;;  %v37_v45 = vld [vmem:[%s369_s0 + $0xe8] sm:$0xff]  ;;  %v55_v46 = vmax.f32 %v38_v42, %v39_v43 }
   0xc   :  { %82 = vrot.lane.b32.xlu1 %v219_v16, %s158_s22  ;;  %v54_v47 = vmax.f32 %v36_v44, %v37_v45 }
   0xd   :  { %80 = vrot.lane.b32.xlu0 %v223_v17, %s158_s22 }
  0x10   :  { %86 = vrot.lane.b32.xlu1 %v47_v22, %s158_s22 }
  0x11   :  { %84 = vrot.lane.b32.xlu0 %v46_v23, %s158_s22 }
  0x14   :  { %90 = vrot.lane.b32.xlu1 %v49_v28, %s158_s22 }
  0x15   :  { %88 = vrot.lane.b32.xlu0 %v48_v29, %s158_s22 }
  0x18   :  { %94 = vrot.lane.b32.xlu1 %v51_v34, %s158_s22 }
  0x19   :  { %92 = vrot.lane.b32.xlu0 %v50_v35, %s158_s22 }
  0x1c   :  { %98 = vrot.lane.b32.xlu1 %v53_v40, %s158_s22 }
  0x1d   :  { %96 = vrot.lane.b32.xlu0 %v52_v41, %s158_s22 }
  0x20   :  { %102 = vrot.lane.b32.xlu1 %v55_v46, %s158_s22 }
  0x21   :  { %100 = vrot.lane.b32.xlu0 %v54_v47, %s158_s22 }
  0x76   :  { %v77_v48 = vpop.permute.xlu1 %76 }
  0x77   :  { %v122_v49 = vmax.f32 %v178_v3, %v77_v48  ;;  %v73_v50 = vpop.permute.xlu0 %72 }
  0x78   :  { %v120_v51 = vmax.f32 %v189_v7, %v73_v50 }
  0x79   :  { %139 = vst.msk [vmem:[%s370_s1 + $0x10] sm:$0xff] %vm136_vm0, %v122_v49 }
  0x7a   :  { %137 = vst.msk [vmem:[%s370_s1] sm:$0xff] %vm136_vm0, %v120_v51  ;;  %v79_v52 = vpop.permute.xlu1 %78 }
  0x7b   :  { %v123_v53 = vmax.f32 %v199_v10, %v79_v52  ;;  %v75_v54 = vpop.permute.xlu0 %74 }
  0x7c   :  { %v121_v55 = vmax.f32 %v203_v11, %v75_v54 }
  0x7d   :  { %140 = vst.msk [vmem:[%s370_s1 + $0x18] sm:$0xff] %vm136_vm0, %v123_v53 }
  0x7e   :  { %138 = vst.msk [vmem:[%s370_s1 + $0x8] sm:$0xff] %vm136_vm0, %v121_v55  ;;  %v83_v56 = vpop.permute.xlu1 %82 }
  0x7f   :  { %v125_v57 = vmax.f32 %v219_v16, %v83_v56  ;;  %v81_v58 = vpop.permute.xlu0 %80 }
  0x80   :  { %v124_v59 = vmax.f32 %v223_v17, %v81_v58 }
  0x81   :  { %142 = vst.msk [vmem:[%s370_s1 + $0x28] sm:$0xff] %vm136_vm0, %v125_v57 }
  0x82   :  { %141 = vst.msk [vmem:[%s370_s1 + $0x20] sm:$0xff] %vm136_vm0, %v124_v59  ;;  %v87_v60 = vpop.permute.xlu1 %86 }
  0x83   :  { %v127_v61 = vmax.f32 %v47_v22, %v87_v60  ;;  %v85_v62 = vpop.permute.xlu0 %84 }
  0x84   :  { %v126_v63 = vmax.f32 %v46_v23, %v85_v62 }
  0x85   :  { %144 = vst.msk [vmem:[%s370_s1 + $0x38] sm:$0xff] %vm136_vm0, %v127_v61 }
  0x86   :  { %143 = vst.msk [vmem:[%s370_s1 + $0x30] sm:$0xff] %vm136_vm0, %v126_v63  ;;  %v91_v0 = vpop.permute.xlu1 %90 }
  0x87   :  { %v129_v1 = vmax.f32 %v49_v28, %v91_v0  ;;  %v89_v2 = vpop.permute.xlu0 %88 }
  0x88   :  { %v128_v3 = vmax.f32 %v48_v29, %v89_v2 }
  0x89   :  { %146 = vst.msk [vmem:[%s370_s1 + $0x48] sm:$0xff] %vm136_vm0, %v129_v1 }
  0x8a   :  { %145 = vst.msk [vmem:[%s370_s1 + $0x40] sm:$0xff] %vm136_vm0, %v128_v3  ;;  %v95_v4 = vpop.permute.xlu1 %94 }
  0x8b   :  { %v131_v5 = vmax.f32 %v51_v34, %v95_v4  ;;  %v93_v6 = vpop.permute.xlu0 %92 }
  0x8c   :  { %v130_v7 = vmax.f32 %v50_v35, %v93_v6 }
  0x8d   :  { %148 = vst.msk [vmem:[%s370_s1 + $0x58] sm:$0xff] %vm136_vm0, %v131_v5 }
  0x8e   :  { %147 = vst.msk [vmem:[%s370_s1 + $0x50] sm:$0xff] %vm136_vm0, %v130_v7  ;;  %v99_v8 = vpop.permute.xlu1 %98 }
  0x8f   :  { %v133_v9 = vmax.f32 %v53_v40, %v99_v8  ;;  %v97_v10 = vpop.permute.xlu0 %96 }
  0x90   :  { %v132_v11 = vmax.f32 %v52_v41, %v97_v10 }
  0x91   :  { %150 = vst.msk [vmem:[%s370_s1 + $0x68] sm:$0xff] %vm136_vm0, %v133_v9 }
  0x92   :  { %149 = vst.msk [vmem:[%s370_s1 + $0x60] sm:$0xff] %vm136_vm0, %v132_v11  ;;  %v103_v12 = vpop.permute.xlu1 %102 }
  0x93   :  { %v135_v13 = vmax.f32 %v55_v46, %v103_v12  ;;  %v101_v14 = vpop.permute.xlu0 %100 }
  0x94   :  { %v134_v15 = vmax.f32 %v54_v47, %v101_v14 }
  0x95   :  { %152 = vst.msk [vmem:[%s370_s1 + $0x78] sm:$0xff] %vm136_vm0, %v135_v13 }
  0x96   :  { %151 = vst.msk [vmem:[%s370_s1 + $0x70] sm:$0xff] %vm136_vm0, %v134_v15 }

// kernel: vgg19_forward.21
= control target key start
LH: loop header
LB: loop body
LE: loop exit
PB: predicated region body
PF: predicated region fallthrough
CT: control target
= control target key end

     0   :  { %s2634_s12 = smov 0   ;;  %s2636_s13 = smov 0   ;;  %s3298_s0 = inlined_call_operand.vmem [shape: bf16[512,576], index: 0, kind: input, shape index: {}]   ;;  %s3299_s1 = inlined_call_operand.vmem [shape: bf16[576,64], index: 1, kind: input, shape index: {}]   ;;  %s3300_s2 = inlined_call_operand.vmem [shape: f32[1,64], index: 2, kind: input, shape index: {}]   ;;  %s3301_s3 = inlined_call_operand.vmem [shape: f32[512,64], index: 3, kind: output, shape index: {}]  }
   0x1   :  { %s2638_s14 = smov 0  }
   0x2 LB: > { %s32_s15 = sadd.s32 1, %s2607_s13  ;;  %p1975_p0 = scmp.ge.s32.totalorder %s2611_s14, 1  ;;  %s2611_s14 = sphi %s2638_s14, %s13_s14   ;;  %s2607_s13 = sphi %s2636_s13, %s3303_s13   ;;  %s2603_s12 = sphi %s2634_s12, %s3302_s12  }
   0x3   : > { %p34_p1 = scmp.ge.s32.totalorder %s32_s15, 2  ;;  %p191_p2 = scmp.lt.s32.totalorder %s2611_s14, 3 }
   0x5   : > { %s3305_s15 = smov (%p34_p1, %s32_s15), 0  ;;  %p192_p3 = pnand %p1975_p0, %p191_p2 }
   0x6   : > { %v2441_v0 = vld [vmem:[%s3299_s1 + $0x40] sm:$0xff] (!%p192_p3)   ;;  %s1976_s18 = sshll.u32 (!%p192_p3), %s2603_s12, 5  ;;  %v2443_v2 = vld [vmem:[%s3299_s1 + $0x48] sm:$0xff] (!%p192_p3)   ;;  %v2445_v4 = vld [vmem:[%s3299_s1 + $0x50] sm:$0xff] (!%p192_p3)   ;;  %vm272_vm0 = vcmask (!%p192_p3), 523264  }
   0x7   : > { %195 = sbr.rel (%p192_p3) target bundleno = 427 (0x1ab), region = 32  ;;  %v2442_v1 = vld [vmem:[%s3299_s1] sm:$0xff] (!%p192_p3)   ;;  %2115 = vmatprep.subr.bf16.mxu0 (!%p192_p3), %v2441_v0  ;;  %2399 = vmatprep.subr.bf16.mxu1 (!%p192_p3), %v2441_v0  ;;  %p236_p4 = scmp.lt.s32.totalorder (!%p192_p3), %s1976_s18, 63  ;;  %v2444_v3 = vld [vmem:[%s3299_s1 + $0x8] sm:$0xff] (!%p192_p3)   ;;  %v2446_v5 = vld [vmem:[%s3299_s1 + $0x10] sm:$0xff] (!%p192_p3)  }
   0x8   : > { %2116 = vmatpush3.bf16.msra.mxu0 (!%p192_p3), %v2442_v1  ;;  %2407 = vmatpush3.bf16.msra.mxu1 (!%p192_p3), %v2442_v1  ;;  %v2447_v6 = vld [vmem:[%s3299_s1 + $0x58] sm:$0xff] (!%p192_p3)   ;;  %v2449_v8 = vld [vmem:[%s3299_s1 + $0x60] sm:$0xff] (!%p192_p3)   ;;  %v2451_v10 = vld [vmem:[%s3299_s1 + $0x68] sm:$0xff] (!%p192_p3)  }
   0x9   : > { %2117 = vmatprep.subr.bf16.mxu0 (!%p192_p3), %v2443_v2  ;;  %2400 = vmatprep.subr.bf16.mxu1 (!%p192_p3), %v2443_v2  ;;  %v2448_v7 = vld [vmem:[%s3299_s1 + $0x18] sm:$0xff] (!%p192_p3)   ;;  %v2450_v9 = vld [vmem:[%s3299_s1 + $0x20] sm:$0xff] (!%p192_p3)   ;;  %v2452_v13 = vld [vmem:[%s3299_s1 + $0x28] sm:$0xff] (!%p192_p3)  }
   0xa   : > { %v2453_v14 = vld [vmem:[%s3299_s1 + $0x70] sm:$0xff] (!%p192_p3)   ;;  %v2455_v16 = vld [vmem:[%s3299_s1 + $0x78] sm:$0xff] (!%p192_p3)   ;;  %v2463_v18 = vld [vmem:[%s3299_s1 + $0xc0] sm:$0xff] (!%p192_p3)  }
   0xb   : > { %v2454_v15 = vld [vmem:[%s3299_s1 + $0x30] sm:$0xff] (!%p192_p3)   ;;  %v2456_v17 = vld [vmem:[%s3299_s1 + $0x38] sm:$0xff] (!%p192_p3)   ;;  %v2466_v19 = vld [vmem:[%s3299_s1 + $0x100] sm:$0xff] (!%p192_p3)  }
   0xc   : > { %2118 = vmatpush3.bf16.msra.mxu0 (!%p192_p3), %v2444_v3  ;;  %2408 = vmatpush3.bf16.msra.mxu1 (!%p192_p3), %v2444_v3  ;;  %v2464_v22 = vld [vmem:[%s3299_s1 + $0x80] sm:$0xff] (!%p192_p3)   ;;  %v2465_v23 = vld [vmem:[%s3299_s1 + $0xc8] sm:$0xff] (!%p192_p3)   ;;  %v2474_v28 = vld [vmem:[%s3299_s1 + $0xd0] sm:$0xff] (!%p192_p3)  }
   0xd   : > { %2119 = vmatprep.subr.bf16.mxu0 (!%p192_p3), %v2445_v4  ;;  %2401 = vmatprep.subr.bf16.mxu1 (!%p192_p3), %v2445_v4  ;;  %v2467_v26 = vld [vmem:[%s3299_s1 + $0x88] sm:$0xff] (!%p192_p3)   ;;  %v2475_v30 = vld [vmem:[%s3299_s1 + $0x90] sm:$0xff] (!%p192_p3)   ;;  %v2476_v31 = vld [vmem:[%s3299_s1 + $0xd8] sm:$0xff] (!%p192_p3)  }
   0xe   : > { %s3307_s18 = smov (!%p236_p4, %s1976_s18), 63  ;;  %v2477_v34 = vld [vmem:[%s3299_s1 + $0x98] sm:$0xff]   ;;  %v2497_v35 = vld [vmem:[%s3299_s1 + $0x108] sm:$0xff]   ;;  %v2484_v37 = vld [vmem:[%s3299_s1 + $0xe0] sm:$0xff]  }
   0xf   : > { %s2415_s4 = smul.u32 20, %s3307_s18  ;;  %v2485_v39 = vld [vmem:[%s3299_s1 + $0xa0] sm:$0xff]   ;;  %v2486_v40 = vld [vmem:[%s3299_s1 + $0xe8] sm:$0xff]   ;;  %v2494_v46 = vld [vmem:[%s3299_s1 + $0xf0] sm:$0xff]   ;;  %s1979_s26 = sshll.u32 %s3307_s18, 3 }
  0x10   : > { %2120 = vmatpush3.bf16.msra.mxu0 %v2446_v5  ;;  %2409 = vmatpush3.bf16.msra.mxu1 %v2446_v5  ;;  %v2487_v43 = vld [vmem:[%s3299_s1 + $0xa8] sm:$0xff]   ;;  %v2517_v47 = vld [vmem:[%s3299_s1 + $0x110] sm:$0xff]   ;;  %v2496_v49 = vld [vmem:[%s3299_s1 + $0xf8] sm:$0xff]   ;;  %s2868_s29 = scalar_lea.vmem %s3301_s3, %s1979_s26 }
  0x11   : > { %2121 = vmatprep.subr.bf16.mxu0 %v2447_v6  ;;  %2402 = vmatprep.subr.bf16.mxu1 %v2447_v6  ;;  %s2685_s11 = scalar_lea.vmem %s3298_s0, %s2415_s4  ;;  %v2495_v48 = vld [vmem:[%s3299_s1 + $0xb0] sm:$0xff]   ;;  %v2498_v52 = vld [vmem:[%s3299_s1 + $0xb8] sm:$0xff]  }
  0x12   : > { %v2459_v11 = vld [vmem:[%s2685_s11 + $0x4] ss:$20 sps:$4 sm:$0xff]   ;;  %v2457_v20 = vld [vmem:[%s2685_s11] ss:$20 sps:$4 sm:$0xff]   ;;  %v2472_v27 = vld [vmem:[%s2685_s11 + $0x28] ss:$20 sps:$4 sm:$0xff]  }
  0x13   : > { %v2462_v12 = vld [vmem:[%s2685_s11 + $0x1e4] ss:$20 sps:$4 sm:$0xff]   ;;  %1202 = vmatprep.mubr.bf16.mxu0 %v2459_v11  ;;  %v2460_v21 = vld [vmem:[%s2685_s11 + $0x1e0] ss:$20 sps:$4 sm:$0xff]   ;;  %v2473_v29 = vld [vmem:[%s2685_s11 + $0x208] ss:$20 sps:$4 sm:$0xff]  }
  0x14   : > { %2122 = vmatpush3.bf16.msra.mxu0 %v2448_v7  ;;  %2410 = vmatpush3.bf16.msra.mxu1 %v2448_v7  ;;  %v2468_v24 = vld [vmem:[%s2685_s11 + $0x2c] ss:$20 sps:$4 sm:$0xff]   ;;  %v2478_v32 = vld [vmem:[%s2685_s11 + $0x54] ss:$20 sps:$4 sm:$0xff]   ;;  %v2482_v36 = vld [vmem:[%s2685_s11 + $0x50] ss:$20 sps:$4 sm:$0xff]  }
  0x15   : > { %2123 = vmatprep.subr.bf16.mxu0 %v2449_v8  ;;  %2403 = vmatprep.subr.bf16.mxu1 %v2449_v8  ;;  %v2470_v25 = vld [vmem:[%s2685_s11 + $0x20c] ss:$20 sps:$4 sm:$0xff]   ;;  %v2480_v33 = vld [vmem:[%s2685_s11 + $0x234] ss:$20 sps:$4 sm:$0xff]   ;;  %v2483_v38 = vld [vmem:[%s2685_s11 + $0x230] ss:$20 sps:$4 sm:$0xff]  }
  0x16   : > { %1298 = vmatprep.mubr.bf16.mxu1 %v2462_v12  ;;  %v2488_v41 = vld [vmem:[%s2685_s11 + $0x7c] ss:$20 sps:$4 sm:$0xff]   ;;  %v2492_v44 = vld [vmem:[%s2685_s11 + $0x78] ss:$20 sps:$4 sm:$0xff]   ;;  %v2504_v54 = vld [vmem:[%s2685_s11 + $0xa0] ss:$20 sps:$4 sm:$0xff]  }
  0x17   : > { %v2490_v42 = vld [vmem:[%s2685_s11 + $0x25c] ss:$20 sps:$4 sm:$0xff]   ;;  %v2493_v45 = vld [vmem:[%s2685_s11 + $0x258] ss:$20 sps:$4 sm:$0xff]   ;;  %v2507_v57 = vld [vmem:[%s2685_s11 + $0x34] ss:$20 sps:$4 sm:$0xff]  }
  0x18   : > { %2124 = vmatpush3.bf16.msra.mxu0 %v2450_v9  ;;  %2411 = vmatpush3.bf16.msra.mxu1 %v2450_v9  ;;  %v2499_v50 = vld [vmem:[%s2685_s11 + $0xa4] ss:$20 sps:$4 sm:$0xff]   ;;  %v2503_v51 = vld [vmem:[%s2685_s11 + $0xc] ss:$20 sps:$4 sm:$0xff]   ;;  %v2501_v53 = vld [vmem:[%s2685_s11 + $0x8] ss:$20 sps:$4 sm:$0xff]  }
  0x19   : > { %2125 = vmatprep.subr.bf16.mxu0 %v2451_v10  ;;  %2404 = vmatprep.subr.bf16.mxu1 %v2451_v10  ;;  %v2505_v55 = vld [vmem:[%s2685_s11 + $0xcc] ss:$20 sps:$4 sm:$0xff]   ;;  %v2536_v56 = vld [vmem:[%s3299_s1 + $0x118] sm:$0xff]   ;;  %v2510_v59 = vld [vmem:[%s2685_s11 + $0x30] ss:$20 sps:$4 sm:$0xff]  }
  0x1a   : > { %v2509_v58 = vld [vmem:[%s2685_s11 + $0xc8] ss:$20 sps:$4 sm:$0xff]   ;;  %v2515_v62 = vld [vmem:[%s2685_s11 + $0xf0] ss:$20 sps:$4 sm:$0xff]   ;;  %v2516_v63 = vld [vmem:[%s2685_s11 + $0x58] ss:$20 sps:$4 sm:$0xff]  }
  0x1b   : > { %v2511_v60 = vld [vmem:[%s2685_s11 + $0xf4] ss:$20 sps:$4 sm:$0xff]   ;;  %v2513_v61 = vld [vmem:[%s2685_s11 + $0x5c] ss:$20 sps:$4 sm:$0xff]   ;;  %v2520_v1 = vld [vmem:[%s2685_s11 + $0x84] ss:$20 sps:$4 sm:$0xff]  }
  0x1c   : > { %2126 = vmatpush3.bf16.msra.mxu0 %v2452_v13  ;;  %2412 = vmatpush3.bf16.msra.mxu1 %v2452_v13  ;;  %v2518_v0 = vld [vmem:[%s2685_s11 + $0x11c] ss:$20 sps:$4 sm:$0xff]   ;;  %v2522_v2 = vld [vmem:[%s2685_s11 + $0x118] ss:$20 sps:$4 sm:$0xff]   ;;  %v2523_v3 = vld [vmem:[%s2685_s11 + $0x80] ss:$20 sps:$4 sm:$0xff]  }
  0x1d   : > { %2127 = vmatprep.subr.bf16.mxu0 %v2453_v14  ;;  %2405 = vmatprep.subr.bf16.mxu1 %v2453_v14  ;;  %v2524_v4 = vld [vmem:[%s2685_s11 + $0x144] ss:$20 sps:$4 sm:$0xff]   ;;  %v2526_v5 = vld [vmem:[%s2685_s11 + $0xac] ss:$20 sps:$4 sm:$0xff]   ;;  %v2529_v7 = vld [vmem:[%s2685_s11 + $0xa8] ss:$20 sps:$4 sm:$0xff]  }
  0x1e   : > { %v2528_v6 = vld [vmem:[%s2685_s11 + $0x140] ss:$20 sps:$4 sm:$0xff]   ;;  %v2534_v10 = vld [vmem:[%s2685_s11 + $0x168] ss:$20 sps:$4 sm:$0xff]   ;;  %v2535_v11 = vld [vmem:[%s2685_s11 + $0xd0] ss:$20 sps:$4 sm:$0xff]  }
  0x1f   : > { %v2530_v8 = vld [vmem:[%s2685_s11 + $0x16c] ss:$20 sps:$4 sm:$0xff]   ;;  %v2532_v9 = vld [vmem:[%s2685_s11 + $0xd4] ss:$20 sps:$4 sm:$0xff]   ;;  %v2539_v13 = vld [vmem:[%s2685_s11 + $0xfc] ss:$20 sps:$4 sm:$0xff]  }
  0x20   : > { %2128 = vmatpush3.bf16.msra.mxu0 %v2454_v15  ;;  %2413 = vmatpush3.bf16.msra.mxu1 %v2454_v15  ;;  %v2537_v12 = vld [vmem:[%s2685_s11 + $0x194] ss:$20 sps:$4 sm:$0xff]   ;;  %v2541_v14 = vld [vmem:[%s2685_s11 + $0x190] ss:$20 sps:$4 sm:$0xff]   ;;  %v2542_v15 = vld [vmem:[%s2685_s11 + $0xf8] ss:$20 sps:$4 sm:$0xff]  }
  0x21   : > { %2129 = vmatprep.subr.bf16.mxu0 %v2455_v16  ;;  %2406 = vmatprep.subr.bf16.mxu1 %v2455_v16  ;;  %v2543_v16 = vld [vmem:[%s2685_s11 + $0x1bc] ss:$20 sps:$4 sm:$0xff]  }
  0x24   : > { %2130 = vmatpush3.bf16.msra.mxu0 %v2456_v17  ;;  %2414 = vmatpush3.bf16.msra.mxu1 %v2456_v17  ;;  %v2545_v17 = vld [vmem:[%s2685_s11 + $0x124] ss:$20 sps:$4 sm:$0xff]  }
  0x25   : > { %2227 = vmatprep.subr.bf16.mxu1 %v2463_v18  ;;  %2359 = vmatprep.subr.bf16.mxu0 %v2466_v19  ;;  %v2547_v18 = vld [vmem:[%s2685_s11 + $0x1b8] ss:$20 sps:$4 sm:$0xff]  }
  0x27   : > { %1203 = vmatmul.mubr.bf16.vlgmr.msra.gmra.mrb[0].mxu0 %v2457_v20  ;;  %1299 = vmatmul.mubr.bf16.vlgmr.msra.gmra.mrb[0].mxu1 %v2460_v21  ;;  %v2549_v20 = vld [vmem:[%s2685_s11 + $0x14c] ss:$20 sps:$4 sm:$0xff]   ;;  %v2551_v21 = vld [vmem:[%s2685_s11 + $0x10] ss:$20 sps:$4 sm:$0xff]  }
  0x28   : > { %2228 = vmatpush3.bf16.msra.mxu1 %v2464_v22  ;;  %2360 = vmatpush3.bf16.msra.mxu0 %v2466_v19  ;;  %v2548_v19 = vld [vmem:[%s2685_s11 + $0x120] ss:$20 sps:$4 sm:$0xff]   ;;  %v2552_v22 = vld [vmem:[%s2685_s11 + $0x148] ss:$20 sps:$4 sm:$0xff]  }
  0x29   : > { %2229 = vmatprep.subr.bf16.mxu1 %v2465_v23  ;;  %1210 = vmatprep.mubr.bf16.mxu0 %v2468_v24  ;;  %v2553_v23 = vld [vmem:[%s2685_s11 + $0x38] ss:$20 sps:$4 sm:$0xff]   ;;  %v2554_v24 = vld [vmem:[%s2685_s11 + $0x174] ss:$20 sps:$4 sm:$0xff]  }
  0x2a   : > { %1306 = vmatprep.mubr.bf16.mxu1 %v2470_v25  ;;  %2361 = vmatprep.subr.bf16.mxu0 %v2497_v35  ;;  %v2556_v25 = vld [vmem:[%s2685_s11 + $0x60] ss:$20 sps:$4 sm:$0xff]  }
  0x2c   : > { %2230 = vmatpush3.bf16.msra.mxu1 %v2467_v26  ;;  %2362 = vmatpush3.bf16.msra.mxu0 %v2497_v35  ;;  %v2557_v26 = vld [vmem:[%s2685_s11 + $0x170] ss:$20 sps:$4 sm:$0xff]   ;;  %v2568_v35 = vld [vmem:[%s2685_s11 + $0x128] ss:$20 sps:$4 sm:$0xff]  }
  0x2d   : > { %2231 = vmatprep.subr.bf16.mxu1 %v2474_v28  ;;  %2363 = vmatprep.subr.bf16.mxu0 %v2517_v47  ;;  %v2559_v28 = vld [vmem:[%s2685_s11 + $0x19c] ss:$20 sps:$4 sm:$0xff]  }
  0x2f   : > { %1211 = vmatmul.mubr.bf16.gmra.mrb[4].mxu0 %v2472_v27  ;;  %1307 = vmatmul.mubr.bf16.gmra.mrb[4].mxu1 %v2473_v29  ;;  %v2558_v27 = vld [vmem:[%s2685_s11 + $0x88] ss:$20 sps:$4 sm:$0xff]   ;;  %v2561_v29 = vld [vmem:[%s2685_s11 + $0xb0] ss:$20 sps:$4 sm:$0xff]  }
  0x30   : > { %2232 = vmatpush3.bf16.msra.mxu1 %v2475_v30  ;;  %1218 = vmatprep.mubr.bf16.mxu0 %v2478_v32  ;;  %v2562_v30 = vld [vmem:[%s2685_s11 + $0x198] ss:$20 sps:$4 sm:$0xff]  }
  0x31   : > { %2233 = vmatprep.subr.bf16.mxu1 %v2476_v31  ;;  %1314 = vmatprep.mubr.bf16.mxu1 %v2480_v33  ;;  %v2563_v31 = vld [vmem:[%s2685_s11 + $0xd8] ss:$20 sps:$4 sm:$0xff]   ;;  %v2566_v33 = vld [vmem:[%s2685_s11 + $0x100] ss:$20 sps:$4 sm:$0xff]  }
  0x32   : > { %2364 = vmatpush3.bf16.msra.mxu0 %v2517_v47  ;;  %v2564_v32 = vld [vmem:[%s2685_s11 + $0x1c4] ss:$20 sps:$4 sm:$0xff]  }
  0x33   : > { %2365 = vmatprep.subr.bf16.mxu0 %v2536_v56  ;;  %v2583_v47 = vld [vmem:[%s2685_s11 + $0x218] ss:$20 sps:$4 sm:$0xff]  }
  0x34   : > { %2234 = vmatpush3.bf16.msra.mxu1 %v2477_v34  ;;  %v2567_v34 = vld [vmem:[%s2685_s11 + $0x1c0] ss:$20 sps:$4 sm:$0xff]  }
  0x35   : > { %2235 = vmatprep.subr.bf16.mxu1 %v2484_v37  ;;  %v2571_v37 = vld [vmem:[%s2685_s11 + $0x150] ss:$20 sps:$4 sm:$0xff]  }
  0x36   : > { %2366 = vmatpush3.bf16.msra.mxu0 %v2536_v56 }
  0x37   : > { %1219 = vmatmul.mubr.bf16.gmra.mrb[8].mxu0 %v2482_v36  ;;  %1315 = vmatmul.mubr.bf16.gmra.mrb[8].mxu1 %v2483_v38  ;;  %v2569_v36 = vld [vmem:[%s2685_s11 + $0x1ec] ss:$20 sps:$4 sm:$0xff]   ;;  %v2572_v38 = vld [vmem:[%s2685_s11 + $0x1e8] ss:$20 sps:$4 sm:$0xff]  }
  0x38   : > { %2236 = vmatpush3.bf16.msra.mxu1 %v2485_v39  ;;  %1226 = vmatprep.mubr.bf16.mxu0 %v2488_v41  ;;  %v2573_v39 = vld [vmem:[%s2685_s11 + $0x178] ss:$20 sps:$4 sm:$0xff]   ;;  %v2576_v41 = vld [vmem:[%s2685_s11 + $0x1a0] ss:$20 sps:$4 sm:$0xff]  }
  0x39   : > { %2237 = vmatprep.subr.bf16.mxu1 %v2486_v40  ;;  %1322 = vmatprep.mubr.bf16.mxu1 %v2490_v42  ;;  %v2574_v40 = vld [vmem:[%s2685_s11 + $0x214] ss:$20 sps:$4 sm:$0xff]   ;;  %v2577_v42 = vld [vmem:[%s2685_s11 + $0x210] ss:$20 sps:$4 sm:$0xff]  }
  0x3c   : > { %2238 = vmatpush3.bf16.msra.mxu1 %v2487_v43  ;;  %v2578_v43 = vld [vmem:[%s2685_s11 + $0x1c8] ss:$20 sps:$4 sm:$0xff]  }
  0x3d   : > { %2239 = vmatprep.subr.bf16.mxu1 %v2494_v46  ;;  %v2582_v46 = vld [vmem:[%s2685_s11 + $0x238] ss:$20 sps:$4 sm:$0xff]  }
  0x3f   : > { %1227 = vmatmul.mubr.bf16.gmra.mrb[12].mxu0 %v2492_v44  ;;  %1323 = vmatmul.mubr.bf16.gmra.mrb[12].mxu1 %v2493_v45  ;;  %v2579_v44 = vld [vmem:[%s2685_s11 + $0x23c] ss:$20 sps:$4 sm:$0xff]  }
  0x40   : > { %2240 = vmatpush3.bf16.msra.mxu1 %v2495_v48  ;;  %1234 = vmatprep.mubr.bf16.mxu0 %v2499_v50  ;;  %v2581_v45 = vld [vmem:[%s2685_s11 + $0x1f0] ss:$20 sps:$4 sm:$0xff]   ;;  %v2587_v50 = vld [vmem:[%s2685_s11 + $0x260] ss:$20 sps:$4 sm:$0xff]  }
  0x41   : > { %2241 = vmatprep.subr.bf16.mxu1 %v2496_v49  ;;  %1363 = vmatprep.mubr.bf16.mxu1 %v2503_v51  ;;  %v2584_v48 = vld [vmem:[%s2685_s11 + $0x264] ss:$20 sps:$4 sm:$0xff]   ;;  %v2586_v49 = vld [vmem:[%s2685_s11 + $0x240] ss:$20 sps:$4 sm:$0xff]   ;;  %v2588_v51 = vld [vmem:[%s2685_s11 + $0x268] ss:$20 sps:$4 sm:$0xff]  }
  0x44   : > { %2242 = vmatpush3.bf16.msra.mxu1 %v2498_v52  ;;  %v2613_v52 = vmov 0.0  }
  0x45   : > { %275 = vst.msk [vmem:[%s2868_s29 + $0x10] sm:$0xff] %vm272_vm0, %v2613_v52  ;;  %273 = vst.msk [vmem:[%s2868_s29] sm:$0xff] %vm272_vm0, %v2613_v52 }
  0x46   : > { %274 = vst.msk [vmem:[%s2868_s29 + $0x8] sm:$0xff] %vm272_vm0, %v2613_v52  ;;  %276 = vst.msk [vmem:[%s2868_s29 + $0x18] sm:$0xff] %vm272_vm0, %v2613_v52 }
  0x47   : > { %1235 = vmatmul.mubr.bf16.gmra.mrb[16].mxu0 %v2504_v54  ;;  %1364 = vmatmul.mubr.bf16.vlgmr.msra.gmra.mrb[16].mxu1 %v2501_v53  ;;  %277 = vst.msk [vmem:[%s2868_s29 + $0x20] sm:$0xff] %vm272_vm0, %v2613_v52  ;;  %278 = vst.msk [vmem:[%s2868_s29 + $0x28] sm:$0xff] %vm272_vm0, %v2613_v52 }
  0x48   : > { %1242 = vmatprep.mubr.bf16.mxu0 %v2505_v55  ;;  %1371 = vmatprep.mubr.bf16.mxu1 %v2507_v57  ;;  %279 = vst.msk [vmem:[%s2868_s29 + $0x30] sm:$0xff] %vm272_vm0, %v2613_v52  ;;  %280 = vst.msk [vmem:[%s2868_s29 + $0x38] sm:$0xff] %vm272_vm0, %v2613_v52 }
  0x49   : > { %281 = vst.msk [vmem:[%s2868_s29 + $0x40] sm:$0xff] %vm272_vm0, %v2613_v52  ;;  %282 = vst.msk [vmem:[%s2868_s29 + $0x48] sm:$0xff] %vm272_vm0, %v2613_v52 }
  0x4a   : > { %283 = vst.msk [vmem:[%s2868_s29 + $0x50] sm:$0xff] %vm272_vm0, %v2613_v52  ;;  %284 = vst.msk [vmem:[%s2868_s29 + $0x58] sm:$0xff] %vm272_vm0, %v2613_v52 }
  0x4b   : > { %285 = vst.msk [vmem:[%s2868_s29 + $0x60] sm:$0xff] %vm272_vm0, %v2613_v52  ;;  %286 = vst.msk [vmem:[%s2868_s29 + $0x68] sm:$0xff] %vm272_vm0, %v2613_v52 }
  0x4c   : > { %287 = vst.msk [vmem:[%s2868_s29 + $0x70] sm:$0xff] %vm272_vm0, %v2613_v52  ;;  %288 = vst.msk [vmem:[%s2868_s29 + $0x78] sm:$0xff] %vm272_vm0, %v2613_v52 }
  0x4d   : > { %289 = vst.msk [vmem:[%s2868_s29 + $0x80] sm:$0xff] %vm272_vm0, %v2613_v52  ;;  %290 = vst.msk [vmem:[%s2868_s29 + $0x88] sm:$0xff] %vm272_vm0, %v2613_v52 }
  0x4e   : > { %291 = vst.msk [vmem:[%s2868_s29 + $0x90] sm:$0xff] %vm272_vm0, %v2613_v52  ;;  %292 = vst.msk [vmem:[%s2868_s29 + $0x98] sm:$0xff] %vm272_vm0, %v2613_v52 }
  0x4f   : > { %1243 = vmatmul.mubr.bf16.gmra.mrb[20].mxu0 %v2509_v58  ;;  %1372 = vmatmul.mubr.bf16.gmra.mrb[20].mxu1 %v2510_v59  ;;  %293 = vst.msk [vmem:[%s2868_s29 + $0xa0] sm:$0xff] %vm272_vm0, %v2613_v52  ;;  %294 = vst.msk [vmem:[%s2868_s29 + $0xa8] sm:$0xff] %vm272_vm0, %v2613_v52 }
  0x50   : > { %1250 = vmatprep.mubr.bf16.mxu0 %v2511_v60  ;;  %1379 = vmatprep.mubr.bf16.mxu1 %v2513_v61  ;;  %295 = vst.msk [vmem:[%s2868_s29 + $0xb0] sm:$0xff] %vm272_vm0, %v2613_v52  ;;  %296 = vst.msk [vmem:[%s2868_s29 + $0xb8] sm:$0xff] %vm272_vm0, %v2613_v52 }
  0x51   : > { %297 = vst.msk [vmem:[%s2868_s29 + $0xc0] sm:$0xff] %vm272_vm0, %v2613_v52  ;;  %298 = vst.msk [vmem:[%s2868_s29 + $0xc8] sm:$0xff] %vm272_vm0, %v2613_v52 }
  0x52   : > { %299 = vst.msk [vmem:[%s2868_s29 + $0xd0] sm:$0xff] %vm272_vm0, %v2613_v52  ;;  %300 = vst.msk [vmem:[%s2868_s29 + $0xd8] sm:$0xff] %vm272_vm0, %v2613_v52 }
  0x53   : > { %301 = vst.msk [vmem:[%s2868_s29 + $0xe0] sm:$0xff] %vm272_vm0, %v2613_v52  ;;  %302 = vst.msk [vmem:[%s2868_s29 + $0xe8] sm:$0xff] %vm272_vm0, %v2613_v52 }
  0x54   : > { %303 = vst.msk [vmem:[%s2868_s29 + $0xf0] sm:$0xff] %vm272_vm0, %v2613_v52  ;;  %304 = vst.msk [vmem:[%s2868_s29 + $0xf8] sm:$0xff] %vm272_vm0, %v2613_v52 }
  0x57   : > { %1251 = vmatmul.mubr.bf16.gmra.mrb[24].mxu0 %v2515_v62  ;;  %1380 = vmatmul.mubr.bf16.gmra.mrb[24].mxu1 %v2516_v63 }
  0x58   : > { %1258 = vmatprep.mubr.bf16.mxu0 %v2518_v0  ;;  %1387 = vmatprep.mubr.bf16.mxu1 %v2520_v1 }
  0x5f   : > { %1259 = vmatmul.mubr.bf16.gmra.mrb[28].mxu0 %v2522_v2  ;;  %1388 = vmatmul.mubr.bf16.gmra.mrb[28].mxu1 %v2523_v3 }
  0x60   : > { %1266 = vmatprep.mubr.bf16.mxu0 %v2524_v4  ;;  %1395 = vmatprep.mubr.bf16.mxu1 %v2526_v5 }
  0x67   : > { %1267 = vmatmul.mubr.bf16.gmra.mrb[32].mxu0 %v2528_v6  ;;  %1396 = vmatmul.mubr.bf16.gmra.mrb[32].mxu1 %v2529_v7 }
  0x68   : > { %1274 = vmatprep.mubr.bf16.mxu0 %v2530_v8  ;;  %1403 = vmatprep.mubr.bf16.mxu1 %v2532_v9 }
  0x6f   : > { %1275 = vmatmul.mubr.bf16.gmra.mrb[36].mxu0 %v2534_v10  ;;  %1404 = vmatmul.mubr.bf16.gmra.mrb[36].mxu1 %v2535_v11 }
  0x70   : > { %1282 = vmatprep.mubr.bf16.mxu0 %v2537_v12  ;;  %1411 = vmatprep.mubr.bf16.mxu1 %v2539_v13 }
  0x77   : > { %1283 = vmatmul.mubr.bf16.gmra.mrb[40].mxu0 %v2541_v14  ;;  %1412 = vmatmul.mubr.bf16.gmra.mrb[40].mxu1 %v2542_v15 }
  0x78   : > { %1290 = vmatprep.mubr.bf16.mxu0 %v2543_v16  ;;  %1419 = vmatprep.mubr.bf16.mxu1 %v2545_v17 }
  0x7f   : > { %1291 = vmatmul.mubr.bf16.gmra.mrb[44].mxu0 %v2547_v18  ;;  %1420 = vmatmul.mubr.bf16.gmra.mrb[44].mxu1 %v2548_v19 }
  0x80   : > { %1427 = vmatprep.mubr.bf16.mxu1 %v2549_v20  ;;  %2367 = vmatprep.mubr.msk.bf16.mxu0 %vm272_vm0, %v2551_v21 }
  0x87   : > { %1428 = vmatmul.mubr.bf16.gmra.mrb[48].mxu1 %v2552_v22  ;;  %2368 = vmatmul.mubr.msk.bf16.vlgmr.msra.gmra.mrb[48].mxu0 %vm272_vm0, %v2553_v23 }
  0x88   : > { %1435 = vmatprep.mubr.bf16.mxu1 %v2554_v24  ;;  %2371 = vmatprep.mubr.msk.bf16.mxu0 %vm272_vm0, %v2556_v25 }
  0x8f   : > { %1436 = vmatmul.mubr.bf16.gmra.mrb[52].mxu1 %v2557_v26  ;;  %2372 = vmatmul.mubr.msk.bf16.gmra.mrb[52].mxu0 %vm272_vm0, %v2558_v27 }
  0x90   : > { %1443 = vmatprep.mubr.bf16.mxu1 %v2559_v28  ;;  %2375 = vmatprep.mubr.msk.bf16.mxu0 %vm272_vm0, %v2561_v29 }
  0x97   : > { %1444 = vmatmul.mubr.bf16.gmra.mrb[56].mxu1 %v2562_v30  ;;  %2376 = vmatmul.mubr.msk.bf16.gmra.mrb[56].mxu0 %vm272_vm0, %v2563_v31 }
  0x98   : > { %1451 = vmatprep.mubr.bf16.mxu1 %v2564_v32  ;;  %2379 = vmatprep.mubr.msk.bf16.mxu0 %vm272_vm0, %v2566_v33 }
  0x9f   : > { %1452 = vmatmul.mubr.bf16.gmra.mrb[60].mxu1 %v2567_v34  ;;  %2380 = vmatmul.mubr.msk.bf16.gmra.mrb[60].mxu0 %vm272_vm0, %v2568_v35 }
  0xa0   : > { %1459 = vmatprep.mubr.bf16.mxu1 %v2569_v36  ;;  %2383 = vmatprep.mubr.msk.bf16.mxu0 %vm272_vm0, %v2571_v37 }
  0xa7   : > { %1460 = vmatmul.mubr.bf16.gmra.mrb[64].mxu1 %v2572_v38  ;;  %2384 = vmatmul.mubr.msk.bf16.gmra.mrb[64].mxu0 %vm272_vm0, %v2573_v39 }
  0xa8   : > { %1467 = vmatprep.mubr.bf16.mxu1 %v2574_v40  ;;  %2387 = vmatprep.mubr.msk.bf16.mxu0 %vm272_vm0, %v2576_v41 }
  0xaf   : > { %1468 = vmatmul.mubr.bf16.gmra.mrb[68].mxu1 %v2577_v42  ;;  %2388 = vmatmul.mubr.msk.bf16.gmra.mrb[68].mxu0 %vm272_vm0, %v2578_v43 }
  0xb0   : > { %1475 = vmatprep.mubr.bf16.mxu1 %v2579_v44  ;;  %2391 = vmatprep.mubr.msk.bf16.mxu0 %vm272_vm0, %v2581_v45 }
  0xb7   : > { %1476 = vmatmul.mubr.bf16.gmra.mrb[72].mxu1 %v2582_v46  ;;  %2392 = vmatmul.mubr.msk.bf16.gmra.mrb[72].mxu0 %vm272_vm0, %v2583_v47 }
  0xb8   : > { %1483 = vmatprep.mubr.bf16.mxu1 %v2584_v48  ;;  %2395 = vmatprep.mubr.msk.bf16.mxu0 %vm272_vm0, %v2586_v49 }
  0xbf   : > { %1484 = vmatmul.mubr.bf16.gmra.mrb[76].mxu1 %v2587_v50  ;;  %2396 = vmatmul.mubr.msk.bf16.gmra.mrb[76].mxu0 %vm272_vm0, %v2588_v51 }
  0xfa   : > { %v2203_v53 = vpop.f32.mrb[0].mxu1  ;;  %v2131_v54 = vpop.f32.mrb[0].mxu0 }
  0xfb   : > { %v2204_v55 = vpop.f32.mrb[1].mxu1  ;;  %v2132_v56 = vpop.f32.mrb[1].mxu0 }
  0xfc   : > { %v2934_v57 = vadd.f32 %v2204_v55, %v2203_v53  ;;  %v2206_v58 = vpop.f32.mrb[2].mxu1  ;;  %v2133_v59 = vadd.f32 %v2132_v56, %v2131_v54  ;;  %v2134_v60 = vpop.f32.mrb[2].mxu0 }
  0xfd   : > { %v2207_v61 = vpop.f32.mrb[3].mxu1  ;;  %v2135_v62 = vpop.f32.mrb[3].mxu0 }
  0xfe   : > { %v2936_v63 = vadd.f32 %v2207_v61, %v2206_v58  ;;  %v2136_v0 = vadd.f32 %v2135_v62, %v2134_v60 }
 0x102   : > { %v2209_v1 = vpop.f32.mrb[4].mxu1  ;;  %v2137_v2 = vpop.f32.mrb[4].mxu0 }
 0x103   : > { %v2210_v3 = vpop.f32.mrb[5].mxu1  ;;  %v2138_v4 = vpop.f32.mrb[5].mxu0 }
 0x104   : > { %v2938_v5 = vadd.f32 %v2210_v3, %v2209_v1  ;;  %v2212_v6 = vpop.f32.mrb[6].mxu1  ;;  %v2139_v7 = vadd.f32 %v2138_v4, %v2137_v2  ;;  %v2140_v8 = vpop.f32.mrb[6].mxu0 }
 0x105   : > { %v2213_v9 = vpop.f32.mrb[7].mxu1  ;;  %v2141_v10 = vpop.f32.mrb[7].mxu0 }
 0x106   : > { %v2940_v11 = vadd.f32 %v2213_v9, %v2212_v6  ;;  %v2142_v12 = vadd.f32 %v2141_v10, %v2140_v8 }
 0x10a   : > { %v2215_v13 = vpop.f32.mrb[8].mxu1  ;;  %v2143_v14 = vpop.f32.mrb[8].mxu0 }
 0x10b   : > { %v2216_v15 = vpop.f32.mrb[9].mxu1  ;;  %v2144_v16 = vpop.f32.mrb[9].mxu0 }
 0x10c   : > { %v2942_v17 = vadd.f32 %v2216_v15, %v2215_v13  ;;  %v2218_v18 = vpop.f32.mrb[10].mxu1  ;;  %v2145_v19 = vadd.f32 %v2144_v16, %v2143_v14  ;;  %v2146_v20 = vpop.f32.mrb[10].mxu0 }
 0x10d   : > { %v2219_v21 = vpop.f32.mrb[11].mxu1  ;;  %v2147_v22 = vpop.f32.mrb[11].mxu0 }
 0x10e   : > { %v2944_v23 = vadd.f32 %v2219_v21, %v2218_v18  ;;  %v2148_v24 = vadd.f32 %v2147_v22, %v2146_v20 }
 0x112   : > { %v2221_v25 = vpop.f32.mrb[12].mxu1  ;;  %v2149_v26 = vpop.f32.mrb[12].mxu0 }
 0x113   : > { %v2222_v27 = vpop.f32.mrb[13].mxu1  ;;  %v2150_v28 = vpop.f32.mrb[13].mxu0 }
 0x114   : > { %v2946_v29 = vadd.f32 %v2222_v27, %v2221_v25  ;;  %v2224_v30 = vpop.f32.mrb[14].mxu1  ;;  %v2151_v31 = vadd.f32 %v2150_v28, %v2149_v26  ;;  %v2152_v32 = vpop.f32.mrb[14].mxu0 }
 0x115   : > { %v2225_v33 = vpop.f32.mrb[15].mxu1  ;;  %v2153_v34 = vpop.f32.mrb[15].mxu0 }
 0x116   : > { %v2948_v35 = vadd.f32 %v2225_v33, %v2224_v30  ;;  %v2154_v36 = vadd.f32 %v2153_v34, %v2152_v32 }
 0x11a   : > { %v2243_v37 = vpop.f32.mrb[16].mxu1  ;;  %v2155_v38 = vpop.f32.mrb[16].mxu0 }
 0x11b   : > { %v2244_v39 = vpop.f32.mrb[17].mxu1  ;;  %v2156_v40 = vpop.f32.mrb[17].mxu0 }
 0x11c   : > { %v2245_v41 = vadd.f32 %v2244_v39, %v2243_v37  ;;  %v2246_v42 = vpop.f32.mrb[18].mxu1  ;;  %v2157_v43 = vadd.f32 %v2156_v40, %v2155_v38  ;;  %v2158_v44 = vpop.f32.mrb[18].mxu0 }
 0x11d   : > { %v2247_v45 = vpop.f32.mrb[19].mxu1  ;;  %v2159_v46 = vpop.f32.mrb[19].mxu0 }
 0x11e   : > { %v2248_v47 = vadd.f32 %v2247_v45, %v2246_v42  ;;  %v2160_v48 = vadd.f32 %v2159_v46, %v2158_v44  ;;  %v2950_v49 = vadd.f32 %v2245_v41, %v2133_v59 }
 0x120   : > { %v2952_v50 = vadd.f32 %v2248_v47, %v2136_v0 }
 0x122   : > { %v2249_v51 = vpop.f32.mrb[20].mxu1  ;;  %v2161_v52 = vpop.f32.mrb[20].mxu0 }
 0x123   : > { %v2250_v53 = vpop.f32.mrb[21].mxu1  ;;  %v2162_v54 = vpop.f32.mrb[21].mxu0 }
 0x124   : > { %v2251_v55 = vadd.f32 %v2250_v53, %v2249_v51  ;;  %v2252_v56 = vpop.f32.mrb[22].mxu1  ;;  %v2163_v58 = vadd.f32 %v2162_v54, %v2161_v52  ;;  %v2164_v60 = vpop.f32.mrb[22].mxu0 }
 0x125   : > { %v2253_v61 = vpop.f32.mrb[23].mxu1  ;;  %v2165_v62 = vpop.f32.mrb[23].mxu0 }
 0x126   : > { %v2254_v1 = vadd.f32 %v2253_v61, %v2252_v56  ;;  %v2166_v2 = vadd.f32 %v2165_v62, %v2164_v60  ;;  %v2954_v3 = vadd.f32 %v2251_v55, %v2139_v7 }
 0x128   : > { %v2956_v4 = vadd.f32 %v2254_v1, %v2142_v12 }
 0x12a   : > { %v2255_v59 = vpop.f32.mrb[24].mxu1  ;;  %v2167_v6 = vpop.f32.mrb[24].mxu0 }
 0x12b   : > { %v2256_v0 = vpop.f32.mrb[25].mxu1  ;;  %v2168_v8 = vpop.f32.mrb[25].mxu0 }
 0x12c   : > { %v2257_v9 = vadd.f32 %v2256_v0, %v2255_v59  ;;  %v2258_v10 = vpop.f32.mrb[26].mxu1  ;;  %v2169_v13 = vadd.f32 %v2168_v8, %v2167_v6  ;;  %v2170_v14 = vpop.f32.mrb[26].mxu0 }
 0x12d   : > { %v2259_v15 = vpop.f32.mrb[27].mxu1  ;;  %v2171_v16 = vpop.f32.mrb[27].mxu0 }
 0x12e   : > { %v2260_v18 = vadd.f32 %v2259_v15, %v2258_v10  ;;  %v2172_v20 = vadd.f32 %v2171_v16, %v2170_v14  ;;  %v2958_v21 = vadd.f32 %v2257_v9, %v2145_v19 }
 0x130   : > { %v2960_v22 = vadd.f32 %v2260_v18, %v2148_v24 }
 0x132   : > { %v2261_v7 = vpop.f32.mrb[28].mxu1  ;;  %v2173_v25 = vpop.f32.mrb[28].mxu0 }
 0x133   : > { %v2262_v12 = vpop.f32.mrb[29].mxu1  ;;  %v2174_v26 = vpop.f32.mrb[29].mxu0 }
 0x134   : > { %v2263_v27 = vadd.f32 %v2262_v12, %v2261_v7  ;;  %v2264_v28 = vpop.f32.mrb[30].mxu1  ;;  %v2175_v30 = vadd.f32 %v2174_v26, %v2173_v25  ;;  %v2176_v32 = vpop.f32.mrb[30].mxu0 }
 0x135   : > { %v2265_v33 = vpop.f32.mrb[31].mxu1  ;;  %v2177_v34 = vpop.f32.mrb[31].mxu0 }
 0x136   : > { %v2266_v37 = vadd.f32 %v2265_v33, %v2264_v28  ;;  %v2178_v38 = vadd.f32 %v2177_v34, %v2176_v32  ;;  %v2962_v39 = vadd.f32 %v2263_v27, %v2151_v31 }
 0x138   : > { %v2964_v40 = vadd.f32 %v2266_v37, %v2154_v36 }
 0x13a   : > { %v2267_v19 = vpop.f32.mrb[32].mxu1  ;;  %v2179_v41 = vpop.f32.mrb[32].mxu0 }
 0x13b   : > { %v2268_v24 = vpop.f32.mrb[33].mxu1  ;;  %v2180_v42 = vpop.f32.mrb[33].mxu0 }
 0x13c   : > { %v2269_v44 = vadd.f32 %v2268_v24, %v2267_v19  ;;  %v2270_v45 = vpop.f32.mrb[34].mxu1  ;;  %v2966_v46 = vadd.f32 %v2180_v42, %v2179_v41  ;;  %v2182_v47 = vpop.f32.mrb[34].mxu0 }
 0x13d   : > { %v2271_v51 = vpop.f32.mrb[35].mxu1  ;;  %v2183_v52 = vpop.f32.mrb[35].mxu0 }
 0x13e   : > { %v2272_v53 = vadd.f32 %v2271_v51, %v2270_v45  ;;  %v2968_v54 = vadd.f32 %v2183_v52, %v2182_v47  ;;  %v2970_v55 = vadd.f32 %v2269_v44, %v2157_v43 }
 0x140   : > { %v2972_v31 = vadd.f32 %v2272_v53, %v2160_v48 }
 0x142   : > { %v2273_v36 = vpop.f32.mrb[36].mxu1  ;;  %v2185_v56 = vpop.f32.mrb[36].mxu0 }
 0x143   : > { %v2274_v60 = vpop.f32.mrb[37].mxu1  ;;  %v2186_v61 = vpop.f32.mrb[37].mxu0 }
 0x144   : > { %v2275_v62 = vadd.f32 %v2274_v60, %v2273_v36  ;;  %v2276_v1 = vpop.f32.mrb[38].mxu1  ;;  %v2974_v59 = vadd.f32 %v2186_v61, %v2185_v56  ;;  %v2188_v6 = vpop.f32.mrb[38].mxu0  ;;  %v307_v56 = vld [vmem:[%s2868_s29 + $0x10] sm:$0xff] }
 0x145   : > { %v2277_v0 = vpop.f32.mrb[39].mxu1  ;;  %v2189_v8 = vpop.f32.mrb[39].mxu0 }
 0x146   : > { %v2278_v9 = vadd.f32 %v2277_v0, %v2276_v1  ;;  %v2976_v10 = vadd.f32 %v2189_v8, %v2188_v6  ;;  %v2978_v14 = vadd.f32 %v2275_v62, %v2163_v58  ;;  %v305_v1 = vld [vmem:[%s2868_s29] sm:$0xff] }
 0x148   : > { %v2980_v43 = vadd.f32 %v2278_v9, %v2166_v2 }
 0x14a   : > { %v2279_v48 = vpop.f32.mrb[40].mxu1  ;;  %v2191_v15 = vpop.f32.mrb[40].mxu0 }
 0x14b   : > { %v2280_v16 = vpop.f32.mrb[41].mxu1  ;;  %v2192_v18 = vpop.f32.mrb[41].mxu0 }
 0x14c   : > { %v2281_v7 = vadd.f32 %v2280_v16, %v2279_v48  ;;  %v2282_v25 = vpop.f32.mrb[42].mxu1  ;;  %v2982_v12 = vadd.f32 %v2192_v18, %v2191_v15  ;;  %v2194_v26 = vpop.f32.mrb[42].mxu0  ;;  %v308_v48 = vld [vmem:[%s2868_s29 + $0x18] sm:$0xff]  ;;  %v306_v18 = vld [vmem:[%s2868_s29 + $0x8] sm:$0xff] }
 0x14d   : > { %v2283_v27 = vpop.f32.mrb[43].mxu1  ;;  %v2195_v28 = vpop.f32.mrb[43].mxu0 }
 0x14e   : > { %v2284_v32 = vadd.f32 %v2283_v27, %v2282_v25  ;;  %v2984_v33 = vadd.f32 %v2195_v28, %v2194_v26  ;;  %v2986_v34 = vadd.f32 %v2281_v7, %v2169_v13 }
 0x150   : > { %v2988_v58 = vadd.f32 %v2284_v32, %v2172_v20 }
 0x152   : > { %v2285_v2 = vpop.f32.mrb[44].mxu1  ;;  %v2197_v37 = vpop.f32.mrb[44].mxu0 }
 0x153   : > { %v2286_v19 = vpop.f32.mrb[45].mxu1  ;;  %v2198_v41 = vpop.f32.mrb[45].mxu0 }
 0x154   : > { %v2287_v24 = vadd.f32 %v2286_v19, %v2285_v2  ;;  %v2288_v42 = vpop.f32.mrb[46].mxu1  ;;  %v2990_v44 = vadd.f32 %v2198_v41, %v2197_v37  ;;  %v2200_v45 = vpop.f32.mrb[46].mxu0  ;;  %v309_v19 = vld [vmem:[%s2868_s29 + $0x20] sm:$0xff] }
 0x155   : > { %v2289_v47 = vpop.f32.mrb[47].mxu1  ;;  %v2201_v51 = vpop.f32.mrb[47].mxu0 }
 0x156   : > { %v2290_v52 = vadd.f32 %v2289_v47, %v2288_v42  ;;  %v2992_v53 = vadd.f32 %v2201_v51, %v2200_v45  ;;  %v2994_v13 = vadd.f32 %v2287_v24, %v2175_v30  ;;  %v3026_v24 = vld [vmem:[%s3300_s2] ss:$0 sm:$0xff]  ;;  %v312_v47 = vld [vmem:[%s2868_s29 + $0x38] sm:$0xff] }
 0x158   : > { %v2996_v20 = vadd.f32 %v2290_v52, %v2178_v38 }
 0x15a   : > { %v2291_v36 = vpop.f32.mrb[48].mxu1  ;;  %v2369_v60 = vpop.f32.mrb[48].mxu0 }
 0x15b   : > { %v1535_v61 = vadd.f32 %v2369_v60, %v2954_v3  ;;  %v2292_v62 = vpop.f32.mrb[49].mxu1  ;;  %v1526_v6 = vpop.f32.mrb[49].mxu0 }
 0x15c   : > { %v2293_v0 = vadd.f32 %v2292_v62, %v2291_v36  ;;  %v1527_v8 = vadd.f32 %v1526_v6, %v2950_v49  ;;  %v2294_v9 = vpop.f32.mrb[50].mxu1  ;;  %v2370_v30 = vpop.f32.mrb[50].mxu0 }
 0x15d   : > { %v1655_v38 = vadd.f32 %v1535_v61, %v307_v56  ;;  %v1538_v15 = vadd.f32 %v2370_v30, %v2956_v4  ;;  %v2295_v16 = vpop.f32.mrb[51].mxu1  ;;  %v1529_v3 = vpop.f32.mrb[51].mxu0  ;;  %v310_v56 = vld [vmem:[%s2868_s29 + $0x28] sm:$0xff] }
 0x15e   : > { %v1653_v7 = vadd.f32 %v1527_v8, %v305_v1  ;;  %v2296_v25 = vadd.f32 %v2295_v16, %v2294_v9  ;;  %v1530_v26 = vadd.f32 %v1529_v3, %v2952_v50  ;;  %v3007_v27 = vadd.f32 %v2293_v0, %v2966_v46  ;;  %v311_v50 = vld [vmem:[%s2868_s29 + $0x30] sm:$0xff] }
 0x15f   : > { %1687 = vst.msk [vmem:[%s2868_s29 + $0x10] sm:$0xff] %vm272_vm0, %v1655_v38  ;;  %v1656_v49 = vadd.f32 %v1538_v15, %v308_v48 }
 0x160   : > { %1685 = vst.msk [vmem:[%s2868_s29] sm:$0xff] %vm272_vm0, %v1653_v7  ;;  %v1654_v28 = vadd.f32 %v1530_v26, %v306_v18  ;;  %v3014_v4 = vadd.f32 %v2296_v25, %v2968_v54  ;;  %v315_v7 = vld [vmem:[%s2868_s29 + $0x50] sm:$0xff] }
 0x161   : > { %1688 = vst.msk [vmem:[%s2868_s29 + $0x18] sm:$0xff] %vm272_vm0, %v1656_v49 }
 0x162   : > { %1686 = vst.msk [vmem:[%s2868_s29 + $0x8] sm:$0xff] %vm272_vm0, %v1654_v28  ;;  %v2297_v32 = vpop.f32.mrb[52].mxu1  ;;  %v2373_v2 = vpop.f32.mrb[52].mxu0  ;;  %v313_v28 = vld [vmem:[%s2868_s29 + $0x40] sm:$0xff] }
 0x163   : > { %v1551_v46 = vadd.f32 %v2373_v2, %v2962_v39  ;;  %v2298_v37 = vpop.f32.mrb[53].mxu1  ;;  %v1542_v41 = vpop.f32.mrb[53].mxu0 }
 0x164   : > { %v2299_v54 = vadd.f32 %v2298_v37, %v2297_v32  ;;  %v1543_v42 = vadd.f32 %v1542_v41, %v2958_v21  ;;  %v2300_v45 = vpop.f32.mrb[54].mxu1  ;;  %v2374_v51 = vpop.f32.mrb[54].mxu0 }
 0x165   : > { %v1659_v52 = vadd.f32 %v1551_v46, %v311_v50  ;;  %v1554_v39 = vadd.f32 %v2374_v51, %v2964_v40  ;;  %v2301_v36 = vpop.f32.mrb[55].mxu1  ;;  %v1545_v60 = vpop.f32.mrb[55].mxu0 }
 0x166   : > { %v1722_v61 = vld [vmem:[%s2868_s29 + $0x10] sm:$0xff]  ;;  %v1657_v62 = vadd.f32 %v1543_v42, %v309_v19  ;;  %v2302_v1 = vadd.f32 %v2301_v36, %v2300_v45  ;;  %v1546_v6 = vadd.f32 %v1545_v60, %v2960_v22  ;;  %v3035_v21 = vadd.f32 %v2299_v54, %v2974_v59  ;;  %v316_v19 = vld [vmem:[%s2868_s29 + $0x58] sm:$0xff]  ;;  %v314_v45 = vld [vmem:[%s2868_s29 + $0x48] sm:$0xff] }
 0x167   : > { %v1761_v0 = vadd.f32 %v3026_v24, %v1722_v61  ;;  %v1720_v8 = vld [vmem:[%s2868_s29] sm:$0xff]  ;;  %1691 = vst.msk [vmem:[%s2868_s29 + $0x30] sm:$0xff] %vm272_vm0, %v1659_v52  ;;  %v1660_v40 = vadd.f32 %v1554_v39, %v312_v47 }
 0x168   : > { %v1759_v9 = vadd.f32 %v3026_v24, %v1720_v8  ;;  %v1723_v48 = vld [vmem:[%s2868_s29 + $0x18] sm:$0xff]  ;;  %1689 = vst.msk [vmem:[%s2868_s29 + $0x20] sm:$0xff] %vm272_vm0, %v1657_v62  ;;  %v1658_v30 = vadd.f32 %v1546_v6, %v310_v56  ;;  %v3046_v22 = vadd.f32 %v2302_v1, %v2976_v10 }
 0x169   : > { %v1793_v59 = vmax.f32 %v1761_v0, 0.0  ;;  %v1762_v38 = vadd.f32 %v3026_v24, %v1723_v48  ;;  %v1721_v15 = vld [vmem:[%s2868_s29 + $0x8] sm:$0xff]  ;;  %1692 = vst.msk [vmem:[%s2868_s29 + $0x38] sm:$0xff] %vm272_vm0, %v1660_v40  ;;  %v319_v48 = vld [vmem:[%s2868_s29 + $0x70] sm:$0xff] }
 0x16a   : > { %v1791_v16 = vmax.f32 %v1759_v9, 0.0  ;;  %v1760_v18 = vadd.f32 %v3026_v24, %v1721_v15  ;;  %1690 = vst.msk [vmem:[%s2868_s29 + $0x28] sm:$0xff] %vm272_vm0, %v1658_v30  ;;  %v2303_v3 = vpop.f32.mrb[56].mxu1  ;;  %v2377_v25 = vpop.f32.mrb[56].mxu0  ;;  %v317_v15 = vld [vmem:[%s2868_s29 + $0x60] sm:$0xff] }
 0x16b   : > { %1825 = vst.msk [vmem:[%s2868_s29 + $0x10] sm:$0xff] %vm272_vm0, %v1793_v59  ;;  %v1794_v10 = vmax.f32 %v1762_v38, 0.0  ;;  %v1567_v26 = vadd.f32 %v2377_v25, %v2978_v14  ;;  %v2304_v49 = vpop.f32.mrb[57].mxu1  ;;  %v1558_v32 = vpop.f32.mrb[57].mxu0 }
 0x16c   : > { %1823 = vst.msk [vmem:[%s2868_s29] sm:$0xff] %vm272_vm0, %v1791_v16  ;;  %v1792_v50 = vmax.f32 %v1760_v18, 0.0  ;;  %v2305_v2 = vadd.f32 %v2304_v49, %v2303_v3  ;;  %v1559_v46 = vadd.f32 %v1558_v32, %v2970_v55  ;;  %v2306_v37 = vpop.f32.mrb[58].mxu1  ;;  %v2378_v41 = vpop.f32.mrb[58].mxu0  ;;  %v318_v32 = vld [vmem:[%s2868_s29 + $0x68] sm:$0xff] }
 0x16d   : > { %1826 = vst.msk [vmem:[%s2868_s29 + $0x18] sm:$0xff] %vm272_vm0, %v1794_v10  ;;  %v1663_v54 = vadd.f32 %v1567_v26, %v315_v7  ;;  %v1570_v14 = vadd.f32 %v2378_v41, %v2980_v43  ;;  %v2307_v42 = vpop.f32.mrb[59].mxu1  ;;  %v1561_v47 = vpop.f32.mrb[59].mxu0  ;;  %v320_v10 = vld [vmem:[%s2868_s29 + $0x78] sm:$0xff] }
 0x16e   : > { %1824 = vst.msk [vmem:[%s2868_s29 + $0x8] sm:$0xff] %vm272_vm0, %v1792_v50  ;;  %v1726_v51 = vld [vmem:[%s2868_s29 + $0x30] sm:$0xff]  ;;  %v1661_v55 = vadd.f32 %v1559_v46, %v313_v28  ;;  %v2308_v52 = vadd.f32 %v2307_v42, %v2306_v37  ;;  %v1562_v39 = vadd.f32 %v1561_v47, %v2972_v31  ;;  %v3073_v36 = vadd.f32 %v2305_v2, %v2982_v12 }
 0x16f   : > { %v1765_v56 = vadd.f32 %v3026_v24, %v1726_v51  ;;  %v1724_v43 = vld [vmem:[%s2868_s29 + $0x20] sm:$0xff]  ;;  %1695 = vst.msk [vmem:[%s2868_s29 + $0x50] sm:$0xff] %vm272_vm0, %v1663_v54  ;;  %v1664_v60 = vadd.f32 %v1570_v14, %v316_v19 }
 0x170   : > { %v1763_v61 = vadd.f32 %v3026_v24, %v1724_v43  ;;  %v1727_v62 = vld [vmem:[%s2868_s29 + $0x38] sm:$0xff]  ;;  %1693 = vst.msk [vmem:[%s2868_s29 + $0x40] sm:$0xff] %vm272_vm0, %v1661_v55  ;;  %v1662_v1 = vadd.f32 %v1562_v39, %v314_v45  ;;  %v3084_v31 = vadd.f32 %v2308_v52, %v2984_v33 }
 0x171   : > { %v1797_v12 = vmax.f32 %v1765_v56, 0.0  ;;  %v1766_v6 = vadd.f32 %v3026_v24, %v1727_v62  ;;  %v1725_v0 = vld [vmem:[%s2868_s29 + $0x28] sm:$0xff]  ;;  %1696 = vst.msk [vmem:[%s2868_s29 + $0x58] sm:$0xff] %vm272_vm0, %v1664_v60  ;;  %v323_v56 = vld [vmem:[%s2868_s29 + $0x90] sm:$0xff]  ;;  %v321_v62 = vld [vmem:[%s2868_s29 + $0x80] sm:$0xff] }
 0x172   : > { %v1795_v8 = vmax.f32 %v1763_v61, 0.0  ;;  %v1764_v40 = vadd.f32 %v3026_v24, %v1725_v0  ;;  %1694 = vst.msk [vmem:[%s2868_s29 + $0x48] sm:$0xff] %vm272_vm0, %v1662_v1  ;;  %v2309_v9 = vpop.f32.mrb[60].mxu1  ;;  %v2381_v30 = vpop.f32.mrb[60].mxu0 }
 0x173   : > { %1829 = vst.msk [vmem:[%s2868_s29 + $0x30] sm:$0xff] %vm272_vm0, %v1797_v12  ;;  %v1798_v33 = vmax.f32 %v1766_v6, 0.0  ;;  %v1583_v59 = vadd.f32 %v2381_v30, %v2994_v13  ;;  %v2310_v38 = vpop.f32.mrb[61].mxu1  ;;  %v1574_v16 = vpop.f32.mrb[61].mxu0 }
 0x174   : > { %1827 = vst.msk [vmem:[%s2868_s29 + $0x20] sm:$0xff] %vm272_vm0, %v1795_v8  ;;  %v1796_v18 = vmax.f32 %v1764_v40, 0.0  ;;  %v2311_v3 = vadd.f32 %v2310_v38, %v2309_v9  ;;  %v1575_v7 = vadd.f32 %v1574_v16, %v2986_v34  ;;  %v2312_v25 = vpop.f32.mrb[62].mxu1  ;;  %v2382_v26 = vpop.f32.mrb[62].mxu0  ;;  %v324_v40 = vld [vmem:[%s2868_s29 + $0x98] sm:$0xff] }
 0x175   : > { %1830 = vst.msk [vmem:[%s2868_s29 + $0x38] sm:$0xff] %vm272_vm0, %v1798_v33  ;;  %v1667_v49 = vadd.f32 %v1583_v59, %v319_v48  ;;  %v1586_v13 = vadd.f32 %v2382_v26, %v2996_v20  ;;  %v2313_v28 = vpop.f32.mrb[63].mxu1  ;;  %v1577_v50 = vpop.f32.mrb[63].mxu0  ;;  %v322_v33 = vld [vmem:[%s2868_s29 + $0x88] sm:$0xff] }
 0x176   : > { %1828 = vst.msk [vmem:[%s2868_s29 + $0x28] sm:$0xff] %vm272_vm0, %v1796_v18  ;;  %v1730_v2 = vld [vmem:[%s2868_s29 + $0x50] sm:$0xff]  ;;  %v1665_v34 = vadd.f32 %v1575_v7, %v317_v15  ;;  %v2314_v46 = vadd.f32 %v2313_v28, %v2312_v25  ;;  %v1578_v37 = vadd.f32 %v1577_v50, %v2988_v58  ;;  %v3111_v19 = vadd.f32 %v2311_v3, %v2990_v44 }
 0x177   : > { %v1769_v41 = vadd.f32 %v3026_v24, %v1730_v2  ;;  %v1728_v20 = vld [vmem:[%s2868_s29 + $0x40] sm:$0xff]  ;;  %1699 = vst.msk [vmem:[%s2868_s29 + $0x70] sm:$0xff] %vm272_vm0, %v1667_v49  ;;  %v1668_v54 = vadd.f32 %v1586_v13, %v320_v10  ;;  %v327_v2 = vld [vmem:[%s2868_s29 + $0xb0] sm:$0xff] }
 0x178   : > { %v1767_v14 = vadd.f32 %v3026_v24, %v1728_v20  ;;  %v1731_v42 = vld [vmem:[%s2868_s29 + $0x58] sm:$0xff]  ;;  %1697 = vst.msk [vmem:[%s2868_s29 + $0x60] sm:$0xff] %vm272_vm0, %v1665_v34  ;;  %v1666_v45 = vadd.f32 %v1578_v37, %v318_v32  ;;  %v3122_v58 = vadd.f32 %v2314_v46, %v2992_v53 }
 0x179   : > { %v1801_v44 = vmax.f32 %v1769_v41, 0.0  ;;  %v1770_v47 = vadd.f32 %v3026_v24, %v1731_v42  ;;  %v1729_v51 = vld [vmem:[%s2868_s29 + $0x48] sm:$0xff]  ;;  %1700 = vst.msk [vmem:[%s2868_s29 + $0x78] sm:$0xff] %vm272_vm0, %v1668_v54  ;;  %v325_v41 = vld [vmem:[%s2868_s29 + $0xa0] sm:$0xff] }
 0x17a   : > { %v1799_v55 = vmax.f32 %v1767_v14, 0.0  ;;  %v1768_v52 = vadd.f32 %v3026_v24, %v1729_v51  ;;  %1698 = vst.msk [vmem:[%s2868_s29 + $0x68] sm:$0xff] %vm272_vm0, %v1666_v45  ;;  %v2315_v39 = vpop.f32.mrb[64].mxu1  ;;  %v2385_v43 = vpop.f32.mrb[64].mxu0 }
 0x17b   : > { %1833 = vst.msk [vmem:[%s2868_s29 + $0x50] sm:$0xff] %vm272_vm0, %v1801_v44  ;;  %v1802_v53 = vmax.f32 %v1770_v47, 0.0  ;;  %v1599_v60 = vadd.f32 %v2385_v43, %v3035_v21  ;;  %v2316_v61 = vpop.f32.mrb[65].mxu1  ;;  %v1590_v1 = vpop.f32.mrb[65].mxu0  ;;  %v328_v44 = vld [vmem:[%s2868_s29 + $0xb8] sm:$0xff] }
 0x17c   : > { %1831 = vst.msk [vmem:[%s2868_s29 + $0x40] sm:$0xff] %vm272_vm0, %v1799_v55  ;;  %v1800_v12 = vmax.f32 %v1768_v52, 0.0  ;;  %v2317_v6 = vadd.f32 %v2316_v61, %v2315_v39  ;;  %v1591_v0 = vadd.f32 %v1590_v1, %v3007_v27  ;;  %v2318_v8 = vpop.f32.mrb[66].mxu1  ;;  %v2386_v9 = vpop.f32.mrb[66].mxu0  ;;  %v326_v52 = vld [vmem:[%s2868_s29 + $0xa8] sm:$0xff] }
 0x17d   : > { %1834 = vst.msk [vmem:[%s2868_s29 + $0x58] sm:$0xff] %vm272_vm0, %v1802_v53  ;;  %v1671_v48 = vadd.f32 %v1599_v60, %v323_v56  ;;  %v1602_v21 = vadd.f32 %v2386_v9, %v3046_v22  ;;  %v2319_v30 = vpop.f32.mrb[67].mxu1  ;;  %v1593_v59 = vpop.f32.mrb[67].mxu0 }
 0x17e   : > { %1832 = vst.msk [vmem:[%s2868_s29 + $0x48] sm:$0xff] %vm272_vm0, %v1800_v12  ;;  %v1734_v38 = vld [vmem:[%s2868_s29 + $0x70] sm:$0xff]  ;;  %v1669_v27 = vadd.f32 %v1591_v0, %v321_v62  ;;  %v2320_v15 = vadd.f32 %v2319_v30, %v2318_v8  ;;  %v1594_v16 = vadd.f32 %v1593_v59, %v3014_v4  ;;  %v3149_v18 = vadd.f32 %v2317_v6, %v2934_v57 }
 0x17f   : > { %v1773_v3 = vadd.f32 %v3026_v24, %v1734_v38  ;;  %v1732_v22 = vld [vmem:[%s2868_s29 + $0x60] sm:$0xff]  ;;  %1703 = vst.msk [vmem:[%s2868_s29 + $0x90] sm:$0xff] %vm272_vm0, %v1671_v48  ;;  %v1672_v7 = vadd.f32 %v1602_v21, %v324_v40  ;;  %v331_v21 = vld [vmem:[%s2868_s29 + $0xd0] sm:$0xff] }
 0x180   : > { %v1771_v25 = vadd.f32 %v3026_v24, %v1732_v22  ;;  %v1735_v10 = vld [vmem:[%s2868_s29 + $0x78] sm:$0xff]  ;;  %1701 = vst.msk [vmem:[%s2868_s29 + $0x80] sm:$0xff] %vm272_vm0, %v1669_v27  ;;  %v1670_v26 = vadd.f32 %v1594_v16, %v322_v33  ;;  %v3160_v4 = vadd.f32 %v2320_v15, %v2936_v63  ;;  %v329_v38 = vld [vmem:[%s2868_s29 + $0xc0] sm:$0xff] }
 0x181   : > { %v1805_v57 = vmax.f32 %v1773_v3, 0.0  ;;  %v1774_v49 = vadd.f32 %v3026_v24, %v1735_v10  ;;  %v1733_v13 = vld [vmem:[%s2868_s29 + $0x68] sm:$0xff]  ;;  %1704 = vst.msk [vmem:[%s2868_s29 + $0x98] sm:$0xff] %vm272_vm0, %v1672_v7  ;;  %v332_v7 = vld [vmem:[%s2868_s29 + $0xd8] sm:$0xff] }
 0x182   : > { %v1803_v28 = vmax.f32 %v1771_v25, 0.0  ;;  %v1772_v32 = vadd.f32 %v3026_v24, %v1733_v13  ;;  %1702 = vst.msk [vmem:[%s2868_s29 + $0x88] sm:$0xff] %vm272_vm0, %v1670_v26  ;;  %v2321_v50 = vpop.f32.mrb[68].mxu1  ;;  %v2389_v34 = vpop.f32.mrb[68].mxu0 }
 0x183   : > { %1837 = vst.msk [vmem:[%s2868_s29 + $0x70] sm:$0xff] %vm272_vm0, %v1805_v57  ;;  %v1806_v63 = vmax.f32 %v1774_v49, 0.0  ;;  %v1615_v46 = vadd.f32 %v2389_v34, %v3111_v19  ;;  %v2322_v37 = vpop.f32.mrb[69].mxu1  ;;  %v1606_v20 = vpop.f32.mrb[69].mxu0  ;;  %v330_v49 = vld [vmem:[%s2868_s29 + $0xc8] sm:$0xff] }
 0x184   : > { %1835 = vst.msk [vmem:[%s2868_s29 + $0x60] sm:$0xff] %vm272_vm0, %v1803_v28  ;;  %v1804_v54 = vmax.f32 %v1772_v32, 0.0  ;;  %v2323_v14 = vadd.f32 %v2322_v37, %v2321_v50  ;;  %v1607_v42 = vadd.f32 %v1606_v20, %v3073_v36  ;;  %v2324_v45 = vpop.f32.mrb[70].mxu1  ;;  %v2390_v47 = vpop.f32.mrb[70].mxu0 }
 0x185   : > { %1838 = vst.msk [vmem:[%s2868_s29 + $0x78] sm:$0xff] %vm272_vm0, %v1806_v63  ;;  %v1675_v51 = vadd.f32 %v1615_v46, %v327_v2  ;;  %v1618_v19 = vadd.f32 %v2390_v47, %v3122_v58  ;;  %v2325_v55 = vpop.f32.mrb[71].mxu1  ;;  %v1609_v39 = vpop.f32.mrb[71].mxu0 }
 0x186   : > { %1836 = vst.msk [vmem:[%s2868_s29 + $0x68] sm:$0xff] %vm272_vm0, %v1804_v54  ;;  %v1738_v56 = vld [vmem:[%s2868_s29 + $0x90] sm:$0xff]  ;;  %v1673_v36 = vadd.f32 %v1607_v42, %v325_v41  ;;  %v2326_v43 = vadd.f32 %v2325_v55, %v2324_v45  ;;  %v1610_v53 = vadd.f32 %v1609_v39, %v3084_v31  ;;  %v1470_v60 = vadd.f32 %v2323_v14, %v2938_v5 }
 0x187   : > { %v1777_v61 = vadd.f32 %v3026_v24, %v1738_v56  ;;  %v1736_v62 = vld [vmem:[%s2868_s29 + $0x80] sm:$0xff]  ;;  %1707 = vst.msk [vmem:[%s2868_s29 + $0xb0] sm:$0xff] %vm272_vm0, %v1675_v51  ;;  %v1676_v58 = vadd.f32 %v1618_v19, %v328_v44 }
 0x188   : > { %v1775_v1 = vadd.f32 %v3026_v24, %v1736_v62  ;;  %v1739_v12 = vld [vmem:[%s2868_s29 + $0x98] sm:$0xff]  ;;  %1705 = vst.msk [vmem:[%s2868_s29 + $0xa0] sm:$0xff] %vm272_vm0, %v1673_v36  ;;  %v1674_v6 = vadd.f32 %v1610_v53, %v326_v52  ;;  %v1473_v31 = vadd.f32 %v2326_v43, %v2940_v11  ;;  %v333_v19 = vld [vmem:[%s2868_s29 + $0xe0] sm:$0xff] }
 0x189   : > { %v1809_v0 = vmax.f32 %v1777_v61, 0.0  ;;  %v1778_v5 = vadd.f32 %v3026_v24, %v1739_v12  ;;  %v1737_v8 = vld [vmem:[%s2868_s29 + $0x88] sm:$0xff]  ;;  %1708 = vst.msk [vmem:[%s2868_s29 + $0xb8] sm:$0xff] %vm272_vm0, %v1676_v58 }
 0x18a   : > { %v1807_v40 = vmax.f32 %v1775_v1, 0.0  ;;  %v1776_v9 = vadd.f32 %v3026_v24, %v1737_v8  ;;  %1706 = vst.msk [vmem:[%s2868_s29 + $0xa8] sm:$0xff] %vm272_vm0, %v1674_v6  ;;  %v2327_v48 = vpop.f32.mrb[72].mxu1  ;;  %v2393_v30 = vpop.f32.mrb[72].mxu0 }
 0x18b   : > { %1841 = vst.msk [vmem:[%s2868_s29 + $0x90] sm:$0xff] %vm272_vm0, %v1809_v0  ;;  %v1810_v11 = vmax.f32 %v1778_v5, 0.0  ;;  %v1631_v33 = vadd.f32 %v2393_v30, %v1470_v60  ;;  %v2328_v59 = vpop.f32.mrb[73].mxu1  ;;  %v1622_v27 = vpop.f32.mrb[73].mxu0  ;;  %v334_v60 = vld [vmem:[%s2868_s29 + $0xe8] sm:$0xff]  ;;  %v335_v5 = vld [vmem:[%s2868_s29 + $0xf0] sm:$0xff] }
 0x18c   : > { %1839 = vst.msk [vmem:[%s2868_s29 + $0x80] sm:$0xff] %vm272_vm0, %v1807_v40  ;;  %v1808_v15 = vmax.f32 %v1776_v9, 0.0  ;;  %v2329_v16 = vadd.f32 %v2328_v59, %v2327_v48  ;;  %v1623_v3 = vadd.f32 %v1622_v27, %v3149_v18  ;;  %v2330_v22 = vpop.f32.mrb[74].mxu1  ;;  %v2394_v25 = vpop.f32.mrb[74].mxu0 }
 0x18d   : > { %1842 = vst.msk [vmem:[%s2868_s29 + $0x98] sm:$0xff] %vm272_vm0, %v1810_v11  ;;  %v1679_v10 = vadd.f32 %v1631_v33, %v331_v21  ;;  %v1634_v26 = vadd.f32 %v2394_v25, %v1473_v31  ;;  %v2331_v57 = vpop.f32.mrb[75].mxu1  ;;  %v1625_v13 = vpop.f32.mrb[75].mxu0  ;;  %v336_v33 = vld [vmem:[%s2868_s29 + $0xf8] sm:$0xff] }
 0x18e   : > { %1840 = vst.msk [vmem:[%s2868_s29 + $0x88] sm:$0xff] %vm272_vm0, %v1808_v15  ;;  %v1742_v28 = vld [vmem:[%s2868_s29 + $0xb0] sm:$0xff]  ;;  %v1677_v32 = vadd.f32 %v1623_v3, %v329_v38  ;;  %v2332_v18 = vadd.f32 %v2331_v57, %v2330_v22  ;;  %v1626_v50 = vadd.f32 %v1625_v13, %v3160_v4  ;;  %v1478_v2 = vadd.f32 %v2329_v16, %v2942_v17 }
 0x18f   : > { %v1781_v34 = vadd.f32 %v3026_v24, %v1742_v28  ;;  %v1740_v63 = vld [vmem:[%s2868_s29 + $0xa0] sm:$0xff]  ;;  %1711 = vst.msk [vmem:[%s2868_s29 + $0xd0] sm:$0xff] %vm272_vm0, %v1679_v10  ;;  %v1680_v46 = vadd.f32 %v1634_v26, %v332_v7 }
 0x190   : > { %v1779_v37 = vadd.f32 %v3026_v24, %v1740_v63  ;;  %v1743_v41 = vld [vmem:[%s2868_s29 + $0xb8] sm:$0xff]  ;;  %1709 = vst.msk [vmem:[%s2868_s29 + $0xc0] sm:$0xff] %vm272_vm0, %v1677_v32  ;;  %v1678_v20 = vadd.f32 %v1626_v50, %v330_v49  ;;  %v1481_v4 = vadd.f32 %v2332_v18, %v2944_v23 }
 0x191   : > { %v1813_v54 = vmax.f32 %v1781_v34, 0.0  ;;  %v1782_v17 = vadd.f32 %v3026_v24, %v1743_v41  ;;  %v1741_v14 = vld [vmem:[%s2868_s29 + $0xa8] sm:$0xff]  ;;  %1712 = vst.msk [vmem:[%s2868_s29 + $0xd8] sm:$0xff] %vm272_vm0, %v1680_v46 }
 0x192   : > { %v1811_v42 = vmax.f32 %v1779_v37, 0.0  ;;  %v1780_v45 = vadd.f32 %v3026_v24, %v1741_v14  ;;  %1710 = vst.msk [vmem:[%s2868_s29 + $0xc8] sm:$0xff] %vm272_vm0, %v1678_v20  ;;  %v2333_v44 = vpop.f32.mrb[76].mxu1  ;;  %v2397_v47 = vpop.f32.mrb[76].mxu0 }
 0x193   : > { %1845 = vst.msk [vmem:[%s2868_s29 + $0xb0] sm:$0xff] %vm272_vm0, %v1813_v54  ;;  %v1814_v23 = vmax.f32 %v1782_v17, 0.0  ;;  %v2334_v51 = vpop.f32.mrb[77].mxu1  ;;  %v1638_v55 = vpop.f32.mrb[77].mxu0 }
 0x194   : > { %1843 = vst.msk [vmem:[%s2868_s29 + $0xa0] sm:$0xff] %vm272_vm0, %v1811_v42  ;;  %v1812_v52 = vmax.f32 %v1780_v45, 0.0  ;;  %v2335_v39 = vadd.f32 %v2334_v51, %v2333_v44  ;;  %v1639_v56 = vadd.f32 %v1638_v55, %v1478_v2  ;;  %v2336_v36 = vpop.f32.mrb[78].mxu1  ;;  %v2398_v43 = vpop.f32.mrb[78].mxu0 }
 0x195   : > { %1846 = vst.msk [vmem:[%s2868_s29 + $0xb8] sm:$0xff] %vm272_vm0, %v1814_v23  ;;  %v2337_v53 = vpop.f32.mrb[79].mxu1  ;;  %v1641_v61 = vpop.f32.mrb[79].mxu0 }
 0x196   : > { %1844 = vst.msk [vmem:[%s2868_s29 + $0xa8] sm:$0xff] %vm272_vm0, %v1812_v52  ;;  %v1746_v62 = vld [vmem:[%s2868_s29 + $0xd0] sm:$0xff]  ;;  %v1486_v58 = vadd.f32 %v2335_v39, %v2946_v29  ;;  %v1681_v1 = vadd.f32 %v1639_v56, %v333_v19  ;;  %v2338_v12 = vadd.f32 %v2337_v53, %v2336_v36  ;;  %v1642_v6 = vadd.f32 %v1641_v61, %v1481_v4 }
 0x197   : > { %v1785_v31 = vadd.f32 %v3026_v24, %v1746_v62  ;;  %v1744_v0 = vld [vmem:[%s2868_s29 + $0xc0] sm:$0xff] }
 0x198   : > { %v1783_v8 = vadd.f32 %v3026_v24, %v1744_v0  ;;  %v1747_v40 = vld [vmem:[%s2868_s29 + $0xd8] sm:$0xff]  ;;  %v1647_v9 = vadd.f32 %v2397_v47, %v1486_v58  ;;  %1713 = vst.msk [vmem:[%s2868_s29 + $0xe0] sm:$0xff] %vm272_vm0, %v1681_v1  ;;  %v1489_v29 = vadd.f32 %v2338_v12, %v2948_v35  ;;  %v1682_v48 = vadd.f32 %v1642_v6, %v334_v60 }
 0x199   : > { %v1817_v21 = vmax.f32 %v1785_v31, 0.0  ;;  %v1786_v30 = vadd.f32 %v3026_v24, %v1747_v40  ;;  %v1745_v11 = vld [vmem:[%s2868_s29 + $0xc8] sm:$0xff] }
 0x19a   : > { %v1815_v59 = vmax.f32 %v1783_v8, 0.0  ;;  %v1784_v38 = vadd.f32 %v3026_v24, %v1745_v11  ;;  %v1683_v27 = vadd.f32 %v1647_v9, %v335_v5  ;;  %v1650_v15 = vadd.f32 %v2398_v43, %v1489_v29  ;;  %1714 = vst.msk [vmem:[%s2868_s29 + $0xe8] sm:$0xff] %vm272_vm0, %v1682_v48 }
 0x19b   : > { %1849 = vst.msk [vmem:[%s2868_s29 + $0xd0] sm:$0xff] %vm272_vm0, %v1817_v21  ;;  %v1818_v35 = vmax.f32 %v1786_v30, 0.0 }
 0x19c   : > { %1847 = vst.msk [vmem:[%s2868_s29 + $0xc0] sm:$0xff] %vm272_vm0, %v1815_v59  ;;  %v1816_v16 = vmax.f32 %v1784_v38, 0.0  ;;  %1715 = vst.msk [vmem:[%s2868_s29 + $0xf0] sm:$0xff] %vm272_vm0, %v1683_v27  ;;  %v1684_v3 = vadd.f32 %v1650_v15, %v336_v33 }
 0x19d   : > { %1850 = vst.msk [vmem:[%s2868_s29 + $0xd8] sm:$0xff] %vm272_vm0, %v1818_v35 }
 0x19e   : > { %1848 = vst.msk [vmem:[%s2868_s29 + $0xc8] sm:$0xff] %vm272_vm0, %v1816_v16  ;;  %1716 = vst.msk [vmem:[%s2868_s29 + $0xf8] sm:$0xff] %vm272_vm0, %v1684_v3 }
 0x19f   : > { %v1748_v22 = vld [vmem:[%s2868_s29 + $0xe0] sm:$0xff] }
 0x1a0   : > { %v1787_v7 = vadd.f32 %v3026_v24, %v1748_v22 }
 0x1a1   : > { %v1749_v25 = vld [vmem:[%s2868_s29 + $0xe8] sm:$0xff] }
 0x1a2   : > { %v1819_v10 = vmax.f32 %v1787_v7, 0.0  ;;  %v1788_v26 = vadd.f32 %v3026_v24, %v1749_v25 }
 0x1a3   : > { %v1750_v57 = vld [vmem:[%s2868_s29 + $0xf0] sm:$0xff] }
 0x1a4   : > { %v1789_v49 = vadd.f32 %v3026_v24, %v1750_v57  ;;  %1851 = vst.msk [vmem:[%s2868_s29 + $0xe0] sm:$0xff] %vm272_vm0, %v1819_v10  ;;  %v1820_v13 = vmax.f32 %v1788_v26, 0.0 }
 0x1a5   : > { %v1751_v28 = vld [vmem:[%s2868_s29 + $0xf8] sm:$0xff] }
 0x1a6   : > { %v1821_v32 = vmax.f32 %v1789_v49, 0.0  ;;  %v1790_v18 = vadd.f32 %v3026_v24, %v1751_v28  ;;  %1852 = vst.msk [vmem:[%s2868_s29 + $0xe8] sm:$0xff] %vm272_vm0, %v1820_v13 }
 0x1a8   : > { %1853 = vst.msk [vmem:[%s2868_s29 + $0xf0] sm:$0xff] %vm272_vm0, %v1821_v32  ;;  %v1822_v50 = vmax.f32 %v1790_v18, 0.0 }
 0x1aa   : > { %1854 = vst.msk [vmem:[%s2868_s29 + $0xf8] sm:$0xff] %vm272_vm0, %v1822_v50 }
 0x1ab PF: > { %s13_s14 = sadd.s32 1, %s2611_s14   ;;  %s3302_s12 = smov %s2607_s13 }
 0x1ac   : > { %p10_p5 = scmp.ge.s32.totalorder %s13_s14, 4   ;;  %s3303_s13 = smov %s3305_s15 }
 0x1ae   :  { %12 = sbr.rel (!%p10_p5) target bundleno = 2 (0x2), region = 76 }

// kernel: vgg19_forward.23
= control target key start
LH: loop header
LB: loop body
LE: loop exit
PB: predicated region body
PF: predicated region fallthrough
CT: control target
= control target key end

     0   :  { %vm587_vm0 = vcmask 523264   ;;  %s1718_s1 = inlined_call_operand.vmem [shape: bf16[576,128], index: 1, kind: input, shape index: {}]   ;;  %s1719_s0 = inlined_call_operand.vmem [shape: bf16[128,576], index: 0, kind: input, shape index: {}]   ;;  %s1720_s2 = inlined_call_operand.vmem [shape: f32[1,128], index: 2, kind: input, shape index: {}]   ;;  %s1721_s3 = inlined_call_operand.vmem [shape: f32[128,128], index: 3, kind: output, shape index: {}]  }
   0x1   :  { %v1271_v0 = vld [vmem:[%s1718_s1 + $0x40] sm:$0xff]   ;;  %v1275_v4 = vld [vmem:[%s1718_s1 + $0x48] sm:$0xff]   ;;  %v1279_v8 = vld [vmem:[%s1718_s1 + $0x50] sm:$0xff]  }
   0x2   :  { %v1272_v1 = vld [vmem:[%s1718_s1 + $0xc0] sm:$0xff]   ;;  %1098 = vmatprep.subr.bf16.mxu0 %v1271_v0  ;;  %v1276_v5 = vld [vmem:[%s1718_s1 + $0xc8] sm:$0xff]   ;;  %v1280_v9 = vld [vmem:[%s1718_s1 + $0xd0] sm:$0xff]  }
   0x3   :  { %v1273_v2 = vld [vmem:[%s1718_s1] sm:$0xff]   ;;  %1162 = vmatprep.subr.bf16.mxu1 %v1272_v1  ;;  %v1277_v6 = vld [vmem:[%s1718_s1 + $0x8] sm:$0xff]   ;;  %v1281_v10 = vld [vmem:[%s1718_s1 + $0x10] sm:$0xff]  }
   0x4   :  { %v1274_v3 = vld [vmem:[%s1718_s1 + $0x80] sm:$0xff]   ;;  %1099 = vmatpush3.bf16.msra.mxu0 %v1273_v2  ;;  %v1278_v7 = vld [vmem:[%s1718_s1 + $0x88] sm:$0xff]   ;;  %v1282_v11 = vld [vmem:[%s1718_s1 + $0x90] sm:$0xff]  }
   0x5   :  { %1163 = vmatpush3.bf16.msra.mxu1 %v1274_v3  ;;  %1100 = vmatprep.subr.bf16.mxu0 %v1275_v4  ;;  %v1283_v12 = vld [vmem:[%s1718_s1 + $0x58] sm:$0xff]   ;;  %v1287_v16 = vld [vmem:[%s1718_s1 + $0x60] sm:$0xff]   ;;  %v1291_v20 = vld [vmem:[%s1718_s1 + $0x68] sm:$0xff]  }
   0x6   :  { %1164 = vmatprep.subr.bf16.mxu1 %v1276_v5  ;;  %v1284_v13 = vld [vmem:[%s1718_s1 + $0xd8] sm:$0xff]   ;;  %v1288_v17 = vld [vmem:[%s1718_s1 + $0xe0] sm:$0xff]   ;;  %v1292_v21 = vld [vmem:[%s1718_s1 + $0xe8] sm:$0xff]  }
   0x7   :  { %v1285_v14 = vld [vmem:[%s1718_s1 + $0x18] sm:$0xff]   ;;  %v1289_v18 = vld [vmem:[%s1718_s1 + $0x20] sm:$0xff]   ;;  %v1293_v22 = vld [vmem:[%s1718_s1 + $0x28] sm:$0xff]  }
   0x8   :  { %1101 = vmatpush3.bf16.msra.mxu0 %v1277_v6  ;;  %v1286_v15 = vld [vmem:[%s1718_s1 + $0x98] sm:$0xff]   ;;  %v1290_v19 = vld [vmem:[%s1718_s1 + $0xa0] sm:$0xff]   ;;  %v1294_v23 = vld [vmem:[%s1718_s1 + $0xa8] sm:$0xff]  }
   0x9   :  { %1165 = vmatpush3.bf16.msra.mxu1 %v1278_v7  ;;  %1102 = vmatprep.subr.bf16.mxu0 %v1279_v8  ;;  %v1295_v24 = vld [vmem:[%s1718_s1 + $0x70] sm:$0xff]   ;;  %v1299_v28 = vld [vmem:[%s1718_s1 + $0x78] sm:$0xff]   ;;  %v1308_v35 = vld [vmem:[%s1719_s0 + $0xc] ss:$20 sps:$4 sm:$0xff]  }
   0xa   :  { %1166 = vmatprep.subr.bf16.mxu1 %v1280_v9  ;;  %v1296_v25 = vld [vmem:[%s1718_s1 + $0xf0] sm:$0xff]   ;;  %v1300_v29 = vld [vmem:[%s1718_s1 + $0xf8] sm:$0xff]   ;;  %v1309_v36 = vld [vmem:[%s1718_s1 + $0x100] sm:$0xff]   ;;  %741 = vmatprep.mubr.bf16.mxu1 %v1308_v35 }
   0xb   :  { %v1297_v26 = vld [vmem:[%s1718_s1 + $0x30] sm:$0xff]   ;;  %v1301_v30 = vld [vmem:[%s1718_s1 + $0x38] sm:$0xff]   ;;  %v1310_v37 = vld [vmem:[%s1719_s0 + $0x2c] ss:$20 sps:$4 sm:$0xff]  }
   0xc   :  { %1103 = vmatpush3.bf16.msra.mxu0 %v1281_v10  ;;  %v1298_v27 = vld [vmem:[%s1718_s1 + $0xb0] sm:$0xff]   ;;  %v1302_v31 = vld [vmem:[%s1718_s1 + $0xb8] sm:$0xff]   ;;  %v1322_v42 = vld [vmem:[%s1718_s1 + $0x108] sm:$0xff]  }
   0xd   :  { %1167 = vmatpush3.bf16.msra.mxu1 %v1282_v11  ;;  %1104 = vmatprep.subr.bf16.mxu0 %v1283_v12  ;;  %v1303_v32 = vld [vmem:[%s1719_s0] ss:$20 sps:$4 sm:$0xff]   ;;  %v1305_v33 = vld [vmem:[%s1719_s0 + $0x4] ss:$20 sps:$4 sm:$0xff]   ;;  %v1306_v34 = vld [vmem:[%s1719_s0 + $0x8] ss:$20 sps:$4 sm:$0xff]  }
   0xe   :  { %1168 = vmatprep.subr.bf16.mxu1 %v1284_v13  ;;  %644 = vmatprep.mubr.bf16.mxu0 %v1305_v33  ;;  %v1312_v38 = vld [vmem:[%s1719_s0 + $0x34] ss:$20 sps:$4 sm:$0xff]   ;;  %v1315_v40 = vld [vmem:[%s1719_s0 + $0x30] ss:$20 sps:$4 sm:$0xff]   ;;  %v1321_v45 = vld [vmem:[%s1719_s0 + $0x58] ss:$20 sps:$4 sm:$0xff]  }
   0xf   :  { %v1314_v39 = vld [vmem:[%s1719_s0 + $0x28] ss:$20 sps:$4 sm:$0xff]   ;;  %v1320_v44 = vld [vmem:[%s1719_s0 + $0x50] ss:$20 sps:$4 sm:$0xff]   ;;  %v1327_v50 = vld [vmem:[%s1719_s0 + $0x78] ss:$20 sps:$4 sm:$0xff]  }
  0x10   :  { %1105 = vmatpush3.bf16.msra.mxu0 %v1285_v14  ;;  %v1316_v41 = vld [vmem:[%s1719_s0 + $0x54] ss:$20 sps:$4 sm:$0xff]   ;;  %v1318_v43 = vld [vmem:[%s1719_s0 + $0x5c] ss:$20 sps:$4 sm:$0xff]   ;;  %v1325_v48 = vld [vmem:[%s1719_s0 + $0x84] ss:$20 sps:$4 sm:$0xff]  }
  0x11   :  { %1169 = vmatpush3.bf16.msra.mxu1 %v1286_v15  ;;  %1106 = vmatprep.subr.bf16.mxu0 %v1287_v16  ;;  %v1335_v46 = vld [vmem:[%s1718_s1 + $0x110] sm:$0xff]   ;;  %v1348_v49 = vld [vmem:[%s1718_s1 + $0x118] sm:$0xff]   ;;  %v1331_v53 = vld [vmem:[%s1719_s0 + $0xac] ss:$20 sps:$4 sm:$0xff]  }
  0x12   :  { %1170 = vmatprep.subr.bf16.mxu1 %v1288_v17  ;;  %v1323_v47 = vld [vmem:[%s1719_s0 + $0x7c] ss:$20 sps:$4 sm:$0xff]   ;;  %v1328_v51 = vld [vmem:[%s1719_s0 + $0x80] ss:$20 sps:$4 sm:$0xff]   ;;  %v1329_v52 = vld [vmem:[%s1719_s0 + $0xa4] ss:$20 sps:$4 sm:$0xff]  }
  0x13   :  { %v1333_v54 = vld [vmem:[%s1719_s0 + $0xa0] ss:$20 sps:$4 sm:$0xff]   ;;  %v1334_v55 = vld [vmem:[%s1719_s0 + $0xa8] ss:$20 sps:$4 sm:$0xff]   ;;  %v1341_v59 = vld [vmem:[%s1719_s0 + $0xd0] ss:$20 sps:$4 sm:$0xff]  }
  0x14   :  { %1107 = vmatpush3.bf16.msra.mxu0 %v1289_v18  ;;  %v1336_v56 = vld [vmem:[%s1719_s0 + $0xcc] ss:$20 sps:$4 sm:$0xff]   ;;  %v1338_v57 = vld [vmem:[%s1719_s0 + $0xd4] ss:$20 sps:$4 sm:$0xff]   ;;  %v1344_v61 = vld [vmem:[%s1719_s0 + $0xfc] ss:$20 sps:$4 sm:$0xff]  }
  0x15   :  { %1171 = vmatpush3.bf16.msra.mxu1 %v1290_v19  ;;  %1108 = vmatprep.subr.bf16.mxu0 %v1291_v20  ;;  %v1340_v58 = vld [vmem:[%s1719_s0 + $0xc8] ss:$20 sps:$4 sm:$0xff]   ;;  %v1346_v62 = vld [vmem:[%s1719_s0 + $0xf0] ss:$20 sps:$4 sm:$0xff]   ;;  %v1347_v63 = vld [vmem:[%s1719_s0 + $0xf8] ss:$20 sps:$4 sm:$0xff]  }
  0x16   :  { %1172 = vmatprep.subr.bf16.mxu1 %v1292_v21  ;;  %v1342_v60 = vld [vmem:[%s1719_s0 + $0xf4] ss:$20 sps:$4 sm:$0xff]   ;;  %v1349_v0 = vld [vmem:[%s1719_s0 + $0x11c] ss:$20 sps:$4 sm:$0xff]   ;;  %v1351_v1 = vld [vmem:[%s1719_s0 + $0x124] ss:$20 sps:$4 sm:$0xff]  }
  0x17   :  { %v1353_v2 = vld [vmem:[%s1719_s0 + $0x118] ss:$20 sps:$4 sm:$0xff]   ;;  %v1354_v3 = vld [vmem:[%s1719_s0 + $0x120] ss:$20 sps:$4 sm:$0xff]   ;;  %v1355_v4 = vld [vmem:[%s1719_s0 + $0x10] ss:$20 sps:$4 sm:$0xff]  }
  0x18   :  { %1109 = vmatpush3.bf16.msra.mxu0 %v1293_v22  ;;  %v1356_v5 = vld [vmem:[%s1719_s0 + $0xb0] ss:$20 sps:$4 sm:$0xff]   ;;  %v1357_v6 = vld [vmem:[%s1719_s0 + $0x38] ss:$20 sps:$4 sm:$0xff]   ;;  %v1359_v8 = vld [vmem:[%s1719_s0 + $0x60] ss:$20 sps:$4 sm:$0xff]  }
  0x19   :  { %1173 = vmatpush3.bf16.msra.mxu1 %v1294_v23  ;;  %1110 = vmatprep.subr.bf16.mxu0 %v1295_v24  ;;  %v1358_v7 = vld [vmem:[%s1719_s0 + $0xd8] ss:$20 sps:$4 sm:$0xff]   ;;  %v1360_v9 = vld [vmem:[%s1719_s0 + $0x100] ss:$20 sps:$4 sm:$0xff]   ;;  %v1361_v10 = vld [vmem:[%s1719_s0 + $0x88] ss:$20 sps:$4 sm:$0xff]  }
  0x1a   :  { %1174 = vmatprep.subr.bf16.mxu1 %v1296_v25  ;;  %v1362_v11 = vld [vmem:[%s1719_s0 + $0x128] ss:$20 sps:$4 sm:$0xff]  }
  0x1c   :  { %1111 = vmatpush3.bf16.msra.mxu0 %v1297_v26 }
  0x1d   :  { %1175 = vmatpush3.bf16.msra.mxu1 %v1298_v27  ;;  %1112 = vmatprep.subr.bf16.mxu0 %v1299_v28 }
  0x1e   :  { %1176 = vmatprep.subr.bf16.mxu1 %v1300_v29 }
  0x20   :  { %1113 = vmatpush3.bf16.msra.mxu0 %v1301_v30 }
  0x21   :  { %1177 = vmatpush3.bf16.msra.mxu1 %v1302_v31  ;;  %1238 = vmatprep.subr.bf16.mxu0 %v1309_v36 }
  0x22   :  { %1262 = vmatprep.subr.bf16.mxu1 %v1309_v36 }
  0x23   :  { %645 = vmatmul.mubr.bf16.vlgmr.msra.gmra.mrb[0].mxu0 %v1303_v32 }
  0x24   :  { %742 = vmatmul.mubr.bf16.vlgmr.msra.gmra.mrb[0].mxu1 %v1306_v34  ;;  %1239 = vmatpush3.bf16.msra.mxu0 %v1309_v36 }
  0x25   :  { %1266 = vmatpush3.bf16.msra.mxu1 %v1309_v36  ;;  %652 = vmatprep.mubr.bf16.mxu0 %v1310_v37 }
  0x26   :  { %749 = vmatprep.mubr.bf16.mxu1 %v1312_v38  ;;  %1240 = vmatprep.subr.bf16.mxu0 %v1322_v42 }
  0x27   :  { %1263 = vmatprep.subr.bf16.mxu1 %v1322_v42 }
  0x28   :  { %1241 = vmatpush3.bf16.msra.mxu0 %v1322_v42 }
  0x29   :  { %1267 = vmatpush3.bf16.msra.mxu1 %v1322_v42  ;;  %1242 = vmatprep.subr.bf16.mxu0 %v1335_v46 }
  0x2a   :  { %1264 = vmatprep.subr.bf16.mxu1 %v1335_v46 }
  0x2b   :  { %653 = vmatmul.mubr.bf16.gmra.mrb[4].mxu0 %v1314_v39 }
  0x2c   :  { %750 = vmatmul.mubr.bf16.gmra.mrb[4].mxu1 %v1315_v40  ;;  %660 = vmatprep.mubr.bf16.mxu0 %v1316_v41 }
  0x2d   :  { %757 = vmatprep.mubr.bf16.mxu1 %v1318_v43  ;;  %1243 = vmatpush3.bf16.msra.mxu0 %v1335_v46 }
  0x2e   :  { %1268 = vmatpush3.bf16.msra.mxu1 %v1335_v46  ;;  %1244 = vmatprep.subr.bf16.mxu0 %v1348_v49 }
  0x2f   :  { %1265 = vmatprep.subr.bf16.mxu1 %v1348_v49 }
  0x31   :  { %1245 = vmatpush3.bf16.msra.mxu0 %v1348_v49 }
  0x32   :  { %1269 = vmatpush3.bf16.msra.mxu1 %v1348_v49 }
  0x33   :  { %661 = vmatmul.mubr.bf16.gmra.mrb[8].mxu0 %v1320_v44 }
  0x34   :  { %758 = vmatmul.mubr.bf16.gmra.mrb[8].mxu1 %v1321_v45  ;;  %668 = vmatprep.mubr.bf16.mxu0 %v1323_v47 }
  0x35   :  { %765 = vmatprep.mubr.bf16.mxu1 %v1325_v48 }
  0x3b   :  { %669 = vmatmul.mubr.bf16.gmra.mrb[12].mxu0 %v1327_v50 }
  0x3c   :  { %766 = vmatmul.mubr.bf16.gmra.mrb[12].mxu1 %v1328_v51  ;;  %676 = vmatprep.mubr.bf16.mxu0 %v1329_v52 }
  0x3d   :  { %773 = vmatprep.mubr.bf16.mxu1 %v1331_v53 }
  0x43   :  { %677 = vmatmul.mubr.bf16.gmra.mrb[16].mxu0 %v1333_v54 }
  0x44   :  { %774 = vmatmul.mubr.bf16.gmra.mrb[16].mxu1 %v1334_v55  ;;  %684 = vmatprep.mubr.bf16.mxu0 %v1336_v56 }
  0x45   :  { %781 = vmatprep.mubr.bf16.mxu1 %v1338_v57 }
  0x4b   :  { %685 = vmatmul.mubr.bf16.gmra.mrb[20].mxu0 %v1340_v58 }
  0x4c   :  { %782 = vmatmul.mubr.bf16.gmra.mrb[20].mxu1 %v1341_v59  ;;  %692 = vmatprep.mubr.bf16.mxu0 %v1342_v60 }
  0x4d   :  { %789 = vmatprep.mubr.bf16.mxu1 %v1344_v61 }
  0x53   :  { %693 = vmatmul.mubr.bf16.gmra.mrb[24].mxu0 %v1346_v62 }
  0x54   :  { %790 = vmatmul.mubr.bf16.gmra.mrb[24].mxu1 %v1347_v63  ;;  %700 = vmatprep.mubr.bf16.mxu0 %v1349_v0 }
  0x55   :  { %797 = vmatprep.mubr.bf16.mxu1 %v1351_v1 }
  0x5b   :  { %701 = vmatmul.mubr.bf16.gmra.mrb[28].mxu0 %v1353_v2 }
  0x5c   :  { %798 = vmatmul.mubr.bf16.gmra.mrb[28].mxu1 %v1354_v3  ;;  %1246 = vmatprep.mubr.msk.bf16.mxu0 %vm587_vm0, %v1355_v4 }
  0x5d   :  { %1254 = vmatprep.mubr.msk.bf16.mxu1 %vm587_vm0, %v1356_v5 }
  0x63   :  { %1247 = vmatmul.mubr.msk.bf16.vlgmr.msra.gmra.mrb[32].mxu0 %vm587_vm0, %v1357_v6 }
  0x64   :  { %1255 = vmatmul.mubr.msk.bf16.vlgmr.msra.gmra.mrb[32].mxu1 %vm587_vm0, %v1358_v7  ;;  %1250 = vmatprep.mubr.msk.bf16.mxu0 %vm587_vm0, %v1359_v8 }
  0x65   :  { %1258 = vmatprep.mubr.msk.bf16.mxu1 %vm587_vm0, %v1360_v9 }
  0x6b   :  { %1251 = vmatmul.mubr.msk.bf16.gmra.mrb[36].mxu0 %vm587_vm0, %v1361_v10 }
  0x6c   :  { %1259 = vmatmul.mubr.msk.bf16.gmra.mrb[36].mxu1 %vm587_vm0, %v1362_v11 }
  0xf6   :  { %v1114_v12 = vpop.f32.mrb[0].mxu0 }
  0xf7   :  { %v1178_v13 = vpop.f32.mrb[0].mxu1  ;;  %v1115_v14 = vpop.f32.mrb[1].mxu0 }
  0xf8   :  { %v1116_v15 = vadd.f32 %v1115_v14, %v1114_v12  ;;  %v1179_v16 = vpop.f32.mrb[1].mxu1  ;;  %v1117_v17 = vpop.f32.mrb[2].mxu0 }
  0xf9   :  { %v1180_v18 = vadd.f32 %v1179_v16, %v1178_v13  ;;  %v1181_v19 = vpop.f32.mrb[2].mxu1  ;;  %v1118_v20 = vpop.f32.mrb[3].mxu0 }
  0xfa   :  { %v1119_v21 = vadd.f32 %v1118_v20, %v1117_v17  ;;  %v1182_v22 = vpop.f32.mrb[3].mxu1 }
  0xfb   :  { %v1183_v23 = vadd.f32 %v1182_v22, %v1181_v19  ;;  %v1619_v24 = vadd.f32 %v1180_v18, %v1116_v15 }
  0xfd   :  { %v1621_v25 = vadd.f32 %v1183_v23, %v1119_v21 }
  0xfe   :  { %v1120_v26 = vpop.f32.mrb[4].mxu0 }
  0xff   :  { %v1184_v27 = vpop.f32.mrb[4].mxu1  ;;  %v1121_v28 = vpop.f32.mrb[5].mxu0 }
 0x100   :  { %v1122_v29 = vadd.f32 %v1121_v28, %v1120_v26  ;;  %v1185_v30 = vpop.f32.mrb[5].mxu1  ;;  %v1123_v31 = vpop.f32.mrb[6].mxu0 }
 0x101   :  { %v1186_v32 = vadd.f32 %v1185_v30, %v1184_v27  ;;  %v1187_v33 = vpop.f32.mrb[6].mxu1  ;;  %v1124_v34 = vpop.f32.mrb[7].mxu0 }
 0x102   :  { %v1125_v35 = vadd.f32 %v1124_v34, %v1123_v31  ;;  %v1188_v36 = vpop.f32.mrb[7].mxu1 }
 0x103   :  { %v1189_v37 = vadd.f32 %v1188_v36, %v1187_v33  ;;  %v1623_v38 = vadd.f32 %v1186_v32, %v1122_v29 }
 0x105   :  { %v1625_v39 = vadd.f32 %v1189_v37, %v1125_v35 }
 0x106   :  { %v1126_v40 = vpop.f32.mrb[8].mxu0 }
 0x107   :  { %v1190_v41 = vpop.f32.mrb[8].mxu1  ;;  %v1127_v42 = vpop.f32.mrb[9].mxu0 }
 0x108   :  { %v1128_v43 = vadd.f32 %v1127_v42, %v1126_v40  ;;  %v1191_v44 = vpop.f32.mrb[9].mxu1  ;;  %v1129_v45 = vpop.f32.mrb[10].mxu0 }
 0x109   :  { %v1192_v46 = vadd.f32 %v1191_v44, %v1190_v41  ;;  %v1193_v47 = vpop.f32.mrb[10].mxu1  ;;  %v1130_v48 = vpop.f32.mrb[11].mxu0 }
 0x10a   :  { %v1131_v49 = vadd.f32 %v1130_v48, %v1129_v45  ;;  %v1194_v50 = vpop.f32.mrb[11].mxu1 }
 0x10b   :  { %v1195_v51 = vadd.f32 %v1194_v50, %v1193_v47  ;;  %v1627_v52 = vadd.f32 %v1192_v46, %v1128_v43 }
 0x10d   :  { %v1629_v53 = vadd.f32 %v1195_v51, %v1131_v49 }
 0x10e   :  { %v1132_v54 = vpop.f32.mrb[12].mxu0 }
 0x10f   :  { %v1196_v55 = vpop.f32.mrb[12].mxu1  ;;  %v1133_v56 = vpop.f32.mrb[13].mxu0 }
 0x110   :  { %v1134_v57 = vadd.f32 %v1133_v56, %v1132_v54  ;;  %v1197_v58 = vpop.f32.mrb[13].mxu1  ;;  %v1135_v59 = vpop.f32.mrb[14].mxu0 }
 0x111   :  { %v1198_v60 = vadd.f32 %v1197_v58, %v1196_v55  ;;  %v1199_v61 = vpop.f32.mrb[14].mxu1  ;;  %v1136_v62 = vpop.f32.mrb[15].mxu0 }
 0x112   :  { %v1137_v63 = vadd.f32 %v1136_v62, %v1135_v59  ;;  %v1200_v0 = vpop.f32.mrb[15].mxu1 }
 0x113   :  { %v1201_v1 = vadd.f32 %v1200_v0, %v1199_v61  ;;  %v1631_v2 = vadd.f32 %v1198_v60, %v1134_v57 }
 0x115   :  { %v1633_v3 = vadd.f32 %v1201_v1, %v1137_v63 }
 0x116   :  { %v1138_v4 = vpop.f32.mrb[16].mxu0 }
 0x117   :  { %v1202_v5 = vpop.f32.mrb[16].mxu1  ;;  %v1139_v6 = vpop.f32.mrb[17].mxu0 }
 0x118   :  { %v1140_v7 = vadd.f32 %v1139_v6, %v1138_v4  ;;  %v1203_v8 = vpop.f32.mrb[17].mxu1  ;;  %v1141_v9 = vpop.f32.mrb[18].mxu0 }
 0x119   :  { %v1204_v10 = vadd.f32 %v1203_v8, %v1202_v5  ;;  %v1205_v11 = vpop.f32.mrb[18].mxu1  ;;  %v1142_v12 = vpop.f32.mrb[19].mxu0  ;;  %v1643_v8 = vld [vmem:[%s1720_s2] ss:$0 sm:$0xff] }
 0x11a   :  { %v1143_v13 = vadd.f32 %v1142_v12, %v1141_v9  ;;  %v1206_v14 = vpop.f32.mrb[19].mxu1 }
 0x11b   :  { %v1207_v15 = vadd.f32 %v1206_v14, %v1205_v11  ;;  %v776_v16 = vadd.f32 %v1204_v10, %v1140_v7 }
 0x11d   :  { %v779_v17 = vadd.f32 %v1207_v15, %v1143_v13 }
 0x11e   :  { %v1144_v18 = vpop.f32.mrb[20].mxu0 }
 0x11f   :  { %v1208_v19 = vpop.f32.mrb[20].mxu1  ;;  %v1145_v20 = vpop.f32.mrb[21].mxu0 }
 0x120   :  { %v1146_v21 = vadd.f32 %v1145_v20, %v1144_v18  ;;  %v1209_v22 = vpop.f32.mrb[21].mxu1  ;;  %v1147_v23 = vpop.f32.mrb[22].mxu0 }
 0x121   :  { %v1210_v26 = vadd.f32 %v1209_v22, %v1208_v19  ;;  %v1211_v27 = vpop.f32.mrb[22].mxu1  ;;  %v1148_v28 = vpop.f32.mrb[23].mxu0 }
 0x122   :  { %v1149_v29 = vadd.f32 %v1148_v28, %v1147_v23  ;;  %v1212_v30 = vpop.f32.mrb[23].mxu1 }
 0x123   :  { %v1213_v31 = vadd.f32 %v1212_v30, %v1211_v27  ;;  %v784_v32 = vadd.f32 %v1210_v26, %v1146_v21 }
 0x125   :  { %v787_v33 = vadd.f32 %v1213_v31, %v1149_v29 }
 0x126   :  { %v1150_v34 = vpop.f32.mrb[24].mxu0 }
 0x127   :  { %v1214_v35 = vpop.f32.mrb[24].mxu1  ;;  %v1151_v36 = vpop.f32.mrb[25].mxu0 }
 0x128   :  { %v1152_v37 = vadd.f32 %v1151_v36, %v1150_v34  ;;  %v1215_v40 = vpop.f32.mrb[25].mxu1  ;;  %v1153_v41 = vpop.f32.mrb[26].mxu0 }
 0x129   :  { %v1216_v42 = vadd.f32 %v1215_v40, %v1214_v35  ;;  %v1217_v43 = vpop.f32.mrb[26].mxu1  ;;  %v1154_v44 = vpop.f32.mrb[27].mxu0 }
 0x12a   :  { %v1155_v45 = vadd.f32 %v1154_v44, %v1153_v41  ;;  %v1218_v46 = vpop.f32.mrb[27].mxu1 }
 0x12b   :  { %v1219_v47 = vadd.f32 %v1218_v46, %v1217_v43  ;;  %v1635_v48 = vadd.f32 %v1216_v42, %v1152_v37 }
 0x12d   :  { %v1637_v49 = vadd.f32 %v1219_v47, %v1155_v45 }
 0x12e   :  { %v1156_v50 = vpop.f32.mrb[28].mxu0 }
 0x12f   :  { %v1220_v51 = vpop.f32.mrb[28].mxu1  ;;  %v1157_v54 = vpop.f32.mrb[29].mxu0 }
 0x130   :  { %v1158_v55 = vadd.f32 %v1157_v54, %v1156_v50  ;;  %v1221_v56 = vpop.f32.mrb[29].mxu1  ;;  %v1159_v57 = vpop.f32.mrb[30].mxu0 }
 0x131   :  { %v1222_v58 = vadd.f32 %v1221_v56, %v1220_v51  ;;  %v1223_v59 = vpop.f32.mrb[30].mxu1  ;;  %v1160_v60 = vpop.f32.mrb[31].mxu0 }
 0x132   :  { %v1161_v61 = vadd.f32 %v1160_v60, %v1159_v57  ;;  %v1224_v62 = vpop.f32.mrb[31].mxu1 }
 0x133   :  { %v1225_v63 = vadd.f32 %v1224_v62, %v1223_v59  ;;  %v800_v0 = vadd.f32 %v1222_v58, %v1158_v55 }
 0x135   :  { %v803_v1 = vadd.f32 %v1225_v63, %v1161_v61 }
 0x136   :  { %v1248_v4 = vpop.f32.mrb[32].mxu0 }
 0x137   :  { %v849_v5 = vadd.f32 %v1248_v4, %v1623_v38  ;;  %v1256_v6 = vpop.f32.mrb[32].mxu1  ;;  %v840_v7 = vpop.f32.mrb[33].mxu0 }
 0x138   :  { %v881_v9 = vadd.f32 %v1256_v6, %v784_v32  ;;  %v841_v10 = vadd.f32 %v840_v7, %v1619_v24  ;;  %v872_v11 = vpop.f32.mrb[33].mxu1  ;;  %v1249_v12 = vpop.f32.mrb[34].mxu0 }
 0x139   :  { %v873_v13 = vadd.f32 %v872_v11, %v776_v16  ;;  %v852_v14 = vadd.f32 %v1249_v12, %v1625_v39  ;;  %v1257_v15 = vpop.f32.mrb[34].mxu1  ;;  %v843_v18 = vpop.f32.mrb[35].mxu0  ;;  %v963_v21 = vadd.f32 %v1643_v8, %v849_v5 }
 0x13a   :  { %v884_v19 = vadd.f32 %v1257_v15, %v787_v33  ;;  %v844_v38 = vadd.f32 %v843_v18, %v1621_v25  ;;  %v875_v20 = vpop.f32.mrb[35].mxu1  ;;  %v971_v23 = vadd.f32 %v1643_v8, %v881_v9  ;;  %v961_v26 = vadd.f32 %v1643_v8, %v841_v10 }
 0x13b   :  { %v876_v22 = vadd.f32 %v875_v20, %v779_v17  ;;  %v979_v27 = vmax.f32 %v963_v21, 0.0  ;;  %v969_v24 = vadd.f32 %v1643_v8, %v873_v13  ;;  %v964_v16 = vadd.f32 %v1643_v8, %v852_v14 }
 0x13c   :  { %v987_v28 = vmax.f32 %v971_v23, 0.0  ;;  %v977_v39 = vmax.f32 %v961_v26, 0.0  ;;  %v972_v29 = vadd.f32 %v1643_v8, %v884_v19  ;;  %v962_v30 = vadd.f32 %v1643_v8, %v844_v38 }
 0x13d   :  { %995 = vst [vmem:[%s1721_s3 + $0x10] sm:$0xff] %v979_v27  ;;  %v985_v17 = vmax.f32 %v969_v24, 0.0  ;;  %v980_v31 = vmax.f32 %v964_v16, 0.0  ;;  %v970_v32 = vadd.f32 %v1643_v8, %v876_v22 }
 0x13e   :  { %v1252_v25 = vpop.f32.mrb[36].mxu0  ;;  %1003 = vst [vmem:[%s1721_s3 + $0x50] sm:$0xff] %v987_v28  ;;  %993 = vst [vmem:[%s1721_s3] sm:$0xff] %v977_v39  ;;  %v988_v36 = vmax.f32 %v972_v29, 0.0  ;;  %v978_v37 = vmax.f32 %v962_v30, 0.0 }
 0x13f   :  { %v865_v33 = vadd.f32 %v1252_v25, %v1631_v2  ;;  %v1260_v34 = vpop.f32.mrb[36].mxu1  ;;  %v856_v35 = vpop.f32.mrb[37].mxu0  ;;  %1001 = vst [vmem:[%s1721_s3 + $0x40] sm:$0xff] %v985_v17  ;;  %996 = vst [vmem:[%s1721_s3 + $0x18] sm:$0xff] %v980_v31  ;;  %v986_v2 = vmax.f32 %v970_v32, 0.0 }
 0x140   :  { %v897_v40 = vadd.f32 %v1260_v34, %v800_v0  ;;  %v857_v41 = vadd.f32 %v856_v35, %v1627_v52  ;;  %v888_v42 = vpop.f32.mrb[37].mxu1  ;;  %v1253_v43 = vpop.f32.mrb[38].mxu0  ;;  %1004 = vst [vmem:[%s1721_s3 + $0x58] sm:$0xff] %v988_v36  ;;  %994 = vst [vmem:[%s1721_s3 + $0x8] sm:$0xff] %v978_v37 }
 0x141   :  { %v889_v44 = vadd.f32 %v888_v42, %v1635_v48  ;;  %v868_v45 = vadd.f32 %v1253_v43, %v1633_v3  ;;  %v1261_v46 = vpop.f32.mrb[38].mxu1  ;;  %v859_v47 = vpop.f32.mrb[39].mxu0  ;;  %1002 = vst [vmem:[%s1721_s3 + $0x48] sm:$0xff] %v986_v2  ;;  %v967_v3 = vadd.f32 %v1643_v8, %v865_v33 }
 0x142   :  { %v900_v52 = vadd.f32 %v1261_v46, %v803_v1  ;;  %v860_v50 = vadd.f32 %v859_v47, %v1629_v53  ;;  %v891_v51 = vpop.f32.mrb[39].mxu1  ;;  %v975_v54 = vadd.f32 %v1643_v8, %v897_v40  ;;  %v965_v55 = vadd.f32 %v1643_v8, %v857_v41 }
 0x143   :  { %v892_v48 = vadd.f32 %v891_v51, %v1637_v49  ;;  %v983_v56 = vmax.f32 %v967_v3, 0.0  ;;  %v973_v57 = vadd.f32 %v1643_v8, %v889_v44  ;;  %v968_v58 = vadd.f32 %v1643_v8, %v868_v45 }
 0x144   :  { %v991_v59 = vmax.f32 %v975_v54, 0.0  ;;  %v981_v53 = vmax.f32 %v965_v55, 0.0  ;;  %v976_v60 = vadd.f32 %v1643_v8, %v900_v52  ;;  %v966_v61 = vadd.f32 %v1643_v8, %v860_v50 }
 0x145   :  { %999 = vst [vmem:[%s1721_s3 + $0x30] sm:$0xff] %v983_v56  ;;  %v989_v49 = vmax.f32 %v973_v57, 0.0  ;;  %v984_v62 = vmax.f32 %v968_v58, 0.0  ;;  %v974_v63 = vadd.f32 %v1643_v8, %v892_v48 }
 0x146   :  { %1007 = vst [vmem:[%s1721_s3 + $0x70] sm:$0xff] %v991_v59  ;;  %997 = vst [vmem:[%s1721_s3 + $0x20] sm:$0xff] %v981_v53  ;;  %v992_v0 = vmax.f32 %v976_v60, 0.0  ;;  %v982_v1 = vmax.f32 %v966_v61, 0.0 }
 0x147   :  { %1005 = vst [vmem:[%s1721_s3 + $0x60] sm:$0xff] %v989_v49  ;;  %1000 = vst [vmem:[%s1721_s3 + $0x38] sm:$0xff] %v984_v62  ;;  %v990_v4 = vmax.f32 %v974_v63, 0.0 }
 0x148   :  { %1008 = vst [vmem:[%s1721_s3 + $0x78] sm:$0xff] %v992_v0  ;;  %998 = vst [vmem:[%s1721_s3 + $0x28] sm:$0xff] %v982_v1 }
 0x149   :  { %1006 = vst [vmem:[%s1721_s3 + $0x68] sm:$0xff] %v990_v4 }

// kernel: vgg19_forward.25
= control target key start
LH: loop header
LB: loop body
LE: loop exit
PB: predicated region body
PF: predicated region fallthrough
CT: control target
= control target key end

     0   :  { %s158_s0 = inlined_call_operand.vmem [shape: f32[8,2,4,256], index: 0, kind: input, shape index: {}]   ;;  %s159_s1 = inlined_call_operand.vmem [shape: f32[8,4,128], index: 1, kind: output, shape index: {}]  }
   0x1   :  { %v8_v0 = vld [vmem:[%s158_s0] sm:$0xff]  ;;  %v9_v1 = vld [vmem:[%s158_s0 + $0x8] sm:$0xff]  ;;  %v10_v2 = vld [vmem:[%s158_s0 + $0x10] sm:$0xff] }
   0x2   :  { %v24_v3 = vmax.f32 %v8_v0, %v9_v1  ;;  %v11_v4 = vld [vmem:[%s158_s0 + $0x18] sm:$0xff]  ;;  %v12_v5 = vld [vmem:[%s158_s0 + $0x20] sm:$0xff]  ;;  %v13_v6 = vld [vmem:[%s158_s0 + $0x28] sm:$0xff] }
   0x3   :  { %v25_v7 = vmax.f32 %v10_v2, %v11_v4  ;;  %v26_v8 = vmax.f32 %v12_v5, %v13_v6  ;;  %v14_v9 = vld [vmem:[%s158_s0 + $0x30] sm:$0xff]  ;;  %v15_v10 = vld [vmem:[%s158_s0 + $0x38] sm:$0xff]  ;;  %v16_v11 = vld [vmem:[%s158_s0 + $0x40] sm:$0xff] }
   0x4   :  { %v40_v12 = vrot.slane %v24_v3, 4  ;;  %v27_v13 = vmax.f32 %v14_v9, %v15_v10  ;;  %v17_v14 = vld [vmem:[%s158_s0 + $0x48] sm:$0xff]  ;;  %v18_v15 = vld [vmem:[%s158_s0 + $0x50] sm:$0xff]  ;;  %v19_v16 = vld [vmem:[%s158_s0 + $0x58] sm:$0xff] }
   0x5   :  { %v41_v17 = vrot.slane %v25_v7, 4  ;;  %v42_v18 = vrot.slane %v26_v8, 4  ;;  %v28_v19 = vmax.f32 %v16_v11, %v17_v14  ;;  %v29_v20 = vmax.f32 %v18_v15, %v19_v16  ;;  %v20_v21 = vld [vmem:[%s158_s0 + $0x60] sm:$0xff]  ;;  %v21_v22 = vld [vmem:[%s158_s0 + $0x68] sm:$0xff]  ;;  %v22_v23 = vld [vmem:[%s158_s0 + $0x70] sm:$0xff] }
   0x6   :  { %v56_v24 = vmax.f32 %v24_v3, %v40_v12  ;;  %v43_v25 = vrot.slane %v27_v13, 4  ;;  %v30_v26 = vmax.f32 %v20_v21, %v21_v22  ;;  %v23_v27 = vld [vmem:[%s158_s0 + $0x78] sm:$0xff] }
   0x7   :  { %v57_v28 = vmax.f32 %v25_v7, %v41_v17  ;;  %v58_v29 = vmax.f32 %v26_v8, %v42_v18  ;;  %v44_v30 = vrot.slane %v28_v19, 4  ;;  %v45_v31 = vrot.slane %v29_v20, 4 }
   0x8   :  { %64 = vst [vmem:[%s159_s1] sm:$0xf] %v56_v24  ;;  %v59_v32 = vmax.f32 %v27_v13, %v43_v25  ;;  %v46_v33 = vrot.slane %v30_v26, 4  ;;  %v31_v34 = vmax.f32 %v22_v23, %v23_v27 }
   0x9   :  { %65 = vst [vmem:[%s159_s1 + $0x4] sm:$0xf] %v57_v28  ;;  %66 = vst [vmem:[%s159_s1 + $0x8] sm:$0xf] %v58_v29  ;;  %v60_v35 = vmax.f32 %v28_v19, %v44_v30  ;;  %v61_v36 = vmax.f32 %v29_v20, %v45_v31 }
   0xa   :  { %67 = vst [vmem:[%s159_s1 + $0xc] sm:$0xf] %v59_v32  ;;  %v62_v37 = vmax.f32 %v30_v26, %v46_v33  ;;  %v47_v38 = vrot.slane %v31_v34, 4 }
   0xb   :  { %68 = vst [vmem:[%s159_s1 + $0x10] sm:$0xf] %v60_v35  ;;  %69 = vst [vmem:[%s159_s1 + $0x14] sm:$0xf] %v61_v36 }
   0xc   :  { %70 = vst [vmem:[%s159_s1 + $0x18] sm:$0xf] %v62_v37  ;;  %v63_v39 = vmax.f32 %v31_v34, %v47_v38 }
   0xe   :  { %71 = vst [vmem:[%s159_s1 + $0x1c] sm:$0xf] %v63_v39 }

// kernel: vgg19_forward.24
= control target key start
LH: loop header
LB: loop body
LE: loop exit
PB: predicated region body
PF: predicated region fallthrough
CT: control target
= control target key end

     0   :  { %s2914_s1 = inlined_call_operand.vmem [shape: bf16[1152,128], index: 1, kind: input, shape index: {}]   ;;  %s2915_s0 = inlined_call_operand.vmem [shape: bf16[128,1152], index: 0, kind: input, shape index: {}]   ;;  %s2916_s2 = inlined_call_operand.vmem [shape: f32[1,128], index: 2, kind: input, shape index: {}]   ;;  %s2917_s3 = inlined_call_operand.vmem [shape: f32[128,128], index: 3, kind: output, shape index: {}]  }
   0x1   :  { %v2136_v0 = vld [vmem:[%s2914_s1 + $0x40] sm:$0xff]   ;;  %v2140_v4 = vld [vmem:[%s2914_s1 + $0x48] sm:$0xff]   ;;  %v2144_v8 = vld [vmem:[%s2914_s1 + $0x50] sm:$0xff]  }
   0x2   :  { %v2137_v1 = vld [vmem:[%s2914_s1 + $0xc0] sm:$0xff]   ;;  %1815 = vmatprep.subr.bf16.mxu0 %v2136_v0  ;;  %v2141_v5 = vld [vmem:[%s2914_s1 + $0xc8] sm:$0xff]   ;;  %v2145_v9 = vld [vmem:[%s2914_s1 + $0xd0] sm:$0xff]  }
   0x3   :  { %v2138_v2 = vld [vmem:[%s2914_s1] sm:$0xff]   ;;  %1879 = vmatprep.subr.bf16.mxu1 %v2137_v1  ;;  %v2142_v6 = vld [vmem:[%s2914_s1 + $0x8] sm:$0xff]   ;;  %v2146_v10 = vld [vmem:[%s2914_s1 + $0x10] sm:$0xff]  }
   0x4   :  { %v2139_v3 = vld [vmem:[%s2914_s1 + $0x80] sm:$0xff]   ;;  %1816 = vmatpush3.bf16.msra.mxu0 %v2138_v2  ;;  %v2143_v7 = vld [vmem:[%s2914_s1 + $0x88] sm:$0xff]   ;;  %v2147_v11 = vld [vmem:[%s2914_s1 + $0x90] sm:$0xff]  }
   0x5   :  { %1880 = vmatpush3.bf16.msra.mxu1 %v2139_v3  ;;  %1817 = vmatprep.subr.bf16.mxu0 %v2140_v4  ;;  %v2148_v12 = vld [vmem:[%s2914_s1 + $0x58] sm:$0xff]   ;;  %v2152_v16 = vld [vmem:[%s2914_s1 + $0x60] sm:$0xff]   ;;  %v2156_v20 = vld [vmem:[%s2914_s1 + $0x68] sm:$0xff]  }
   0x6   :  { %1881 = vmatprep.subr.bf16.mxu1 %v2141_v5  ;;  %v2149_v13 = vld [vmem:[%s2914_s1 + $0xd8] sm:$0xff]   ;;  %v2153_v17 = vld [vmem:[%s2914_s1 + $0xe0] sm:$0xff]   ;;  %v2157_v21 = vld [vmem:[%s2914_s1 + $0xe8] sm:$0xff]  }
   0x7   :  { %v2150_v14 = vld [vmem:[%s2914_s1 + $0x18] sm:$0xff]   ;;  %v2154_v18 = vld [vmem:[%s2914_s1 + $0x20] sm:$0xff]   ;;  %v2158_v22 = vld [vmem:[%s2914_s1 + $0x28] sm:$0xff]  }
   0x8   :  { %1818 = vmatpush3.bf16.msra.mxu0 %v2142_v6  ;;  %v2151_v15 = vld [vmem:[%s2914_s1 + $0x98] sm:$0xff]   ;;  %v2155_v19 = vld [vmem:[%s2914_s1 + $0xa0] sm:$0xff]   ;;  %v2159_v23 = vld [vmem:[%s2914_s1 + $0xa8] sm:$0xff]  }
   0x9   :  { %1882 = vmatpush3.bf16.msra.mxu1 %v2143_v7  ;;  %1819 = vmatprep.subr.bf16.mxu0 %v2144_v8  ;;  %v2160_v24 = vld [vmem:[%s2914_s1 + $0x70] sm:$0xff]   ;;  %v2164_v28 = vld [vmem:[%s2914_s1 + $0x78] sm:$0xff]   ;;  %v2168_v32 = vld [vmem:[%s2915_s0] ss:$36 sps:$4 sm:$0xff]  }
   0xa   :  { %1883 = vmatprep.subr.bf16.mxu1 %v2145_v9  ;;  %v2161_v25 = vld [vmem:[%s2914_s1 + $0xf0] sm:$0xff]   ;;  %v2165_v29 = vld [vmem:[%s2914_s1 + $0xf8] sm:$0xff]   ;;  %v2170_v33 = vld [vmem:[%s2915_s0 + $0x4] ss:$36 sps:$4 sm:$0xff]  }
   0xb   :  { %v2162_v26 = vld [vmem:[%s2914_s1 + $0x30] sm:$0xff]   ;;  %v2166_v30 = vld [vmem:[%s2914_s1 + $0x38] sm:$0xff]   ;;  %v2171_v34 = vld [vmem:[%s2915_s0 + $0x8] ss:$36 sps:$4 sm:$0xff]   ;;  %1107 = vmatprep.mubr.bf16.mxu0 %v2170_v33 }
   0xc   :  { %1820 = vmatpush3.bf16.msra.mxu0 %v2146_v10  ;;  %v2163_v27 = vld [vmem:[%s2914_s1 + $0xb0] sm:$0xff]   ;;  %v2167_v31 = vld [vmem:[%s2914_s1 + $0xb8] sm:$0xff]   ;;  %v2174_v36 = vld [vmem:[%s2914_s1 + $0x140] sm:$0xff]  }
   0xd   :  { %1884 = vmatpush3.bf16.msra.mxu1 %v2147_v11  ;;  %1821 = vmatprep.subr.bf16.mxu0 %v2148_v12  ;;  %v2173_v35 = vld [vmem:[%s2915_s0 + $0xc] ss:$36 sps:$4 sm:$0xff]   ;;  %v2175_v37 = vld [vmem:[%s2914_s1 + $0x1c0] sm:$0xff]   ;;  %v2180_v41 = vld [vmem:[%s2915_s0 + $0x54] ss:$36 sps:$4 sm:$0xff]  }
   0xe   :  { %1885 = vmatprep.subr.bf16.mxu1 %v2149_v13  ;;  %1204 = vmatprep.mubr.bf16.mxu1 %v2173_v35  ;;  %v2176_v38 = vld [vmem:[%s2914_s1 + $0x100] sm:$0xff]   ;;  %v2178_v40 = vld [vmem:[%s2915_s0 + $0x4c] ss:$36 sps:$4 sm:$0xff]   ;;  %v2188_v48 = vld [vmem:[%s2915_s0 + $0x94] ss:$36 sps:$4 sm:$0xff]  }
   0xf   :  { %v2177_v39 = vld [vmem:[%s2914_s1 + $0x180] sm:$0xff]   ;;  %v2182_v42 = vld [vmem:[%s2915_s0 + $0x48] ss:$36 sps:$4 sm:$0xff]   ;;  %v2183_v43 = vld [vmem:[%s2915_s0 + $0x50] ss:$36 sps:$4 sm:$0xff]  }
  0x10   :  { %1822 = vmatpush3.bf16.msra.mxu0 %v2150_v14  ;;  %v2184_v44 = vld [vmem:[%s2914_s1 + $0x148] sm:$0xff]   ;;  %v2190_v49 = vld [vmem:[%s2915_s0 + $0x9c] ss:$36 sps:$4 sm:$0xff]   ;;  %v2192_v50 = vld [vmem:[%s2915_s0 + $0x90] ss:$36 sps:$4 sm:$0xff]  }
  0x11   :  { %1886 = vmatpush3.bf16.msra.mxu1 %v2151_v15  ;;  %1823 = vmatprep.subr.bf16.mxu0 %v2152_v16  ;;  %v2185_v45 = vld [vmem:[%s2914_s1 + $0x1c8] sm:$0xff]   ;;  %v2193_v51 = vld [vmem:[%s2915_s0 + $0x98] ss:$36 sps:$4 sm:$0xff]   ;;  %v2194_v52 = vld [vmem:[%s2914_s1 + $0x150] sm:$0xff]  }
  0x12   :  { %1887 = vmatprep.subr.bf16.mxu1 %v2153_v17  ;;  %v2186_v46 = vld [vmem:[%s2914_s1 + $0x108] sm:$0xff]   ;;  %v2195_v53 = vld [vmem:[%s2914_s1 + $0x1d0] sm:$0xff]   ;;  %v2198_v56 = vld [vmem:[%s2915_s0 + $0xdc] ss:$36 sps:$4 sm:$0xff]  }
  0x13   :  { %v2187_v47 = vld [vmem:[%s2914_s1 + $0x188] sm:$0xff]   ;;  %v2196_v54 = vld [vmem:[%s2914_s1 + $0x110] sm:$0xff]   ;;  %v2202_v58 = vld [vmem:[%s2915_s0 + $0xd8] ss:$36 sps:$4 sm:$0xff]  }
  0x14   :  { %1824 = vmatpush3.bf16.msra.mxu0 %v2154_v18  ;;  %v2197_v55 = vld [vmem:[%s2914_s1 + $0x190] sm:$0xff]   ;;  %v2200_v57 = vld [vmem:[%s2915_s0 + $0xe4] ss:$36 sps:$4 sm:$0xff]   ;;  %v2204_v60 = vld [vmem:[%s2914_s1 + $0x158] sm:$0xff]  }
  0x15   :  { %1888 = vmatpush3.bf16.msra.mxu1 %v2155_v19  ;;  %1825 = vmatprep.subr.bf16.mxu0 %v2156_v20  ;;  %v2203_v59 = vld [vmem:[%s2915_s0 + $0xe0] ss:$36 sps:$4 sm:$0xff]   ;;  %v2205_v61 = vld [vmem:[%s2914_s1 + $0x1d8] sm:$0xff]   ;;  %v2210_v1 = vld [vmem:[%s2915_s0 + $0x12c] ss:$36 sps:$4 sm:$0xff]  }
  0x16   :  { %1889 = vmatprep.subr.bf16.mxu1 %v2157_v21  ;;  %v2206_v62 = vld [vmem:[%s2914_s1 + $0x118] sm:$0xff]   ;;  %v2208_v0 = vld [vmem:[%s2915_s0 + $0x124] ss:$36 sps:$4 sm:$0xff]   ;;  %v2218_v8 = vld [vmem:[%s2915_s0 + $0x16c] ss:$36 sps:$4 sm:$0xff]  }
  0x17   :  { %v2207_v63 = vld [vmem:[%s2914_s1 + $0x198] sm:$0xff]   ;;  %v2212_v2 = vld [vmem:[%s2915_s0 + $0x120] ss:$36 sps:$4 sm:$0xff]   ;;  %v2213_v4 = vld [vmem:[%s2915_s0 + $0x128] ss:$36 sps:$4 sm:$0xff]  }
  0x18   :  { %1826 = vmatpush3.bf16.msra.mxu0 %v2158_v22  ;;  %v2214_v3 = vld [vmem:[%s2914_s1 + $0x160] sm:$0xff]   ;;  %v2220_v9 = vld [vmem:[%s2915_s0 + $0x174] ss:$36 sps:$4 sm:$0xff]   ;;  %v2224_v10 = vld [vmem:[%s2914_s1 + $0x168] sm:$0xff]  }
  0x19   :  { %1890 = vmatpush3.bf16.msra.mxu1 %v2159_v23  ;;  %1827 = vmatprep.subr.bf16.mxu0 %v2160_v24  ;;  %v2215_v5 = vld [vmem:[%s2914_s1 + $0x1e0] sm:$0xff]   ;;  %v2225_v11 = vld [vmem:[%s2914_s1 + $0x1e8] sm:$0xff]   ;;  %v2223_v15 = vld [vmem:[%s2915_s0 + $0x170] ss:$36 sps:$4 sm:$0xff]  }
  0x1a   :  { %1891 = vmatprep.subr.bf16.mxu1 %v2161_v25  ;;  %v2216_v6 = vld [vmem:[%s2914_s1 + $0x120] sm:$0xff]   ;;  %v2222_v12 = vld [vmem:[%s2915_s0 + $0x168] ss:$36 sps:$4 sm:$0xff]   ;;  %v2228_v16 = vld [vmem:[%s2915_s0 + $0x1b4] ss:$36 sps:$4 sm:$0xff]  }
  0x1b   :  { %v2217_v7 = vld [vmem:[%s2914_s1 + $0x1a0] sm:$0xff]   ;;  %v2226_v13 = vld [vmem:[%s2914_s1 + $0x128] sm:$0xff]   ;;  %v2234_v18 = vld [vmem:[%s2914_s1 + $0x170] sm:$0xff]  }
  0x1c   :  { %1828 = vmatpush3.bf16.msra.mxu0 %v2162_v26  ;;  %v2227_v14 = vld [vmem:[%s2914_s1 + $0x1a8] sm:$0xff]   ;;  %v2230_v17 = vld [vmem:[%s2915_s0 + $0x1bc] ss:$36 sps:$4 sm:$0xff]   ;;  %v2235_v19 = vld [vmem:[%s2914_s1 + $0x1f0] sm:$0xff]  }
  0x1d   :  { %1892 = vmatpush3.bf16.msra.mxu1 %v2163_v27  ;;  %1829 = vmatprep.subr.bf16.mxu0 %v2164_v28  ;;  %v2236_v20 = vld [vmem:[%s2914_s1 + $0x130] sm:$0xff]   ;;  %v2233_v23 = vld [vmem:[%s2915_s0 + $0x1b8] ss:$36 sps:$4 sm:$0xff]   ;;  %v2240_v25 = vld [vmem:[%s2915_s0 + $0x204] ss:$36 sps:$4 sm:$0xff]  }
  0x1e   :  { %1893 = vmatprep.subr.bf16.mxu1 %v2165_v29  ;;  %v2237_v21 = vld [vmem:[%s2914_s1 + $0x1b0] sm:$0xff]   ;;  %v2238_v24 = vld [vmem:[%s2915_s0 + $0x1fc] ss:$36 sps:$4 sm:$0xff]  }
  0x1f   :  { %v2232_v22 = vld [vmem:[%s2915_s0 + $0x1b0] ss:$36 sps:$4 sm:$0xff]   ;;  %v2244_v26 = vld [vmem:[%s2914_s1 + $0x178] sm:$0xff]  }
  0x20   :  { %1830 = vmatpush3.bf16.msra.mxu0 %v2166_v30  ;;  %v2245_v27 = vld [vmem:[%s2914_s1 + $0x1f8] sm:$0xff]   ;;  %v2248_v35 = vld [vmem:[%s2915_s0 + $0x10] ss:$36 sps:$4 sm:$0xff]  }
  0x21   :  { %1894 = vmatpush3.bf16.msra.mxu1 %v2167_v31  ;;  %1943 = vmatprep.subr.bf16.mxu0 %v2174_v36  ;;  %v2246_v28 = vld [vmem:[%s2914_s1 + $0x138] sm:$0xff]   ;;  %v2243_v31 = vld [vmem:[%s2915_s0 + $0x200] ss:$36 sps:$4 sm:$0xff]  }
  0x22   :  { %2007 = vmatprep.subr.bf16.mxu1 %v2175_v37  ;;  %v2247_v29 = vld [vmem:[%s2914_s1 + $0x1b8] sm:$0xff]  }
  0x23   :  { %1108 = vmatmul.mubr.bf16.vlgmr.msra.gmra.mrb[0].mxu0 %v2168_v32  ;;  %v2242_v30 = vld [vmem:[%s2915_s0 + $0x1f8] ss:$36 sps:$4 sm:$0xff]   ;;  %v2254_v32 = vld [vmem:[%s2914_s1 + $0x200] sm:$0xff]  }
  0x24   :  { %1205 = vmatmul.mubr.bf16.vlgmr.msra.gmra.mrb[0].mxu1 %v2171_v34  ;;  %1944 = vmatpush3.bf16.msra.mxu0 %v2176_v38  ;;  %v2250_v33 = vld [vmem:[%s2915_s0 + $0x14] ss:$36 sps:$4 sm:$0xff]   ;;  %v2253_v34 = vld [vmem:[%s2915_s0 + $0x1c] ss:$36 sps:$4 sm:$0xff]   ;;  %v2257_v38 = vld [vmem:[%s2915_s0 + $0x64] ss:$36 sps:$4 sm:$0xff]  }
  0x25   :  { %2008 = vmatpush3.bf16.msra.mxu1 %v2177_v39  ;;  %1115 = vmatprep.mubr.bf16.mxu0 %v2178_v40  ;;  %v2251_v36 = vld [vmem:[%s2915_s0 + $0x18] ss:$36 sps:$4 sm:$0xff]   ;;  %v2261_v39 = vld [vmem:[%s2914_s1 + $0x208] sm:$0xff]   ;;  %v2268_v40 = vld [vmem:[%s2914_s1 + $0x210] sm:$0xff]  }
  0x26   :  { %1212 = vmatprep.mubr.bf16.mxu1 %v2180_v41  ;;  %1945 = vmatprep.subr.bf16.mxu0 %v2184_v44  ;;  %v2255_v37 = vld [vmem:[%s2915_s0 + $0x5c] ss:$36 sps:$4 sm:$0xff]   ;;  %v2264_v44 = vld [vmem:[%s2915_s0 + $0xac] ss:$36 sps:$4 sm:$0xff]  }
  0x27   :  { %2009 = vmatprep.subr.bf16.mxu1 %v2185_v45  ;;  %v2259_v41 = vld [vmem:[%s2915_s0 + $0x58] ss:$36 sps:$4 sm:$0xff]  }
  0x28   :  { %1946 = vmatpush3.bf16.msra.mxu0 %v2186_v46  ;;  %v2275_v45 = vld [vmem:[%s2914_s1 + $0x218] sm:$0xff]   ;;  %v2282_v46 = vld [vmem:[%s2914_s1 + $0x220] sm:$0xff]  }
  0x29   :  { %2010 = vmatpush3.bf16.msra.mxu1 %v2187_v47  ;;  %1947 = vmatprep.subr.bf16.mxu0 %v2194_v52  ;;  %v2266_v47 = vld [vmem:[%s2915_s0 + $0xa0] ss:$36 sps:$4 sm:$0xff]   ;;  %v2273_v52 = vld [vmem:[%s2915_s0 + $0xe8] ss:$36 sps:$4 sm:$0xff]  }
  0x2a   :  { %2011 = vmatprep.subr.bf16.mxu1 %v2195_v53  ;;  %v2296_v53 = vld [vmem:[%s2914_s1 + $0x230] sm:$0xff]  }
  0x2b   :  { %1116 = vmatmul.mubr.bf16.gmra.mrb[4].mxu0 %v2182_v42  ;;  %v2260_v42 = vld [vmem:[%s2915_s0 + $0x60] ss:$36 sps:$4 sm:$0xff]  }
  0x2c   :  { %1213 = vmatmul.mubr.bf16.gmra.mrb[4].mxu1 %v2183_v43  ;;  %1123 = vmatprep.mubr.bf16.mxu0 %v2188_v48  ;;  %v2262_v43 = vld [vmem:[%s2915_s0 + $0xa4] ss:$36 sps:$4 sm:$0xff]  }
  0x2d   :  { %1220 = vmatprep.mubr.bf16.mxu1 %v2190_v49  ;;  %1948 = vmatpush3.bf16.msra.mxu0 %v2196_v54  ;;  %v2267_v48 = vld [vmem:[%s2915_s0 + $0xa8] ss:$36 sps:$4 sm:$0xff]   ;;  %v2274_v54 = vld [vmem:[%s2915_s0 + $0xf0] ss:$36 sps:$4 sm:$0xff]  }
  0x2e   :  { %2012 = vmatpush3.bf16.msra.mxu1 %v2197_v55  ;;  %1949 = vmatprep.subr.bf16.mxu0 %v2204_v60  ;;  %v2269_v49 = vld [vmem:[%s2915_s0 + $0xec] ss:$36 sps:$4 sm:$0xff]   ;;  %v2276_v55 = vld [vmem:[%s2915_s0 + $0x134] ss:$36 sps:$4 sm:$0xff]   ;;  %v2283_v60 = vld [vmem:[%s2915_s0 + $0x17c] ss:$36 sps:$4 sm:$0xff]  }
  0x2f   :  { %2013 = vmatprep.subr.bf16.mxu1 %v2205_v61  ;;  %v2285_v61 = vld [vmem:[%s2915_s0 + $0x184] ss:$36 sps:$4 sm:$0xff]  }
  0x31   :  { %1950 = vmatpush3.bf16.msra.mxu0 %v2206_v62  ;;  %v2287_v62 = vld [vmem:[%s2915_s0 + $0x178] ss:$36 sps:$4 sm:$0xff]  }
  0x32   :  { %2014 = vmatpush3.bf16.msra.mxu1 %v2207_v63  ;;  %1951 = vmatprep.subr.bf16.mxu0 %v2214_v3  ;;  %v2288_v63 = vld [vmem:[%s2915_s0 + $0x180] ss:$36 sps:$4 sm:$0xff]   ;;  %v2295_v3 = vld [vmem:[%s2915_s0 + $0x1c8] ss:$36 sps:$4 sm:$0xff]  }
  0x33   :  { %1124 = vmatmul.mubr.bf16.gmra.mrb[8].mxu0 %v2192_v50  ;;  %2015 = vmatprep.subr.bf16.mxu1 %v2215_v5  ;;  %v2271_v50 = vld [vmem:[%s2915_s0 + $0xf4] ss:$36 sps:$4 sm:$0xff]  }
  0x34   :  { %1221 = vmatmul.mubr.bf16.gmra.mrb[8].mxu1 %v2193_v51  ;;  %1131 = vmatprep.mubr.bf16.mxu0 %v2198_v56  ;;  %v2289_v51 = vld [vmem:[%s2914_s1 + $0x228] sm:$0xff]   ;;  %v2278_v56 = vld [vmem:[%s2915_s0 + $0x13c] ss:$36 sps:$4 sm:$0xff]   ;;  %v2299_v5 = vld [vmem:[%s2915_s0 + $0x214] ss:$36 sps:$4 sm:$0xff]  }
  0x35   :  { %1228 = vmatprep.mubr.bf16.mxu1 %v2200_v57  ;;  %1952 = vmatpush3.bf16.msra.mxu0 %v2216_v6  ;;  %v2303_v57 = vld [vmem:[%s2914_s1 + $0x238] sm:$0xff]   ;;  %v2301_v6 = vld [vmem:[%s2915_s0 + $0x208] ss:$36 sps:$4 sm:$0xff]  }
  0x36   :  { %2016 = vmatpush3.bf16.msra.mxu1 %v2217_v7  ;;  %1953 = vmatprep.subr.bf16.mxu0 %v2224_v10  ;;  %v2302_v7 = vld [vmem:[%s2915_s0 + $0x210] ss:$36 sps:$4 sm:$0xff]   ;;  %v2306_v10 = vld [vmem:[%s2915_s0 + $0x68] ss:$36 sps:$4 sm:$0xff]  }
  0x37   :  { %2017 = vmatprep.subr.bf16.mxu1 %v2225_v11  ;;  %v2307_v11 = vld [vmem:[%s2915_s0 + $0x188] ss:$36 sps:$4 sm:$0xff]  }
  0x39   :  { %1954 = vmatpush3.bf16.msra.mxu0 %v2226_v13  ;;  %v2309_v13 = vld [vmem:[%s2915_s0 + $0x1d0] ss:$36 sps:$4 sm:$0xff]  }
  0x3a   :  { %2018 = vmatpush3.bf16.msra.mxu1 %v2227_v14  ;;  %1955 = vmatprep.subr.bf16.mxu0 %v2234_v18  ;;  %v2310_v14 = vld [vmem:[%s2915_s0 + $0xf8] ss:$36 sps:$4 sm:$0xff]  }
  0x3b   :  { %1132 = vmatmul.mubr.bf16.gmra.mrb[12].mxu0 %v2202_v58  ;;  %2019 = vmatprep.subr.bf16.mxu1 %v2235_v19  ;;  %v2280_v58 = vld [vmem:[%s2915_s0 + $0x130] ss:$36 sps:$4 sm:$0xff]  }
  0x3c   :  { %1229 = vmatmul.mubr.bf16.gmra.mrb[12].mxu1 %v2203_v59  ;;  %1139 = vmatprep.mubr.bf16.mxu0 %v2208_v0  ;;  %v2281_v59 = vld [vmem:[%s2915_s0 + $0x138] ss:$36 sps:$4 sm:$0xff]   ;;  %v2290_v0 = vld [vmem:[%s2915_s0 + $0x1c4] ss:$36 sps:$4 sm:$0xff]  }
  0x3d   :  { %1236 = vmatprep.mubr.bf16.mxu1 %v2210_v1  ;;  %1956 = vmatpush3.bf16.msra.mxu0 %v2236_v20  ;;  %v2292_v1 = vld [vmem:[%s2915_s0 + $0x1cc] ss:$36 sps:$4 sm:$0xff]  }
  0x3e   :  { %2020 = vmatpush3.bf16.msra.mxu1 %v2237_v21  ;;  %1957 = vmatprep.subr.bf16.mxu0 %v2244_v26 }
  0x3f   :  { %2021 = vmatprep.subr.bf16.mxu1 %v2245_v27 }
  0x41   :  { %1958 = vmatpush3.bf16.msra.mxu0 %v2246_v28 }
  0x42   :  { %2022 = vmatpush3.bf16.msra.mxu1 %v2247_v29  ;;  %2087 = vmatprep.subr.bf16.mxu0 %v2254_v32 }
  0x43   :  { %1140 = vmatmul.mubr.bf16.gmra.mrb[16].mxu0 %v2212_v2  ;;  %2119 = vmatprep.subr.bf16.mxu1 %v2254_v32  ;;  %v2294_v2 = vld [vmem:[%s2915_s0 + $0x1c0] ss:$36 sps:$4 sm:$0xff]  }
  0x44   :  { %1237 = vmatmul.mubr.bf16.gmra.mrb[16].mxu1 %v2213_v4  ;;  %1147 = vmatprep.mubr.bf16.mxu0 %v2218_v8  ;;  %v2297_v4 = vld [vmem:[%s2915_s0 + $0x20c] ss:$36 sps:$4 sm:$0xff]   ;;  %v2304_v8 = vld [vmem:[%s2915_s0 + $0x20] ss:$36 sps:$4 sm:$0xff]  }
  0x45   :  { %1244 = vmatprep.mubr.bf16.mxu1 %v2220_v9  ;;  %v2305_v9 = vld [vmem:[%s2915_s0 + $0x140] ss:$36 sps:$4 sm:$0xff]  }
  0x4b   :  { %1148 = vmatmul.mubr.bf16.gmra.mrb[20].mxu0 %v2222_v12  ;;  %v2308_v12 = vld [vmem:[%s2915_s0 + $0xb0] ss:$36 sps:$4 sm:$0xff]  }
  0x4c   :  { %1245 = vmatmul.mubr.bf16.gmra.mrb[20].mxu1 %v2223_v15  ;;  %1155 = vmatprep.mubr.bf16.mxu0 %v2228_v16  ;;  %v2311_v15 = vld [vmem:[%s2915_s0 + $0x218] ss:$36 sps:$4 sm:$0xff]  }
  0x4d   :  { %1252 = vmatprep.mubr.bf16.mxu1 %v2230_v17 }
  0x53   :  { %1156 = vmatmul.mubr.bf16.gmra.mrb[24].mxu0 %v2232_v22 }
  0x54   :  { %1253 = vmatmul.mubr.bf16.gmra.mrb[24].mxu1 %v2233_v23  ;;  %1163 = vmatprep.mubr.bf16.mxu0 %v2238_v24 }
  0x55   :  { %1260 = vmatprep.mubr.bf16.mxu1 %v2240_v25 }
  0x5b   :  { %1164 = vmatmul.mubr.bf16.gmra.mrb[28].mxu0 %v2242_v30 }
  0x5c   :  { %1261 = vmatmul.mubr.bf16.gmra.mrb[28].mxu1 %v2243_v31  ;;  %1301 = vmatprep.mubr.bf16.mxu0 %v2250_v33 }
  0x5d   :  { %1398 = vmatprep.mubr.bf16.mxu1 %v2253_v34 }
  0x63   :  { %1302 = vmatmul.mubr.bf16.vlgmr.msra.gmra.mrb[32].mxu0 %v2248_v35 }
  0x64   :  { %1399 = vmatmul.mubr.bf16.vlgmr.msra.gmra.mrb[32].mxu1 %v2251_v36  ;;  %2088 = vmatpush3.bf16.msra.mxu0 %v2254_v32 }
  0x65   :  { %2127 = vmatpush3.bf16.msra.mxu1 %v2254_v32  ;;  %1309 = vmatprep.mubr.bf16.mxu0 %v2255_v37 }
  0x66   :  { %1406 = vmatprep.mubr.bf16.mxu1 %v2257_v38  ;;  %2089 = vmatprep.subr.bf16.mxu0 %v2261_v39 }
  0x67   :  { %2120 = vmatprep.subr.bf16.mxu1 %v2261_v39 }
  0x68   :  { %2090 = vmatpush3.bf16.msra.mxu0 %v2261_v39 }
  0x69   :  { %2128 = vmatpush3.bf16.msra.mxu1 %v2261_v39  ;;  %2091 = vmatprep.subr.bf16.mxu0 %v2268_v40 }
  0x6a   :  { %2121 = vmatprep.subr.bf16.mxu1 %v2268_v40 }
  0x6b   :  { %1310 = vmatmul.mubr.bf16.gmra.mrb[36].mxu0 %v2259_v41 }
  0x6c   :  { %1407 = vmatmul.mubr.bf16.gmra.mrb[36].mxu1 %v2260_v42  ;;  %1317 = vmatprep.mubr.bf16.mxu0 %v2262_v43 }
  0x6d   :  { %1414 = vmatprep.mubr.bf16.mxu1 %v2264_v44  ;;  %2092 = vmatpush3.bf16.msra.mxu0 %v2268_v40 }
  0x6e   :  { %2129 = vmatpush3.bf16.msra.mxu1 %v2268_v40  ;;  %2093 = vmatprep.subr.bf16.mxu0 %v2275_v45 }
  0x6f   :  { %2122 = vmatprep.subr.bf16.mxu1 %v2275_v45 }
  0x71   :  { %2094 = vmatpush3.bf16.msra.mxu0 %v2275_v45 }
  0x72   :  { %2130 = vmatpush3.bf16.msra.mxu1 %v2275_v45  ;;  %2095 = vmatprep.subr.bf16.mxu0 %v2282_v46 }
  0x73   :  { %1318 = vmatmul.mubr.bf16.gmra.mrb[40].mxu0 %v2266_v47  ;;  %2123 = vmatprep.subr.bf16.mxu1 %v2282_v46 }
  0x74   :  { %1415 = vmatmul.mubr.bf16.gmra.mrb[40].mxu1 %v2267_v48  ;;  %1325 = vmatprep.mubr.bf16.mxu0 %v2269_v49 }
  0x75   :  { %1422 = vmatprep.mubr.bf16.mxu1 %v2271_v50  ;;  %2096 = vmatpush3.bf16.msra.mxu0 %v2282_v46 }
  0x76   :  { %2131 = vmatpush3.bf16.msra.mxu1 %v2282_v46  ;;  %2097 = vmatprep.subr.bf16.mxu0 %v2289_v51 }
  0x77   :  { %2124 = vmatprep.subr.bf16.mxu1 %v2289_v51 }
  0x79   :  { %2098 = vmatpush3.bf16.msra.mxu0 %v2289_v51 }
  0x7a   :  { %2132 = vmatpush3.bf16.msra.mxu1 %v2289_v51  ;;  %2099 = vmatprep.subr.bf16.mxu0 %v2296_v53 }
  0x7b   :  { %1326 = vmatmul.mubr.bf16.gmra.mrb[44].mxu0 %v2273_v52  ;;  %2125 = vmatprep.subr.bf16.mxu1 %v2296_v53 }
  0x7c   :  { %1423 = vmatmul.mubr.bf16.gmra.mrb[44].mxu1 %v2274_v54  ;;  %1333 = vmatprep.mubr.bf16.mxu0 %v2276_v55 }
  0x7d   :  { %1430 = vmatprep.mubr.bf16.mxu1 %v2278_v56  ;;  %2100 = vmatpush3.bf16.msra.mxu0 %v2296_v53 }
  0x7e   :  { %2133 = vmatpush3.bf16.msra.mxu1 %v2296_v53  ;;  %2101 = vmatprep.subr.bf16.mxu0 %v2303_v57 }
  0x7f   :  { %2126 = vmatprep.subr.bf16.mxu1 %v2303_v57 }
  0x81   :  { %2102 = vmatpush3.bf16.msra.mxu0 %v2303_v57 }
  0x82   :  { %2134 = vmatpush3.bf16.msra.mxu1 %v2303_v57 }
  0x83   :  { %1334 = vmatmul.mubr.bf16.gmra.mrb[48].mxu0 %v2280_v58 }
  0x84   :  { %1431 = vmatmul.mubr.bf16.gmra.mrb[48].mxu1 %v2281_v59  ;;  %1341 = vmatprep.mubr.bf16.mxu0 %v2283_v60 }
  0x85   :  { %1438 = vmatprep.mubr.bf16.mxu1 %v2285_v61 }
  0x8b   :  { %1342 = vmatmul.mubr.bf16.gmra.mrb[52].mxu0 %v2287_v62 }
  0x8c   :  { %1439 = vmatmul.mubr.bf16.gmra.mrb[52].mxu1 %v2288_v63  ;;  %1349 = vmatprep.mubr.bf16.mxu0 %v2290_v0 }
  0x8d   :  { %1446 = vmatprep.mubr.bf16.mxu1 %v2292_v1 }
  0x93   :  { %1350 = vmatmul.mubr.bf16.gmra.mrb[56].mxu0 %v2294_v2 }
  0x94   :  { %1447 = vmatmul.mubr.bf16.gmra.mrb[56].mxu1 %v2295_v3  ;;  %1357 = vmatprep.mubr.bf16.mxu0 %v2297_v4 }
  0x95   :  { %1454 = vmatprep.mubr.bf16.mxu1 %v2299_v5 }
  0x9b   :  { %1358 = vmatmul.mubr.bf16.gmra.mrb[60].mxu0 %v2301_v6 }
  0x9c   :  { %1455 = vmatmul.mubr.bf16.gmra.mrb[60].mxu1 %v2302_v7  ;;  %2103 = vmatprep.mubr.bf16.mxu0 %v2304_v8 }
  0x9d   :  { %2111 = vmatprep.mubr.bf16.mxu1 %v2305_v9 }
  0xa3   :  { %2104 = vmatmul.mubr.bf16.vlgmr.msra.gmra.mrb[64].mxu0 %v2306_v10 }
  0xa4   :  { %2112 = vmatmul.mubr.bf16.vlgmr.msra.gmra.mrb[64].mxu1 %v2307_v11  ;;  %2107 = vmatprep.mubr.bf16.mxu0 %v2308_v12 }
  0xa5   :  { %2115 = vmatprep.mubr.bf16.mxu1 %v2309_v13 }
  0xab   :  { %2108 = vmatmul.mubr.bf16.gmra.mrb[68].mxu0 %v2310_v14 }
  0xac   :  { %2116 = vmatmul.mubr.bf16.gmra.mrb[68].mxu1 %v2311_v15 }
  0xf6   :  { %v1831_v16 = vpop.f32.mrb[0].mxu0 }
  0xf7   :  { %v1895_v17 = vpop.f32.mrb[0].mxu1  ;;  %v1832_v18 = vpop.f32.mrb[1].mxu0 }
  0xf8   :  { %v1833_v19 = vadd.f32 %v1832_v18, %v1831_v16  ;;  %v1896_v20 = vpop.f32.mrb[1].mxu1  ;;  %v1834_v21 = vpop.f32.mrb[2].mxu0 }
  0xf9   :  { %v1897_v22 = vadd.f32 %v1896_v20, %v1895_v17  ;;  %v1898_v23 = vpop.f32.mrb[2].mxu1  ;;  %v1835_v24 = vpop.f32.mrb[3].mxu0 }
  0xfa   :  { %v1836_v25 = vadd.f32 %v1835_v24, %v1834_v21  ;;  %v1899_v26 = vpop.f32.mrb[3].mxu1 }
  0xfb   :  { %v2764_v27 = vadd.f32 %v1897_v22, %v1833_v19  ;;  %v1900_v28 = vadd.f32 %v1899_v26, %v1898_v23 }
  0xfd   :  { %v2766_v29 = vadd.f32 %v1900_v28, %v1836_v25 }
  0xfe   :  { %v1837_v30 = vpop.f32.mrb[4].mxu0 }
  0xff   :  { %v1901_v31 = vpop.f32.mrb[4].mxu1  ;;  %v1838_v32 = vpop.f32.mrb[5].mxu0 }
 0x100   :  { %v1839_v33 = vadd.f32 %v1838_v32, %v1837_v30  ;;  %v1902_v34 = vpop.f32.mrb[5].mxu1  ;;  %v1840_v35 = vpop.f32.mrb[6].mxu0 }
 0x101   :  { %v1903_v36 = vadd.f32 %v1902_v34, %v1901_v31  ;;  %v1904_v37 = vpop.f32.mrb[6].mxu1  ;;  %v1841_v38 = vpop.f32.mrb[7].mxu0 }
 0x102   :  { %v1842_v39 = vadd.f32 %v1841_v38, %v1840_v35  ;;  %v1905_v40 = vpop.f32.mrb[7].mxu1 }
 0x103   :  { %v2768_v41 = vadd.f32 %v1903_v36, %v1839_v33  ;;  %v1906_v42 = vadd.f32 %v1905_v40, %v1904_v37 }
 0x105   :  { %v2770_v43 = vadd.f32 %v1906_v42, %v1842_v39 }
 0x106   :  { %v1843_v44 = vpop.f32.mrb[8].mxu0 }
 0x107   :  { %v1907_v45 = vpop.f32.mrb[8].mxu1  ;;  %v1844_v46 = vpop.f32.mrb[9].mxu0 }
 0x108   :  { %v1845_v47 = vadd.f32 %v1844_v46, %v1843_v44  ;;  %v1908_v48 = vpop.f32.mrb[9].mxu1  ;;  %v1846_v49 = vpop.f32.mrb[10].mxu0 }
 0x109   :  { %v1909_v50 = vadd.f32 %v1908_v48, %v1907_v45  ;;  %v1910_v51 = vpop.f32.mrb[10].mxu1  ;;  %v1847_v52 = vpop.f32.mrb[11].mxu0 }
 0x10a   :  { %v1848_v53 = vadd.f32 %v1847_v52, %v1846_v49  ;;  %v1911_v54 = vpop.f32.mrb[11].mxu1 }
 0x10b   :  { %v2772_v55 = vadd.f32 %v1909_v50, %v1845_v47  ;;  %v1912_v56 = vadd.f32 %v1911_v54, %v1910_v51 }
 0x10d   :  { %v2774_v57 = vadd.f32 %v1912_v56, %v1848_v53 }
 0x10e   :  { %v1849_v58 = vpop.f32.mrb[12].mxu0 }
 0x10f   :  { %v1913_v59 = vpop.f32.mrb[12].mxu1  ;;  %v1850_v60 = vpop.f32.mrb[13].mxu0 }
 0x110   :  { %v1851_v61 = vadd.f32 %v1850_v60, %v1849_v58  ;;  %v1914_v62 = vpop.f32.mrb[13].mxu1  ;;  %v1852_v63 = vpop.f32.mrb[14].mxu0 }
 0x111   :  { %v1915_v0 = vadd.f32 %v1914_v62, %v1913_v59  ;;  %v1916_v1 = vpop.f32.mrb[14].mxu1  ;;  %v1853_v2 = vpop.f32.mrb[15].mxu0 }
 0x112   :  { %v1854_v3 = vadd.f32 %v1853_v2, %v1852_v63  ;;  %v1917_v4 = vpop.f32.mrb[15].mxu1 }
 0x113   :  { %v2776_v5 = vadd.f32 %v1915_v0, %v1851_v61  ;;  %v1918_v6 = vadd.f32 %v1917_v4, %v1916_v1 }
 0x115   :  { %v2778_v7 = vadd.f32 %v1918_v6, %v1854_v3 }
 0x116   :  { %v1855_v8 = vpop.f32.mrb[16].mxu0 }
 0x117   :  { %v1919_v9 = vpop.f32.mrb[16].mxu1  ;;  %v1856_v10 = vpop.f32.mrb[17].mxu0 }
 0x118   :  { %v1857_v11 = vadd.f32 %v1856_v10, %v1855_v8  ;;  %v1920_v12 = vpop.f32.mrb[17].mxu1  ;;  %v1858_v13 = vpop.f32.mrb[18].mxu0 }
 0x119   :  { %v1921_v14 = vadd.f32 %v1920_v12, %v1919_v9  ;;  %v1922_v15 = vpop.f32.mrb[18].mxu1  ;;  %v1859_v16 = vpop.f32.mrb[19].mxu0 }
 0x11a   :  { %v1860_v17 = vadd.f32 %v1859_v16, %v1858_v13  ;;  %v1923_v18 = vpop.f32.mrb[19].mxu1 }
 0x11b   :  { %v2780_v19 = vadd.f32 %v1921_v14, %v1857_v11  ;;  %v1924_v20 = vadd.f32 %v1923_v18, %v1922_v15 }
 0x11d   :  { %v2782_v21 = vadd.f32 %v1924_v20, %v1860_v17 }
 0x11e   :  { %v1861_v22 = vpop.f32.mrb[20].mxu0 }
 0x11f   :  { %v1925_v23 = vpop.f32.mrb[20].mxu1  ;;  %v1862_v24 = vpop.f32.mrb[21].mxu0 }
 0x120   :  { %v1863_v25 = vadd.f32 %v1862_v24, %v1861_v22  ;;  %v1926_v26 = vpop.f32.mrb[21].mxu1  ;;  %v1864_v28 = vpop.f32.mrb[22].mxu0 }
 0x121   :  { %v1927_v30 = vadd.f32 %v1926_v26, %v1925_v23  ;;  %v1928_v31 = vpop.f32.mrb[22].mxu1  ;;  %v1865_v32 = vpop.f32.mrb[23].mxu0 }
 0x122   :  { %v1866_v33 = vadd.f32 %v1865_v32, %v1864_v28  ;;  %v1929_v34 = vpop.f32.mrb[23].mxu1 }
 0x123   :  { %v2784_v35 = vadd.f32 %v1927_v30, %v1863_v25  ;;  %v1930_v36 = vadd.f32 %v1929_v34, %v1928_v31 }
 0x125   :  { %v2786_v37 = vadd.f32 %v1930_v36, %v1866_v33 }
 0x126   :  { %v1867_v38 = vpop.f32.mrb[24].mxu0 }
 0x127   :  { %v1931_v39 = vpop.f32.mrb[24].mxu1  ;;  %v1868_v40 = vpop.f32.mrb[25].mxu0 }
 0x128   :  { %v1869_v42 = vadd.f32 %v1868_v40, %v1867_v38  ;;  %v1932_v44 = vpop.f32.mrb[25].mxu1  ;;  %v1870_v45 = vpop.f32.mrb[26].mxu0 }
 0x129   :  { %v1933_v46 = vadd.f32 %v1932_v44, %v1931_v39  ;;  %v1934_v47 = vpop.f32.mrb[26].mxu1  ;;  %v1871_v48 = vpop.f32.mrb[27].mxu0 }
 0x12a   :  { %v1872_v49 = vadd.f32 %v1871_v48, %v1870_v45  ;;  %v1935_v50 = vpop.f32.mrb[27].mxu1 }
 0x12b   :  { %v2788_v51 = vadd.f32 %v1933_v46, %v1869_v42  ;;  %v1936_v52 = vadd.f32 %v1935_v50, %v1934_v47 }
 0x12d   :  { %v2790_v53 = vadd.f32 %v1936_v52, %v1872_v49 }
 0x12e   :  { %v1873_v54 = vpop.f32.mrb[28].mxu0 }
 0x12f   :  { %v1937_v56 = vpop.f32.mrb[28].mxu1  ;;  %v1874_v58 = vpop.f32.mrb[29].mxu0 }
 0x130   :  { %v1875_v59 = vadd.f32 %v1874_v58, %v1873_v54  ;;  %v1938_v60 = vpop.f32.mrb[29].mxu1  ;;  %v1876_v61 = vpop.f32.mrb[30].mxu0 }
 0x131   :  { %v1939_v62 = vadd.f32 %v1938_v60, %v1937_v56  ;;  %v1940_v63 = vpop.f32.mrb[30].mxu1  ;;  %v1877_v0 = vpop.f32.mrb[31].mxu0 }
 0x132   :  { %v1878_v1 = vadd.f32 %v1877_v0, %v1876_v61  ;;  %v1941_v2 = vpop.f32.mrb[31].mxu1 }
 0x133   :  { %v2792_v3 = vadd.f32 %v1939_v62, %v1875_v59  ;;  %v1942_v4 = vadd.f32 %v1941_v2, %v1940_v63 }
 0x135   :  { %v2794_v6 = vadd.f32 %v1942_v4, %v1878_v1 }
 0x136   :  { %v1959_v8 = vpop.f32.mrb[32].mxu0 }
 0x137   :  { %v2023_v9 = vpop.f32.mrb[32].mxu1  ;;  %v1960_v10 = vpop.f32.mrb[33].mxu0 }
 0x138   :  { %v1961_v11 = vadd.f32 %v1960_v10, %v1959_v8  ;;  %v2024_v12 = vpop.f32.mrb[33].mxu1  ;;  %v1962_v13 = vpop.f32.mrb[34].mxu0 }
 0x139   :  { %v2025_v14 = vadd.f32 %v2024_v12, %v2023_v9  ;;  %v2026_v15 = vpop.f32.mrb[34].mxu1  ;;  %v1963_v16 = vpop.f32.mrb[35].mxu0 }
 0x13a   :  { %v1304_v17 = vadd.f32 %v1961_v11, %v2764_v27  ;;  %v1964_v18 = vadd.f32 %v1963_v16, %v1962_v13  ;;  %v2027_v20 = vpop.f32.mrb[35].mxu1 }
 0x13b   :  { %v2028_v22 = vadd.f32 %v2027_v20, %v2026_v15 }
 0x13c   :  { %v1307_v23 = vadd.f32 %v1964_v18, %v2766_v29  ;;  %v2798_v24 = vadd.f32 %v2025_v14, %v1304_v17 }
 0x13e   :  { %v1965_v25 = vpop.f32.mrb[36].mxu0  ;;  %v2800_v26 = vadd.f32 %v2028_v22, %v1307_v23 }
 0x13f   :  { %v2029_v28 = vpop.f32.mrb[36].mxu1  ;;  %v1966_v30 = vpop.f32.mrb[37].mxu0 }
 0x140   :  { %v1967_v31 = vadd.f32 %v1966_v30, %v1965_v25  ;;  %v2030_v32 = vpop.f32.mrb[37].mxu1  ;;  %v1968_v33 = vpop.f32.mrb[38].mxu0 }
 0x141   :  { %v2031_v34 = vadd.f32 %v2030_v32, %v2029_v28  ;;  %v2032_v36 = vpop.f32.mrb[38].mxu1  ;;  %v1969_v38 = vpop.f32.mrb[39].mxu0 }
 0x142   :  { %v1312_v27 = vadd.f32 %v1967_v31, %v2768_v41  ;;  %v1970_v39 = vadd.f32 %v1969_v38, %v1968_v33  ;;  %v2033_v40 = vpop.f32.mrb[39].mxu1 }
 0x143   :  { %v2034_v42 = vadd.f32 %v2033_v40, %v2032_v36 }
 0x144   :  { %v1315_v29 = vadd.f32 %v1970_v39, %v2770_v43  ;;  %v2804_v44 = vadd.f32 %v2031_v34, %v1312_v27 }
 0x146   :  { %v1971_v45 = vpop.f32.mrb[40].mxu0  ;;  %v2806_v46 = vadd.f32 %v2034_v42, %v1315_v29 }
 0x147   :  { %v2035_v47 = vpop.f32.mrb[40].mxu1  ;;  %v1972_v48 = vpop.f32.mrb[41].mxu0 }
 0x148   :  { %v1973_v49 = vadd.f32 %v1972_v48, %v1971_v45  ;;  %v2036_v50 = vpop.f32.mrb[41].mxu1  ;;  %v1974_v52 = vpop.f32.mrb[42].mxu0 }
 0x149   :  { %v2037_v54 = vadd.f32 %v2036_v50, %v2035_v47  ;;  %v2038_v56 = vpop.f32.mrb[42].mxu1  ;;  %v1975_v58 = vpop.f32.mrb[43].mxu0 }
 0x14a   :  { %v1320_v41 = vadd.f32 %v1973_v49, %v2772_v55  ;;  %v1976_v59 = vadd.f32 %v1975_v58, %v1974_v52  ;;  %v2039_v60 = vpop.f32.mrb[43].mxu1 }
 0x14b   :  { %v2040_v61 = vadd.f32 %v2039_v60, %v2038_v56 }
 0x14c   :  { %v1323_v43 = vadd.f32 %v1976_v59, %v2774_v57  ;;  %v2810_v62 = vadd.f32 %v2037_v54, %v1320_v41 }
 0x14e   :  { %v1977_v63 = vpop.f32.mrb[44].mxu0  ;;  %v2812_v0 = vadd.f32 %v2040_v61, %v1323_v43 }
 0x14f   :  { %v2041_v1 = vpop.f32.mrb[44].mxu1  ;;  %v1978_v2 = vpop.f32.mrb[45].mxu0 }
 0x150   :  { %v1979_v4 = vadd.f32 %v1978_v2, %v1977_v63  ;;  %v2042_v8 = vpop.f32.mrb[45].mxu1  ;;  %v1980_v9 = vpop.f32.mrb[46].mxu0 }
 0x151   :  { %v2043_v10 = vadd.f32 %v2042_v8, %v2041_v1  ;;  %v2044_v11 = vpop.f32.mrb[46].mxu1  ;;  %v1981_v12 = vpop.f32.mrb[47].mxu0 }
 0x152   :  { %v1328_v55 = vadd.f32 %v1979_v4, %v2776_v5  ;;  %v1982_v13 = vadd.f32 %v1981_v12, %v1980_v9  ;;  %v2045_v14 = vpop.f32.mrb[47].mxu1 }
 0x153   :  { %v2046_v15 = vadd.f32 %v2045_v14, %v2044_v11 }
 0x154   :  { %v1331_v57 = vadd.f32 %v1982_v13, %v2778_v7  ;;  %v2816_v16 = vadd.f32 %v2043_v10, %v1328_v55 }
 0x156   :  { %v1983_v17 = vpop.f32.mrb[48].mxu0  ;;  %v2818_v18 = vadd.f32 %v2046_v15, %v1331_v57 }
 0x157   :  { %v2047_v20 = vpop.f32.mrb[48].mxu1  ;;  %v1984_v22 = vpop.f32.mrb[49].mxu0 }
 0x158   :  { %v1985_v23 = vadd.f32 %v1984_v22, %v1983_v17  ;;  %v2048_v25 = vpop.f32.mrb[49].mxu1  ;;  %v1986_v28 = vpop.f32.mrb[50].mxu0 }
 0x159   :  { %v2049_v30 = vadd.f32 %v2048_v25, %v2047_v20  ;;  %v2050_v31 = vpop.f32.mrb[50].mxu1  ;;  %v1987_v32 = vpop.f32.mrb[51].mxu0 }
 0x15a   :  { %v1336_v5 = vadd.f32 %v1985_v23, %v2780_v19  ;;  %v1988_v33 = vadd.f32 %v1987_v32, %v1986_v28  ;;  %v2051_v34 = vpop.f32.mrb[51].mxu1 }
 0x15b   :  { %v2052_v36 = vadd.f32 %v2051_v34, %v2050_v31 }
 0x15c   :  { %v1339_v7 = vadd.f32 %v1988_v33, %v2782_v21  ;;  %v1433_v38 = vadd.f32 %v2049_v30, %v1336_v5 }
 0x15e   :  { %v1989_v27 = vpop.f32.mrb[52].mxu0  ;;  %v2822_v39 = vadd.f32 %v2052_v36, %v1339_v7 }
 0x15f   :  { %v2053_v40 = vpop.f32.mrb[52].mxu1  ;;  %v1990_v42 = vpop.f32.mrb[53].mxu0 }
 0x160   :  { %v1991_v29 = vadd.f32 %v1990_v42, %v1989_v27  ;;  %v2054_v45 = vpop.f32.mrb[53].mxu1  ;;  %v1992_v47 = vpop.f32.mrb[54].mxu0  ;;  %v2838_v27 = vld [vmem:[%s2916_s2] ss:$0 sm:$0xff] }
 0x161   :  { %v2055_v48 = vadd.f32 %v2054_v45, %v2053_v40  ;;  %v2056_v49 = vpop.f32.mrb[54].mxu1  ;;  %v1993_v50 = vpop.f32.mrb[55].mxu0 }
 0x162   :  { %v1344_v52 = vadd.f32 %v1991_v29, %v2784_v35  ;;  %v1994_v19 = vadd.f32 %v1993_v50, %v1992_v47  ;;  %v2057_v54 = vpop.f32.mrb[55].mxu1 }
 0x163   :  { %v2058_v56 = vadd.f32 %v2057_v54, %v2056_v49 }
 0x164   :  { %v1347_v58 = vadd.f32 %v1994_v19, %v2786_v37  ;;  %v1441_v21 = vadd.f32 %v2055_v48, %v1344_v52 }
 0x166   :  { %v1995_v41 = vpop.f32.mrb[56].mxu0  ;;  %v1444_v59 = vadd.f32 %v2058_v56, %v1347_v58 }
 0x167   :  { %v2059_v60 = vpop.f32.mrb[56].mxu1  ;;  %v1996_v61 = vpop.f32.mrb[57].mxu0 }
 0x168   :  { %v1997_v43 = vadd.f32 %v1996_v61, %v1995_v41  ;;  %v2060_v63 = vpop.f32.mrb[57].mxu1  ;;  %v1998_v1 = vpop.f32.mrb[58].mxu0 }
 0x169   :  { %v2061_v2 = vadd.f32 %v2060_v63, %v2059_v60  ;;  %v2062_v4 = vpop.f32.mrb[58].mxu1  ;;  %v1999_v8 = vpop.f32.mrb[59].mxu0 }
 0x16a   :  { %v1352_v9 = vadd.f32 %v1997_v43, %v2788_v51  ;;  %v2000_v10 = vadd.f32 %v1999_v8, %v1998_v1  ;;  %v2063_v35 = vpop.f32.mrb[59].mxu1 }
 0x16b   :  { %v2064_v11 = vadd.f32 %v2063_v35, %v2062_v4 }
 0x16c   :  { %v1355_v12 = vadd.f32 %v2000_v10, %v2790_v53  ;;  %v2828_v55 = vadd.f32 %v2061_v2, %v1352_v9 }
 0x16e   :  { %v2001_v37 = vpop.f32.mrb[60].mxu0  ;;  %v2830_v13 = vadd.f32 %v2064_v11, %v1355_v12 }
 0x16f   :  { %v2065_v14 = vpop.f32.mrb[60].mxu1  ;;  %v2002_v15 = vpop.f32.mrb[61].mxu0 }
 0x170   :  { %v2003_v57 = vadd.f32 %v2002_v15, %v2001_v37  ;;  %v2066_v17 = vpop.f32.mrb[61].mxu1  ;;  %v2004_v20 = vpop.f32.mrb[62].mxu0 }
 0x171   :  { %v2067_v22 = vadd.f32 %v2066_v17, %v2065_v14  ;;  %v2068_v23 = vpop.f32.mrb[62].mxu1  ;;  %v2005_v25 = vpop.f32.mrb[63].mxu0 }
 0x172   :  { %v1360_v51 = vadd.f32 %v2003_v57, %v2792_v3  ;;  %v2006_v28 = vadd.f32 %v2005_v25, %v2004_v20  ;;  %v2069_v30 = vpop.f32.mrb[63].mxu1 }
 0x173   :  { %v2070_v31 = vadd.f32 %v2069_v30, %v2068_v23 }
 0x174   :  { %v1363_v53 = vadd.f32 %v2006_v28, %v2794_v6  ;;  %v1457_v32 = vadd.f32 %v2067_v22, %v1360_v51 }
 0x176   :  { %v2105_v5 = vpop.f32.mrb[64].mxu0  ;;  %v1460_v33 = vadd.f32 %v2070_v31, %v1363_v53 }
 0x177   :  { %v1506_v34 = vadd.f32 %v2105_v5, %v2804_v44  ;;  %v2113_v36 = vpop.f32.mrb[64].mxu1  ;;  %v1497_v7 = vpop.f32.mrb[65].mxu0 }
 0x178   :  { %v1538_v40 = vadd.f32 %v2113_v36, %v1441_v21  ;;  %v1498_v3 = vadd.f32 %v1497_v7, %v2798_v24  ;;  %v1529_v42 = vpop.f32.mrb[65].mxu1  ;;  %v2106_v29 = vpop.f32.mrb[66].mxu0 }
 0x179   :  { %v1530_v45 = vadd.f32 %v1529_v42, %v1433_v38  ;;  %v1509_v6 = vadd.f32 %v2106_v29, %v2806_v46  ;;  %v2114_v47 = vpop.f32.mrb[66].mxu1  ;;  %v1500_v48 = vpop.f32.mrb[67].mxu0  ;;  %v1620_v52 = vadd.f32 %v2838_v27, %v1506_v34 }
 0x17a   :  { %v1541_v49 = vadd.f32 %v2114_v47, %v1444_v59  ;;  %v1501_v44 = vadd.f32 %v1500_v48, %v2800_v26  ;;  %v1532_v50 = vpop.f32.mrb[67].mxu1  ;;  %v1628_v54 = vadd.f32 %v2838_v27, %v1538_v40  ;;  %v1618_v56 = vadd.f32 %v2838_v27, %v1498_v3 }
 0x17b   :  { %v1533_v19 = vadd.f32 %v1532_v50, %v2822_v39  ;;  %v1636_v24 = vmax.f32 %v1620_v52, 0.0  ;;  %v1626_v58 = vadd.f32 %v2838_v27, %v1530_v45  ;;  %v1621_v38 = vadd.f32 %v2838_v27, %v1509_v6 }
 0x17c   :  { %v1644_v46 = vmax.f32 %v1628_v54, 0.0  ;;  %v1634_v21 = vmax.f32 %v1618_v56, 0.0  ;;  %v1629_v41 = vadd.f32 %v2838_v27, %v1541_v49  ;;  %v1619_v26 = vadd.f32 %v2838_v27, %v1501_v44 }
 0x17d   :  { %1652 = vst [vmem:[%s2917_s3 + $0x10] sm:$0xff] %v1636_v24  ;;  %v1642_v39 = vmax.f32 %v1626_v58, 0.0  ;;  %v1637_v60 = vmax.f32 %v1621_v38, 0.0  ;;  %v1627_v61 = vadd.f32 %v2838_v27, %v1533_v19 }
 0x17e   :  { %v2109_v59 = vpop.f32.mrb[68].mxu0  ;;  %1660 = vst [vmem:[%s2917_s3 + $0x50] sm:$0xff] %v1644_v46  ;;  %1650 = vst [vmem:[%s2917_s3] sm:$0xff] %v1634_v21  ;;  %v1645_v2 = vmax.f32 %v1629_v41, 0.0  ;;  %v1635_v4 = vmax.f32 %v1619_v26, 0.0 }
 0x17f   :  { %v1522_v43 = vadd.f32 %v2109_v59, %v2816_v16  ;;  %v2117_v63 = vpop.f32.mrb[68].mxu1  ;;  %v1513_v1 = vpop.f32.mrb[69].mxu0  ;;  %1658 = vst [vmem:[%s2917_s3 + $0x40] sm:$0xff] %v1642_v39  ;;  %1653 = vst [vmem:[%s2917_s3 + $0x18] sm:$0xff] %v1637_v60  ;;  %v1643_v16 = vmax.f32 %v1627_v61, 0.0 }
 0x180   :  { %v1554_v8 = vadd.f32 %v2117_v63, %v1457_v32  ;;  %v1514_v9 = vadd.f32 %v1513_v1, %v2810_v62  ;;  %v1545_v10 = vpop.f32.mrb[69].mxu1  ;;  %v2110_v35 = vpop.f32.mrb[70].mxu0  ;;  %1661 = vst [vmem:[%s2917_s3 + $0x58] sm:$0xff] %v1645_v2  ;;  %1651 = vst [vmem:[%s2917_s3 + $0x8] sm:$0xff] %v1635_v4 }
 0x181   :  { %v1546_v11 = vadd.f32 %v1545_v10, %v2828_v55  ;;  %v1525_v12 = vadd.f32 %v2110_v35, %v2818_v18  ;;  %v2118_v37 = vpop.f32.mrb[70].mxu1  ;;  %v1516_v14 = vpop.f32.mrb[71].mxu0  ;;  %1659 = vst [vmem:[%s2917_s3 + $0x48] sm:$0xff] %v1643_v16  ;;  %v1624_v18 = vadd.f32 %v2838_v27, %v1522_v43 }
 0x182   :  { %v1557_v62 = vadd.f32 %v2118_v37, %v1460_v33  ;;  %v1517_v15 = vadd.f32 %v1516_v14, %v2812_v0  ;;  %v1548_v57 = vpop.f32.mrb[71].mxu1  ;;  %v1632_v17 = vadd.f32 %v2838_v27, %v1554_v8  ;;  %v1622_v20 = vadd.f32 %v2838_v27, %v1514_v9 }
 0x183   :  { %v1549_v55 = vadd.f32 %v1548_v57, %v2830_v13  ;;  %v1640_v22 = vmax.f32 %v1624_v18, 0.0  ;;  %v1630_v23 = vadd.f32 %v2838_v27, %v1546_v11  ;;  %v1625_v25 = vadd.f32 %v2838_v27, %v1525_v12 }
 0x184   :  { %v1648_v51 = vmax.f32 %v1632_v17, 0.0  ;;  %v1638_v0 = vmax.f32 %v1622_v20, 0.0  ;;  %v1633_v28 = vadd.f32 %v2838_v27, %v1557_v62  ;;  %v1623_v30 = vadd.f32 %v2838_v27, %v1517_v15 }
 0x185   :  { %1656 = vst [vmem:[%s2917_s3 + $0x30] sm:$0xff] %v1640_v22  ;;  %v1646_v13 = vmax.f32 %v1630_v23, 0.0  ;;  %v1641_v31 = vmax.f32 %v1625_v25, 0.0  ;;  %v1631_v53 = vadd.f32 %v2838_v27, %v1549_v55 }
 0x186   :  { %1664 = vst [vmem:[%s2917_s3 + $0x70] sm:$0xff] %v1648_v51  ;;  %1654 = vst [vmem:[%s2917_s3 + $0x20] sm:$0xff] %v1638_v0  ;;  %v1649_v32 = vmax.f32 %v1633_v28, 0.0  ;;  %v1639_v5 = vmax.f32 %v1623_v30, 0.0 }
 0x187   :  { %1662 = vst [vmem:[%s2917_s3 + $0x60] sm:$0xff] %v1646_v13  ;;  %1657 = vst [vmem:[%s2917_s3 + $0x38] sm:$0xff] %v1641_v31  ;;  %v1647_v33 = vmax.f32 %v1631_v53, 0.0 }
 0x188   :  { %1665 = vst [vmem:[%s2917_s3 + $0x78] sm:$0xff] %v1649_v32  ;;  %1655 = vst [vmem:[%s2917_s3 + $0x28] sm:$0xff] %v1639_v5 }
 0x189   :  { %1663 = vst [vmem:[%s2917_s3 + $0x68] sm:$0xff] %v1647_v33 }

// kernel: vgg19_forward.26
= control target key start
LH: loop header
LB: loop body
LE: loop exit
PB: predicated region body
PF: predicated region fallthrough
CT: control target
= control target key end

     0   :  { %s2331_s1 = inlined_call_operand.vmem [shape: bf16[1152,256], index: 1, kind: input, shape index: {}]   ;;  %s2332_s0 = inlined_call_operand.vmem [shape: bf16[32,1152], index: 0, kind: input, shape index: {}]   ;;  %s2333_s2 = inlined_call_operand.vmem [shape: f32[1,256], index: 2, kind: input, shape index: {}]   ;;  %s2334_s3 = inlined_call_operand.vmem [shape: f32[32,256], index: 3, kind: output, shape index: {}]  }
   0x1   :  { %v1555_v0 = vld [vmem:[%s2331_s1 + $0x4] ss:$8 sps:$4 sm:$0xff]   ;;  %v1559_v2 = vld [vmem:[%s2331_s1] ss:$8 sps:$4 sm:$0xff]   ;;  %v1561_v4 = vld [vmem:[%s2331_s1 + $0x14] ss:$8 sps:$4 sm:$0xff]  }
   0x2   :  { %v1557_v1 = vld [vmem:[%s2331_s1 + $0x204] ss:$8 sps:$4 sm:$0xff]   ;;  %1011 = vmatprep.subr.bf16.mxu1 %v1555_v0  ;;  %v1560_v3 = vld [vmem:[%s2331_s1 + $0x200] ss:$8 sps:$4 sm:$0xff]   ;;  %v1563_v5 = vld [vmem:[%s2331_s1 + $0x214] ss:$8 sps:$4 sm:$0xff]  }
   0x3   :  { %1117 = vmatprep.subr.bf16.mxu0 %v1557_v1  ;;  %1012 = vmatpush1.bf16.msra.mxu1 %v1559_v2  ;;  %v1565_v6 = vld [vmem:[%s2331_s1 + $0x10] ss:$8 sps:$4 sm:$0xff]   ;;  %v1567_v8 = vld [vmem:[%s2331_s1 + $0x24] ss:$8 sps:$4 sm:$0xff]   ;;  %v1571_v10 = vld [vmem:[%s2331_s1 + $0x20] ss:$8 sps:$4 sm:$0xff]  }
   0x4   :  { %1118 = vmatpush1.bf16.msra.mxu0 %v1560_v3  ;;  %1013 = vmatprep.subr.bf16.mxu1 %v1561_v4  ;;  %v1566_v7 = vld [vmem:[%s2331_s1 + $0x210] ss:$8 sps:$4 sm:$0xff]   ;;  %v1569_v9 = vld [vmem:[%s2331_s1 + $0x224] ss:$8 sps:$4 sm:$0xff]   ;;  %v1572_v11 = vld [vmem:[%s2331_s1 + $0x220] ss:$8 sps:$4 sm:$0xff]  }
   0x5   :  { %1119 = vmatprep.subr.bf16.mxu0 %v1563_v5  ;;  %v1573_v12 = vld [vmem:[%s2331_s1 + $0x34] ss:$8 sps:$4 sm:$0xff]   ;;  %v1577_v14 = vld [vmem:[%s2331_s1 + $0x30] ss:$8 sps:$4 sm:$0xff]   ;;  %v1579_v16 = vld [vmem:[%s2331_s1 + $0x44] ss:$8 sps:$4 sm:$0xff]  }
   0x6   :  { %v1575_v13 = vld [vmem:[%s2331_s1 + $0x234] ss:$8 sps:$4 sm:$0xff]   ;;  %v1578_v15 = vld [vmem:[%s2331_s1 + $0x230] ss:$8 sps:$4 sm:$0xff]   ;;  %v1581_v17 = vld [vmem:[%s2331_s1 + $0x244] ss:$8 sps:$4 sm:$0xff]  }
   0x7   :  { %1014 = vmatpush1.bf16.msra.mxu1 %v1565_v6  ;;  %v1583_v18 = vld [vmem:[%s2331_s1 + $0x40] ss:$8 sps:$4 sm:$0xff]   ;;  %v1585_v20 = vld [vmem:[%s2331_s1 + $0x54] ss:$8 sps:$4 sm:$0xff]   ;;  %v1589_v22 = vld [vmem:[%s2331_s1 + $0x50] ss:$8 sps:$4 sm:$0xff]  }
   0x8   :  { %1120 = vmatpush1.bf16.msra.mxu0 %v1566_v7  ;;  %1015 = vmatprep.subr.bf16.mxu1 %v1567_v8  ;;  %v1584_v19 = vld [vmem:[%s2331_s1 + $0x240] ss:$8 sps:$4 sm:$0xff]   ;;  %v1587_v21 = vld [vmem:[%s2331_s1 + $0x254] ss:$8 sps:$4 sm:$0xff]   ;;  %v1590_v23 = vld [vmem:[%s2331_s1 + $0x250] ss:$8 sps:$4 sm:$0xff]  }
   0x9   :  { %1121 = vmatprep.subr.bf16.mxu0 %v1569_v9  ;;  %v1591_v24 = vld [vmem:[%s2331_s1 + $0x64] ss:$8 sps:$4 sm:$0xff]   ;;  %v1595_v26 = vld [vmem:[%s2331_s1 + $0x60] ss:$8 sps:$4 sm:$0xff]   ;;  %v1597_v28 = vld [vmem:[%s2331_s1 + $0x74] ss:$8 sps:$4 sm:$0xff]  }
   0xa   :  { %v1593_v25 = vld [vmem:[%s2331_s1 + $0x264] ss:$8 sps:$4 sm:$0xff]   ;;  %v1596_v27 = vld [vmem:[%s2331_s1 + $0x260] ss:$8 sps:$4 sm:$0xff]   ;;  %v1599_v29 = vld [vmem:[%s2331_s1 + $0x274] ss:$8 sps:$4 sm:$0xff]  }
   0xb   :  { %1016 = vmatpush1.bf16.msra.mxu1 %v1571_v10  ;;  %v1601_v30 = vld [vmem:[%s2331_s1 + $0x70] ss:$8 sps:$4 sm:$0xff]   ;;  %v1603_v32 = vld [vmem:[%s2331_s1 + $0x84] ss:$8 sps:$4 sm:$0xff]   ;;  %v1607_v34 = vld [vmem:[%s2331_s1 + $0x80] ss:$8 sps:$4 sm:$0xff]  }
   0xc   :  { %1122 = vmatpush1.bf16.msra.mxu0 %v1572_v11  ;;  %1017 = vmatprep.subr.bf16.mxu1 %v1573_v12  ;;  %v1602_v31 = vld [vmem:[%s2331_s1 + $0x270] ss:$8 sps:$4 sm:$0xff]   ;;  %v1605_v33 = vld [vmem:[%s2331_s1 + $0x284] ss:$8 sps:$4 sm:$0xff]   ;;  %v1608_v35 = vld [vmem:[%s2331_s1 + $0x280] ss:$8 sps:$4 sm:$0xff]  }
   0xd   :  { %1123 = vmatprep.subr.bf16.mxu0 %v1575_v13  ;;  %v1609_v36 = vld [vmem:[%s2331_s1 + $0x94] ss:$8 sps:$4 sm:$0xff]   ;;  %v1613_v38 = vld [vmem:[%s2331_s1 + $0x90] ss:$8 sps:$4 sm:$0xff]   ;;  %v1615_v40 = vld [vmem:[%s2331_s1 + $0xa4] ss:$8 sps:$4 sm:$0xff]  }
   0xe   :  { %v1611_v37 = vld [vmem:[%s2331_s1 + $0x294] ss:$8 sps:$4 sm:$0xff]   ;;  %v1614_v39 = vld [vmem:[%s2331_s1 + $0x290] ss:$8 sps:$4 sm:$0xff]   ;;  %v1617_v41 = vld [vmem:[%s2331_s1 + $0x2a4] ss:$8 sps:$4 sm:$0xff]  }
   0xf   :  { %1018 = vmatpush1.bf16.msra.mxu1 %v1577_v14  ;;  %v1619_v42 = vld [vmem:[%s2331_s1 + $0xa0] ss:$8 sps:$4 sm:$0xff]   ;;  %v1621_v44 = vld [vmem:[%s2331_s1 + $0xb4] ss:$8 sps:$4 sm:$0xff]   ;;  %v1625_v46 = vld [vmem:[%s2331_s1 + $0xb0] ss:$8 sps:$4 sm:$0xff]  }
  0x10   :  { %1124 = vmatpush1.bf16.msra.mxu0 %v1578_v15  ;;  %1019 = vmatprep.subr.bf16.mxu1 %v1579_v16  ;;  %v1620_v43 = vld [vmem:[%s2331_s1 + $0x2a0] ss:$8 sps:$4 sm:$0xff]   ;;  %v1623_v45 = vld [vmem:[%s2331_s1 + $0x2b4] ss:$8 sps:$4 sm:$0xff]   ;;  %v1626_v47 = vld [vmem:[%s2331_s1 + $0x2b0] ss:$8 sps:$4 sm:$0xff]  }
  0x11   :  { %1125 = vmatprep.subr.bf16.mxu0 %v1581_v17  ;;  %v1653_v48 = vld [vmem:[%s2332_s0 + $0x4] ss:$36 sps:$4 sm:$0xff]   ;;  %v1659_v51 = vld [vmem:[%s2332_s0 + $0x14] ss:$36 sps:$4 sm:$0xff]  }
  0x12   :  { %v1627_v49 = vld [vmem:[%s2331_s1 + $0xc4] ss:$8 sps:$4 sm:$0xff]   ;;  %1043 = vmatprep.mubr.bf16.mxu1 %v1653_v48  ;;  %v1631_v52 = vld [vmem:[%s2331_s1 + $0xc0] ss:$8 sps:$4 sm:$0xff]   ;;  %v1633_v54 = vld [vmem:[%s2331_s1 + $0xd4] ss:$8 sps:$4 sm:$0xff]   ;;  %1149 = vmatprep.mubr.bf16.mxu0 %v1659_v51 }
  0x13   :  { %1020 = vmatpush1.bf16.msra.mxu1 %v1583_v18  ;;  %v1629_v50 = vld [vmem:[%s2331_s1 + $0x2c4] ss:$8 sps:$4 sm:$0xff]   ;;  %v1632_v53 = vld [vmem:[%s2331_s1 + $0x2c0] ss:$8 sps:$4 sm:$0xff]   ;;  %v1635_v55 = vld [vmem:[%s2331_s1 + $0x2d4] ss:$8 sps:$4 sm:$0xff]  }
  0x14   :  { %1126 = vmatpush1.bf16.msra.mxu0 %v1584_v19  ;;  %1021 = vmatprep.subr.bf16.mxu1 %v1585_v20  ;;  %v1637_v56 = vld [vmem:[%s2331_s1 + $0xd0] ss:$8 sps:$4 sm:$0xff]   ;;  %v1639_v58 = vld [vmem:[%s2331_s1 + $0xe4] ss:$8 sps:$4 sm:$0xff]   ;;  %v1643_v60 = vld [vmem:[%s2331_s1 + $0xe0] ss:$8 sps:$4 sm:$0xff]  }
  0x15   :  { %1127 = vmatprep.subr.bf16.mxu0 %v1587_v21  ;;  %v1638_v57 = vld [vmem:[%s2331_s1 + $0x2d0] ss:$8 sps:$4 sm:$0xff]   ;;  %v1641_v59 = vld [vmem:[%s2331_s1 + $0x2e4] ss:$8 sps:$4 sm:$0xff]   ;;  %v1644_v61 = vld [vmem:[%s2331_s1 + $0x2e0] ss:$8 sps:$4 sm:$0xff]  }
  0x16   :  { %v1645_v62 = vld [vmem:[%s2331_s1 + $0xf4] ss:$8 sps:$4 sm:$0xff]   ;;  %v1649_v0 = vld [vmem:[%s2331_s1 + $0xf0] ss:$8 sps:$4 sm:$0xff]   ;;  %v1656_v2 = vld [vmem:[%s2331_s1 + $0x104] ss:$8 sps:$4 sm:$0xff]  }
  0x17   :  { %1022 = vmatpush1.bf16.msra.mxu1 %v1589_v22  ;;  %v1647_v63 = vld [vmem:[%s2331_s1 + $0x2f4] ss:$8 sps:$4 sm:$0xff]   ;;  %v1650_v1 = vld [vmem:[%s2331_s1 + $0x2f0] ss:$8 sps:$4 sm:$0xff]   ;;  %v1662_v3 = vld [vmem:[%s2331_s1 + $0x304] ss:$8 sps:$4 sm:$0xff]  }
  0x18   :  { %1128 = vmatpush1.bf16.msra.mxu0 %v1590_v23  ;;  %1023 = vmatprep.subr.bf16.mxu1 %v1591_v24  ;;  %v1651_v4 = vld [vmem:[%s2332_s0] ss:$36 sps:$4 sm:$0xff]   ;;  %v1657_v6 = vld [vmem:[%s2332_s0 + $0x10] ss:$36 sps:$4 sm:$0xff]  }
  0x19   :  { %1129 = vmatprep.subr.bf16.mxu0 %v1593_v25  ;;  %v1654_v5 = vld [vmem:[%s2331_s1 + $0x100] ss:$8 sps:$4 sm:$0xff]   ;;  %v1665_v8 = vld [vmem:[%s2331_s1 + $0x114] ss:$8 sps:$4 sm:$0xff]   ;;  %v1663_v10 = vld [vmem:[%s2331_s1 + $0x110] ss:$8 sps:$4 sm:$0xff]  }
  0x1a   :  { %v1660_v7 = vld [vmem:[%s2331_s1 + $0x300] ss:$8 sps:$4 sm:$0xff]   ;;  %v1668_v9 = vld [vmem:[%s2331_s1 + $0x314] ss:$8 sps:$4 sm:$0xff]   ;;  %v1666_v11 = vld [vmem:[%s2331_s1 + $0x310] ss:$8 sps:$4 sm:$0xff]  }
  0x1b   :  { %1024 = vmatpush1.bf16.msra.mxu1 %v1595_v26  ;;  %v1671_v12 = vld [vmem:[%s2331_s1 + $0x124] ss:$8 sps:$4 sm:$0xff]   ;;  %v1669_v14 = vld [vmem:[%s2331_s1 + $0x120] ss:$8 sps:$4 sm:$0xff]   ;;  %v1677_v16 = vld [vmem:[%s2331_s1 + $0x134] ss:$8 sps:$4 sm:$0xff]  }
  0x1c   :  { %1130 = vmatpush1.bf16.msra.mxu0 %v1596_v27  ;;  %1025 = vmatprep.subr.bf16.mxu1 %v1597_v28  ;;  %v1674_v13 = vld [vmem:[%s2331_s1 + $0x324] ss:$8 sps:$4 sm:$0xff]   ;;  %v1672_v15 = vld [vmem:[%s2331_s1 + $0x320] ss:$8 sps:$4 sm:$0xff]   ;;  %v1680_v17 = vld [vmem:[%s2331_s1 + $0x334] ss:$8 sps:$4 sm:$0xff]  }
  0x1d   :  { %1131 = vmatprep.subr.bf16.mxu0 %v1599_v29  ;;  %v1675_v18 = vld [vmem:[%s2331_s1 + $0x130] ss:$8 sps:$4 sm:$0xff]   ;;  %v1683_v20 = vld [vmem:[%s2331_s1 + $0x144] ss:$8 sps:$4 sm:$0xff]   ;;  %v1681_v22 = vld [vmem:[%s2331_s1 + $0x140] ss:$8 sps:$4 sm:$0xff]  }
  0x1e   :  { %v1678_v19 = vld [vmem:[%s2331_s1 + $0x330] ss:$8 sps:$4 sm:$0xff]   ;;  %v1686_v21 = vld [vmem:[%s2331_s1 + $0x344] ss:$8 sps:$4 sm:$0xff]   ;;  %v1684_v23 = vld [vmem:[%s2331_s1 + $0x340] ss:$8 sps:$4 sm:$0xff]  }
  0x1f   :  { %1026 = vmatpush1.bf16.msra.mxu1 %v1601_v30  ;;  %v1689_v24 = vld [vmem:[%s2331_s1 + $0x154] ss:$8 sps:$4 sm:$0xff]   ;;  %v1687_v26 = vld [vmem:[%s2331_s1 + $0x150] ss:$8 sps:$4 sm:$0xff]   ;;  %v1695_v28 = vld [vmem:[%s2331_s1 + $0x164] ss:$8 sps:$4 sm:$0xff]  }
  0x20   :  { %1132 = vmatpush1.bf16.msra.mxu0 %v1602_v31  ;;  %1027 = vmatprep.subr.bf16.mxu1 %v1603_v32  ;;  %v1692_v25 = vld [vmem:[%s2331_s1 + $0x354] ss:$8 sps:$4 sm:$0xff]   ;;  %v1690_v27 = vld [vmem:[%s2331_s1 + $0x350] ss:$8 sps:$4 sm:$0xff]   ;;  %v1745_v31 = vld [vmem:[%s2332_s0 + $0x48] ss:$36 sps:$4 sm:$0xff]  }
  0x21   :  { %1133 = vmatprep.subr.bf16.mxu0 %v1605_v33  ;;  %v1741_v29 = vld [vmem:[%s2332_s0 + $0x4c] ss:$36 sps:$4 sm:$0xff]   ;;  %v1743_v30 = vld [vmem:[%s2332_s0 + $0x5c] ss:$36 sps:$4 sm:$0xff]  }
  0x22   :  { %v1698_v32 = vld [vmem:[%s2331_s1 + $0x364] ss:$8 sps:$4 sm:$0xff]   ;;  %v1749_v33 = vld [vmem:[%s2332_s0 + $0x58] ss:$36 sps:$4 sm:$0xff]  }
  0x23   :  { %1028 = vmatpush1.bf16.msra.mxu1 %v1607_v34  ;;  %v1693_v34 = vld [vmem:[%s2331_s1 + $0x160] ss:$8 sps:$4 sm:$0xff]   ;;  %v1711_v48 = vld [vmem:[%s2331_s1 + $0x190] ss:$8 sps:$4 sm:$0xff]   ;;  %v1722_v51 = vld [vmem:[%s2331_s1 + $0x3a4] ss:$8 sps:$4 sm:$0xff]  }
  0x24   :  { %1134 = vmatpush1.bf16.msra.mxu0 %v1608_v35  ;;  %1029 = vmatprep.subr.bf16.mxu1 %v1609_v36  ;;  %v1696_v35 = vld [vmem:[%s2331_s1 + $0x360] ss:$8 sps:$4 sm:$0xff]   ;;  %v1701_v36 = vld [vmem:[%s2331_s1 + $0x174] ss:$8 sps:$4 sm:$0xff]  }
  0x25   :  { %1135 = vmatprep.subr.bf16.mxu0 %v1611_v37  ;;  %v1704_v37 = vld [vmem:[%s2331_s1 + $0x374] ss:$8 sps:$4 sm:$0xff]  }
  0x27   :  { %1030 = vmatpush1.bf16.msra.mxu1 %v1613_v38  ;;  %v1699_v38 = vld [vmem:[%s2331_s1 + $0x170] ss:$8 sps:$4 sm:$0xff]  }
  0x28   :  { %1136 = vmatpush1.bf16.msra.mxu0 %v1614_v39  ;;  %1031 = vmatprep.subr.bf16.mxu1 %v1615_v40  ;;  %v1702_v39 = vld [vmem:[%s2331_s1 + $0x370] ss:$8 sps:$4 sm:$0xff]   ;;  %v1707_v40 = vld [vmem:[%s2331_s1 + $0x184] ss:$8 sps:$4 sm:$0xff]  }
  0x29   :  { %1137 = vmatprep.subr.bf16.mxu0 %v1617_v41  ;;  %v1761_v41 = vld [vmem:[%s2332_s0 + $0xc] ss:$36 sps:$4 sm:$0xff]  }
  0x2b   :  { %1032 = vmatpush1.bf16.msra.mxu1 %v1619_v42  ;;  %v1710_v42 = vld [vmem:[%s2331_s1 + $0x384] ss:$8 sps:$4 sm:$0xff]  }
  0x2c   :  { %1138 = vmatpush1.bf16.msra.mxu0 %v1620_v43  ;;  %1033 = vmatprep.subr.bf16.mxu1 %v1621_v44  ;;  %v1764_v43 = vld [vmem:[%s2332_s0 + $0x1c] ss:$36 sps:$4 sm:$0xff]  }
  0x2d   :  { %1139 = vmatprep.subr.bf16.mxu0 %v1623_v45  ;;  %v1705_v44 = vld [vmem:[%s2331_s1 + $0x180] ss:$8 sps:$4 sm:$0xff]  }
  0x2e   :  { %v1708_v45 = vld [vmem:[%s2331_s1 + $0x380] ss:$8 sps:$4 sm:$0xff]  }
  0x2f   :  { %1034 = vmatpush1.bf16.msra.mxu1 %v1625_v46  ;;  %v1713_v46 = vld [vmem:[%s2331_s1 + $0x194] ss:$8 sps:$4 sm:$0xff]  }
  0x30   :  { %1140 = vmatpush1.bf16.msra.mxu0 %v1626_v47  ;;  %1035 = vmatprep.subr.bf16.mxu1 %v1627_v49  ;;  %v1716_v47 = vld [vmem:[%s2331_s1 + $0x394] ss:$8 sps:$4 sm:$0xff]   ;;  %v1714_v49 = vld [vmem:[%s2331_s1 + $0x390] ss:$8 sps:$4 sm:$0xff]  }
  0x31   :  { %1141 = vmatprep.subr.bf16.mxu0 %v1629_v50  ;;  %v1719_v50 = vld [vmem:[%s2331_s1 + $0x1a4] ss:$8 sps:$4 sm:$0xff]  }
  0x33   :  { %1036 = vmatpush1.bf16.msra.mxu1 %v1631_v52  ;;  %v1717_v52 = vld [vmem:[%s2331_s1 + $0x1a0] ss:$8 sps:$4 sm:$0xff]  }
  0x34   :  { %1142 = vmatpush1.bf16.msra.mxu0 %v1632_v53  ;;  %1037 = vmatprep.subr.bf16.mxu1 %v1633_v54  ;;  %v1720_v53 = vld [vmem:[%s2331_s1 + $0x3a0] ss:$8 sps:$4 sm:$0xff]   ;;  %v1725_v54 = vld [vmem:[%s2331_s1 + $0x1b4] ss:$8 sps:$4 sm:$0xff]  }
  0x35   :  { %1143 = vmatprep.subr.bf16.mxu0 %v1635_v55  ;;  %v1728_v55 = vld [vmem:[%s2331_s1 + $0x3b4] ss:$8 sps:$4 sm:$0xff]  }
  0x37   :  { %1038 = vmatpush1.bf16.msra.mxu1 %v1637_v56  ;;  %v1723_v56 = vld [vmem:[%s2331_s1 + $0x1b0] ss:$8 sps:$4 sm:$0xff]  }
  0x38   :  { %1144 = vmatpush1.bf16.msra.mxu0 %v1638_v57  ;;  %1039 = vmatprep.subr.bf16.mxu1 %v1639_v58  ;;  %v1726_v57 = vld [vmem:[%s2331_s1 + $0x3b0] ss:$8 sps:$4 sm:$0xff]   ;;  %v1731_v58 = vld [vmem:[%s2331_s1 + $0x1c4] ss:$8 sps:$4 sm:$0xff]  }
  0x39   :  { %1145 = vmatprep.subr.bf16.mxu0 %v1641_v59  ;;  %v1734_v59 = vld [vmem:[%s2331_s1 + $0x3c4] ss:$8 sps:$4 sm:$0xff]  }
  0x3b   :  { %1040 = vmatpush1.bf16.msra.mxu1 %v1643_v60  ;;  %v1729_v60 = vld [vmem:[%s2331_s1 + $0x1c0] ss:$8 sps:$4 sm:$0xff]  }
  0x3c   :  { %1146 = vmatpush1.bf16.msra.mxu0 %v1644_v61  ;;  %1041 = vmatprep.subr.bf16.mxu1 %v1645_v62  ;;  %v1732_v61 = vld [vmem:[%s2331_s1 + $0x3c0] ss:$8 sps:$4 sm:$0xff]   ;;  %v1737_v62 = vld [vmem:[%s2331_s1 + $0x1d4] ss:$8 sps:$4 sm:$0xff]  }
  0x3d   :  { %1147 = vmatprep.subr.bf16.mxu0 %v1647_v63  ;;  %v1740_v63 = vld [vmem:[%s2331_s1 + $0x3d4] ss:$8 sps:$4 sm:$0xff]  }
  0x3f   :  { %1042 = vmatpush1.bf16.msra.mxu1 %v1649_v0  ;;  %v1735_v0 = vld [vmem:[%s2331_s1 + $0x1d0] ss:$8 sps:$4 sm:$0xff]  }
  0x40   :  { %1148 = vmatpush1.bf16.msra.mxu0 %v1650_v1  ;;  %1064 = vmatprep.subr.bf16.mxu1 %v1656_v2  ;;  %v1738_v1 = vld [vmem:[%s2331_s1 + $0x3d0] ss:$8 sps:$4 sm:$0xff]   ;;  %v1748_v2 = vld [vmem:[%s2331_s1 + $0x1e4] ss:$8 sps:$4 sm:$0xff]  }
  0x41   :  { %1170 = vmatprep.subr.bf16.mxu0 %v1662_v3  ;;  %v1752_v3 = vld [vmem:[%s2331_s1 + $0x3e4] ss:$8 sps:$4 sm:$0xff]  }
  0x42   :  { %1044 = vmatmul.mubr.bf16.vlgmr.msra.gmra.mrb[0].mxu1 %v1651_v4  ;;  %v1746_v4 = vld [vmem:[%s2331_s1 + $0x1e0] ss:$8 sps:$4 sm:$0xff]  }
  0x43   :  { %1150 = vmatmul.mubr.bf16.vlgmr.msra.gmra.mrb[0].mxu0 %v1657_v6  ;;  %1065 = vmatpush1.bf16.msra.mxu1 %v1654_v5  ;;  %v1750_v5 = vld [vmem:[%s2331_s1 + $0x3e0] ss:$8 sps:$4 sm:$0xff]   ;;  %v1755_v6 = vld [vmem:[%s2331_s1 + $0x1f4] ss:$8 sps:$4 sm:$0xff]  }
  0x44   :  { %1171 = vmatpush1.bf16.msra.mxu0 %v1660_v7  ;;  %1066 = vmatprep.subr.bf16.mxu1 %v1665_v8  ;;  %v1758_v7 = vld [vmem:[%s2331_s1 + $0x3f4] ss:$8 sps:$4 sm:$0xff]   ;;  %v1753_v8 = vld [vmem:[%s2331_s1 + $0x1f0] ss:$8 sps:$4 sm:$0xff]  }
  0x45   :  { %1172 = vmatprep.subr.bf16.mxu0 %v1668_v9  ;;  %1053 = vmatprep.mubr.bf16.mxu1 %v1741_v29  ;;  %v1756_v9 = vld [vmem:[%s2331_s1 + $0x3f0] ss:$8 sps:$4 sm:$0xff]   ;;  %v1791_v29 = vld [vmem:[%s2331_s1 + $0x464] ss:$8 sps:$4 sm:$0xff]  }
  0x46   :  { %1159 = vmatprep.mubr.bf16.mxu0 %v1743_v30  ;;  %v1789_v30 = vld [vmem:[%s2331_s1 + $0x460] ss:$8 sps:$4 sm:$0xff]  }
  0x47   :  { %1067 = vmatpush1.bf16.msra.mxu1 %v1663_v10  ;;  %v1767_v10 = vld [vmem:[%s2331_s1 + $0x404] ss:$8 sps:$4 sm:$0xff]  }
  0x48   :  { %1173 = vmatpush1.bf16.msra.mxu0 %v1666_v11  ;;  %1068 = vmatprep.subr.bf16.mxu1 %v1671_v12  ;;  %v1759_v11 = vld [vmem:[%s2332_s0 + $0x8] ss:$36 sps:$4 sm:$0xff]   ;;  %v1762_v12 = vld [vmem:[%s2332_s0 + $0x18] ss:$36 sps:$4 sm:$0xff]  }
  0x49   :  { %1174 = vmatprep.subr.bf16.mxu0 %v1674_v13  ;;  %v1765_v13 = vld [vmem:[%s2331_s1 + $0x400] ss:$8 sps:$4 sm:$0xff]  }
  0x4a   :  { %1054 = vmatmul.mubr.bf16.gmra.mrb[4].mxu1 %v1745_v31  ;;  %v1794_v31 = vld [vmem:[%s2331_s1 + $0x474] ss:$8 sps:$4 sm:$0xff]  }
  0x4b   :  { %1069 = vmatpush1.bf16.msra.mxu1 %v1669_v14  ;;  %1160 = vmatmul.mubr.bf16.gmra.mrb[4].mxu0 %v1749_v33  ;;  %v1770_v14 = vld [vmem:[%s2331_s1 + $0x414] ss:$8 sps:$4 sm:$0xff]   ;;  %v1795_v33 = vld [vmem:[%s2332_s0 + $0x20] ss:$36 sps:$4 sm:$0xff]  }
  0x4c   :  { %1175 = vmatpush1.bf16.msra.mxu0 %v1672_v15  ;;  %1070 = vmatprep.subr.bf16.mxu1 %v1677_v16  ;;  %v1771_v15 = vld [vmem:[%s2332_s0 + $0x54] ss:$36 sps:$4 sm:$0xff]   ;;  %v1773_v16 = vld [vmem:[%s2332_s0 + $0x64] ss:$36 sps:$4 sm:$0xff]  }
  0x4d   :  { %1176 = vmatprep.subr.bf16.mxu0 %v1680_v17  ;;  %1096 = vmatprep.mubr.bf16.mxu1 %v1761_v41  ;;  %v1768_v17 = vld [vmem:[%s2331_s1 + $0x410] ss:$8 sps:$4 sm:$0xff]  }
  0x4e   :  { %1202 = vmatprep.mubr.bf16.mxu0 %v1764_v43 }
  0x4f   :  { %1071 = vmatpush1.bf16.msra.mxu1 %v1675_v18  ;;  %v1779_v18 = vld [vmem:[%s2331_s1 + $0x424] ss:$8 sps:$4 sm:$0xff]  }
  0x50   :  { %1177 = vmatpush1.bf16.msra.mxu0 %v1678_v19  ;;  %1072 = vmatprep.subr.bf16.mxu1 %v1683_v20  ;;  %v1775_v19 = vld [vmem:[%s2332_s0 + $0x50] ss:$36 sps:$4 sm:$0xff]   ;;  %v1776_v20 = vld [vmem:[%s2332_s0 + $0x60] ss:$36 sps:$4 sm:$0xff]  }
  0x51   :  { %1178 = vmatprep.subr.bf16.mxu0 %v1686_v21  ;;  %v1777_v21 = vld [vmem:[%s2331_s1 + $0x420] ss:$8 sps:$4 sm:$0xff]  }
  0x53   :  { %1073 = vmatpush1.bf16.msra.mxu1 %v1681_v22  ;;  %v1782_v22 = vld [vmem:[%s2331_s1 + $0x434] ss:$8 sps:$4 sm:$0xff]  }
  0x54   :  { %1179 = vmatpush1.bf16.msra.mxu0 %v1684_v23  ;;  %1074 = vmatprep.subr.bf16.mxu1 %v1689_v24  ;;  %v1780_v23 = vld [vmem:[%s2331_s1 + $0x430] ss:$8 sps:$4 sm:$0xff]   ;;  %v1785_v24 = vld [vmem:[%s2331_s1 + $0x444] ss:$8 sps:$4 sm:$0xff]  }
  0x55   :  { %1180 = vmatprep.subr.bf16.mxu0 %v1692_v25  ;;  %v1797_v25 = vmov 0  }
  0x57   :  { %1075 = vmatpush1.bf16.msra.mxu1 %v1687_v26  ;;  %v1783_v26 = vld [vmem:[%s2331_s1 + $0x440] ss:$8 sps:$4 sm:$0xff]  }
  0x58   :  { %1181 = vmatpush1.bf16.msra.mxu0 %v1690_v27  ;;  %1076 = vmatprep.subr.bf16.mxu1 %v1695_v28  ;;  %v1788_v27 = vld [vmem:[%s2331_s1 + $0x454] ss:$8 sps:$4 sm:$0xff]   ;;  %v1786_v28 = vld [vmem:[%s2331_s1 + $0x450] ss:$8 sps:$4 sm:$0xff]  }
  0x59   :  { %1182 = vmatprep.subr.bf16.mxu0 %v1698_v32  ;;  %v1792_v32 = vld [vmem:[%s2331_s1 + $0x470] ss:$8 sps:$4 sm:$0xff]  }
  0x5b   :  { %1077 = vmatpush1.bf16.msra.mxu1 %v1693_v34  ;;  %v1796_v34 = vld [vmem:[%s2332_s0 + $0x68] ss:$36 sps:$4 sm:$0xff]  }
  0x5c   :  { %1183 = vmatpush1.bf16.msra.mxu0 %v1696_v35  ;;  %1078 = vmatprep.subr.bf16.mxu1 %v1701_v36 }
  0x5d   :  { %1184 = vmatprep.subr.bf16.mxu0 %v1704_v37 }
  0x5f   :  { %1079 = vmatpush1.bf16.msra.mxu1 %v1699_v38 }
  0x60   :  { %1185 = vmatpush1.bf16.msra.mxu0 %v1702_v39  ;;  %1080 = vmatprep.subr.bf16.mxu1 %v1707_v40 }
  0x61   :  { %1186 = vmatprep.subr.bf16.mxu0 %v1710_v42 }
  0x63   :  { %1081 = vmatpush1.bf16.msra.mxu1 %v1705_v44 }
  0x64   :  { %1187 = vmatpush1.bf16.msra.mxu0 %v1708_v45  ;;  %1082 = vmatprep.subr.bf16.mxu1 %v1713_v46 }
  0x65   :  { %1188 = vmatprep.subr.bf16.mxu0 %v1716_v47 }
  0x67   :  { %1083 = vmatpush1.bf16.msra.mxu1 %v1711_v48 }
  0x68   :  { %1189 = vmatpush1.bf16.msra.mxu0 %v1714_v49  ;;  %1084 = vmatprep.subr.bf16.mxu1 %v1719_v50 }
  0x69   :  { %1190 = vmatprep.subr.bf16.mxu0 %v1722_v51  ;;  %v1305_v51 = vlaneseq }
  0x6b   :  { %1085 = vmatpush1.bf16.msra.mxu1 %v1717_v52  ;;  %v1306_v52 = vshrl.u32 %v1305_v51, 7 }
  0x6c   :  { %1191 = vmatpush1.bf16.msra.mxu0 %v1720_v53  ;;  %1086 = vmatprep.subr.bf16.mxu1 %v1725_v54  ;;  %v1303_v54 = vld [vmem:[%s2333_s2] sm:$0x3] }
  0x6d   :  { %1192 = vmatprep.subr.bf16.mxu0 %v1728_v55  ;;  %v1307_v53 = vsub.s32 0, %v1306_v52  ;;  %v1311_v55 = vsub.s32 1, %v1306_v52 }
  0x6f   :  { %1087 = vmatpush1.bf16.msra.mxu1 %v1723_v56 }
  0x70   :  { %1193 = vmatpush1.bf16.msra.mxu0 %v1726_v57  ;;  %1088 = vmatprep.subr.bf16.mxu1 %v1731_v58 }
  0x71   :  { %1194 = vmatprep.subr.bf16.mxu0 %v1734_v59  ;;  %v1308_v59 = vrot.slane %v1303_v54, %v1307_v53 }
  0x73   :  { %1089 = vmatpush1.bf16.msra.mxu1 %v1729_v60 }
  0x74   :  { %1195 = vmatpush1.bf16.msra.mxu0 %v1732_v61  ;;  %1090 = vmatprep.subr.bf16.mxu1 %v1737_v62 }
  0x75   :  { %1196 = vmatprep.subr.bf16.mxu0 %v1740_v63 }
  0x77   :  { %1091 = vmatpush1.bf16.msra.mxu1 %v1735_v0  ;;  %v1312_v0 = vrot.slane %v1303_v54, %v1311_v55 }
  0x78   :  { %1197 = vmatpush1.bf16.msra.mxu0 %v1738_v1  ;;  %1092 = vmatprep.subr.bf16.mxu1 %v1748_v2 }
  0x79   :  { %1198 = vmatprep.subr.bf16.mxu0 %v1752_v3 }
  0x7b   :  { %1093 = vmatpush1.bf16.msra.mxu1 %v1746_v4 }
  0x7c   :  { %1199 = vmatpush1.bf16.msra.mxu0 %v1750_v5  ;;  %1094 = vmatprep.subr.bf16.mxu1 %v1755_v6 }
  0x7d   :  { %1200 = vmatprep.subr.bf16.mxu0 %v1758_v7 }
  0x7f   :  { %1095 = vmatpush1.bf16.msra.mxu1 %v1753_v8 }
  0x80   :  { %1201 = vmatpush1.bf16.msra.mxu0 %v1756_v9  ;;  %1505 = vmatprep.subr.bf16.mxu1 %v1767_v10 }
  0x81   :  { %1223 = vmatprep.subr.bf16.mxu0 %v1767_v10 }
  0x82   :  { %1097 = vmatmul.mubr.bf16.vlgmr.msra.gmra.mrb[0].mxu1 %v1759_v11 }
  0x83   :  { %1203 = vmatmul.mubr.bf16.vlgmr.msra.gmra.mrb[0].mxu0 %v1762_v12  ;;  %1513 = vmatpush1.bf16.msra.mxu1 %v1765_v13 }
  0x84   :  { %1224 = vmatpush1.bf16.msra.mxu0 %v1765_v13  ;;  %1506 = vmatprep.subr.bf16.mxu1 %v1770_v14 }
  0x85   :  { %1225 = vmatprep.subr.bf16.mxu0 %v1770_v14  ;;  %1106 = vmatprep.mubr.bf16.mxu1 %v1771_v15 }
  0x86   :  { %1212 = vmatprep.mubr.bf16.mxu0 %v1773_v16 }
  0x87   :  { %1514 = vmatpush1.bf16.msra.mxu1 %v1768_v17 }
  0x88   :  { %1226 = vmatpush1.bf16.msra.mxu0 %v1768_v17  ;;  %1507 = vmatprep.subr.bf16.mxu1 %v1779_v18 }
  0x89   :  { %1227 = vmatprep.subr.bf16.mxu0 %v1779_v18 }
  0x8a   :  { %1107 = vmatmul.mubr.bf16.gmra.mrb[4].mxu1 %v1775_v19 }
  0x8b   :  { %1213 = vmatmul.mubr.bf16.gmra.mrb[4].mxu0 %v1776_v20  ;;  %1515 = vmatpush1.bf16.msra.mxu1 %v1777_v21 }
  0x8c   :  { %1228 = vmatpush1.bf16.msra.mxu0 %v1777_v21  ;;  %1508 = vmatprep.subr.bf16.mxu1 %v1782_v22 }
  0x8d   :  { %1229 = vmatprep.subr.bf16.mxu0 %v1782_v22  ;;  %1255 = vmatprep.mubr.bf16.mxu0 %v1797_v25 }
  0x8e   :  { %1265 = vmatprep.mubr.bf16.mxu1 %v1797_v25 }
  0x8f   :  { %1516 = vmatpush1.bf16.msra.mxu1 %v1780_v23 }
  0x90   :  { %1230 = vmatpush1.bf16.msra.mxu0 %v1780_v23  ;;  %1509 = vmatprep.subr.bf16.mxu1 %v1785_v24 }
  0x91   :  { %1231 = vmatprep.subr.bf16.mxu0 %v1785_v24 }
  0x93   :  { %1517 = vmatpush1.bf16.msra.mxu1 %v1783_v26 }
  0x94   :  { %1232 = vmatpush1.bf16.msra.mxu0 %v1783_v26  ;;  %1510 = vmatprep.subr.bf16.mxu1 %v1788_v27 }
  0x95   :  { %1233 = vmatprep.subr.bf16.mxu0 %v1788_v27 }
  0x97   :  { %1518 = vmatpush1.bf16.msra.mxu1 %v1786_v28 }
  0x98   :  { %1234 = vmatpush1.bf16.msra.mxu0 %v1786_v28  ;;  %1511 = vmatprep.subr.bf16.mxu1 %v1791_v29 }
  0x99   :  { %1235 = vmatprep.subr.bf16.mxu0 %v1791_v29 }
  0x9b   :  { %1519 = vmatpush1.bf16.msra.mxu1 %v1789_v30 }
  0x9c   :  { %1236 = vmatpush1.bf16.msra.mxu0 %v1789_v30  ;;  %1512 = vmatprep.subr.bf16.mxu1 %v1794_v31 }
  0x9d   :  { %1237 = vmatprep.subr.bf16.mxu0 %v1794_v31 }
  0x9f   :  { %1520 = vmatpush1.bf16.msra.mxu1 %v1792_v32 }
  0xa0   :  { %1238 = vmatpush1.bf16.msra.mxu0 %v1792_v32 }
  0xa2   :  { %1266 = vmatmul.mubr.bf16.vlgmr.msra.gmra.mrb[8].mxu1 %v1796_v34 }
  0xa3   :  { %1256 = vmatmul.mubr.bf16.vlgmr.msra.gmra.mrb[0].mxu0 %v1795_v33 }
 0x155   :  { %v1098_v35 = vpop.f32.mrb[0].mxu1 }
 0x156   :  { %v1100_v36 = vpop.f32.mrb[1].mxu1 }
 0x157   :  { %v1102_v37 = vpop.f32.mrb[2].mxu1 }
 0x158   :  { %v1104_v38 = vpop.f32.mrb[3].mxu1 }
 0x15d   :  { %v1108_v39 = vpop.f32.mrb[4].mxu1 }
 0x15e   :  { %v1214_v40 = vpop.f32.mrb[4].mxu0  ;;  %v1110_v42 = vpop.f32.mrb[5].mxu1 }
 0x15f   :  { %v1525_v41 = vadd.f32 %v1214_v40, %v1108_v39  ;;  %v1216_v43 = vpop.f32.mrb[5].mxu0  ;;  %v1112_v45 = vpop.f32.mrb[6].mxu1 }
 0x160   :  { %v1527_v44 = vadd.f32 %v1216_v43, %v1110_v42  ;;  %v1218_v46 = vpop.f32.mrb[6].mxu0  ;;  %v1114_v48 = vpop.f32.mrb[7].mxu1 }
 0x161   :  { %v1529_v47 = vadd.f32 %v1218_v46, %v1112_v45  ;;  %v1220_v49 = vpop.f32.mrb[7].mxu0 }
 0x162   :  { %v1531_v50 = vadd.f32 %v1220_v49, %v1114_v48 }
 0x175   :  { %v1267_v57 = vpop.f32.mrb[8].mxu1 }
 0x176   :  { %v1257_v56 = vpop.f32.mrb[0].mxu0  ;;  %v1526_v60 = vadd.f32 %v1525_v41, %v1267_v57  ;;  %v1269_v62 = vpop.f32.mrb[9].mxu1 }
 0x177   :  { %v1521_v58 = vadd.f32 %v1257_v56, %v1098_v35  ;;  %v1259_v61 = vpop.f32.mrb[1].mxu0  ;;  %v1528_v1 = vadd.f32 %v1527_v44, %v1269_v62  ;;  %v1271_v3 = vpop.f32.mrb[10].mxu1 }
 0x178   :  { %v1522_v63 = vadd.f32 %v1259_v61, %v1100_v36  ;;  %v1261_v2 = vpop.f32.mrb[2].mxu0  ;;  %v1530_v5 = vadd.f32 %v1529_v47, %v1271_v3  ;;  %v1273_v7 = vpop.f32.mrb[11].mxu1  ;;  %v1319_v11 = vadd.f32 %v1526_v60, %v1308_v59 }
 0x179   :  { %v1523_v4 = vadd.f32 %v1261_v2, %v1102_v37  ;;  %v1263_v6 = vpop.f32.mrb[3].mxu0  ;;  %v1532_v9 = vadd.f32 %v1531_v50, %v1273_v7  ;;  %v1315_v10 = vadd.f32 %v1521_v58, %v1308_v59  ;;  %v1320_v13 = vadd.f32 %v1528_v1, %v1312_v0 }
 0x17a   :  { %v1524_v8 = vadd.f32 %v1263_v6, %v1104_v38  ;;  %v1316_v12 = vadd.f32 %v1522_v63, %v1312_v0  ;;  %v1327_v15 = vmax.f32 %v1319_v11, 0.0  ;;  %v1321_v17 = vadd.f32 %v1530_v5, %v1308_v59 }
 0x17b   :  { %v1323_v14 = vmax.f32 %v1315_v10, 0.0  ;;  %v1317_v16 = vadd.f32 %v1523_v4, %v1308_v59  ;;  %v1328_v19 = vmax.f32 %v1320_v13, 0.0  ;;  %v1322_v21 = vadd.f32 %v1532_v9, %v1312_v0 }
 0x17c   :  { %v1324_v18 = vmax.f32 %v1316_v12, 0.0  ;;  %v1318_v20 = vadd.f32 %v1524_v8, %v1312_v0  ;;  %1335 = vst [vmem:[%s2334_s3 + $0x20] sm:$0xff] %v1327_v15  ;;  %v1329_v23 = vmax.f32 %v1321_v17, 0.0 }
 0x17d   :  { %1331 = vst [vmem:[%s2334_s3] sm:$0xff] %v1323_v14  ;;  %v1325_v22 = vmax.f32 %v1317_v16, 0.0  ;;  %1336 = vst [vmem:[%s2334_s3 + $0x28] sm:$0xff] %v1328_v19  ;;  %v1330_v25 = vmax.f32 %v1322_v21, 0.0 }
 0x17e   :  { %1332 = vst [vmem:[%s2334_s3 + $0x8] sm:$0xff] %v1324_v18  ;;  %v1326_v24 = vmax.f32 %v1318_v20, 0.0  ;;  %1337 = vst [vmem:[%s2334_s3 + $0x30] sm:$0xff] %v1329_v23 }
 0x17f   :  { %1333 = vst [vmem:[%s2334_s3 + $0x10] sm:$0xff] %v1325_v22  ;;  %1338 = vst [vmem:[%s2334_s3 + $0x38] sm:$0xff] %v1330_v25 }
 0x180   :  { %1334 = vst [vmem:[%s2334_s3 + $0x18] sm:$0xff] %v1326_v24 }

// kernel: vgg19_forward.27
= control target key start
LH: loop header
LB: loop body
LE: loop exit
PB: predicated region body
PF: predicated region fallthrough
CT: control target
= control target key end

     0   :  { %s1038_s12 = smov 0   ;;  %s1040_s13 = smov 0   ;;  %s1268_s0 = inlined_call_operand.vmem [shape: bf16[32,2304], index: 0, kind: input, shape index: {}]   ;;  %s1269_s1 = inlined_call_operand.vmem [shape: bf16[2304,256], index: 1, kind: input, shape index: {}]   ;;  %s1270_s2 = inlined_call_operand.vmem [shape: f32[1,256], index: 2, kind: input, shape index: {}]   ;;  %s1271_s3 = inlined_call_operand.vmem [shape: f32[32,256], index: 3, kind: output, shape index: {}]  }
   0x1   :  { %s1042_s14 = smov 0   ;;  %s1044_s15 = smov 0  }
   0x2   :  { %s1046_s16 = smov 0  }
   0x3 LB: > { %s25_s17 = sadd.s32 1, %s1011_s15  ;;  %p48_p1 = scmp.ne.s32.totalorder %s1003_s13, %s999_s12  ;;  %s1015_s16 = sphi %s1046_s16, %s13_s16   ;;  %s1011_s15 = sphi %s1044_s15, %s1275_s15   ;;  %s1007_s14 = sphi %s1042_s14, %s1274_s14   ;;  %s1003_s13 = sphi %s1040_s13, %s1273_s13   ;;  %s999_s12 = sphi %s1038_s12, %s1272_s12  }
   0x4   : > { %p26_p0 = scmp.ge.s32.totalorder %s25_s17, 9  ;;  %p49_p2 = scmp.eq.s32.totalorder %s1015_s16, 0 }
   0x5   : > { %s41_s19 = sadd.s32 1, %s1003_s13  ;;  %p797_p5 = scmp.ge.s32.totalorder %s1015_s16, 9 }
   0x6   : > { %s1277_s17 = smov (%p26_p0, %s25_s17), 0  ;;  %p50_p3 = por %p49_p2, %p48_p1 }
   0x7   : > { %s37_s18 = ssub.s32 %s1011_s15, %s1277_s17  ;;  %164 = sbr.rel (%p797_p5) target bundleno = 21 (0x15), region = 20 }
   0x8   : > { %p39_p4 = scmp.eq.s32.totalorder %s37_s18, 0 }
   0xa   : > { %s1073_s20 = scalar_select %p39_p4, %s1003_s13, %s41_s19  }
   0xe   : > { %167 = sbr.rel (!%p50_p3) target bundleno = 21 (0x15), region = 24  ;;  %s169_s21 = sand.u32 (%p50_p3), 1, %s1003_s13  }
   0xf   : > { %s848_s22 = sshll.u32 (%p50_p3), %s1011_s15, 3  ;;  %s798_s23 = sshll.u32 (%p50_p3), %s169_s21, 5 }
  0x10   : > { %s177_s26 = scalar_lea.vmem (%p50_p3), %s1268_s0, %s848_s22  ;;  %s171_s27 = scalar_lea.vmem (%p50_p3), [#allocation2], %s798_s23 }
  0x11   : > { %v211_v0 = vld [vmem:[%s177_s26] sm:$0xff] (%p50_p3)  ;;  %v213_v1 = vld [vmem:[%s177_s26 + $0x48] sm:$0xff] (%p50_p3)  ;;  %v215_v2 = vld [vmem:[%s177_s26 + $0x90] sm:$0xff] (%p50_p3) }
  0x12   : > { %212 = vst [vmem:[%s171_s27] sm:$0xff] (%p50_p3), %v211_v0  ;;  %214 = vst [vmem:[%s171_s27 + $0x8] sm:$0xff] (%p50_p3), %v213_v1  ;;  %v217_v3 = vld [vmem:[%s177_s26 + $0xd8] sm:$0xff] (%p50_p3) }
  0x13   : > { %216 = vst [vmem:[%s171_s27 + $0x10] sm:$0xff] (%p50_p3), %v215_v2  ;;  %218 = vst [vmem:[%s171_s27 + $0x18] sm:$0xff] (%p50_p3), %v217_v3 }
  0x15 PF: > { %p801_p6 = scmp.ge.s32.totalorder %s1015_s16, 1  ;;  %p238_p7 = scmp.lt.s32.totalorder %s1015_s16, 10 }
  0x17   : > { %p239_p8 = pnand %p801_p6, %p238_p7 }
  0x18   : > { %s245_s28 = sand.u32 (!%p239_p8), 1, %s999_s12   ;;  %s803_s29 = sshll.u32 (!%p239_p8), %s1007_s14, 5 }
  0x19   : > { %242 = sbr.rel (%p239_p8) target bundleno = 335 (0x14f), region = 66  ;;  %s802_s30 = sshll.u32 (!%p239_p8), %s245_s28, 5 }
  0x1a   : > { %p291_p9 = scmp.lt.s32.totalorder (!%p239_p8), %s803_s29, 287  ;;  %s1090_s8 = scalar_lea.vmem (!%p239_p8), [#allocation2], %s802_s30 }
  0x1b   : > { %p806_p10 = scmp.ne.s32.totalorder (!%p239_p8), %s1007_s14, 0 }
  0x20   : > { %s1279_s29 = smov (!%p291_p9, %s803_s29), 287  ;;  %321 = sbr.rel (%p806_p10) target bundleno = 39 (0x27), region = 74 }
  0x21   : > { %s849_s4 = sshll.u32 %s1279_s29, 3  ;;  %v1017_v4 = vmov (!%p806_p10), 0.0  }
  0x22   : > { %s1088_s7 = scalar_lea.vmem %s1269_s1, %s849_s4  ;;  %322 = vst [vmem:[%s1271_s3] sm:$0xff] (!%p806_p10), %v1017_v4  ;;  %323 = vst [vmem:[%s1271_s3 + $0x8] sm:$0xff] (!%p806_p10), %v1017_v4 }
  0x23   : > { %324 = vst [vmem:[%s1271_s3 + $0x10] sm:$0xff] (!%p806_p10), %v1017_v4  ;;  %325 = vst [vmem:[%s1271_s3 + $0x18] sm:$0xff] (!%p806_p10), %v1017_v4 }
  0x24   : > { %326 = vst [vmem:[%s1271_s3 + $0x20] sm:$0xff] (!%p806_p10), %v1017_v4  ;;  %327 = vst [vmem:[%s1271_s3 + $0x28] sm:$0xff] (!%p806_p10), %v1017_v4 }
  0x25   : > { %328 = vst [vmem:[%s1271_s3 + $0x30] sm:$0xff] (!%p806_p10), %v1017_v4  ;;  %329 = vst [vmem:[%s1271_s3 + $0x38] sm:$0xff] (!%p806_p10), %v1017_v4 }
  0x27 PF: > { %v923_v5 = vld [vmem:[%s1088_s7 + $0x4] ss:$8 sps:$4 sm:$0xff]   ;;  %v925_v6 = vld [vmem:[%s1088_s7] ss:$8 sps:$4 sm:$0xff]   ;;  %v926_v7 = vld [vmem:[%s1088_s7 + $0x14] ss:$8 sps:$4 sm:$0xff]  }
  0x28   : > { %554 = vmatprep.subr.bf16.mxu0 %v923_v5  ;;  %850 = vmatprep.subr.bf16.mxu1 %v923_v5  ;;  %v928_v8 = vld [vmem:[%s1088_s7 + $0x10] ss:$8 sps:$4 sm:$0xff]   ;;  %v929_v9 = vld [vmem:[%s1088_s7 + $0x24] ss:$8 sps:$4 sm:$0xff]   ;;  %v931_v10 = vld [vmem:[%s1088_s7 + $0x20] ss:$8 sps:$4 sm:$0xff]  }
  0x29   : > { %555 = vmatpush1.bf16.msra.mxu0 %v925_v6  ;;  %866 = vmatpush1.bf16.msra.mxu1 %v925_v6  ;;  %v932_v11 = vld [vmem:[%s1088_s7 + $0x34] ss:$8 sps:$4 sm:$0xff]   ;;  %v934_v12 = vld [vmem:[%s1088_s7 + $0x30] ss:$8 sps:$4 sm:$0xff]   ;;  %v935_v13 = vld [vmem:[%s1088_s7 + $0x44] ss:$8 sps:$4 sm:$0xff]  }
  0x2a   : > { %556 = vmatprep.subr.bf16.mxu0 %v926_v7  ;;  %851 = vmatprep.subr.bf16.mxu1 %v926_v7  ;;  %v937_v14 = vld [vmem:[%s1088_s7 + $0x40] ss:$8 sps:$4 sm:$0xff]   ;;  %v938_v15 = vld [vmem:[%s1088_s7 + $0x54] ss:$8 sps:$4 sm:$0xff]   ;;  %v940_v16 = vld [vmem:[%s1088_s7 + $0x50] ss:$8 sps:$4 sm:$0xff]  }
  0x2b   : > { %v941_v17 = vld [vmem:[%s1088_s7 + $0x64] ss:$8 sps:$4 sm:$0xff]   ;;  %v943_v19 = vld [vmem:[%s1088_s7 + $0x60] ss:$8 sps:$4 sm:$0xff]   ;;  %v976_v20 = vld [vmem:[%s1090_s8 + $0x14] ss:$8 sps:$4 sm:$0xff]  }
  0x2c   : > { %v973_v18 = vld [vmem:[%s1090_s8 + $0x4] ss:$8 sps:$4 sm:$0xff]   ;;  %v944_v21 = vld [vmem:[%s1088_s7 + $0x74] ss:$8 sps:$4 sm:$0xff]   ;;  %596 = vmatprep.mubr.bf16.mxu1 %v976_v20  ;;  %v946_v22 = vld [vmem:[%s1088_s7 + $0x70] ss:$8 sps:$4 sm:$0xff]  }
  0x2d   : > { %557 = vmatpush1.bf16.msra.mxu0 %v928_v8  ;;  %867 = vmatpush1.bf16.msra.mxu1 %v928_v8  ;;  %v947_v23 = vld [vmem:[%s1088_s7 + $0x84] ss:$8 sps:$4 sm:$0xff]   ;;  %v949_v24 = vld [vmem:[%s1088_s7 + $0x80] ss:$8 sps:$4 sm:$0xff]   ;;  %v950_v25 = vld [vmem:[%s1088_s7 + $0x94] ss:$8 sps:$4 sm:$0xff]  }
  0x2e   : > { %558 = vmatprep.subr.bf16.mxu0 %v929_v9  ;;  %852 = vmatprep.subr.bf16.mxu1 %v929_v9  ;;  %v952_v26 = vld [vmem:[%s1088_s7 + $0x90] ss:$8 sps:$4 sm:$0xff]   ;;  %v953_v27 = vld [vmem:[%s1088_s7 + $0xa4] ss:$8 sps:$4 sm:$0xff]   ;;  %v955_v28 = vld [vmem:[%s1088_s7 + $0xa0] ss:$8 sps:$4 sm:$0xff]  }
  0x2f   : > { %586 = vmatprep.mubr.bf16.mxu0 %v973_v18  ;;  %v956_v29 = vld [vmem:[%s1088_s7 + $0xb4] ss:$8 sps:$4 sm:$0xff]   ;;  %v958_v30 = vld [vmem:[%s1088_s7 + $0xb0] ss:$8 sps:$4 sm:$0xff]   ;;  %v959_v31 = vld [vmem:[%s1088_s7 + $0xc4] ss:$8 sps:$4 sm:$0xff]  }
  0x30   : > { %v961_v32 = vld [vmem:[%s1088_s7 + $0xc0] ss:$8 sps:$4 sm:$0xff]   ;;  %v962_v33 = vld [vmem:[%s1088_s7 + $0xd4] ss:$8 sps:$4 sm:$0xff]   ;;  %v964_v34 = vld [vmem:[%s1088_s7 + $0xd0] ss:$8 sps:$4 sm:$0xff]  }
  0x31   : > { %559 = vmatpush1.bf16.msra.mxu0 %v931_v10  ;;  %868 = vmatpush1.bf16.msra.mxu1 %v931_v10  ;;  %v965_v35 = vld [vmem:[%s1088_s7 + $0xe4] ss:$8 sps:$4 sm:$0xff]   ;;  %v967_v36 = vld [vmem:[%s1088_s7 + $0xe0] ss:$8 sps:$4 sm:$0xff]   ;;  %v968_v37 = vld [vmem:[%s1088_s7 + $0xf4] ss:$8 sps:$4 sm:$0xff]  }
  0x32   : > { %560 = vmatprep.subr.bf16.mxu0 %v932_v11  ;;  %853 = vmatprep.subr.bf16.mxu1 %v932_v11  ;;  %v970_v38 = vld [vmem:[%s1088_s7 + $0xf0] ss:$8 sps:$4 sm:$0xff]   ;;  %v971_v39 = vld [vmem:[%s1090_s8] ss:$8 sps:$4 sm:$0xff]   ;;  %p843_p11 = scmp.ne.s32.totalorder %s1007_s14, 8 }
  0x33   : > { %v974_v40 = vld [vmem:[%s1090_s8 + $0x10] ss:$8 sps:$4 sm:$0xff]   ;;  %v330_v41 = vld [vmem:[%s1271_s3] sm:$0xff]  ;;  %v331_v43 = vld [vmem:[%s1271_s3 + $0x8] sm:$0xff]  ;;  %v637_v1 = vlaneseq (!%p843_p11) }
  0x34   : > { %v334_v42 = vld [vmem:[%s1271_s3 + $0x20] sm:$0xff]  ;;  %v335_v44 = vld [vmem:[%s1271_s3 + $0x28] sm:$0xff]  ;;  %v332_v47 = vld [vmem:[%s1271_s3 + $0x10] sm:$0xff] }
  0x35   : > { %561 = vmatpush1.bf16.msra.mxu0 %v934_v12  ;;  %869 = vmatpush1.bf16.msra.mxu1 %v934_v12  ;;  %v336_v48 = vld [vmem:[%s1271_s3 + $0x30] sm:$0xff]  ;;  %v333_v53 = vld [vmem:[%s1271_s3 + $0x18] sm:$0xff]  ;;  %v638_v2 = vshrl.u32 (!%p843_p11), %v637_v1, 7  ;;  %v635_v3 = vld [vmem:[%s1270_s2] sm:$0x3] (!%p843_p11) }
  0x36   : > { %562 = vmatprep.subr.bf16.mxu0 %v935_v13  ;;  %854 = vmatprep.subr.bf16.mxu1 %v935_v13  ;;  %v337_v54 = vld [vmem:[%s1271_s3 + $0x38] sm:$0xff] }
  0x37   : > { %v639_v5 = vsub.s32 (!%p843_p11), 0, %v638_v2  ;;  %v643_v7 = vsub.s32 (!%p843_p11), 1, %v638_v2 }
  0x39   : > { %563 = vmatpush1.bf16.msra.mxu0 %v937_v14  ;;  %870 = vmatpush1.bf16.msra.mxu1 %v937_v14  ;;  %v640_v11 = vrot.slane (!%p843_p11), %v635_v3, %v639_v5  ;;  %v644_v12 = vrot.slane (!%p843_p11), %v635_v3, %v643_v7 }
  0x3a   : > { %564 = vmatprep.subr.bf16.mxu0 %v938_v15  ;;  %855 = vmatprep.subr.bf16.mxu1 %v938_v15 }
  0x3d   : > { %565 = vmatpush1.bf16.msra.mxu0 %v940_v16  ;;  %871 = vmatpush1.bf16.msra.mxu1 %v940_v16 }
  0x3e   : > { %566 = vmatprep.subr.bf16.mxu0 %v941_v17  ;;  %856 = vmatprep.subr.bf16.mxu1 %v941_v17 }
  0x41   : > { %567 = vmatpush1.bf16.msra.mxu0 %v943_v19  ;;  %872 = vmatpush1.bf16.msra.mxu1 %v943_v19 }
  0x42   : > { %568 = vmatprep.subr.bf16.mxu0 %v944_v21  ;;  %857 = vmatprep.subr.bf16.mxu1 %v944_v21 }
  0x45   : > { %569 = vmatpush1.bf16.msra.mxu0 %v946_v22  ;;  %873 = vmatpush1.bf16.msra.mxu1 %v946_v22 }
  0x46   : > { %570 = vmatprep.subr.bf16.mxu0 %v947_v23  ;;  %858 = vmatprep.subr.bf16.mxu1 %v947_v23 }
  0x49   : > { %571 = vmatpush1.bf16.msra.mxu0 %v949_v24  ;;  %874 = vmatpush1.bf16.msra.mxu1 %v949_v24 }
  0x4a   : > { %572 = vmatprep.subr.bf16.mxu0 %v950_v25  ;;  %859 = vmatprep.subr.bf16.mxu1 %v950_v25 }
  0x4d   : > { %573 = vmatpush1.bf16.msra.mxu0 %v952_v26  ;;  %875 = vmatpush1.bf16.msra.mxu1 %v952_v26 }
  0x4e   : > { %574 = vmatprep.subr.bf16.mxu0 %v953_v27  ;;  %860 = vmatprep.subr.bf16.mxu1 %v953_v27 }
  0x51   : > { %575 = vmatpush1.bf16.msra.mxu0 %v955_v28  ;;  %876 = vmatpush1.bf16.msra.mxu1 %v955_v28 }
  0x52   : > { %576 = vmatprep.subr.bf16.mxu0 %v956_v29  ;;  %861 = vmatprep.subr.bf16.mxu1 %v956_v29 }
  0x55   : > { %577 = vmatpush1.bf16.msra.mxu0 %v958_v30  ;;  %877 = vmatpush1.bf16.msra.mxu1 %v958_v30 }
  0x56   : > { %578 = vmatprep.subr.bf16.mxu0 %v959_v31  ;;  %862 = vmatprep.subr.bf16.mxu1 %v959_v31 }
  0x59   : > { %579 = vmatpush1.bf16.msra.mxu0 %v961_v32  ;;  %878 = vmatpush1.bf16.msra.mxu1 %v961_v32 }
  0x5a   : > { %580 = vmatprep.subr.bf16.mxu0 %v962_v33  ;;  %863 = vmatprep.subr.bf16.mxu1 %v962_v33 }
  0x5d   : > { %581 = vmatpush1.bf16.msra.mxu0 %v964_v34  ;;  %879 = vmatpush1.bf16.msra.mxu1 %v964_v34 }
  0x5e   : > { %582 = vmatprep.subr.bf16.mxu0 %v965_v35  ;;  %864 = vmatprep.subr.bf16.mxu1 %v965_v35 }
  0x61   : > { %583 = vmatpush1.bf16.msra.mxu0 %v967_v36  ;;  %880 = vmatpush1.bf16.msra.mxu1 %v967_v36 }
  0x62   : > { %584 = vmatprep.subr.bf16.mxu0 %v968_v37  ;;  %865 = vmatprep.subr.bf16.mxu1 %v968_v37 }
  0x65   : > { %585 = vmatpush1.bf16.msra.mxu0 %v970_v38  ;;  %881 = vmatpush1.bf16.msra.mxu1 %v970_v38 }
  0x68   : > { %587 = vmatmul.mubr.bf16.vlgmr.msra.gmra.mrb[0].mxu0 %v971_v39  ;;  %597 = vmatmul.mubr.bf16.vlgmr.msra.gmra.mrb[0].mxu1 %v974_v40 }
 0x13b   : > { %v588_v45 = vpop.f32.mrb[0].mxu0  ;;  %v598_v46 = vpop.f32.mrb[0].mxu1  ;;  %626 = sbr.rel (%p843_p11) target bundleno = 335 (0x14f), region = 78 }
 0x13c   : > { %v607_v49 = vadd.f32 %v588_v45, %v330_v41  ;;  %v611_v50 = vadd.f32 %v598_v46, %v334_v42  ;;  %v590_v51 = vpop.f32.mrb[1].mxu0  ;;  %v600_v52 = vpop.f32.mrb[1].mxu1 }
 0x13d   : > { %v608_v55 = vadd.f32 %v590_v51, %v331_v43  ;;  %v612_v56 = vadd.f32 %v600_v52, %v335_v44  ;;  %v592_v57 = vpop.f32.mrb[2].mxu0  ;;  %v602_v58 = vpop.f32.mrb[2].mxu1 }
 0x13e   : > { %615 = vst [vmem:[%s1271_s3] sm:$0xff] %v607_v49  ;;  %619 = vst [vmem:[%s1271_s3 + $0x20] sm:$0xff] %v611_v50  ;;  %v609_v59 = vadd.f32 %v592_v57, %v332_v47  ;;  %v613_v60 = vadd.f32 %v602_v58, %v336_v48  ;;  %v594_v61 = vpop.f32.mrb[3].mxu0  ;;  %v604_v62 = vpop.f32.mrb[3].mxu1 }
 0x13f   : > { %616 = vst [vmem:[%s1271_s3 + $0x8] sm:$0xff] %v608_v55  ;;  %620 = vst [vmem:[%s1271_s3 + $0x28] sm:$0xff] %v612_v56  ;;  %v610_v63 = vadd.f32 %v594_v61, %v333_v53  ;;  %v614_v0 = vadd.f32 %v604_v62, %v337_v54 }
 0x140   : > { %617 = vst [vmem:[%s1271_s3 + $0x10] sm:$0xff] %v609_v59  ;;  %621 = vst [vmem:[%s1271_s3 + $0x30] sm:$0xff] %v613_v60 }
 0x141   : > { %618 = vst [vmem:[%s1271_s3 + $0x18] sm:$0xff] %v610_v63  ;;  %622 = vst [vmem:[%s1271_s3 + $0x38] sm:$0xff] %v614_v0 }
 0x145   : > { %v627_v4 = vld [vmem:[%s1271_s3] sm:$0xff] }
 0x146   : > { %v628_v6 = vld [vmem:[%s1271_s3 + $0x8] sm:$0xff]  ;;  %v631_v10 = vld [vmem:[%s1271_s3 + $0x20] sm:$0xff]  ;;  %v647_v16 = vadd.f32 %v640_v11, %v627_v4 }
 0x147   : > { %v629_v8 = vld [vmem:[%s1271_s3 + $0x10] sm:$0xff]  ;;  %v632_v13 = vld [vmem:[%s1271_s3 + $0x28] sm:$0xff]  ;;  %v648_v17 = vadd.f32 %v644_v12, %v628_v6  ;;  %v651_v20 = vadd.f32 %v640_v11, %v631_v10 }
 0x148   : > { %v630_v9 = vld [vmem:[%s1271_s3 + $0x18] sm:$0xff]  ;;  %v633_v14 = vld [vmem:[%s1271_s3 + $0x30] sm:$0xff]  ;;  %v649_v18 = vadd.f32 %v640_v11, %v629_v8  ;;  %v652_v21 = vadd.f32 %v644_v12, %v632_v13  ;;  %v655_v24 = vmax.f32 %v647_v16, 0.0 }
 0x149   : > { %v634_v15 = vld [vmem:[%s1271_s3 + $0x38] sm:$0xff]  ;;  %v650_v19 = vadd.f32 %v644_v12, %v630_v9  ;;  %v653_v22 = vadd.f32 %v640_v11, %v633_v14  ;;  %v656_v25 = vmax.f32 %v648_v17, 0.0  ;;  %v659_v28 = vmax.f32 %v651_v20, 0.0 }
 0x14a   : > { %v654_v23 = vadd.f32 %v644_v12, %v634_v15  ;;  %v657_v26 = vmax.f32 %v649_v18, 0.0  ;;  %v660_v29 = vmax.f32 %v652_v21, 0.0  ;;  %663 = vst [vmem:[%s1271_s3] sm:$0xff] %v655_v24 }
 0x14b   : > { %v658_v27 = vmax.f32 %v650_v19, 0.0  ;;  %v661_v30 = vmax.f32 %v653_v22, 0.0  ;;  %664 = vst [vmem:[%s1271_s3 + $0x8] sm:$0xff] %v656_v25  ;;  %667 = vst [vmem:[%s1271_s3 + $0x20] sm:$0xff] %v659_v28 }
 0x14c   : > { %v662_v31 = vmax.f32 %v654_v23, 0.0  ;;  %665 = vst [vmem:[%s1271_s3 + $0x10] sm:$0xff] %v657_v26  ;;  %668 = vst [vmem:[%s1271_s3 + $0x28] sm:$0xff] %v660_v29 }
 0x14d   : > { %666 = vst [vmem:[%s1271_s3 + $0x18] sm:$0xff] %v658_v27  ;;  %669 = vst [vmem:[%s1271_s3 + $0x30] sm:$0xff] %v661_v30 }
 0x14e   : > { %670 = vst [vmem:[%s1271_s3 + $0x38] sm:$0xff] %v662_v31 }
 0x14f PF: > { %s13_s16 = sadd.s32 1, %s1015_s16   ;;  %s1272_s12 = smov %s1003_s13 }
 0x150   : > { %p10_p12 = scmp.ge.s32.totalorder %s13_s16, 11   ;;  %s1273_s13 = smov %s1073_s20 }
 0x151   : > { %s1274_s14 = smov %s1011_s15  ;;  %s1275_s15 = smov %s1277_s17 }
 0x152   :  { %12 = sbr.rel (!%p10_p12) target bundleno = 3 (0x3), region = 119 }

// kernel: vgg19_forward.30
= control target key start
LH: loop header
LB: loop body
LE: loop exit
PB: predicated region body
PF: predicated region fallthrough
CT: control target
= control target key end

     0   :  { %s90_s0 = inlined_call_operand.vmem [shape: f32[4,2,2,512], index: 0, kind: input, shape index: {}]   ;;  %s91_s1 = inlined_call_operand.vmem [shape: f32[4,2,256], index: 1, kind: output, shape index: {}]  }
   0x1   :  { %v8_v0 = vld [vmem:[%s90_s0] sm:$0xff]  ;;  %v9_v1 = vld [vmem:[%s90_s0 + $0x8] sm:$0xff]  ;;  %v10_v2 = vld [vmem:[%s90_s0 + $0x10] sm:$0xff] }
   0x2   :  { %v16_v3 = vmax.f32 %v8_v0, %v9_v1  ;;  %v11_v4 = vld [vmem:[%s90_s0 + $0x18] sm:$0xff]  ;;  %v12_v5 = vld [vmem:[%s90_s0 + $0x20] sm:$0xff]  ;;  %v13_v6 = vld [vmem:[%s90_s0 + $0x28] sm:$0xff] }
   0x3   :  { %v17_v7 = vmax.f32 %v10_v2, %v11_v4  ;;  %v18_v8 = vmax.f32 %v12_v5, %v13_v6  ;;  %v14_v9 = vld [vmem:[%s90_s0 + $0x30] sm:$0xff]  ;;  %v15_v10 = vld [vmem:[%s90_s0 + $0x38] sm:$0xff] }
   0x4   :  { %v24_v11 = vrot.slane %v16_v3, 4  ;;  %v19_v12 = vmax.f32 %v14_v9, %v15_v10 }
   0x5   :  { %v25_v13 = vrot.slane %v17_v7, 4  ;;  %v26_v14 = vrot.slane %v18_v8, 4 }
   0x6   :  { %v32_v15 = vmax.f32 %v16_v3, %v24_v11  ;;  %v27_v16 = vrot.slane %v19_v12, 4 }
   0x7   :  { %v33_v17 = vmax.f32 %v17_v7, %v25_v13  ;;  %v34_v18 = vmax.f32 %v18_v8, %v26_v14 }
   0x8   :  { %36 = vst [vmem:[%s91_s1] sm:$0xf] %v32_v15  ;;  %v35_v19 = vmax.f32 %v19_v12, %v27_v16 }
   0x9   :  { %37 = vst [vmem:[%s91_s1 + $0x4] sm:$0xf] %v33_v17  ;;  %38 = vst [vmem:[%s91_s1 + $0x8] sm:$0xf] %v34_v18 }
   0xa   :  { %39 = vst [vmem:[%s91_s1 + $0xc] sm:$0xf] %v35_v19 }

// kernel: vgg19_forward.31
= control target key start
LH: loop header
LB: loop body
LE: loop exit
PB: predicated region body
PF: predicated region fallthrough
CT: control target
= control target key end

     0   :  { %s1061_s12 = smov 0   ;;  %s1063_s13 = smov 0   ;;  %s1284_s0 = inlined_call_operand.vmem [shape: bf16[8,2304], index: 0, kind: input, shape index: {}]   ;;  %s1285_s1 = inlined_call_operand.vmem [shape: bf16[2304,512], index: 1, kind: input, shape index: {}]   ;;  %s1286_s2 = inlined_call_operand.vmem [shape: f32[1,512], index: 2, kind: input, shape index: {}]   ;;  %s1287_s3 = inlined_call_operand.vmem [shape: f32[8,512], index: 3, kind: output, shape index: {}]  }
   0x1   :  { %s1065_s14 = smov 0   ;;  %s1067_s15 = smov 0  }
   0x2   :  { %s1069_s16 = smov 0   ;;  %s1071_s17 = smov 0  }
   0x3   :  { %s1073_s18 = smov 0  }
   0x4 LB: > { %s25_s19 = sadd.s32 1, %s1030_s16  ;;  %s28_s20 = sadd.s32 1, %s1034_s17  ;;  %s1038_s18 = sphi %s1073_s18, %s13_s18   ;;  %s1034_s17 = sphi %s1071_s17, %s1293_s17   ;;  %s1030_s16 = sphi %s1069_s16, %s1292_s16   ;;  %s1026_s15 = sphi %s1067_s15, %s1291_s15   ;;  %s1022_s14 = sphi %s1065_s14, %s1290_s14   ;;  %s1018_s13 = sphi %s1063_s13, %s1289_s13   ;;  %s1014_s12 = sphi %s1061_s12, %s1288_s12  }
   0x5   : > { %p26_p0 = scmp.ge.s32.totalorder %s25_s19, 9  ;;  %p76_p1 = scmp.ne.s32.totalorder %s1018_s13, %s1014_s12 }
   0x6   : > { %p77_p2 = scmp.eq.s32.totalorder %s1038_s18, 0  ;;  %s69_s24 = sadd.s32 1, %s1018_s13 }
   0x7   : > { %s1295_s19 = smov (%p26_p0, %s25_s19), 0  ;;  %s1297_s20 = smov (!%p26_p0, %s28_s20), %s1034_s17 }
   0x8   : > { %p78_p3 = por %p77_p2, %p76_p1  ;;  %p30_p4 = scmp.ge.s32.totalorder %s1297_s20, 2 }
   0x9   : > { %s64_s21 = ssub.s32 %s1030_s16, %s1295_s19  ;;  %p825_p6 = scmp.ge.s32.totalorder %s1038_s18, 18 }
   0xa   : > { %s1299_s20 = smov (%p30_p4, %s1297_s20), 0 }
   0xb   : > { %s65_s22 = ssub.s32 %s1034_s17, %s1299_s20  ;;  %156 = sbr.rel (%p825_p6) target bundleno = 41 (0x29), region = 16 }
   0xc   : > { %s66_s23 = sor.u32 %s65_s22, %s64_s21 }
   0xd   : > { %p67_p5 = scmp.eq.s32.totalorder %s66_s23, 0 }
   0xf   : > { %s1112_s25 = scalar_select %p67_p5, %s1018_s13, %s69_s24  }
  0x12   : > { %172 = sbr.rel (!%p78_p3) target bundleno = 41 (0x29), region = 24  ;;  %s174_s26 = sand.u32 (%p78_p3), 1, %s1018_s13  }
  0x13   : > { %s828_s27 = sshll.u32 (%p78_p3), %s1034_s17, 1  ;;  %s826_s28 = sshll.u32 (%p78_p3), %s174_s26, 8 }
  0x14   : > { %s876_s29 = sshll.u32 (%p78_p3), %s1030_s16, 7  ;;  %s1126_s8 = scalar_lea.vmem (%p78_p3), [#allocation2], %s826_s28 }
  0x15   : > { %s180_s30 = sadd.s32 (%p78_p3), %s876_s29, %s828_s27 }
  0x16   : > { %s830_s4 = sshll.u32 (%p78_p3), %s180_s30, 2 }
  0x17   : > { %s1121_s7 = scalar_lea.vmem (%p78_p3), %s1285_s1, %s830_s4 }
  0x18   : > { %v272_v0 = vld [vmem:[%s1121_s7] sm:$0xff] (%p78_p3)  ;;  %v274_v1 = vld [vmem:[%s1121_s7 + $0x10] sm:$0xff] (%p78_p3) }
  0x19   : > { %v276_v2 = vld [vmem:[%s1121_s7 + $0x20] sm:$0xff]  ;;  %273 = vst [vmem:[%s1126_s8] sm:$0xff] %v272_v0  ;;  %275 = vst [vmem:[%s1126_s8 + $0x8] sm:$0xff] %v274_v1  ;;  %v278_v3 = vld [vmem:[%s1121_s7 + $0x30] sm:$0xff] }
  0x1a   : > { %277 = vst [vmem:[%s1126_s8 + $0x10] sm:$0xff] %v276_v2  ;;  %v280_v4 = vld [vmem:[%s1121_s7 + $0x40] sm:$0xff]  ;;  %v282_v5 = vld [vmem:[%s1121_s7 + $0x50] sm:$0xff]  ;;  %279 = vst [vmem:[%s1126_s8 + $0x18] sm:$0xff] %v278_v3 }
  0x1b   : > { %281 = vst [vmem:[%s1126_s8 + $0x20] sm:$0xff] %v280_v4  ;;  %283 = vst [vmem:[%s1126_s8 + $0x28] sm:$0xff] %v282_v5  ;;  %v284_v6 = vld [vmem:[%s1121_s7 + $0x60] sm:$0xff]  ;;  %v286_v7 = vld [vmem:[%s1121_s7 + $0x70] sm:$0xff] }
  0x1c   : > { %v288_v8 = vld [vmem:[%s1121_s7 + $0x80] sm:$0xff]  ;;  %285 = vst [vmem:[%s1126_s8 + $0x30] sm:$0xff] %v284_v6  ;;  %287 = vst [vmem:[%s1126_s8 + $0x38] sm:$0xff] %v286_v7  ;;  %v290_v9 = vld [vmem:[%s1121_s7 + $0x90] sm:$0xff] }
  0x1d   : > { %289 = vst [vmem:[%s1126_s8 + $0x40] sm:$0xff] %v288_v8  ;;  %v292_v10 = vld [vmem:[%s1121_s7 + $0xa0] sm:$0xff]  ;;  %v294_v11 = vld [vmem:[%s1121_s7 + $0xb0] sm:$0xff]  ;;  %291 = vst [vmem:[%s1126_s8 + $0x48] sm:$0xff] %v290_v9 }
  0x1e   : > { %293 = vst [vmem:[%s1126_s8 + $0x50] sm:$0xff] %v292_v10  ;;  %295 = vst [vmem:[%s1126_s8 + $0x58] sm:$0xff] %v294_v11  ;;  %v296_v12 = vld [vmem:[%s1121_s7 + $0xc0] sm:$0xff]  ;;  %v298_v13 = vld [vmem:[%s1121_s7 + $0xd0] sm:$0xff] }
  0x1f   : > { %v300_v14 = vld [vmem:[%s1121_s7 + $0xe0] sm:$0xff]  ;;  %297 = vst [vmem:[%s1126_s8 + $0x60] sm:$0xff] %v296_v12  ;;  %299 = vst [vmem:[%s1126_s8 + $0x68] sm:$0xff] %v298_v13  ;;  %v302_v15 = vld [vmem:[%s1121_s7 + $0xf0] sm:$0xff] }
  0x20   : > { %301 = vst [vmem:[%s1126_s8 + $0x70] sm:$0xff] %v300_v14  ;;  %v304_v16 = vld [vmem:[%s1121_s7 + $0x100] sm:$0xff]  ;;  %v306_v17 = vld [vmem:[%s1121_s7 + $0x110] sm:$0xff]  ;;  %303 = vst [vmem:[%s1126_s8 + $0x78] sm:$0xff] %v302_v15 }
  0x21   : > { %305 = vst [vmem:[%s1126_s8 + $0x80] sm:$0xff] %v304_v16  ;;  %307 = vst [vmem:[%s1126_s8 + $0x88] sm:$0xff] %v306_v17  ;;  %v308_v18 = vld [vmem:[%s1121_s7 + $0x120] sm:$0xff]  ;;  %v310_v19 = vld [vmem:[%s1121_s7 + $0x130] sm:$0xff] }
  0x22   : > { %v312_v20 = vld [vmem:[%s1121_s7 + $0x140] sm:$0xff]  ;;  %309 = vst [vmem:[%s1126_s8 + $0x90] sm:$0xff] %v308_v18  ;;  %311 = vst [vmem:[%s1126_s8 + $0x98] sm:$0xff] %v310_v19  ;;  %v314_v21 = vld [vmem:[%s1121_s7 + $0x150] sm:$0xff] }
  0x23   : > { %313 = vst [vmem:[%s1126_s8 + $0xa0] sm:$0xff] %v312_v20  ;;  %v316_v22 = vld [vmem:[%s1121_s7 + $0x160] sm:$0xff]  ;;  %v318_v23 = vld [vmem:[%s1121_s7 + $0x170] sm:$0xff]  ;;  %315 = vst [vmem:[%s1126_s8 + $0xa8] sm:$0xff] %v314_v21 }
  0x24   : > { %317 = vst [vmem:[%s1126_s8 + $0xb0] sm:$0xff] %v316_v22  ;;  %319 = vst [vmem:[%s1126_s8 + $0xb8] sm:$0xff] %v318_v23  ;;  %v320_v24 = vld [vmem:[%s1121_s7 + $0x180] sm:$0xff]  ;;  %v322_v25 = vld [vmem:[%s1121_s7 + $0x190] sm:$0xff] }
  0x25   : > { %v324_v26 = vld [vmem:[%s1121_s7 + $0x1a0] sm:$0xff]  ;;  %321 = vst [vmem:[%s1126_s8 + $0xc0] sm:$0xff] %v320_v24  ;;  %323 = vst [vmem:[%s1126_s8 + $0xc8] sm:$0xff] %v322_v25  ;;  %v326_v27 = vld [vmem:[%s1121_s7 + $0x1b0] sm:$0xff] }
  0x26   : > { %325 = vst [vmem:[%s1126_s8 + $0xd0] sm:$0xff] %v324_v26  ;;  %v328_v28 = vld [vmem:[%s1121_s7 + $0x1c0] sm:$0xff]  ;;  %v330_v29 = vld [vmem:[%s1121_s7 + $0x1d0] sm:$0xff]  ;;  %327 = vst [vmem:[%s1126_s8 + $0xd8] sm:$0xff] %v326_v27 }
  0x27   : > { %329 = vst [vmem:[%s1126_s8 + $0xe0] sm:$0xff] %v328_v28  ;;  %331 = vst [vmem:[%s1126_s8 + $0xe8] sm:$0xff] %v330_v29  ;;  %v332_v30 = vld [vmem:[%s1121_s7 + $0x1e0] sm:$0xff]  ;;  %v334_v31 = vld [vmem:[%s1121_s7 + $0x1f0] sm:$0xff] }
  0x28   : > { %333 = vst [vmem:[%s1126_s8 + $0xf0] sm:$0xff] %v332_v30  ;;  %335 = vst [vmem:[%s1126_s8 + $0xf8] sm:$0xff] %v334_v31 }
  0x29 PF: > { %p831_p7 = scmp.ge.s32.totalorder %s1038_s18, 1  ;;  %p348_p8 = scmp.lt.s32.totalorder %s1038_s18, 19 }
  0x2b   : > { %p349_p9 = pnand %p831_p7, %p348_p8 }
  0x2c   : > { %s355_s9 = sand.u32 (!%p349_p9), 1, %s1014_s12   ;;  %s833_s10 = sshll.u32 (!%p349_p9), %s1022_s14, 1 }
  0x2d   : > { %352 = sbr.rel (%p349_p9) target bundleno = 355 (0x163), region = 66  ;;  %s832_s11 = sshll.u32 (!%p349_p9), %s355_s9, 8 }
  0x2e   : > { %p398_p10 = scmp.lt.s32.totalorder (!%p349_p9), %s833_s10, 17  ;;  %s835_s21 = sshll.u32 (!%p349_p9), %s1026_s15, 1 }
  0x2f   : > { %p408_p11 = scmp.lt.s32.totalorder (!%p349_p9), %s835_s21, 3  ;;  %s1211_s5 = scalar_lea.vmem (!%p349_p9), [#allocation2], %s832_s11 }
  0x30   : > { %p838_p12 = scmp.ne.s32.totalorder (!%p349_p9), %s1022_s14, 0 }
  0x34   : > { %s1301_s10 = smov (!%p398_p10, %s833_s10), 17  ;;  %s1303_s21 = smov (!%p408_p11, %s835_s21), 3 }
  0x35   : > { %s834_s22 = sshll.u32 %s1301_s10, 2  ;;  %s410_s12 = scalar_lea.vmem %s1286_s2, %s1303_s21  ;;  %v1040_v32 = vmov (!%p838_p12), 0.0  }
  0x36   : > { %s1197_s26 = scalar_lea.vmem %s1284_s0, %s834_s22  ;;  %s837_s29 = sshll.u32 %s1303_s21, 3 }
  0x37   : > { %s1209_s15 = scalar_lea.vmem %s1287_s3, %s837_s29  ;;  %425 = sbr.rel (%p838_p12) target bundleno = 62 (0x3e), region = 74 }
  0x38   : > { %426 = vst [vmem:[%s1209_s15] sm:$0xff] (!%p838_p12), %v1040_v32  ;;  %427 = vst [vmem:[%s1209_s15 + $0x8] sm:$0xff] (!%p838_p12), %v1040_v32 }
  0x3e PF: > { %v934_v33 = vld [vmem:[%s1211_s5 + $0x4] ss:$8 sps:$4 sm:$0xff]   ;;  %v936_v34 = vld [vmem:[%s1211_s5] ss:$8 sps:$4 sm:$0xff]   ;;  %v937_v35 = vld [vmem:[%s1211_s5 + $0x14] ss:$8 sps:$4 sm:$0xff]  }
  0x3f   : > { %630 = vmatprep.subr.bf16.mxu0 %v934_v33  ;;  %v939_v36 = vld [vmem:[%s1211_s5 + $0x10] ss:$8 sps:$4 sm:$0xff]   ;;  %v940_v37 = vld [vmem:[%s1211_s5 + $0x24] ss:$8 sps:$4 sm:$0xff]   ;;  %v942_v38 = vld [vmem:[%s1211_s5 + $0x20] ss:$8 sps:$4 sm:$0xff]  }
  0x40   : > { %631 = vmatpush1.bf16.msra.mxu0 %v936_v34  ;;  %v943_v39 = vld [vmem:[%s1211_s5 + $0x34] ss:$8 sps:$4 sm:$0xff]   ;;  %v945_v40 = vld [vmem:[%s1211_s5 + $0x30] ss:$8 sps:$4 sm:$0xff]   ;;  %v946_v41 = vld [vmem:[%s1211_s5 + $0x44] ss:$8 sps:$4 sm:$0xff]  }
  0x41   : > { %632 = vmatprep.subr.bf16.mxu0 %v937_v35  ;;  %v948_v42 = vld [vmem:[%s1211_s5 + $0x40] ss:$8 sps:$4 sm:$0xff]   ;;  %v949_v43 = vld [vmem:[%s1211_s5 + $0x54] ss:$8 sps:$4 sm:$0xff]   ;;  %v951_v44 = vld [vmem:[%s1211_s5 + $0x50] ss:$8 sps:$4 sm:$0xff]  }
  0x42   : > { %v952_v45 = vld [vmem:[%s1211_s5 + $0x64] ss:$8 sps:$4 sm:$0xff]   ;;  %v954_v48 = vld [vmem:[%s1211_s5 + $0x60] ss:$8 sps:$4 sm:$0xff]   ;;  %v955_v49 = vld [vmem:[%s1211_s5 + $0x74] ss:$8 sps:$4 sm:$0xff]  }
  0x43   : > { %v430_v46 = vld [vmem:[%s1197_s26] sm:$0xff]  ;;  %v957_v50 = vld [vmem:[%s1211_s5 + $0x70] ss:$8 sps:$4 sm:$0xff]   ;;  %v961_v53 = vld [vmem:[%s1211_s5 + $0x94] ss:$8 sps:$4 sm:$0xff]   ;;  %p873_p13 = scmp.ne.s32.totalorder %s1022_s14, 8 }
  0x44   : > { %633 = vmatpush1.bf16.msra.mxu0 %v939_v36  ;;  %v840_v47 = vcombine.high %v430_v46, %v430_v46  ;;  %v958_v51 = vld [vmem:[%s1211_s5 + $0x84] ss:$8 sps:$4 sm:$0xff]   ;;  %v960_v52 = vld [vmem:[%s1211_s5 + $0x80] ss:$8 sps:$4 sm:$0xff]   ;;  %v963_v54 = vld [vmem:[%s1211_s5 + $0x90] ss:$8 sps:$4 sm:$0xff]   ;;  %v839_v3 = vcombine.low %v430_v46, %v430_v46  ;;  %v683_v12 = vlaneseq (!%p873_p13) }
  0x45   : > { %634 = vmatprep.subr.bf16.mxu0 %v940_v37  ;;  %v964_v55 = vld [vmem:[%s1211_s5 + $0xa4] ss:$8 sps:$4 sm:$0xff]   ;;  %v966_v56 = vld [vmem:[%s1211_s5 + $0xa0] ss:$8 sps:$4 sm:$0xff]   ;;  %v967_v57 = vld [vmem:[%s1211_s5 + $0xb4] ss:$8 sps:$4 sm:$0xff]  }
  0x46   : > { %662 = vmatprep.mubr.bf16.mxu0 %v840_v47  ;;  %v969_v58 = vld [vmem:[%s1211_s5 + $0xb0] ss:$8 sps:$4 sm:$0xff]   ;;  %v970_v59 = vld [vmem:[%s1211_s5 + $0xc4] ss:$8 sps:$4 sm:$0xff]   ;;  %v972_v60 = vld [vmem:[%s1211_s5 + $0xc0] ss:$8 sps:$4 sm:$0xff]  }
  0x47   : > { %v973_v61 = vld [vmem:[%s1211_s5 + $0xd4] ss:$8 sps:$4 sm:$0xff]   ;;  %v975_v62 = vld [vmem:[%s1211_s5 + $0xd0] ss:$8 sps:$4 sm:$0xff]   ;;  %v976_v63 = vld [vmem:[%s1211_s5 + $0xe4] ss:$8 sps:$4 sm:$0xff]  }
  0x48   : > { %635 = vmatpush1.bf16.msra.mxu0 %v942_v38  ;;  %v978_v0 = vld [vmem:[%s1211_s5 + $0xe0] ss:$8 sps:$4 sm:$0xff]   ;;  %v979_v1 = vld [vmem:[%s1211_s5 + $0xf4] ss:$8 sps:$4 sm:$0xff]   ;;  %v981_v2 = vld [vmem:[%s1211_s5 + $0xf0] ss:$8 sps:$4 sm:$0xff]  }
  0x49   : > { %636 = vmatprep.subr.bf16.mxu0 %v943_v39  ;;  %v428_v4 = vld [vmem:[%s1209_s15] sm:$0xff]  ;;  %v429_v5 = vld [vmem:[%s1209_s15 + $0x8] sm:$0xff]  ;;  %v684_v13 = vshrl.u32 (!%p873_p13), %v683_v12, 7 }
  0x4a   : > { %v681_v14 = vld [vmem:[%s410_s12] sm:$0x3] (!%p873_p13) }
  0x4b   : > { %v685_v15 = vsub.s32 (!%p873_p13), 0, %v684_v13  ;;  %v689_v16 = vsub.s32 (!%p873_p13), 1, %v684_v13 }
  0x4c   : > { %637 = vmatpush1.bf16.msra.mxu0 %v945_v40 }
  0x4d   : > { %638 = vmatprep.subr.bf16.mxu0 %v946_v41  ;;  %v686_v19 = vrot.slane (!%p873_p13), %v681_v14, %v685_v15  ;;  %v690_v20 = vrot.slane (!%p873_p13), %v681_v14, %v689_v16 }
  0x50   : > { %639 = vmatpush1.bf16.msra.mxu0 %v948_v42 }
  0x51   : > { %640 = vmatprep.subr.bf16.mxu0 %v949_v43 }
  0x54   : > { %641 = vmatpush1.bf16.msra.mxu0 %v951_v44 }
  0x55   : > { %642 = vmatprep.subr.bf16.mxu0 %v952_v45 }
  0x58   : > { %643 = vmatpush1.bf16.msra.mxu0 %v954_v48 }
  0x59   : > { %644 = vmatprep.subr.bf16.mxu0 %v955_v49 }
  0x5c   : > { %645 = vmatpush1.bf16.msra.mxu0 %v957_v50 }
  0x5d   : > { %646 = vmatprep.subr.bf16.mxu0 %v958_v51 }
  0x60   : > { %647 = vmatpush1.bf16.msra.mxu0 %v960_v52 }
  0x61   : > { %648 = vmatprep.subr.bf16.mxu0 %v961_v53 }
  0x64   : > { %649 = vmatpush1.bf16.msra.mxu0 %v963_v54 }
  0x65   : > { %650 = vmatprep.subr.bf16.mxu0 %v964_v55 }
  0x68   : > { %651 = vmatpush1.bf16.msra.mxu0 %v966_v56 }
  0x69   : > { %652 = vmatprep.subr.bf16.mxu0 %v967_v57 }
  0x6c   : > { %653 = vmatpush1.bf16.msra.mxu0 %v969_v58 }
  0x6d   : > { %654 = vmatprep.subr.bf16.mxu0 %v970_v59 }
  0x70   : > { %655 = vmatpush1.bf16.msra.mxu0 %v972_v60 }
  0x71   : > { %656 = vmatprep.subr.bf16.mxu0 %v973_v61 }
  0x74   : > { %657 = vmatpush1.bf16.msra.mxu0 %v975_v62 }
  0x75   : > { %658 = vmatprep.subr.bf16.mxu0 %v976_v63 }
  0x78   : > { %659 = vmatpush1.bf16.msra.mxu0 %v978_v0 }
  0x79   : > { %660 = vmatprep.subr.bf16.mxu0 %v979_v1 }
  0x7c   : > { %661 = vmatpush1.bf16.msra.mxu0 %v981_v2 }
  0x7f   : > { %663 = vmatmul.mubr.bf16.vlgmr.msra.gmra.mrb[0].mxu0 %v839_v3 }
 0x150   : > { %678 = sbr.rel (%p873_p13) target bundleno = 355 (0x163), region = 78 }
 0x152   : > { %v664_v6 = vpop.f32.mrb[0].mxu0 }
 0x153   : > { %v671_v7 = vadd.f32 %v664_v6, %v428_v4  ;;  %v666_v8 = vpop.f32.mrb[1].mxu0 }
 0x154   : > { %v672_v9 = vadd.f32 %v666_v8, %v429_v5  ;;  %v668_v10 = vpop.f32.mrb[2].mxu0 }
 0x155   : > { %673 = vst [vmem:[%s1209_s15] sm:$0xff] %v671_v7  ;;  %v669_v11 = vpop.f32.mrb[3].mxu0 }
 0x156   : > { %674 = vst [vmem:[%s1209_s15 + $0x8] sm:$0xff] %v672_v9 }
 0x15c   : > { %v679_v17 = vld [vmem:[%s1209_s15] sm:$0xff] }
 0x15d   : > { %v680_v18 = vld [vmem:[%s1209_s15 + $0x8] sm:$0xff]  ;;  %v693_v21 = vadd.f32 %v686_v19, %v679_v17 }
 0x15e   : > { %v694_v22 = vadd.f32 %v690_v20, %v680_v18 }
 0x15f   : > { %v695_v23 = vmax.f32 %v693_v21, 0.0 }
 0x160   : > { %v696_v24 = vmax.f32 %v694_v22, 0.0 }
 0x161   : > { %697 = vst [vmem:[%s1209_s15] sm:$0xff] %v695_v23 }
 0x162   : > { %698 = vst [vmem:[%s1209_s15 + $0x8] sm:$0xff] %v696_v24 }
 0x163 PF: > { %s13_s18 = sadd.s32 1, %s1038_s18   ;;  %s1288_s12 = smov %s1018_s13 }
 0x164   : > { %p10_p0 = scmp.ge.s32.totalorder %s13_s18, 20   ;;  %s1289_s13 = smov %s1112_s25 }
 0x165   : > { %s1290_s14 = smov %s1030_s16  ;;  %s1291_s15 = smov %s1034_s17 }
 0x166   : > { %s1292_s16 = smov %s1295_s19  ;;  %s1293_s17 = smov %s1299_s20 }
 0x167   :  { %12 = sbr.rel (!%p10_p0) target bundleno = 4 (0x4), region = 119 }

// kernel: vgg19_forward.32
= control target key start
LH: loop header
LB: loop body
LE: loop exit
PB: predicated region body
PF: predicated region fallthrough
CT: control target
= control target key end

     0   :  { %s1061_s12 = smov 0   ;;  %s1063_s13 = smov 0   ;;  %s1284_s0 = inlined_call_operand.vmem [shape: bf16[8,4608], index: 0, kind: input, shape index: {}]   ;;  %s1285_s1 = inlined_call_operand.vmem [shape: bf16[4608,512], index: 1, kind: input, shape index: {}]   ;;  %s1286_s2 = inlined_call_operand.vmem [shape: f32[1,512], index: 2, kind: input, shape index: {}]   ;;  %s1287_s3 = inlined_call_operand.vmem [shape: f32[8,512], index: 3, kind: output, shape index: {}]  }
   0x1   :  { %s1065_s14 = smov 0   ;;  %s1067_s15 = smov 0  }
   0x2   :  { %s1069_s16 = smov 0   ;;  %s1071_s17 = smov 0  }
   0x3   :  { %s1073_s18 = smov 0  }
   0x4 LB: > { %s25_s19 = sadd.s32 1, %s1030_s16  ;;  %s28_s20 = sadd.s32 1, %s1034_s17  ;;  %s1038_s18 = sphi %s1073_s18, %s13_s18   ;;  %s1034_s17 = sphi %s1071_s17, %s1293_s17   ;;  %s1030_s16 = sphi %s1069_s16, %s1292_s16   ;;  %s1026_s15 = sphi %s1067_s15, %s1291_s15   ;;  %s1022_s14 = sphi %s1065_s14, %s1290_s14   ;;  %s1018_s13 = sphi %s1063_s13, %s1289_s13   ;;  %s1014_s12 = sphi %s1061_s12, %s1288_s12  }
   0x5   : > { %p26_p0 = scmp.ge.s32.totalorder %s25_s19, 18  ;;  %p76_p1 = scmp.ne.s32.totalorder %s1018_s13, %s1014_s12 }
   0x6   : > { %p77_p2 = scmp.eq.s32.totalorder %s1038_s18, 0  ;;  %s69_s24 = sadd.s32 1, %s1018_s13 }
   0x7   : > { %s1295_s19 = smov (%p26_p0, %s25_s19), 0  ;;  %s1297_s20 = smov (!%p26_p0, %s28_s20), %s1034_s17 }
   0x8   : > { %p78_p3 = por %p77_p2, %p76_p1  ;;  %p30_p4 = scmp.ge.s32.totalorder %s1297_s20, 2 }
   0x9   : > { %s64_s21 = ssub.s32 %s1030_s16, %s1295_s19  ;;  %p825_p6 = scmp.ge.s32.totalorder %s1038_s18, 36 }
   0xa   : > { %s1299_s20 = smov (%p30_p4, %s1297_s20), 0 }
   0xb   : > { %s65_s22 = ssub.s32 %s1034_s17, %s1299_s20  ;;  %156 = sbr.rel (%p825_p6) target bundleno = 41 (0x29), region = 16 }
   0xc   : > { %s66_s23 = sor.u32 %s65_s22, %s64_s21 }
   0xd   : > { %p67_p5 = scmp.eq.s32.totalorder %s66_s23, 0 }
   0xf   : > { %s1112_s25 = scalar_select %p67_p5, %s1018_s13, %s69_s24  }
  0x12   : > { %172 = sbr.rel (!%p78_p3) target bundleno = 41 (0x29), region = 24  ;;  %s174_s26 = sand.u32 (%p78_p3), 1, %s1018_s13  }
  0x13   : > { %s828_s27 = sshll.u32 (%p78_p3), %s1034_s17, 1  ;;  %s826_s28 = sshll.u32 (%p78_p3), %s174_s26, 8 }
  0x14   : > { %s876_s29 = sshll.u32 (%p78_p3), %s1030_s16, 7  ;;  %s1126_s8 = scalar_lea.vmem (%p78_p3), [#allocation2], %s826_s28 }
  0x15   : > { %s180_s30 = sadd.s32 (%p78_p3), %s876_s29, %s828_s27 }
  0x16   : > { %s830_s4 = sshll.u32 (%p78_p3), %s180_s30, 2 }
  0x17   : > { %s1121_s7 = scalar_lea.vmem (%p78_p3), %s1285_s1, %s830_s4 }
  0x18   : > { %v272_v0 = vld [vmem:[%s1121_s7] sm:$0xff] (%p78_p3)  ;;  %v274_v1 = vld [vmem:[%s1121_s7 + $0x10] sm:$0xff] (%p78_p3) }
  0x19   : > { %v276_v2 = vld [vmem:[%s1121_s7 + $0x20] sm:$0xff]  ;;  %273 = vst [vmem:[%s1126_s8] sm:$0xff] %v272_v0  ;;  %275 = vst [vmem:[%s1126_s8 + $0x8] sm:$0xff] %v274_v1  ;;  %v278_v3 = vld [vmem:[%s1121_s7 + $0x30] sm:$0xff] }
  0x1a   : > { %277 = vst [vmem:[%s1126_s8 + $0x10] sm:$0xff] %v276_v2  ;;  %v280_v4 = vld [vmem:[%s1121_s7 + $0x40] sm:$0xff]  ;;  %v282_v5 = vld [vmem:[%s1121_s7 + $0x50] sm:$0xff]  ;;  %279 = vst [vmem:[%s1126_s8 + $0x18] sm:$0xff] %v278_v3 }
  0x1b   : > { %281 = vst [vmem:[%s1126_s8 + $0x20] sm:$0xff] %v280_v4  ;;  %283 = vst [vmem:[%s1126_s8 + $0x28] sm:$0xff] %v282_v5  ;;  %v284_v6 = vld [vmem:[%s1121_s7 + $0x60] sm:$0xff]  ;;  %v286_v7 = vld [vmem:[%s1121_s7 + $0x70] sm:$0xff] }
  0x1c   : > { %v288_v8 = vld [vmem:[%s1121_s7 + $0x80] sm:$0xff]  ;;  %285 = vst [vmem:[%s1126_s8 + $0x30] sm:$0xff] %v284_v6  ;;  %287 = vst [vmem:[%s1126_s8 + $0x38] sm:$0xff] %v286_v7  ;;  %v290_v9 = vld [vmem:[%s1121_s7 + $0x90] sm:$0xff] }
  0x1d   : > { %289 = vst [vmem:[%s1126_s8 + $0x40] sm:$0xff] %v288_v8  ;;  %v292_v10 = vld [vmem:[%s1121_s7 + $0xa0] sm:$0xff]  ;;  %v294_v11 = vld [vmem:[%s1121_s7 + $0xb0] sm:$0xff]  ;;  %291 = vst [vmem:[%s1126_s8 + $0x48] sm:$0xff] %v290_v9 }
  0x1e   : > { %293 = vst [vmem:[%s1126_s8 + $0x50] sm:$0xff] %v292_v10  ;;  %295 = vst [vmem:[%s1126_s8 + $0x58] sm:$0xff] %v294_v11  ;;  %v296_v12 = vld [vmem:[%s1121_s7 + $0xc0] sm:$0xff]  ;;  %v298_v13 = vld [vmem:[%s1121_s7 + $0xd0] sm:$0xff] }
  0x1f   : > { %v300_v14 = vld [vmem:[%s1121_s7 + $0xe0] sm:$0xff]  ;;  %297 = vst [vmem:[%s1126_s8 + $0x60] sm:$0xff] %v296_v12  ;;  %299 = vst [vmem:[%s1126_s8 + $0x68] sm:$0xff] %v298_v13  ;;  %v302_v15 = vld [vmem:[%s1121_s7 + $0xf0] sm:$0xff] }
  0x20   : > { %301 = vst [vmem:[%s1126_s8 + $0x70] sm:$0xff] %v300_v14  ;;  %v304_v16 = vld [vmem:[%s1121_s7 + $0x100] sm:$0xff]  ;;  %v306_v17 = vld [vmem:[%s1121_s7 + $0x110] sm:$0xff]  ;;  %303 = vst [vmem:[%s1126_s8 + $0x78] sm:$0xff] %v302_v15 }
  0x21   : > { %305 = vst [vmem:[%s1126_s8 + $0x80] sm:$0xff] %v304_v16  ;;  %307 = vst [vmem:[%s1126_s8 + $0x88] sm:$0xff] %v306_v17  ;;  %v308_v18 = vld [vmem:[%s1121_s7 + $0x120] sm:$0xff]  ;;  %v310_v19 = vld [vmem:[%s1121_s7 + $0x130] sm:$0xff] }
  0x22   : > { %v312_v20 = vld [vmem:[%s1121_s7 + $0x140] sm:$0xff]  ;;  %309 = vst [vmem:[%s1126_s8 + $0x90] sm:$0xff] %v308_v18  ;;  %311 = vst [vmem:[%s1126_s8 + $0x98] sm:$0xff] %v310_v19  ;;  %v314_v21 = vld [vmem:[%s1121_s7 + $0x150] sm:$0xff] }
  0x23   : > { %313 = vst [vmem:[%s1126_s8 + $0xa0] sm:$0xff] %v312_v20  ;;  %v316_v22 = vld [vmem:[%s1121_s7 + $0x160] sm:$0xff]  ;;  %v318_v23 = vld [vmem:[%s1121_s7 + $0x170] sm:$0xff]  ;;  %315 = vst [vmem:[%s1126_s8 + $0xa8] sm:$0xff] %v314_v21 }
  0x24   : > { %317 = vst [vmem:[%s1126_s8 + $0xb0] sm:$0xff] %v316_v22  ;;  %319 = vst [vmem:[%s1126_s8 + $0xb8] sm:$0xff] %v318_v23  ;;  %v320_v24 = vld [vmem:[%s1121_s7 + $0x180] sm:$0xff]  ;;  %v322_v25 = vld [vmem:[%s1121_s7 + $0x190] sm:$0xff] }
  0x25   : > { %v324_v26 = vld [vmem:[%s1121_s7 + $0x1a0] sm:$0xff]  ;;  %321 = vst [vmem:[%s1126_s8 + $0xc0] sm:$0xff] %v320_v24  ;;  %323 = vst [vmem:[%s1126_s8 + $0xc8] sm:$0xff] %v322_v25  ;;  %v326_v27 = vld [vmem:[%s1121_s7 + $0x1b0] sm:$0xff] }
  0x26   : > { %325 = vst [vmem:[%s1126_s8 + $0xd0] sm:$0xff] %v324_v26  ;;  %v328_v28 = vld [vmem:[%s1121_s7 + $0x1c0] sm:$0xff]  ;;  %v330_v29 = vld [vmem:[%s1121_s7 + $0x1d0] sm:$0xff]  ;;  %327 = vst [vmem:[%s1126_s8 + $0xd8] sm:$0xff] %v326_v27 }
  0x27   : > { %329 = vst [vmem:[%s1126_s8 + $0xe0] sm:$0xff] %v328_v28  ;;  %331 = vst [vmem:[%s1126_s8 + $0xe8] sm:$0xff] %v330_v29  ;;  %v332_v30 = vld [vmem:[%s1121_s7 + $0x1e0] sm:$0xff]  ;;  %v334_v31 = vld [vmem:[%s1121_s7 + $0x1f0] sm:$0xff] }
  0x28   : > { %333 = vst [vmem:[%s1126_s8 + $0xf0] sm:$0xff] %v332_v30  ;;  %335 = vst [vmem:[%s1126_s8 + $0xf8] sm:$0xff] %v334_v31 }
  0x29 PF: > { %p831_p7 = scmp.ge.s32.totalorder %s1038_s18, 1  ;;  %p348_p8 = scmp.lt.s32.totalorder %s1038_s18, 37 }
  0x2b   : > { %p349_p9 = pnand %p831_p7, %p348_p8 }
  0x2c   : > { %s355_s9 = sand.u32 (!%p349_p9), 1, %s1014_s12   ;;  %s833_s10 = sshll.u32 (!%p349_p9), %s1022_s14, 1 }
  0x2d   : > { %352 = sbr.rel (%p349_p9) target bundleno = 355 (0x163), region = 66  ;;  %s832_s11 = sshll.u32 (!%p349_p9), %s355_s9, 8 }
  0x2e   : > { %p398_p10 = scmp.lt.s32.totalorder (!%p349_p9), %s833_s10, 35  ;;  %s835_s21 = sshll.u32 (!%p349_p9), %s1026_s15, 1 }
  0x2f   : > { %p408_p11 = scmp.lt.s32.totalorder (!%p349_p9), %s835_s21, 3  ;;  %s1211_s5 = scalar_lea.vmem (!%p349_p9), [#allocation2], %s832_s11 }
  0x30   : > { %p838_p12 = scmp.ne.s32.totalorder (!%p349_p9), %s1022_s14, 0 }
  0x34   : > { %s1301_s10 = smov (!%p398_p10, %s833_s10), 35  ;;  %s1303_s21 = smov (!%p408_p11, %s835_s21), 3 }
  0x35   : > { %s834_s22 = sshll.u32 %s1301_s10, 2  ;;  %s410_s12 = scalar_lea.vmem %s1286_s2, %s1303_s21  ;;  %v1040_v32 = vmov (!%p838_p12), 0.0  }
  0x36   : > { %s1197_s26 = scalar_lea.vmem %s1284_s0, %s834_s22  ;;  %s837_s29 = sshll.u32 %s1303_s21, 3 }
  0x37   : > { %s1209_s15 = scalar_lea.vmem %s1287_s3, %s837_s29  ;;  %425 = sbr.rel (%p838_p12) target bundleno = 62 (0x3e), region = 74 }
  0x38   : > { %426 = vst [vmem:[%s1209_s15] sm:$0xff] (!%p838_p12), %v1040_v32  ;;  %427 = vst [vmem:[%s1209_s15 + $0x8] sm:$0xff] (!%p838_p12), %v1040_v32 }
  0x3e PF: > { %v934_v33 = vld [vmem:[%s1211_s5 + $0x4] ss:$8 sps:$4 sm:$0xff]   ;;  %v936_v34 = vld [vmem:[%s1211_s5] ss:$8 sps:$4 sm:$0xff]   ;;  %v937_v35 = vld [vmem:[%s1211_s5 + $0x14] ss:$8 sps:$4 sm:$0xff]  }
  0x3f   : > { %630 = vmatprep.subr.bf16.mxu0 %v934_v33  ;;  %v939_v36 = vld [vmem:[%s1211_s5 + $0x10] ss:$8 sps:$4 sm:$0xff]   ;;  %v940_v37 = vld [vmem:[%s1211_s5 + $0x24] ss:$8 sps:$4 sm:$0xff]   ;;  %v942_v38 = vld [vmem:[%s1211_s5 + $0x20] ss:$8 sps:$4 sm:$0xff]  }
  0x40   : > { %631 = vmatpush1.bf16.msra.mxu0 %v936_v34  ;;  %v943_v39 = vld [vmem:[%s1211_s5 + $0x34] ss:$8 sps:$4 sm:$0xff]   ;;  %v945_v40 = vld [vmem:[%s1211_s5 + $0x30] ss:$8 sps:$4 sm:$0xff]   ;;  %v946_v41 = vld [vmem:[%s1211_s5 + $0x44] ss:$8 sps:$4 sm:$0xff]  }
  0x41   : > { %632 = vmatprep.subr.bf16.mxu0 %v937_v35  ;;  %v948_v42 = vld [vmem:[%s1211_s5 + $0x40] ss:$8 sps:$4 sm:$0xff]   ;;  %v949_v43 = vld [vmem:[%s1211_s5 + $0x54] ss:$8 sps:$4 sm:$0xff]   ;;  %v951_v44 = vld [vmem:[%s1211_s5 + $0x50] ss:$8 sps:$4 sm:$0xff]  }
  0x42   : > { %v952_v45 = vld [vmem:[%s1211_s5 + $0x64] ss:$8 sps:$4 sm:$0xff]   ;;  %v954_v48 = vld [vmem:[%s1211_s5 + $0x60] ss:$8 sps:$4 sm:$0xff]   ;;  %v955_v49 = vld [vmem:[%s1211_s5 + $0x74] ss:$8 sps:$4 sm:$0xff]  }
  0x43   : > { %v430_v46 = vld [vmem:[%s1197_s26] sm:$0xff]  ;;  %v957_v50 = vld [vmem:[%s1211_s5 + $0x70] ss:$8 sps:$4 sm:$0xff]   ;;  %v961_v53 = vld [vmem:[%s1211_s5 + $0x94] ss:$8 sps:$4 sm:$0xff]   ;;  %p873_p13 = scmp.ne.s32.totalorder %s1022_s14, 17 }
  0x44   : > { %633 = vmatpush1.bf16.msra.mxu0 %v939_v36  ;;  %v840_v47 = vcombine.high %v430_v46, %v430_v46  ;;  %v958_v51 = vld [vmem:[%s1211_s5 + $0x84] ss:$8 sps:$4 sm:$0xff]   ;;  %v960_v52 = vld [vmem:[%s1211_s5 + $0x80] ss:$8 sps:$4 sm:$0xff]   ;;  %v963_v54 = vld [vmem:[%s1211_s5 + $0x90] ss:$8 sps:$4 sm:$0xff]   ;;  %v839_v3 = vcombine.low %v430_v46, %v430_v46  ;;  %v683_v12 = vlaneseq (!%p873_p13) }
  0x45   : > { %634 = vmatprep.subr.bf16.mxu0 %v940_v37  ;;  %v964_v55 = vld [vmem:[%s1211_s5 + $0xa4] ss:$8 sps:$4 sm:$0xff]   ;;  %v966_v56 = vld [vmem:[%s1211_s5 + $0xa0] ss:$8 sps:$4 sm:$0xff]   ;;  %v967_v57 = vld [vmem:[%s1211_s5 + $0xb4] ss:$8 sps:$4 sm:$0xff]  }
  0x46   : > { %662 = vmatprep.mubr.bf16.mxu0 %v840_v47  ;;  %v969_v58 = vld [vmem:[%s1211_s5 + $0xb0] ss:$8 sps:$4 sm:$0xff]   ;;  %v970_v59 = vld [vmem:[%s1211_s5 + $0xc4] ss:$8 sps:$4 sm:$0xff]   ;;  %v972_v60 = vld [vmem:[%s1211_s5 + $0xc0] ss:$8 sps:$4 sm:$0xff]  }
  0x47   : > { %v973_v61 = vld [vmem:[%s1211_s5 + $0xd4] ss:$8 sps:$4 sm:$0xff]   ;;  %v975_v62 = vld [vmem:[%s1211_s5 + $0xd0] ss:$8 sps:$4 sm:$0xff]   ;;  %v976_v63 = vld [vmem:[%s1211_s5 + $0xe4] ss:$8 sps:$4 sm:$0xff]  }
  0x48   : > { %635 = vmatpush1.bf16.msra.mxu0 %v942_v38  ;;  %v978_v0 = vld [vmem:[%s1211_s5 + $0xe0] ss:$8 sps:$4 sm:$0xff]   ;;  %v979_v1 = vld [vmem:[%s1211_s5 + $0xf4] ss:$8 sps:$4 sm:$0xff]   ;;  %v981_v2 = vld [vmem:[%s1211_s5 + $0xf0] ss:$8 sps:$4 sm:$0xff]  }
  0x49   : > { %636 = vmatprep.subr.bf16.mxu0 %v943_v39  ;;  %v428_v4 = vld [vmem:[%s1209_s15] sm:$0xff]  ;;  %v429_v5 = vld [vmem:[%s1209_s15 + $0x8] sm:$0xff]  ;;  %v684_v13 = vshrl.u32 (!%p873_p13), %v683_v12, 7 }
  0x4a   : > { %v681_v14 = vld [vmem:[%s410_s12] sm:$0x3] (!%p873_p13) }
  0x4b   : > { %v685_v15 = vsub.s32 (!%p873_p13), 0, %v684_v13  ;;  %v689_v16 = vsub.s32 (!%p873_p13), 1, %v684_v13 }
  0x4c   : > { %637 = vmatpush1.bf16.msra.mxu0 %v945_v40 }
  0x4d   : > { %638 = vmatprep.subr.bf16.mxu0 %v946_v41  ;;  %v686_v19 = vrot.slane (!%p873_p13), %v681_v14, %v685_v15  ;;  %v690_v20 = vrot.slane (!%p873_p13), %v681_v14, %v689_v16 }
  0x50   : > { %639 = vmatpush1.bf16.msra.mxu0 %v948_v42 }
  0x51   : > { %640 = vmatprep.subr.bf16.mxu0 %v949_v43 }
  0x54   : > { %641 = vmatpush1.bf16.msra.mxu0 %v951_v44 }
  0x55   : > { %642 = vmatprep.subr.bf16.mxu0 %v952_v45 }
  0x58   : > { %643 = vmatpush1.bf16.msra.mxu0 %v954_v48 }
  0x59   : > { %644 = vmatprep.subr.bf16.mxu0 %v955_v49 }
  0x5c   : > { %645 = vmatpush1.bf16.msra.mxu0 %v957_v50 }
  0x5d   : > { %646 = vmatprep.subr.bf16.mxu0 %v958_v51 }
  0x60   : > { %647 = vmatpush1.bf16.msra.mxu0 %v960_v52 }
  0x61   : > { %648 = vmatprep.subr.bf16.mxu0 %v961_v53 }
  0x64   : > { %649 = vmatpush1.bf16.msra.mxu0 %v963_v54 }
  0x65   : > { %650 = vmatprep.subr.bf16.mxu0 %v964_v55 }
  0x68   : > { %651 = vmatpush1.bf16.msra.mxu0 %v966_v56 }
  0x69   : > { %652 = vmatprep.subr.bf16.mxu0 %v967_v57 }
  0x6c   : > { %653 = vmatpush1.bf16.msra.mxu0 %v969_v58 }
  0x6d   : > { %654 = vmatprep.subr.bf16.mxu0 %v970_v59 }
  0x70   : > { %655 = vmatpush1.bf16.msra.mxu0 %v972_v60 }
  0x71   : > { %656 = vmatprep.subr.bf16.mxu0 %v973_v61 }
  0x74   : > { %657 = vmatpush1.bf16.msra.mxu0 %v975_v62 }
  0x75   : > { %658 = vmatprep.subr.bf16.mxu0 %v976_v63 }
  0x78   : > { %659 = vmatpush1.bf16.msra.mxu0 %v978_v0 }
  0x79   : > { %660 = vmatprep.subr.bf16.mxu0 %v979_v1 }
  0x7c   : > { %661 = vmatpush1.bf16.msra.mxu0 %v981_v2 }
  0x7f   : > { %663 = vmatmul.mubr.bf16.vlgmr.msra.gmra.mrb[0].mxu0 %v839_v3 }
 0x150   : > { %678 = sbr.rel (%p873_p13) target bundleno = 355 (0x163), region = 78 }
 0x152   : > { %v664_v6 = vpop.f32.mrb[0].mxu0 }
 0x153   : > { %v671_v7 = vadd.f32 %v664_v6, %v428_v4  ;;  %v666_v8 = vpop.f32.mrb[1].mxu0 }
 0x154   : > { %v672_v9 = vadd.f32 %v666_v8, %v429_v5  ;;  %v668_v10 = vpop.f32.mrb[2].mxu0 }
 0x155   : > { %673 = vst [vmem:[%s1209_s15] sm:$0xff] %v671_v7  ;;  %v669_v11 = vpop.f32.mrb[3].mxu0 }
 0x156   : > { %674 = vst [vmem:[%s1209_s15 + $0x8] sm:$0xff] %v672_v9 }
 0x15c   : > { %v679_v17 = vld [vmem:[%s1209_s15] sm:$0xff] }
 0x15d   : > { %v680_v18 = vld [vmem:[%s1209_s15 + $0x8] sm:$0xff]  ;;  %v693_v21 = vadd.f32 %v686_v19, %v679_v17 }
 0x15e   : > { %v694_v22 = vadd.f32 %v690_v20, %v680_v18 }
 0x15f   : > { %v695_v23 = vmax.f32 %v693_v21, 0.0 }
 0x160   : > { %v696_v24 = vmax.f32 %v694_v22, 0.0 }
 0x161   : > { %697 = vst [vmem:[%s1209_s15] sm:$0xff] %v695_v23 }
 0x162   : > { %698 = vst [vmem:[%s1209_s15 + $0x8] sm:$0xff] %v696_v24 }
 0x163 PF: > { %s13_s18 = sadd.s32 1, %s1038_s18   ;;  %s1288_s12 = smov %s1018_s13 }
 0x164   : > { %p10_p0 = scmp.ge.s32.totalorder %s13_s18, 38   ;;  %s1289_s13 = smov %s1112_s25 }
 0x165   : > { %s1290_s14 = smov %s1030_s16  ;;  %s1291_s15 = smov %s1034_s17 }
 0x166   : > { %s1292_s16 = smov %s1295_s19  ;;  %s1293_s17 = smov %s1299_s20 }
 0x167   :  { %12 = sbr.rel (!%p10_p0) target bundleno = 4 (0x4), region = 119 }

// kernel: vgg19_forward.35
= control target key start
LH: loop header
LB: loop body
LE: loop exit
PB: predicated region body
PF: predicated region fallthrough
CT: control target
= control target key end

     0   :  { %v22_v2 = vlaneseq  ;;  %s60_s0 = inlined_call_operand.vmem [shape: f32[2,2,1,1024], index: 0, kind: input, shape index: {}]   ;;  %s61_s1 = inlined_call_operand.vmem [shape: f32[2,1,512], index: 1, kind: output, shape index: {}]  }
   0x1   :  { %v8_v0 = vld [vmem:[%s60_s0] sm:$0xff]  ;;  %v9_v1 = vld [vmem:[%s60_s0 + $0x8] sm:$0xff]  ;;  %v10_v3 = vld [vmem:[%s60_s0 + $0x10] sm:$0xff] }
   0x2   :  { %v12_v4 = vmax.f32 %v8_v0, %v9_v1  ;;  %v11_v5 = vld [vmem:[%s60_s0 + $0x18] sm:$0xff]  ;;  %vm24_vm0 = vcmp.lt.s32.totalorder %v22_v2, 512 }
   0x3   :  { %v13_v6 = vmax.f32 %v10_v3, %v11_v5 }
   0x4   :  { %v16_v7 = vrot.slane %v12_v4, 4 }
   0x5   :  { %v17_v8 = vrot.slane %v13_v6, 4 }
   0x6   :  { %v20_v9 = vmax.f32 %v12_v4, %v16_v7 }
   0x7   :  { %v21_v10 = vmax.f32 %v13_v6, %v17_v8 }
   0x8   :  { %26 = vst.msk [vmem:[%s61_s1] sm:$0xf] %vm24_vm0, %v20_v9 }
   0x9   :  { %27 = vst.msk [vmem:[%s61_s1 + $0x4] sm:$0xf] %vm24_vm0, %v21_v10 }

// kernel: vgg19_forward.36
= control target key start
LH: loop header
LB: loop body
LE: loop exit
PB: predicated region body
PF: predicated region fallthrough
CT: control target
= control target key end

     0   :  { %s1083_s12 = smov 0   ;;  %s1085_s13 = smov 0   ;;  %s1312_s0 = inlined_call_operand.vmem [shape: bf16[2,4608], index: 0, kind: input, shape index: {}]   ;;  %s1313_s1 = inlined_call_operand.vmem [shape: bf16[4608,512], index: 1, kind: input, shape index: {}]   ;;  %s1314_s2 = inlined_call_operand.vmem [shape: f32[1,512], index: 2, kind: input, shape index: {}]   ;;  %s1315_s3 = inlined_call_operand.vmem [shape: f32[2,512], index: 3, kind: output, shape index: {}]  }
   0x1   :  { %s1087_s14 = smov 0   ;;  %s1089_s15 = smov 0  }
   0x2   :  { %s1091_s16 = smov 0   ;;  %s1093_s17 = smov 0  }
   0x3   :  { %s1095_s18 = smov 0  }
   0x4 LB: > { %s25_s19 = sadd.s32 1, %s1050_s16  ;;  %s28_s20 = sadd.s32 1, %s1054_s17  ;;  %s1058_s18 = sphi %s1095_s18, %s13_s18   ;;  %s1054_s17 = sphi %s1093_s17, %s1321_s17   ;;  %s1050_s16 = sphi %s1091_s16, %s1320_s16   ;;  %s1046_s15 = sphi %s1089_s15, %s1319_s15   ;;  %s1042_s14 = sphi %s1087_s14, %s1318_s14   ;;  %s1038_s13 = sphi %s1085_s13, %s1317_s13   ;;  %s1034_s12 = sphi %s1083_s12, %s1316_s12  }
   0x5   : > { %p26_p0 = scmp.ge.s32.totalorder %s25_s19, 18  ;;  %p76_p1 = scmp.ne.s32.totalorder %s1038_s13, %s1034_s12 }
   0x6   : > { %p77_p2 = scmp.eq.s32.totalorder %s1058_s18, 0  ;;  %s69_s24 = sadd.s32 1, %s1038_s13 }
   0x7   : > { %s1323_s19 = smov (%p26_p0, %s25_s19), 0  ;;  %s1325_s20 = smov (!%p26_p0, %s28_s20), %s1054_s17 }
   0x8   : > { %p78_p3 = por %p77_p2, %p76_p1  ;;  %p30_p4 = scmp.ge.s32.totalorder %s1325_s20, 2 }
   0x9   : > { %s64_s21 = ssub.s32 %s1050_s16, %s1323_s19  ;;  %p847_p6 = scmp.ge.s32.totalorder %s1058_s18, 36 }
   0xa   : > { %s1327_s20 = smov (%p30_p4, %s1325_s20), 0 }
   0xb   : > { %s65_s22 = ssub.s32 %s1054_s17, %s1327_s20  ;;  %156 = sbr.rel (%p847_p6) target bundleno = 41 (0x29), region = 16 }
   0xc   : > { %s66_s23 = sor.u32 %s65_s22, %s64_s21 }
   0xd   : > { %p67_p5 = scmp.eq.s32.totalorder %s66_s23, 0 }
   0xf   : > { %s1134_s25 = scalar_select %p67_p5, %s1038_s13, %s69_s24  }
  0x12   : > { %171 = sbr.rel (!%p78_p3) target bundleno = 41 (0x29), region = 24  ;;  %s173_s26 = sand.u32 (%p78_p3), 1, %s1038_s13  }
  0x13   : > { %s850_s27 = sshll.u32 (%p78_p3), %s1054_s17, 1  ;;  %s848_s28 = sshll.u32 (%p78_p3), %s173_s26, 8 }
  0x14   : > { %s896_s29 = sshll.u32 (%p78_p3), %s1050_s16, 7  ;;  %s1148_s8 = scalar_lea.vmem (%p78_p3), [#allocation2], %s848_s28 }
  0x15   : > { %s179_s30 = sadd.s32 (%p78_p3), %s896_s29, %s850_s27 }
  0x16   : > { %s852_s4 = sshll.u32 (%p78_p3), %s179_s30, 2 }
  0x17   : > { %s1143_s7 = scalar_lea.vmem (%p78_p3), %s1313_s1, %s852_s4 }
  0x18   : > { %v271_v0 = vld [vmem:[%s1143_s7] sm:$0xff] (%p78_p3)  ;;  %v273_v1 = vld [vmem:[%s1143_s7 + $0x10] sm:$0xff] (%p78_p3) }
  0x19   : > { %v275_v2 = vld [vmem:[%s1143_s7 + $0x20] sm:$0xff]  ;;  %272 = vst [vmem:[%s1148_s8] sm:$0xff] %v271_v0  ;;  %274 = vst [vmem:[%s1148_s8 + $0x8] sm:$0xff] %v273_v1  ;;  %v277_v3 = vld [vmem:[%s1143_s7 + $0x30] sm:$0xff] }
  0x1a   : > { %276 = vst [vmem:[%s1148_s8 + $0x10] sm:$0xff] %v275_v2  ;;  %v279_v4 = vld [vmem:[%s1143_s7 + $0x40] sm:$0xff]  ;;  %v281_v5 = vld [vmem:[%s1143_s7 + $0x50] sm:$0xff]  ;;  %278 = vst [vmem:[%s1148_s8 + $0x18] sm:$0xff] %v277_v3 }
  0x1b   : > { %280 = vst [vmem:[%s1148_s8 + $0x20] sm:$0xff] %v279_v4  ;;  %282 = vst [vmem:[%s1148_s8 + $0x28] sm:$0xff] %v281_v5  ;;  %v283_v6 = vld [vmem:[%s1143_s7 + $0x60] sm:$0xff]  ;;  %v285_v7 = vld [vmem:[%s1143_s7 + $0x70] sm:$0xff] }
  0x1c   : > { %v287_v8 = vld [vmem:[%s1143_s7 + $0x80] sm:$0xff]  ;;  %284 = vst [vmem:[%s1148_s8 + $0x30] sm:$0xff] %v283_v6  ;;  %286 = vst [vmem:[%s1148_s8 + $0x38] sm:$0xff] %v285_v7  ;;  %v289_v9 = vld [vmem:[%s1143_s7 + $0x90] sm:$0xff] }
  0x1d   : > { %288 = vst [vmem:[%s1148_s8 + $0x40] sm:$0xff] %v287_v8  ;;  %v291_v10 = vld [vmem:[%s1143_s7 + $0xa0] sm:$0xff]  ;;  %v293_v11 = vld [vmem:[%s1143_s7 + $0xb0] sm:$0xff]  ;;  %290 = vst [vmem:[%s1148_s8 + $0x48] sm:$0xff] %v289_v9 }
  0x1e   : > { %292 = vst [vmem:[%s1148_s8 + $0x50] sm:$0xff] %v291_v10  ;;  %294 = vst [vmem:[%s1148_s8 + $0x58] sm:$0xff] %v293_v11  ;;  %v295_v12 = vld [vmem:[%s1143_s7 + $0xc0] sm:$0xff]  ;;  %v297_v13 = vld [vmem:[%s1143_s7 + $0xd0] sm:$0xff] }
  0x1f   : > { %v299_v14 = vld [vmem:[%s1143_s7 + $0xe0] sm:$0xff]  ;;  %296 = vst [vmem:[%s1148_s8 + $0x60] sm:$0xff] %v295_v12  ;;  %298 = vst [vmem:[%s1148_s8 + $0x68] sm:$0xff] %v297_v13  ;;  %v301_v15 = vld [vmem:[%s1143_s7 + $0xf0] sm:$0xff] }
  0x20   : > { %300 = vst [vmem:[%s1148_s8 + $0x70] sm:$0xff] %v299_v14  ;;  %v303_v16 = vld [vmem:[%s1143_s7 + $0x100] sm:$0xff]  ;;  %v305_v17 = vld [vmem:[%s1143_s7 + $0x110] sm:$0xff]  ;;  %302 = vst [vmem:[%s1148_s8 + $0x78] sm:$0xff] %v301_v15 }
  0x21   : > { %304 = vst [vmem:[%s1148_s8 + $0x80] sm:$0xff] %v303_v16  ;;  %306 = vst [vmem:[%s1148_s8 + $0x88] sm:$0xff] %v305_v17  ;;  %v307_v18 = vld [vmem:[%s1143_s7 + $0x120] sm:$0xff]  ;;  %v309_v19 = vld [vmem:[%s1143_s7 + $0x130] sm:$0xff] }
  0x22   : > { %v311_v20 = vld [vmem:[%s1143_s7 + $0x140] sm:$0xff]  ;;  %308 = vst [vmem:[%s1148_s8 + $0x90] sm:$0xff] %v307_v18  ;;  %310 = vst [vmem:[%s1148_s8 + $0x98] sm:$0xff] %v309_v19  ;;  %v313_v21 = vld [vmem:[%s1143_s7 + $0x150] sm:$0xff] }
  0x23   : > { %312 = vst [vmem:[%s1148_s8 + $0xa0] sm:$0xff] %v311_v20  ;;  %v315_v22 = vld [vmem:[%s1143_s7 + $0x160] sm:$0xff]  ;;  %v317_v23 = vld [vmem:[%s1143_s7 + $0x170] sm:$0xff]  ;;  %314 = vst [vmem:[%s1148_s8 + $0xa8] sm:$0xff] %v313_v21 }
  0x24   : > { %316 = vst [vmem:[%s1148_s8 + $0xb0] sm:$0xff] %v315_v22  ;;  %318 = vst [vmem:[%s1148_s8 + $0xb8] sm:$0xff] %v317_v23  ;;  %v319_v24 = vld [vmem:[%s1143_s7 + $0x180] sm:$0xff]  ;;  %v321_v25 = vld [vmem:[%s1143_s7 + $0x190] sm:$0xff] }
  0x25   : > { %v323_v26 = vld [vmem:[%s1143_s7 + $0x1a0] sm:$0xff]  ;;  %320 = vst [vmem:[%s1148_s8 + $0xc0] sm:$0xff] %v319_v24  ;;  %322 = vst [vmem:[%s1148_s8 + $0xc8] sm:$0xff] %v321_v25  ;;  %v325_v27 = vld [vmem:[%s1143_s7 + $0x1b0] sm:$0xff] }
  0x26   : > { %324 = vst [vmem:[%s1148_s8 + $0xd0] sm:$0xff] %v323_v26  ;;  %v327_v28 = vld [vmem:[%s1143_s7 + $0x1c0] sm:$0xff]  ;;  %v329_v29 = vld [vmem:[%s1143_s7 + $0x1d0] sm:$0xff]  ;;  %326 = vst [vmem:[%s1148_s8 + $0xd8] sm:$0xff] %v325_v27 }
  0x27   : > { %328 = vst [vmem:[%s1148_s8 + $0xe0] sm:$0xff] %v327_v28  ;;  %330 = vst [vmem:[%s1148_s8 + $0xe8] sm:$0xff] %v329_v29  ;;  %v331_v30 = vld [vmem:[%s1143_s7 + $0x1e0] sm:$0xff]  ;;  %v333_v31 = vld [vmem:[%s1143_s7 + $0x1f0] sm:$0xff] }
  0x28   : > { %332 = vst [vmem:[%s1148_s8 + $0xf0] sm:$0xff] %v331_v30  ;;  %334 = vst [vmem:[%s1148_s8 + $0xf8] sm:$0xff] %v333_v31 }
  0x29 PF: > { %p853_p7 = scmp.ge.s32.totalorder %s1058_s18, 1  ;;  %p347_p8 = scmp.lt.s32.totalorder %s1058_s18, 37 }
  0x2b   : > { %p348_p9 = pnand %p853_p7, %p347_p8 }
  0x2c   : > { %s354_s9 = sand.u32 (!%p348_p9), 1, %s1034_s12   ;;  %s855_s10 = sshll.u32 (!%p348_p9), %s1042_s14, 1 }
  0x2d   : > { %351 = sbr.rel (%p348_p9) target bundleno = 358 (0x166), region = 66  ;;  %s854_s11 = sshll.u32 (!%p348_p9), %s354_s9, 8 }
  0x2e   : > { %p396_p10 = scmp.lt.s32.totalorder (!%p348_p9), %s855_s10, 35  ;;  %s856_s21 = sshll.u32 (!%p348_p9), %s1046_s15, 1 }
  0x2f   : > { %p405_p11 = scmp.lt.s32.totalorder (!%p348_p9), %s856_s21, 3  ;;  %s1234_s4 = scalar_lea.vmem (!%p348_p9), [#allocation2], %s854_s11 }
  0x30   : > { %p859_p12 = scmp.ne.s32.totalorder (!%p348_p9), %s1042_s14, 0 }
  0x34   : > { %s1329_s10 = smov (!%p396_p10, %s855_s10), 35  ;;  %s1331_s21 = smov (!%p405_p11, %s856_s21), 3 }
  0x35   : > { %s400_s24 = scalar_lea.vmem %s1312_s0, %s1329_s10  ;;  %s407_s12 = scalar_lea.vmem %s1314_s2, %s1331_s21  ;;  %v1060_v32 = vmov (!%p859_p12), 0.0  }
  0x36   : > { %s858_s28 = sshll.u32 %s1331_s21, 1  ;;  %422 = sbr.rel (%p859_p12) target bundleno = 61 (0x3d), region = 74 }
  0x37   : > { %s1232_s15 = scalar_lea.vmem %s1315_s3, %s858_s28 }
  0x38   : > { %423 = vst [vmem:[%s1232_s15] sm:$0xf] (!%p859_p12), %v1060_v32 }
  0x3d PF: > { %v956_v33 = vld [vmem:[%s1234_s4 + $0x4] ss:$8 sps:$4 sm:$0xff]   ;;  %v958_v34 = vld [vmem:[%s1234_s4] ss:$8 sps:$4 sm:$0xff]   ;;  %v959_v35 = vld [vmem:[%s1234_s4 + $0x14] ss:$8 sps:$4 sm:$0xff]   ;;  %v470_v44 = vlaneseq }
  0x3e   : > { %643 = vmatprep.subr.bf16.mxu0 %v956_v33  ;;  %v961_v36 = vld [vmem:[%s1234_s4 + $0x10] ss:$8 sps:$4 sm:$0xff]   ;;  %v962_v37 = vld [vmem:[%s1234_s4 + $0x24] ss:$8 sps:$4 sm:$0xff]   ;;  %v964_v38 = vld [vmem:[%s1234_s4 + $0x20] ss:$8 sps:$4 sm:$0xff]  }
  0x3f   : > { %644 = vmatpush1.bf16.msra.mxu0 %v958_v34  ;;  %v965_v39 = vld [vmem:[%s1234_s4 + $0x34] ss:$8 sps:$4 sm:$0xff]   ;;  %v967_v40 = vld [vmem:[%s1234_s4 + $0x30] ss:$8 sps:$4 sm:$0xff]   ;;  %v968_v41 = vld [vmem:[%s1234_s4 + $0x44] ss:$8 sps:$4 sm:$0xff]  }
  0x40   : > { %645 = vmatprep.subr.bf16.mxu0 %v959_v35  ;;  %v1061_v42 = vmov 1966171168   ;;  %v970_v45 = vld [vmem:[%s1234_s4 + $0x40] ss:$8 sps:$4 sm:$0xff]   ;;  %v971_v46 = vld [vmem:[%s1234_s4 + $0x54] ss:$8 sps:$4 sm:$0xff]  }
  0x41   : > { %v468_v43 = vunpack.c.l.s4 %v1061_v42  ;;  %v1249_v48 = vshrl.u32 %v470_v44, 7  ;;  %v973_v49 = vld [vmem:[%s1234_s4 + $0x50] ss:$8 sps:$4 sm:$0xff]   ;;  %v974_v50 = vld [vmem:[%s1234_s4 + $0x64] ss:$8 sps:$4 sm:$0xff]   ;;  %p893_p13 = scmp.ne.s32.totalorder %s1042_s14, 17 }
  0x42   : > { %v860_v52 = vld.sshfl [vmem:[%s400_s24] sm:$0x11 pattern:$0x75316420]  ;;  %v977_v55 = vld [vmem:[%s1234_s4 + $0x74] ss:$8 sps:$4 sm:$0xff]  }
  0x43   : > { %646 = vmatpush1.bf16.msra.mxu0 %v961_v36  ;;  %v469_v47 = vunpack.c.0.s8 %v468_v43  ;;  %v466_v53 = vcombine.high %v860_v52, %v860_v52  ;;  %v976_v54 = vld [vmem:[%s1234_s4 + $0x60] ss:$8 sps:$4 sm:$0xff]   ;;  %v979_v57 = vld [vmem:[%s1234_s4 + $0x70] ss:$8 sps:$4 sm:$0xff]   ;;  %v980_v58 = vld [vmem:[%s1234_s4 + $0x84] ss:$8 sps:$4 sm:$0xff]  }
  0x44   : > { %647 = vmatprep.subr.bf16.mxu0 %v962_v37  ;;  %v982_v59 = vld [vmem:[%s1234_s4 + $0x80] ss:$8 sps:$4 sm:$0xff]   ;;  %v983_v60 = vld [vmem:[%s1234_s4 + $0x94] ss:$8 sps:$4 sm:$0xff]   ;;  %v985_v61 = vld [vmem:[%s1234_s4 + $0x90] ss:$8 sps:$4 sm:$0xff]  }
  0x45   : > { %v472_v51 = vsub.s32 %v469_v47, %v1249_v48  ;;  %v986_v62 = vld [vmem:[%s1234_s4 + $0xa4] ss:$8 sps:$4 sm:$0xff]   ;;  %v988_v63 = vld [vmem:[%s1234_s4 + $0xa0] ss:$8 sps:$4 sm:$0xff]   ;;  %v989_v0 = vld [vmem:[%s1234_s4 + $0xb4] ss:$8 sps:$4 sm:$0xff]  }
  0x46   : > { %v991_v1 = vld [vmem:[%s1234_s4 + $0xb0] ss:$8 sps:$4 sm:$0xff]   ;;  %v992_v2 = vld [vmem:[%s1234_s4 + $0xc4] ss:$8 sps:$4 sm:$0xff]   ;;  %v994_v3 = vld [vmem:[%s1234_s4 + $0xc0] ss:$8 sps:$4 sm:$0xff]  }
  0x47   : > { %648 = vmatpush1.bf16.msra.mxu0 %v964_v38  ;;  %v480_v56 = vrot.slane %v466_v53, %v472_v51  ;;  %v995_v4 = vld [vmem:[%s1234_s4 + $0xd4] ss:$8 sps:$4 sm:$0xff]   ;;  %v997_v5 = vld [vmem:[%s1234_s4 + $0xd0] ss:$8 sps:$4 sm:$0xff]   ;;  %v998_v6 = vld [vmem:[%s1234_s4 + $0xe4] ss:$8 sps:$4 sm:$0xff]   ;;  %v473_v10 = vrot.slane %v860_v52, %v472_v51 }
  0x48   : > { %649 = vmatprep.subr.bf16.mxu0 %v965_v39  ;;  %v1000_v7 = vld [vmem:[%s1234_s4 + $0xe0] ss:$8 sps:$4 sm:$0xff]   ;;  %v1001_v8 = vld [vmem:[%s1234_s4 + $0xf4] ss:$8 sps:$4 sm:$0xff]   ;;  %v1003_v9 = vld [vmem:[%s1234_s4 + $0xf0] ss:$8 sps:$4 sm:$0xff]  }
  0x49   : > { %675 = vmatprep.mubr.bf16.mxu0 %v480_v56  ;;  %v1062_v11 = vmov 1983009808   ;;  %v424_v19 = vld [vmem:[%s1232_s15] sm:$0xf]  ;;  %v706_v24 = vsub.s32 (!%p893_p13), 0, %v1249_v48  ;;  %v710_v25 = vsub.s32 (!%p893_p13), 1, %v1249_v48 }
  0x4a   : > { %v688_v12 = vunpack.c.l.s4 %v1062_v11  ;;  %v702_v23 = vld [vmem:[%s407_s12] sm:$0x3] (!%p893_p13) }
  0x4b   : > { %650 = vmatpush1.bf16.msra.mxu0 %v967_v40  ;;  %v707_v26 = vrot.slane (!%p893_p13), %v702_v23, %v706_v24  ;;  %v711_v27 = vrot.slane (!%p893_p13), %v702_v23, %v710_v25 }
  0x4c   : > { %651 = vmatprep.subr.bf16.mxu0 %v968_v41  ;;  %v689_v13 = vunpack.c.0.s8 %v688_v12 }
  0x4d   : > { %v712_v28 = vcombine.low (!%p893_p13), %v707_v26, %v711_v27 }
  0x4e   : > { %v692_v15 = vsub.s32 %v689_v13, %v1249_v48 }
  0x4f   : > { %652 = vmatpush1.bf16.msra.mxu0 %v970_v45 }
  0x50   : > { %653 = vmatprep.subr.bf16.mxu0 %v971_v46  ;;  %v719_v30 = vrot.slane (!%p893_p13), %v712_v28, %v692_v15 }
  0x53   : > { %654 = vmatpush1.bf16.msra.mxu0 %v973_v49 }
  0x54   : > { %655 = vmatprep.subr.bf16.mxu0 %v974_v50 }
  0x57   : > { %656 = vmatpush1.bf16.msra.mxu0 %v976_v54 }
  0x58   : > { %657 = vmatprep.subr.bf16.mxu0 %v977_v55 }
  0x5b   : > { %658 = vmatpush1.bf16.msra.mxu0 %v979_v57 }
  0x5c   : > { %659 = vmatprep.subr.bf16.mxu0 %v980_v58 }
  0x5f   : > { %660 = vmatpush1.bf16.msra.mxu0 %v982_v59 }
  0x60   : > { %661 = vmatprep.subr.bf16.mxu0 %v983_v60 }
  0x63   : > { %662 = vmatpush1.bf16.msra.mxu0 %v985_v61 }
  0x64   : > { %663 = vmatprep.subr.bf16.mxu0 %v986_v62 }
  0x67   : > { %664 = vmatpush1.bf16.msra.mxu0 %v988_v63 }
  0x68   : > { %665 = vmatprep.subr.bf16.mxu0 %v989_v0 }
  0x6b   : > { %666 = vmatpush1.bf16.msra.mxu0 %v991_v1 }
  0x6c   : > { %667 = vmatprep.subr.bf16.mxu0 %v992_v2 }
  0x6f   : > { %668 = vmatpush1.bf16.msra.mxu0 %v994_v3 }
  0x70   : > { %669 = vmatprep.subr.bf16.mxu0 %v995_v4 }
  0x73   : > { %670 = vmatpush1.bf16.msra.mxu0 %v997_v5 }
  0x74   : > { %671 = vmatprep.subr.bf16.mxu0 %v998_v6 }
  0x77   : > { %672 = vmatpush1.bf16.msra.mxu0 %v1000_v7 }
  0x78   : > { %673 = vmatprep.subr.bf16.mxu0 %v1001_v8 }
  0x7b   : > { %674 = vmatpush1.bf16.msra.mxu0 %v1003_v9 }
  0x7e   : > { %676 = vmatmul.mubr.bf16.vlgmr.msra.gmra.mrb[0].mxu0 %v473_v10 }
 0x151   : > { %v677_v14 = vpop.f32.mrb[0].mxu0 }
 0x152   : > { %v679_v16 = vpop.f32.mrb[1].mxu0 }
 0x153   : > { %v686_v17 = vcombine.low %v677_v14, %v679_v16  ;;  %v681_v18 = vpop.f32.mrb[2].mxu0  ;;  %700 = sbr.rel (%p893_p13) target bundleno = 358 (0x166), region = 78 }
 0x154   : > { %v682_v20 = vpop.f32.mrb[3].mxu0 }
 0x155   : > { %v693_v21 = vrot.slane %v686_v17, %v692_v15 }
 0x157   : > { %v695_v22 = vadd.f32 %v693_v21, %v424_v19 }
 0x159   : > { %696 = vst [vmem:[%s1232_s15] sm:$0xf] %v695_v22 }
 0x160   : > { %v701_v29 = vld [vmem:[%s1232_s15] sm:$0xf] }
 0x161   : > { %v721_v31 = vadd.f32 %v719_v30, %v701_v29 }
 0x163   : > { %v722_v32 = vmax.f32 %v721_v31, 0.0 }
 0x165   : > { %723 = vst [vmem:[%s1232_s15] sm:$0xf] %v722_v32 }
 0x166 PF: > { %s13_s18 = sadd.s32 1, %s1058_s18   ;;  %s1316_s12 = smov %s1038_s13 }
 0x167   : > { %p10_p0 = scmp.ge.s32.totalorder %s13_s18, 38   ;;  %s1317_s13 = smov %s1134_s25 }
 0x168   : > { %s1318_s14 = smov %s1050_s16  ;;  %s1319_s15 = smov %s1054_s17 }
 0x169   : > { %s1320_s16 = smov %s1323_s19  ;;  %s1321_s17 = smov %s1327_s20 }
 0x16a   :  { %12 = sbr.rel (!%p10_p0) target bundleno = 4 (0x4), region = 119 }

</bundles_post_ra>
